<compile_context>
chip_gen: v7x
topology: tpu7x:2x2x1
jax: 0.10.0
libtpu: 0.0.40
codegen_flags: <defaults>
</compile_context>

<pallas_src>
import functools

import jax
import jax.numpy as jnp
from jax import lax
from jax.experimental import pallas as pl
from jax.experimental.pallas import tpu as pltpu

F32 = jnp.float32
BF16 = jnp.bfloat16
BN_EPS = 1e-5
VMEM_LIMIT_BYTES = 32 * 1024 * 1024
LANE = 128
NUM_SPLITS = 2          # point-axis splits -> second "parallel" grid dim (v7x)
STN_TILE_CAP = 1024     # point-tile cap for the 128->1024 STN feature pass
TRUNK_TILE_CAP = 4096   # point-tile cap for the cheap trunk passes


def _cdiv(a, b):
    return -(-a // b)


def _plan_points(n, cap, splits):
    """Lane-aligned point-axis plan: (padded_n, tile, steps_per_split)."""
    cap_blocks = max(1, cap // LANE)
    blocks_total = _cdiv(n, LANE)
    per_split = _cdiv(blocks_total, splits)
    steps = _cdiv(per_split, cap_blocks)
    tile_blocks = _cdiv(per_split, steps)      # balanced tile size
    tile = tile_blocks * LANE
    n_pad = steps * tile_blocks * splits * LANE
    return n_pad, tile, steps


def _lane_mask(tn, steps, n_valid):
    """(1, TN) bool mask of valid (non-padded) point columns in this tile."""
    start = (pl.program_id(1) * steps + pl.program_id(2)) * tn
    col = lax.broadcasted_iota(jnp.int32, (1, tn), 1)
    return (start + col) < n_valid


def _conv_from3(w_t, x3, b):
    """3-input-channel 1x1 conv on the VPU: (Cout,3) x (3,TN) + (Cout,1)."""
    return (w_t[:, 0:1] * x3[0:1, :] + w_t[:, 1:2] * x3[1:2, :]
            + w_t[:, 2:3] * x3[2:3, :] + b)


# ----------------------------------------------------------------------------
# STN3d
# ----------------------------------------------------------------------------
def _stn_feat_kernel(x_ref, w1_ref, b1_ref, w2_ref, b2_ref, w3_ref, b3_ref,
                     feat_ref, *, tn, steps, n_valid, masked):
    """conv1->relu->conv2->relu->conv3->relu + running max over points."""
    n = pl.program_id(2)
    x = x_ref[0]                                                    # (3, TN)
    h1 = jnp.maximum(_conv_from3(w1_ref[...], x, b1_ref[...]), 0.0)  # (64, TN)
    h2 = jnp.maximum(
        jnp.dot(w2_ref[...], h1.astype(BF16), preferred_element_type=F32)
        + b2_ref[...], 0.0)                                         # (128, TN)
    h3 = jnp.maximum(
        jnp.dot(w3_ref[...], h2.astype(BF16), preferred_element_type=F32)
        + b3_ref[...], 0.0)                                         # (1024, TN)
    if masked:
        h3 = jnp.where(_lane_mask(tn, steps, n_valid), h3, -jnp.inf)
    tile_max = jnp.max(h3, axis=1, keepdims=True)                   # (1024, 1)

    @pl.when(n == 0)
    def _():
        feat_ref[...] = jnp.full_like(feat_ref, -jnp.inf)

    feat_ref[...] = jnp.maximum(feat_ref[...], tile_max[None, None])


def stn_point_features(x, p, *, tn, steps, n_valid, masked):
    """(B, 3, Npad) NCW -> (B, 1024) max-pooled STN point feature."""
    B = x.shape[0]
    kern = functools.partial(_stn_feat_kernel, tn=tn, steps=steps,
                             n_valid=n_valid, masked=masked)
    feat = pl.pallas_call(
        kern,
        out_shape=jax.ShapeDtypeStruct((B, NUM_SPLITS, 1024, 1), F32),
        grid=(B, NUM_SPLITS, steps),
        in_specs=[
            pl.BlockSpec((1, 3, tn), lambda b, s, n: (b, 0, s * steps + n)),
            pl.BlockSpec((64, 3), lambda b, s, n: (0, 0)),
            pl.BlockSpec((64, 1), lambda b, s, n: (0, 0)),
            pl.BlockSpec((128, 64), lambda b, s, n: (0, 0)),
            pl.BlockSpec((128, 1), lambda b, s, n: (0, 0)),
            pl.BlockSpec((1024, 128), lambda b, s, n: (0, 0)),
            pl.BlockSpec((1024, 1), lambda b, s, n: (0, 0)),
        ],
        out_specs=pl.BlockSpec((1, 1, 1024, 1), lambda b, s, n: (b, s, 0, 0)),
        compiler_params=pltpu.CompilerParams(
            dimension_semantics=("parallel", "parallel", "arbitrary"),
            vmem_limit_bytes=VMEM_LIMIT_BYTES),
    )(x,
      p["stn_c1_w"].T, p["stn_c1_b"].reshape(64, 1),
      p["stn_c2_w"].T.astype(BF16), p["stn_c2_b"].reshape(128, 1),
      p["stn_c3_w"].T.astype(BF16), p["stn_c3_b"].reshape(1024, 1))
    return jnp.max(feat[:, :, :, 0], axis=1)          # combine splits: (B, 1024)


def _stn_head_kernel(f_ref, w1_ref, b1_ref, w2_ref, b2_ref, w3_ref, b3_ref,
                     o_ref):
    """fc1->relu->fc2->relu->fc3 (identity folded into fc3 bias), bf16 MXU."""
    h = jnp.maximum(
        jnp.dot(f_ref[...].astype(BF16), w1_ref[...],
                preferred_element_type=F32) + b1_ref[...], 0.0)
    h = jnp.maximum(
        jnp.dot(h.astype(BF16), w2_ref[...],
                preferred_element_type=F32) + b2_ref[...], 0.0)
    o_ref[...] = jnp.dot(h, w3_ref[...], preferred_element_type=F32) + b3_ref[...]


def stn_head(feat, p):
    """(B, 1024) -> (B, 3, 3) transform."""
    B = feat.shape[0]
    iden = jnp.array([1, 0, 0, 0, 1, 0, 0, 0, 1], F32)
    fc3_b = (p["stn_fc3_b"] + iden).reshape(1, 9)
    t9 = pl.pallas_call(
        _stn_head_kernel,
        out_shape=jax.ShapeDtypeStruct((B, 9), F32),
        grid=(1,),
        in_specs=[
            pl.BlockSpec((B, 1024), lambda i: (0, 0)),
            pl.BlockSpec((1024, 512), lambda i: (0, 0)),
            pl.BlockSpec((1, 512), lambda i: (0, 0)),
            pl.BlockSpec((512, 256), lambda i: (0, 0)),
            pl.BlockSpec((1, 256), lambda i: (0, 0)),
            pl.BlockSpec((256, 9), lambda i: (0, 0)),
            pl.BlockSpec((1, 9), lambda i: (0, 0)),
        ],
        out_specs=pl.BlockSpec((B, 9), lambda i: (0, 0)),
        compiler_params=pltpu.CompilerParams(
            dimension_semantics=("arbitrary",),
            vmem_limit_bytes=VMEM_LIMIT_BYTES),
    )(feat,
      p["stn_fc1_w"].astype(BF16), p["stn_fc1_b"].reshape(1, 512),
      p["stn_fc2_w"].astype(BF16), p["stn_fc2_b"].reshape(1, 256),
      p["stn_fc3_w"], fc3_b)
    return t9.reshape(B, 3, 3)


# ----------------------------------------------------------------------------
# Encoder trunk: streaming fused passes (no (C, B*N) intermediate in HBM)
# ----------------------------------------------------------------------------
def _enc_stats1_kernel(x_ref, tw1_ref, b1_ref, s_ref, q_ref,
                       *, tn, steps, n_valid, masked):
    """conv1 (STN transform folded) -> BN1 batch statistics."""
    n = pl.program_id(2)
    y1 = _conv_from3(tw1_ref[0], x_ref[0], b1_ref[...])             # (64, TN)
    if masked:
        y1 = jnp.where(_lane_mask(tn, steps, n_valid), y1, 0.0)

    @pl.when(n == 0)
    def _():
        s_ref[...] = jnp.zeros_like(s_ref)
        q_ref[...] = jnp.zeros_like(q_ref)

    s_ref[...] += jnp.sum(y1, axis=1, keepdims=True)[None, None]
    q_ref[...] += jnp.sum(y1 * y1, axis=1, keepdims=True)[None, None]


def _enc_stats2_kernel(x_ref, tw1_ref, b1_ref, w2_ref, b2_ref, s_ref, q_ref,
                       *, tn, steps, n_valid, masked):
    """conv1 (trans+BN1 folded) -> relu -> conv2 -> BN2 batch statistics."""
    n = pl.program_id(2)
    h1 = jnp.maximum(_conv_from3(tw1_ref[0], x_ref[0], b1_ref[...]), 0.0)
    y2 = jnp.dot(w2_ref[...], h1.astype(BF16),
                 preferred_element_type=F32) + b2_ref[...]          # (128, TN)
    if masked:
        y2 = jnp.where(_lane_mask(tn, steps, n_valid), y2, 0.0)

    @pl.when(n == 0)
    def _():
        s_ref[...] = jnp.zeros_like(s_ref)
        q_ref[...] = jnp.zeros_like(q_ref)

    s_ref[...] += jnp.sum(y2, axis=1, keepdims=True)[None, None]
    q_ref[...] += jnp.sum(y2 * y2, axis=1, keepdims=True)[None, None]


def _enc_final_kernel(x_ref, tw1_ref, b1_ref, w2_ref, b2_ref, w3_ref, b3_ref,
                      s_ref, q_ref, mx_ref, mn_ref,
                      *, tn, steps, n_valid, masked):
    """Full trunk (BN1/BN2 folded) + BN3 stats + running max/min over points."""
    n = pl.program_id(2)
    h1 = jnp.maximum(_conv_from3(tw1_ref[0], x_ref[0], b1_ref[...]), 0.0)
    h2 = jnp.maximum(
        jnp.dot(w2_ref[...], h1.astype(BF16), preferred_element_type=F32)
        + b2_ref[...], 0.0)                                         # (128, TN)
    y3 = jnp.dot(w3_ref[...], h2, preferred_element_type=F32) + b3_ref[...]
    if masked:
        valid = _lane_mask(tn, steps, n_valid)
        ys = jnp.where(valid, y3, 0.0)
        ymax = jnp.where(valid, y3, -jnp.inf)
        ymin = jnp.where(valid, y3, jnp.inf)
    else:
        ys = ymax = ymin = y3

    @pl.when(n == 0)
    def _():
        s_ref[...] = jnp.zeros_like(s_ref)
        q_ref[...] = jnp.zeros_like(q_ref)
        mx_ref[...] = jnp.full_like(mx_ref, -jnp.inf)
        mn_ref[...] = jnp.full_like(mn_ref, jnp.inf)

    s_ref[...] += jnp.sum(ys, axis=1, keepdims=True)[None, None]
    q_ref[...] += jnp.sum(ys * ys, axis=1, keepdims=True)[None, None]
    mx_ref[...] = jnp.maximum(mx_ref[...],
                              jnp.max(ymax, axis=1, keepdims=True)[None, None])
    mn_ref[...] = jnp.minimum(mn_ref[...],
                              jnp.min(ymin, axis=1, keepdims=True)[None, None])


def _bn_scale_shift(s_acc, q_acc, count, gamma, beta, eps=BN_EPS):
    """Fold training-mode BN into per-channel scale/shift (tiny O(C) glue)."""
    total = jnp.sum(s_acc[..., 0], axis=(0, 1))
    total_sq = jnp.sum(q_acc[..., 0], axis=(0, 1))
    mean = total / count
    # biased variance (BN train mode); clamp to >= 0 against fp cancellation.
    var = jnp.maximum(total_sq / count - mean * mean, 0.0)
    scale = gamma * lax.rsqrt(var + eps)
    shift = beta - mean * scale
    return scale, shift


def encoder_2f_forward(params, x_ncw, num_feats=5):
    """x_ncw: (B, 3, N) PyTorch NCW layout -> (B, num_feats) global feature."""
    B, cin, N = x_ncw.shape
    assert cin == 3
    x = x_ncw.astype(F32)                                  # stays NCW, no transpose

    # Lane-aligned point-axis plans; pad x once only if N is ragged / tiny.
    n_pad_stn, tn_stn, steps_stn = _plan_points(N, STN_TILE_CAP, NUM_SPLITS)
    n_pad_trk, tn_trk, steps_trk = _plan_points(N, TRUNK_TILE_CAP, NUM_SPLITS)
    n_pad = max(n_pad_stn, n_pad_trk)
    if n_pad != N:
        x = jnp.pad(x, ((0, 0), (0, 0), (0, n_pad - N)))
    masked_stn = n_pad_stn != N
    masked_trk = n_pad_trk != N

    # ---- STN3d -------------------------------------------------------------
    feat = stn_point_features(x, params, tn=tn_stn, steps=steps_stn,
                              n_valid=N, masked=masked_stn)          # (B, 1024)
    trans = stn_head(feat, params)                                   # (B, 3, 3)

    # ---- host-side folds (tiny O(C) work) -----------------------------------
    p = params
    # tw1_t[b] = (trans[b] @ c1_w).T  -> conv1 weight with the bmm folded in.
    tw1_t = jnp.einsum("bij,jk->bki", trans, p["c1_w"])              # (B, 64, 3)
    b1 = p["c1_b"].reshape(64, 1)
    w2_t = p["c2_w"].T                                               # (128, 64)
    b2 = p["c2_b"].reshape(128, 1)
    w3_t = p["c3_w"].T                                               # (nf, 128)
    b3 = p["c3_b"].reshape(num_feats, 1)

    # ---- encoder trunk -------------------------------------------------------
    TN, STEPS, masked = tn_trk, steps_trk, masked_trk
    grid = (B, NUM_SPLITS, STEPS)
    count = float(B * N)
    cparams = pltpu.CompilerParams(
        dimension_semantics=("parallel", "parallel", "arbitrary"),
        vmem_limit_bytes=VMEM_LIMIT_BYTES)

    x_spec = pl.BlockSpec((1, 3, TN), lambda b, s, n: (b, 0, s * STEPS + n))
    tw_spec = pl.BlockSpec((1, 64, 3), lambda b, s, n: (b, 0, 0))

    def w_spec(shape):
        return pl.BlockSpec(shape, lambda b, s, n: (0, 0))

    def acc_spec(c):
        return pl.BlockSpec((1, 1, c, 1), lambda b, s, n: (b, s, 0, 0))

    def acc_shape(c):
        return jax.ShapeDtypeStruct((B, NUM_SPLITS, c, 1), F32)

    static = dict(tn=TN, steps=STEPS, n_valid=N, masked=masked)

    # Pass 1: conv1 (STN transform folded) -> BN1 batch statistics.
    s1, q1 = pl.pallas_call(
        functools.partial(_enc_stats1_kernel, **static),
        out_shape=(acc_shape(64), acc_shape(64)),
        grid=grid,
        in_specs=[x_spec, tw_spec, w_spec((64, 1))],
        out_specs=(acc_spec(64), acc_spec(64)),
        compiler_params=cparams,
    )(x, tw1_t, b1)
    sc1, sh1 = _bn_scale_shift(s1, q1, count, p["bn1_g"], p["bn1_b"])

    # Fold BN1 into the (per-batch) conv1 weight/bias for passes 2 & 3.
    tw1f_t = tw1_t * sc1[None, :, None]
    b1f = (b1[:, 0] * sc1 + sh1).reshape(64, 1)

    # Pass 2: conv1+bn1+relu -> conv2 -> BN2 batch statistics.
    s2, q2 = pl.pallas_call(
        functools.partial(_enc_stats2_kernel, **static),
        out_shape=(acc_shape(128), acc_shape(128)),
        grid=grid,
        in_specs=[x_spec, tw_spec, w_spec((64, 1)),
                  w_spec((128, 64)), w_spec((128, 1))],
        out_specs=(acc_spec(128), acc_spec(128)),
        compiler_params=cparams,
    )(x, tw1f_t, b1f, w2_t.astype(BF16), b2)
    sc2, sh2 = _bn_scale_shift(s2, q2, count, p["bn2_g"], p["bn2_b"])

    # Fold BN2 into conv2 for pass 3.
    w2f_bf = (w2_t * sc2[:, None]).astype(BF16)
    b2f = (b2[:, 0] * sc2 + sh2).reshape(128, 1)

    # Pass 3: full trunk, fused with BN3 statistics and the per-batch running
    # max/min over points.
    s3, q3, mx3, mn3 = pl.pallas_call(
        functools.partial(_enc_final_kernel, **static),
        out_shape=tuple(acc_shape(num_feats) for _ in range(4)),
        grid=grid,
        in_specs=[x_spec, tw_spec, w_spec((64, 1)),
                  w_spec((128, 64)), w_spec((128, 1)),
                  w_spec((num_feats, 128)), w_spec((num_feats, 1))],
        out_specs=tuple(acc_spec(num_feats) for _ in range(4)),
        compiler_params=cparams,
    )(x, tw1f_t, b1f, w2f_bf, b2f, w3_t, b3)

    # BN3 is a per-channel monotone affine map => max over points commutes:
    # use the per-batch max where scale >= 0 and the min where scale < 0.
    sc3, sh3 = _bn_scale_shift(s3, q3, count, p["bn3_g"], p["bn3_b"])
    mx = jnp.max(mx3[..., 0], axis=1)                 # combine splits: (B, nf)
    mn = jnp.min(mn3[..., 0], axis=1)
    out = jnp.where(sc3 >= 0.0, mx, mn) * sc3 + sh3
    return out  # global_feat=True, trans=True branch of the PyTorch module


# ----------------------------------------------------------------------------
# Parameters (deterministic synthetic init)
# ----------------------------------------------------------------------------
def init_params(key, num_feats=5):
    def wmat(k, fan_in, fan_out):
        return jax.random.normal(k, (fan_in, fan_out), F32) * (fan_in ** -0.5)

    def vec(k, n, scale=0.05):
        return jax.random.normal(k, (n,), F32) * scale

    ks = iter(jax.random.split(key, 32))
    p = {}
    # STN3d: conv1(3->64), conv2(64->128), conv3(128->1024), fc1..fc3
    p["stn_c1_w"], p["stn_c1_b"] = wmat(next(ks), 3, 64), vec(next(ks), 64)
    p["stn_c2_w"], p["stn_c2_b"] = wmat(next(ks), 64, 128), vec(next(ks), 128)
    p["stn_c3_w"], p["stn_c3_b"] = wmat(next(ks), 128, 1024), vec(next(ks), 1024)
    p["stn_fc1_w"], p["stn_fc1_b"] = wmat(next(ks), 1024, 512), vec(next(ks), 512)
    p["stn_fc2_w"], p["stn_fc2_b"] = wmat(next(ks), 512, 256), vec(next(ks), 256)
    p["stn_fc3_w"], p["stn_fc3_b"] = wmat(next(ks), 256, 9), vec(next(ks), 9)
    # Encoder: conv1(3->64), conv2(64->128), conv3(128->num_feats) + BN params
    p["c1_w"], p["c1_b"] = wmat(next(ks), 3, 64), vec(next(ks), 64)
    p["c2_w"], p["c2_b"] = wmat(next(ks), 64, 128), vec(next(ks), 128)
    p["c3_w"], p["c3_b"] = wmat(next(ks), 128, num_feats), vec(next(ks), num_feats)
    p["bn1_g"] = 1.0 + vec(next(ks), 64)
    p["bn1_b"] = vec(next(ks), 64)
    p["bn2_g"] = 1.0 + vec(next(ks), 128)
    p["bn2_b"] = vec(next(ks), 128)
    p["bn3_g"] = 1.0 + vec(next(ks), num_feats)
    p["bn3_b"] = vec(next(ks), num_feats)
    return p


# ----------------------------------------------------------------------------
if __name__ == "__main__":
    key = jax.random.PRNGKey(0)
    kp, kx = jax.random.split(key)

    B, N, NUM_FEATS = 2, 16, 5
    params = init_params(kp, num_feats=NUM_FEATS)
    x = jax.random.normal(kx, (B, 3, N), jnp.float32)   # PyTorch layout (B, 3, N)

    fwd = jax.jit(functools.partial(encoder_2f_forward, num_feats=NUM_FEATS))
    out = jax.block_until_ready(fwd(params, x))

    assert out.shape == (B, NUM_FEATS), out.shape
    assert out.dtype == jnp.float32
    print("KERNEL_OK")
</pallas_src>

<mosaic_0001>
module attributes {stable_mosaic.version = 11 : i64} {
  func.func @_stn_feat_kernel(%arg0: i32, %arg1: i32, %arg2: i32, %arg3: memref<1x3x128xf32, #tpu.memory_space<vmem>>, %arg4: memref<64x3xf32, #tpu.memory_space<vmem>>, %arg5: memref<64x1xf32, #tpu.memory_space<vmem>>, %arg6: memref<128x64xbf16, #tpu.memory_space<vmem>>, %arg7: memref<128x1xf32, #tpu.memory_space<vmem>>, %arg8: memref<1024x128xbf16, #tpu.memory_space<vmem>>, %arg9: memref<1024x1xf32, #tpu.memory_space<vmem>>, %arg10: memref<1x1x1024x1xf32, #tpu.memory_space<vmem>>) attributes {dimension_semantics = [#tpu.dimension_semantics<parallel>, #tpu.dimension_semantics<parallel>, #tpu.dimension_semantics<arbitrary>], iteration_bounds = array<i64: 2, 2, 1>, scalar_prefetch = 0 : i64, scratch_operands = 0 : i64, tpu.core_type = #tpu.core_type<tc>, window_params = [{transform_indices = @transform_0, window_bounds = array<i64: 1, 3, 128>}, {pipeline_mode = #tpu.pipeline_mode<synchronous>, transform_indices = @transform_1, window_bounds = array<i64: 64, 3>}, {pipeline_mode = #tpu.pipeline_mode<synchronous>, transform_indices = @transform_2, window_bounds = array<i64: 64, 1>}, {pipeline_mode = #tpu.pipeline_mode<synchronous>, transform_indices = @transform_3, window_bounds = array<i64: 128, 64>}, {pipeline_mode = #tpu.pipeline_mode<synchronous>, transform_indices = @transform_4, window_bounds = array<i64: 128, 1>}, {pipeline_mode = #tpu.pipeline_mode<synchronous>, transform_indices = @transform_5, window_bounds = array<i64: 1024, 128>}, {pipeline_mode = #tpu.pipeline_mode<synchronous>, transform_indices = @transform_6, window_bounds = array<i64: 1024, 1>}, {transform_indices = @transform_7, window_bounds = array<i64: 1, 1, 1024, 1>}]} {
    %c0 = arith.constant 0 : index
    %c0_0 = arith.constant 0 : index
    %c0_1 = arith.constant 0 : index
    %0 = vector.load %arg3[%c0, %c0_0, %c0_1] : memref<1x3x128xf32, #tpu.memory_space<vmem>>, vector<1x3x128xf32>
    %1 = vector.shape_cast %0 : vector<1x3x128xf32> to vector<3x128xf32>
    %c0_2 = arith.constant 0 : index
    %c0_3 = arith.constant 0 : index
    %2 = vector.load %arg4[%c0_2, %c0_3] : memref<64x3xf32, #tpu.memory_space<vmem>>, vector<64x3xf32>
    %c0_4 = arith.constant 0 : index
    %c0_5 = arith.constant 0 : index
    %3 = vector.load %arg5[%c0_4, %c0_5] : memref<64x1xf32, #tpu.memory_space<vmem>>, vector<64x1xf32>
    %4 = vector.extract_strided_slice %2 {offsets = [0, 0], sizes = [64, 1], strides = [1, 1]} : vector<64x3xf32> to vector<64x1xf32>
    %5 = vector.extract_strided_slice %1 {offsets = [0, 0], sizes = [1, 128], strides = [1, 1]} : vector<3x128xf32> to vector<1x128xf32>
    %6 = vector.broadcast %4 : vector<64x1xf32> to vector<64x128xf32>
    %7 = vector.broadcast %5 : vector<1x128xf32> to vector<64x128xf32>
    %8 = arith.mulf %6, %7 : vector<64x128xf32>
    %9 = vector.extract_strided_slice %2 {offsets = [0, 1], sizes = [64, 1], strides = [1, 1]} : vector<64x3xf32> to vector<64x1xf32>
    %10 = vector.extract_strided_slice %1 {offsets = [1, 0], sizes = [1, 128], strides = [1, 1]} : vector<3x128xf32> to vector<1x128xf32>
    %11 = vector.broadcast %9 : vector<64x1xf32> to vector<64x128xf32>
    %12 = vector.broadcast %10 : vector<1x128xf32> to vector<64x128xf32>
    %13 = arith.mulf %11, %12 : vector<64x128xf32>
    %14 = arith.addf %8, %13 : vector<64x128xf32>
    %15 = vector.extract_strided_slice %2 {offsets = [0, 2], sizes = [64, 1], strides = [1, 1]} : vector<64x3xf32> to vector<64x1xf32>
    %16 = vector.extract_strided_slice %1 {offsets = [2, 0], sizes = [1, 128], strides = [1, 1]} : vector<3x128xf32> to vector<1x128xf32>
    %17 = vector.broadcast %15 : vector<64x1xf32> to vector<64x128xf32>
    %18 = vector.broadcast %16 : vector<1x128xf32> to vector<64x128xf32>
    %19 = arith.mulf %17, %18 : vector<64x128xf32>
    %20 = arith.addf %14, %19 : vector<64x128xf32>
    %21 = vector.broadcast %3 : vector<64x1xf32> to vector<64x128xf32>
    %22 = arith.addf %20, %21 : vector<64x128xf32>
    %cst = arith.constant 0.000000e+00 : f32
    %23 = vector.broadcast %cst : f32 to vector<64x128xf32>
    %24 = arith.maximumf %22, %23 : vector<64x128xf32>
    %c0_6 = arith.constant 0 : index
    %c0_7 = arith.constant 0 : index
    %25 = vector.load %arg6[%c0_6, %c0_7] : memref<128x64xbf16, #tpu.memory_space<vmem>>, vector<128x64xbf16>
    %26 = arith.truncf %24 : vector<64x128xf32> to vector<64x128xbf16>
    %cst_8 = arith.constant dense<0.000000e+00> : vector<128x128xf32>
    %27 = tpu.matmul %25, %26, %cst_8 {dimension_numbers = #tpu.dot_dimension_numbers<[1], [0], [0], [1], [0, 0, 1, 1], [], []>} : vector<128x64xbf16>, vector<64x128xbf16>, vector<128x128xf32> -> vector<128x128xf32>
    %c0_9 = arith.constant 0 : index
    %c0_10 = arith.constant 0 : index
    %28 = vector.load %arg7[%c0_9, %c0_10] : memref<128x1xf32, #tpu.memory_space<vmem>>, vector<128x1xf32>
    %29 = vector.broadcast %28 : vector<128x1xf32> to vector<128x128xf32>
    %30 = arith.addf %27, %29 : vector<128x128xf32>
    %cst_11 = arith.constant 0.000000e+00 : f32
    %31 = vector.broadcast %cst_11 : f32 to vector<128x128xf32>
    %32 = arith.maximumf %30, %31 : vector<128x128xf32>
    %c0_12 = arith.constant 0 : index
    %c0_13 = arith.constant 0 : index
    %33 = vector.load %arg8[%c0_12, %c0_13] : memref<1024x128xbf16, #tpu.memory_space<vmem>>, vector<1024x128xbf16>
    %34 = arith.truncf %32 : vector<128x128xf32> to vector<128x128xbf16>
    %cst_14 = arith.constant dense<0.000000e+00> : vector<1024x128xf32>
    %35 = tpu.matmul %33, %34, %cst_14 {dimension_numbers = #tpu.dot_dimension_numbers<[1], [0], [0], [1], [0, 0, 1, 1], [], []>} : vector<1024x128xbf16>, vector<128x128xbf16>, vector<1024x128xf32> -> vector<1024x128xf32>
    %c0_15 = arith.constant 0 : index
    %c0_16 = arith.constant 0 : index
    %36 = vector.load %arg9[%c0_15, %c0_16] : memref<1024x1xf32, #tpu.memory_space<vmem>>, vector<1024x1xf32>
    %37 = vector.broadcast %36 : vector<1024x1xf32> to vector<1024x128xf32>
    %38 = arith.addf %35, %37 : vector<1024x128xf32>
    %cst_17 = arith.constant 0.000000e+00 : f32
    %39 = vector.broadcast %cst_17 : f32 to vector<1024x128xf32>
    %40 = arith.maximumf %38, %39 : vector<1024x128xf32>
    %c1_i32 = arith.constant 1 : i32
    %41 = arith.muli %arg1, %c1_i32 : i32
    %42 = arith.addi %41, %arg2 : i32
    %c128_i32 = arith.constant 128 : i32
    %43 = arith.muli %42, %c128_i32 : i32
    %44 = tpu.iota {dimensions = array<i32: 1>} : vector<1x128xi32>
    %45 = vector.broadcast %43 : i32 to vector<1x128xi32>
    %46 = arith.addi %45, %44 : vector<1x128xi32>
    %c16_i32 = arith.constant 16 : i32
    %47 = vector.broadcast %c16_i32 : i32 to vector<1x128xi32>
    %48 = arith.cmpi slt, %46, %47 : vector<1x128xi32>
    %cst_18 = arith.constant 0xFF800000 : f32
    %49 = vector.shape_cast %48 : vector<1x128xi1> to vector<1x128xi1>
    %50 = vector.broadcast %49 : vector<1x128xi1> to vector<1024x128xi1>
    %51 = vector.broadcast %cst_18 : f32 to vector<1024x128xf32>
    %52 = arith.select %50, %40, %51 : vector<1024x128xi1>, vector<1024x128xf32>
    %cst_19 = arith.constant dense<0xFF800000> : vector<1024xf32>
    %53 = vector.multi_reduction <maximumf>, %52, %cst_19 [1] : vector<1024x128xf32> to vector<1024xf32>
    %54 = vector.shape_cast %53 : vector<1024xf32> to vector<1024x1xf32>
    %c0_i32 = arith.constant 0 : i32
    %55 = arith.cmpi eq, %arg2, %c0_i32 : i32
    %56 = arith.extui %55 : i1 to i32
    %c0_i32_20 = arith.constant 0 : i32
    %57 = arith.cmpi ne, %56, %c0_i32_20 : i32
    scf.if %57 {
      %cst_29 = arith.constant 0xFF800000 : f32
      %62 = vector.broadcast %cst_29 : f32 to vector<1x1x1024x1xf32>
      %c0_30 = arith.constant 0 : index
      %c0_31 = arith.constant 0 : index
      %c0_32 = arith.constant 0 : index
      %c0_33 = arith.constant 0 : index
      %63 = vector.load %arg10[%c0_30, %c0_31, %c0_32, %c0_33] : memref<1x1x1024x1xf32, #tpu.memory_space<vmem>>, vector<1x1x1024x1xf32>
      tpu.vector_store %arg10[%c0_30, %c0_31, %c0_32, %c0_33], %62 {strides = array<i32>} : memref<1x1x1024x1xf32, #tpu.memory_space<vmem>>, vector<1x1x1024x1xf32>,
    } else {
    }
    %c0_21 = arith.constant 0 : index
    %c0_22 = arith.constant 0 : index
    %c0_23 = arith.constant 0 : index
    %c0_24 = arith.constant 0 : index
    %58 = vector.load %arg10[%c0_21, %c0_22, %c0_23, %c0_24] : memref<1x1x1024x1xf32, #tpu.memory_space<vmem>>, vector<1x1x1024x1xf32>
    %59 = vector.shape_cast %54 : vector<1024x1xf32> to vector<1x1x1024x1xf32>
    %60 = arith.maximumf %58, %59 : vector<1x1x1024x1xf32>
    %c0_25 = arith.constant 0 : index
    %c0_26 = arith.constant 0 : index
    %c0_27 = arith.constant 0 : index
    %c0_28 = arith.constant 0 : index
    %61 = vector.load %arg10[%c0_25, %c0_26, %c0_27, %c0_28] : memref<1x1x1024x1xf32, #tpu.memory_space<vmem>>, vector<1x1x1024x1xf32>
    tpu.vector_store %arg10[%c0_25, %c0_26, %c0_27, %c0_28], %60 {strides = array<i32>} : memref<1x1x1024x1xf32, #tpu.memory_space<vmem>>, vector<1x1x1024x1xf32>,
    return
  }
  func.func @transform_0(%arg0: i32, %arg1: i32, %arg2: i32) -> (i32, i32, i32) {
    %c1_i32 = arith.constant 1 : i32
    %0 = arith.muli %arg1, %c1_i32 : i32
    %1 = arith.addi %0, %arg2 : i32
    %c0_i32 = arith.constant 0 : i32
    %c0_i32_0 = arith.constant 0 : i32
    return %arg0, %c0_i32, %1 : i32, i32, i32
  }
  func.func @transform_1(%arg0: i32, %arg1: i32, %arg2: i32) -> (i32, i32) {
    %c0_i32 = arith.constant 0 : i32
    %c0_i32_0 = arith.constant 0 : i32
    %c0_i32_1 = arith.constant 0 : i32
    return %c0_i32, %c0_i32_0 : i32, i32
  }
  func.func @transform_2(%arg0: i32, %arg1: i32, %arg2: i32) -> (i32, i32) {
    %c0_i32 = arith.constant 0 : i32
    %c0_i32_0 = arith.constant 0 : i32
    %c0_i32_1 = arith.constant 0 : i32
    return %c0_i32, %c0_i32_0 : i32, i32
  }
  func.func @transform_3(%arg0: i32, %arg1: i32, %arg2: i32) -> (i32, i32) {
    %c0_i32 = arith.constant 0 : i32
    %c0_i32_0 = arith.constant 0 : i32
    %c0_i32_1 = arith.constant 0 : i32
    return %c0_i32, %c0_i32_0 : i32, i32
  }
  func.func @transform_4(%arg0: i32, %arg1: i32, %arg2: i32) -> (i32, i32) {
    %c0_i32 = arith.constant 0 : i32
    %c0_i32_0 = arith.constant 0 : i32
    %c0_i32_1 = arith.constant 0 : i32
    return %c0_i32, %c0_i32_0 : i32, i32
  }
  func.func @transform_5(%arg0: i32, %arg1: i32, %arg2: i32) -> (i32, i32) {
    %c0_i32 = arith.constant 0 : i32
    %c0_i32_0 = arith.constant 0 : i32
    %c0_i32_1 = arith.constant 0 : i32
    return %c0_i32, %c0_i32_0 : i32, i32
  }
  func.func @transform_6(%arg0: i32, %arg1: i32, %arg2: i32) -> (i32, i32) {
    %c0_i32 = arith.constant 0 : i32
    %c0_i32_0 = arith.constant 0 : i32
    %c0_i32_1 = arith.constant 0 : i32
    return %c0_i32, %c0_i32_0 : i32, i32
  }
  func.func @transform_7(%arg0: i32, %arg1: i32, %arg2: i32) -> (i32, i32, i32, i32) {
    %c0_i32 = arith.constant 0 : i32
    %c0_i32_0 = arith.constant 0 : i32
    %c0_i32_1 = arith.constant 0 : i32
    return %arg0, %arg1, %c0_i32, %c0_i32_0 : i32, i32, i32, i32
  }
}

module attributes {stable_mosaic.version = 11 : i64} {
  func.func @_stn_head_kernel(%arg0: i32, %arg1: memref<2x1024xf32, #tpu.memory_space<vmem>>, %arg2: memref<1024x512xbf16, #tpu.memory_space<vmem>>, %arg3: memref<1x512xf32, #tpu.memory_space<vmem>>, %arg4: memref<512x256xbf16, #tpu.memory_space<vmem>>, %arg5: memref<1x256xf32, #tpu.memory_space<vmem>>, %arg6: memref<256x9xf32, #tpu.memory_space<vmem>>, %arg7: memref<1x9xf32, #tpu.memory_space<vmem>>, %arg8: memref<2x9xf32, #tpu.memory_space<vmem>>) attributes {dimension_semantics = [#tpu.dimension_semantics<arbitrary>], iteration_bounds = array<i64: 1>, scalar_prefetch = 0 : i64, scratch_operands = 0 : i64, tpu.core_type = #tpu.core_type<tc>, window_params = [{pipeline_mode = #tpu.pipeline_mode<synchronous>, transform_indices = @transform_0, window_bounds = array<i64: 2, 1024>}, {pipeline_mode = #tpu.pipeline_mode<synchronous>, transform_indices = @transform_1, window_bounds = array<i64: 1024, 512>}, {pipeline_mode = #tpu.pipeline_mode<synchronous>, transform_indices = @transform_2, window_bounds = array<i64: 1, 512>}, {pipeline_mode = #tpu.pipeline_mode<synchronous>, transform_indices = @transform_3, window_bounds = array<i64: 512, 256>}, {pipeline_mode = #tpu.pipeline_mode<synchronous>, transform_indices = @transform_4, window_bounds = array<i64: 1, 256>}, {pipeline_mode = #tpu.pipeline_mode<synchronous>, transform_indices = @transform_5, window_bounds = array<i64: 256, 9>}, {pipeline_mode = #tpu.pipeline_mode<synchronous>, transform_indices = @transform_6, window_bounds = array<i64: 1, 9>}, {pipeline_mode = #tpu.pipeline_mode<synchronous>, transform_indices = @transform_7, window_bounds = array<i64: 2, 9>}]} {
    %c0 = arith.constant 0 : index
    %c0_0 = arith.constant 0 : index
    %0 = vector.load %arg1[%c0, %c0_0] : memref<2x1024xf32, #tpu.memory_space<vmem>>, vector<2x1024xf32>
    %1 = arith.truncf %0 : vector<2x1024xf32> to vector<2x1024xbf16>
    %c0_1 = arith.constant 0 : index
    %c0_2 = arith.constant 0 : index
    %2 = vector.load %arg2[%c0_1, %c0_2] : memref<1024x512xbf16, #tpu.memory_space<vmem>>, vector<1024x512xbf16>
    %cst = arith.constant dense<0.000000e+00> : vector<2x512xf32>
    %3 = tpu.matmul %1, %2, %cst {dimension_numbers = #tpu.dot_dimension_numbers<[1], [0], [0], [1], [0, 0, 1, 1], [], []>} : vector<2x1024xbf16>, vector<1024x512xbf16>, vector<2x512xf32> -> vector<2x512xf32>
    %c0_3 = arith.constant 0 : index
    %c0_4 = arith.constant 0 : index
    %4 = vector.load %arg3[%c0_3, %c0_4] : memref<1x512xf32, #tpu.memory_space<vmem>>, vector<1x512xf32>
    %5 = vector.broadcast %4 : vector<1x512xf32> to vector<2x512xf32>
    %6 = arith.addf %3, %5 : vector<2x512xf32>
    %cst_5 = arith.constant 0.000000e+00 : f32
    %7 = vector.broadcast %cst_5 : f32 to vector<2x512xf32>
    %8 = arith.maximumf %6, %7 : vector<2x512xf32>
    %9 = arith.truncf %8 : vector<2x512xf32> to vector<2x512xbf16>
    %c0_6 = arith.constant 0 : index
    %c0_7 = arith.constant 0 : index
    %10 = vector.load %arg4[%c0_6, %c0_7] : memref<512x256xbf16, #tpu.memory_space<vmem>>, vector<512x256xbf16>
    %cst_8 = arith.constant dense<0.000000e+00> : vector<2x256xf32>
    %11 = tpu.matmul %9, %10, %cst_8 {dimension_numbers = #tpu.dot_dimension_numbers<[1], [0], [0], [1], [0, 0, 1, 1], [], []>} : vector<2x512xbf16>, vector<512x256xbf16>, vector<2x256xf32> -> vector<2x256xf32>
    %c0_9 = arith.constant 0 : index
    %c0_10 = arith.constant 0 : index
    %12 = vector.load %arg5[%c0_9, %c0_10] : memref<1x256xf32, #tpu.memory_space<vmem>>, vector<1x256xf32>
    %13 = vector.broadcast %12 : vector<1x256xf32> to vector<2x256xf32>
    %14 = arith.addf %11, %13 : vector<2x256xf32>
    %cst_11 = arith.constant 0.000000e+00 : f32
    %15 = vector.broadcast %cst_11 : f32 to vector<2x256xf32>
    %16 = arith.maximumf %14, %15 : vector<2x256xf32>
    %c0_12 = arith.constant 0 : index
    %c0_13 = arith.constant 0 : index
    %17 = vector.load %arg6[%c0_12, %c0_13] : memref<256x9xf32, #tpu.memory_space<vmem>>, vector<256x9xf32>
    %cst_14 = arith.constant dense<0.000000e+00> : vector<2x9xf32>
    %18 = tpu.matmul %16, %17, %cst_14 {dimension_numbers = #tpu.dot_dimension_numbers<[1], [0], [0], [1], [0, 0, 1, 1], [], []>} : vector<2x256xf32>, vector<256x9xf32>, vector<2x9xf32> -> vector<2x9xf32>
    %c0_15 = arith.constant 0 : index
    %c0_16 = arith.constant 0 : index
    %19 = vector.load %arg7[%c0_15, %c0_16] : memref<1x9xf32, #tpu.memory_space<vmem>>, vector<1x9xf32>
    %20 = vector.broadcast %19 : vector<1x9xf32> to vector<2x9xf32>
    %21 = arith.addf %18, %20 : vector<2x9xf32>
    %c0_17 = arith.constant 0 : index
    %c0_18 = arith.constant 0 : index
    %22 = vector.load %arg8[%c0_17, %c0_18] : memref<2x9xf32, #tpu.memory_space<vmem>>, vector<2x9xf32>
    tpu.vector_store %arg8[%c0_17, %c0_18], %21 {strides = array<i32>} : memref<2x9xf32, #tpu.memory_space<vmem>>, vector<2x9xf32>,
    return
  }
  func.func @transform_0(%arg0: i32) -> (i32, i32) {
    %c0_i32 = arith.constant 0 : i32
    %c0_i32_0 = arith.constant 0 : i32
    %c0_i32_1 = arith.constant 0 : i32
    return %c0_i32, %c0_i32_0 : i32, i32
  }
  func.func @transform_1(%arg0: i32) -> (i32, i32) {
    %c0_i32 = arith.constant 0 : i32
    %c0_i32_0 = arith.constant 0 : i32
    %c0_i32_1 = arith.constant 0 : i32
    return %c0_i32, %c0_i32_0 : i32, i32
  }
  func.func @transform_2(%arg0: i32) -> (i32, i32) {
    %c0_i32 = arith.constant 0 : i32
    %c0_i32_0 = arith.constant 0 : i32
    %c0_i32_1 = arith.constant 0 : i32
    return %c0_i32, %c0_i32_0 : i32, i32
  }
  func.func @transform_3(%arg0: i32) -> (i32, i32) {
    %c0_i32 = arith.constant 0 : i32
    %c0_i32_0 = arith.constant 0 : i32
    %c0_i32_1 = arith.constant 0 : i32
    return %c0_i32, %c0_i32_0 : i32, i32
  }
  func.func @transform_4(%arg0: i32) -> (i32, i32) {
    %c0_i32 = arith.constant 0 : i32
    %c0_i32_0 = arith.constant 0 : i32
    %c0_i32_1 = arith.constant 0 : i32
    return %c0_i32, %c0_i32_0 : i32, i32
  }
  func.func @transform_5(%arg0: i32) -> (i32, i32) {
    %c0_i32 = arith.constant 0 : i32
    %c0_i32_0 = arith.constant 0 : i32
    %c0_i32_1 = arith.constant 0 : i32
    return %c0_i32, %c0_i32_0 : i32, i32
  }
  func.func @transform_6(%arg0: i32) -> (i32, i32) {
    %c0_i32 = arith.constant 0 : i32
    %c0_i32_0 = arith.constant 0 : i32
    %c0_i32_1 = arith.constant 0 : i32
    return %c0_i32, %c0_i32_0 : i32, i32
  }
  func.func @transform_7(%arg0: i32) -> (i32, i32) {
    %c0_i32 = arith.constant 0 : i32
    %c0_i32_0 = arith.constant 0 : i32
    %c0_i32_1 = arith.constant 0 : i32
    return %c0_i32, %c0_i32_0 : i32, i32
  }
}

module attributes {stable_mosaic.version = 11 : i64} {
  func.func @_enc_stats1_kernel(%arg0: i32, %arg1: i32, %arg2: i32, %arg3: memref<1x3x128xf32, #tpu.memory_space<vmem>>, %arg4: memref<1x64x3xf32, #tpu.memory_space<vmem>>, %arg5: memref<64x1xf32, #tpu.memory_space<vmem>>, %arg6: memref<1x1x64x1xf32, #tpu.memory_space<vmem>>, %arg7: memref<1x1x64x1xf32, #tpu.memory_space<vmem>>) attributes {dimension_semantics = [#tpu.dimension_semantics<parallel>, #tpu.dimension_semantics<parallel>, #tpu.dimension_semantics<arbitrary>], iteration_bounds = array<i64: 2, 2, 1>, scalar_prefetch = 0 : i64, scratch_operands = 0 : i64, tpu.core_type = #tpu.core_type<tc>, window_params = [{transform_indices = @transform_0, window_bounds = array<i64: 1, 3, 128>}, {transform_indices = @transform_1, window_bounds = array<i64: 1, 64, 3>}, {pipeline_mode = #tpu.pipeline_mode<synchronous>, transform_indices = @transform_2, window_bounds = array<i64: 64, 1>}, {transform_indices = @transform_3, window_bounds = array<i64: 1, 1, 64, 1>}, {transform_indices = @transform_4, window_bounds = array<i64: 1, 1, 64, 1>}]} {
    %c0 = arith.constant 0 : index
    %c0_0 = arith.constant 0 : index
    %c0_1 = arith.constant 0 : index
    %0 = vector.load %arg4[%c0, %c0_0, %c0_1] : memref<1x64x3xf32, #tpu.memory_space<vmem>>, vector<1x64x3xf32>
    %1 = vector.shape_cast %0 : vector<1x64x3xf32> to vector<64x3xf32>
    %c0_2 = arith.constant 0 : index
    %c0_3 = arith.constant 0 : index
    %c0_4 = arith.constant 0 : index
    %2 = vector.load %arg3[%c0_2, %c0_3, %c0_4] : memref<1x3x128xf32, #tpu.memory_space<vmem>>, vector<1x3x128xf32>
    %3 = vector.shape_cast %2 : vector<1x3x128xf32> to vector<3x128xf32>
    %c0_5 = arith.constant 0 : index
    %c0_6 = arith.constant 0 : index
    %4 = vector.load %arg5[%c0_5, %c0_6] : memref<64x1xf32, #tpu.memory_space<vmem>>, vector<64x1xf32>
    %5 = vector.extract_strided_slice %1 {offsets = [0, 0], sizes = [64, 1], strides = [1, 1]} : vector<64x3xf32> to vector<64x1xf32>
    %6 = vector.extract_strided_slice %3 {offsets = [0, 0], sizes = [1, 128], strides = [1, 1]} : vector<3x128xf32> to vector<1x128xf32>
    %7 = vector.broadcast %5 : vector<64x1xf32> to vector<64x128xf32>
    %8 = vector.broadcast %6 : vector<1x128xf32> to vector<64x128xf32>
    %9 = arith.mulf %7, %8 : vector<64x128xf32>
    %10 = vector.extract_strided_slice %1 {offsets = [0, 1], sizes = [64, 1], strides = [1, 1]} : vector<64x3xf32> to vector<64x1xf32>
    %11 = vector.extract_strided_slice %3 {offsets = [1, 0], sizes = [1, 128], strides = [1, 1]} : vector<3x128xf32> to vector<1x128xf32>
    %12 = vector.broadcast %10 : vector<64x1xf32> to vector<64x128xf32>
    %13 = vector.broadcast %11 : vector<1x128xf32> to vector<64x128xf32>
    %14 = arith.mulf %12, %13 : vector<64x128xf32>
    %15 = arith.addf %9, %14 : vector<64x128xf32>
    %16 = vector.extract_strided_slice %1 {offsets = [0, 2], sizes = [64, 1], strides = [1, 1]} : vector<64x3xf32> to vector<64x1xf32>
    %17 = vector.extract_strided_slice %3 {offsets = [2, 0], sizes = [1, 128], strides = [1, 1]} : vector<3x128xf32> to vector<1x128xf32>
    %18 = vector.broadcast %16 : vector<64x1xf32> to vector<64x128xf32>
    %19 = vector.broadcast %17 : vector<1x128xf32> to vector<64x128xf32>
    %20 = arith.mulf %18, %19 : vector<64x128xf32>
    %21 = arith.addf %15, %20 : vector<64x128xf32>
    %22 = vector.broadcast %4 : vector<64x1xf32> to vector<64x128xf32>
    %23 = arith.addf %21, %22 : vector<64x128xf32>
    %c1_i32 = arith.constant 1 : i32
    %24 = arith.muli %arg1, %c1_i32 : i32
    %25 = arith.addi %24, %arg2 : i32
    %c128_i32 = arith.constant 128 : i32
    %26 = arith.muli %25, %c128_i32 : i32
    %27 = tpu.iota {dimensions = array<i32: 1>} : vector<1x128xi32>
    %28 = vector.broadcast %26 : i32 to vector<1x128xi32>
    %29 = arith.addi %28, %27 : vector<1x128xi32>
    %c16_i32 = arith.constant 16 : i32
    %30 = vector.broadcast %c16_i32 : i32 to vector<1x128xi32>
    %31 = arith.cmpi slt, %29, %30 : vector<1x128xi32>
    %cst = arith.constant 0.000000e+00 : f32
    %32 = vector.shape_cast %31 : vector<1x128xi1> to vector<1x128xi1>
    %33 = vector.broadcast %32 : vector<1x128xi1> to vector<64x128xi1>
    %34 = vector.broadcast %cst : f32 to vector<64x128xf32>
    %35 = arith.select %33, %23, %34 : vector<64x128xi1>, vector<64x128xf32>
    %c0_i32 = arith.constant 0 : i32
    %36 = arith.cmpi eq, %arg2, %c0_i32 : i32
    %37 = arith.extui %36 : i1 to i32
    %c0_i32_7 = arith.constant 0 : i32
    %38 = arith.cmpi ne, %37, %c0_i32_7 : i32
    scf.if %38 {
      %cst_26 = arith.constant 0.000000e+00 : f32
      %52 = vector.broadcast %cst_26 : f32 to vector<1x1x64x1xf32>
      %c0_27 = arith.constant 0 : index
      %c0_28 = arith.constant 0 : index
      %c0_29 = arith.constant 0 : index
      %c0_30 = arith.constant 0 : index
      %53 = vector.load %arg6[%c0_27, %c0_28, %c0_29, %c0_30] : memref<1x1x64x1xf32, #tpu.memory_space<vmem>>, vector<1x1x64x1xf32>
      tpu.vector_store %arg6[%c0_27, %c0_28, %c0_29, %c0_30], %52 {strides = array<i32>} : memref<1x1x64x1xf32, #tpu.memory_space<vmem>>, vector<1x1x64x1xf32>,
      %cst_31 = arith.constant 0.000000e+00 : f32
      %54 = vector.broadcast %cst_31 : f32 to vector<1x1x64x1xf32>
      %c0_32 = arith.constant 0 : index
      %c0_33 = arith.constant 0 : index
      %c0_34 = arith.constant 0 : index
      %c0_35 = arith.constant 0 : index
      %55 = vector.load %arg7[%c0_32, %c0_33, %c0_34, %c0_35] : memref<1x1x64x1xf32, #tpu.memory_space<vmem>>, vector<1x1x64x1xf32>
      tpu.vector_store %arg7[%c0_32, %c0_33, %c0_34, %c0_35], %54 {strides = array<i32>} : memref<1x1x64x1xf32, #tpu.memory_space<vmem>>, vector<1x1x64x1xf32>,
    } else {
    }
    %c0_8 = arith.constant 0 : index
    %c0_9 = arith.constant 0 : index
    %c0_10 = arith.constant 0 : index
    %c0_11 = arith.constant 0 : index
    %39 = vector.load %arg6[%c0_8, %c0_9, %c0_10, %c0_11] : memref<1x1x64x1xf32, #tpu.memory_space<vmem>>, vector<1x1x64x1xf32>
    %cst_12 = arith.constant dense<0.000000e+00> : vector<64xf32>
    %40 = vector.multi_reduction <add>, %35, %cst_12 [1] : vector<64x128xf32> to vector<64xf32>
    %41 = vector.shape_cast %40 : vector<64xf32> to vector<64x1xf32>
    %42 = vector.shape_cast %41 : vector<64x1xf32> to vector<1x1x64x1xf32>
    %43 = arith.addf %39, %42 : vector<1x1x64x1xf32>
    %c0_13 = arith.constant 0 : index
    %c0_14 = arith.constant 0 : index
    %c0_15 = arith.constant 0 : index
    %c0_16 = arith.constant 0 : index
    %44 = vector.load %arg6[%c0_13, %c0_14, %c0_15, %c0_16] : memref<1x1x64x1xf32, #tpu.memory_space<vmem>>, vector<1x1x64x1xf32>
    tpu.vector_store %arg6[%c0_13, %c0_14, %c0_15, %c0_16], %43 {strides = array<i32>} : memref<1x1x64x1xf32, #tpu.memory_space<vmem>>, vector<1x1x64x1xf32>,
    %c0_17 = arith.constant 0 : index
    %c0_18 = arith.constant 0 : index
    %c0_19 = arith.constant 0 : index
    %c0_20 = arith.constant 0 : index
    %45 = vector.load %arg7[%c0_17, %c0_18, %c0_19, %c0_20] : memref<1x1x64x1xf32, #tpu.memory_space<vmem>>, vector<1x1x64x1xf32>
    %46 = arith.mulf %35, %35 : vector<64x128xf32>
    %cst_21 = arith.constant dense<0.000000e+00> : vector<64xf32>
    %47 = vector.multi_reduction <add>, %46, %cst_21 [1] : vector<64x128xf32> to vector<64xf32>
    %48 = vector.shape_cast %47 : vector<64xf32> to vector<64x1xf32>
    %49 = vector.shape_cast %48 : vector<64x1xf32> to vector<1x1x64x1xf32>
    %50 = arith.addf %45, %49 : vector<1x1x64x1xf32>
    %c0_22 = arith.constant 0 : index
    %c0_23 = arith.constant 0 : index
    %c0_24 = arith.constant 0 : index
    %c0_25 = arith.constant 0 : index
    %51 = vector.load %arg7[%c0_22, %c0_23, %c0_24, %c0_25] : memref<1x1x64x1xf32, #tpu.memory_space<vmem>>, vector<1x1x64x1xf32>
    tpu.vector_store %arg7[%c0_22, %c0_23, %c0_24, %c0_25], %50 {strides = array<i32>} : memref<1x1x64x1xf32, #tpu.memory_space<vmem>>, vector<1x1x64x1xf32>,
    return
  }
  func.func @transform_0(%arg0: i32, %arg1: i32, %arg2: i32) -> (i32, i32, i32) {
    %c1_i32 = arith.constant 1 : i32
    %0 = arith.muli %arg1, %c1_i32 : i32
    %1 = arith.addi %0, %arg2 : i32
    %c0_i32 = arith.constant 0 : i32
    %c0_i32_0 = arith.constant 0 : i32
    return %arg0, %c0_i32, %1 : i32, i32, i32
  }
  func.func @transform_1(%arg0: i32, %arg1: i32, %arg2: i32) -> (i32, i32, i32) {
    %c0_i32 = arith.constant 0 : i32
    %c0_i32_0 = arith.constant 0 : i32
    %c0_i32_1 = arith.constant 0 : i32
    return %arg0, %c0_i32, %c0_i32_0 : i32, i32, i32
  }
  func.func @transform_2(%arg0: i32, %arg1: i32, %arg2: i32) -> (i32, i32) {
    %c0_i32 = arith.constant 0 : i32
    %c0_i32_0 = arith.constant 0 : i32
    %c0_i32_1 = arith.constant 0 : i32
    return %c0_i32, %c0_i32_0 : i32, i32
  }
  func.func @transform_3(%arg0: i32, %arg1: i32, %arg2: i32) -> (i32, i32, i32, i32) {
    %c0_i32 = arith.constant 0 : i32
    %c0_i32_0 = arith.constant 0 : i32
    %c0_i32_1 = arith.constant 0 : i32
    return %arg0, %arg1, %c0_i32, %c0_i32_0 : i32, i32, i32, i32
  }
  func.func @transform_4(%arg0: i32, %arg1: i32, %arg2: i32) -> (i32, i32, i32, i32) {
    %c0_i32 = arith.constant 0 : i32
    %c0_i32_0 = arith.constant 0 : i32
    %c0_i32_1 = arith.constant 0 : i32
    return %arg0, %arg1, %c0_i32, %c0_i32_0 : i32, i32, i32, i32
  }
}

module attributes {stable_mosaic.version = 11 : i64} {
  func.func @_enc_stats2_kernel(%arg0: i32, %arg1: i32, %arg2: i32, %arg3: memref<1x3x128xf32, #tpu.memory_space<vmem>>, %arg4: memref<1x64x3xf32, #tpu.memory_space<vmem>>, %arg5: memref<64x1xf32, #tpu.memory_space<vmem>>, %arg6: memref<128x64xbf16, #tpu.memory_space<vmem>>, %arg7: memref<128x1xf32, #tpu.memory_space<vmem>>, %arg8: memref<1x1x128x1xf32, #tpu.memory_space<vmem>>, %arg9: memref<1x1x128x1xf32, #tpu.memory_space<vmem>>) attributes {dimension_semantics = [#tpu.dimension_semantics<parallel>, #tpu.dimension_semantics<parallel>, #tpu.dimension_semantics<arbitrary>], iteration_bounds = array<i64: 2, 2, 1>, scalar_prefetch = 0 : i64, scratch_operands = 0 : i64, tpu.core_type = #tpu.core_type<tc>, window_params = [{transform_indices = @transform_0, window_bounds = array<i64: 1, 3, 128>}, {transform_indices = @transform_1, window_bounds = array<i64: 1, 64, 3>}, {pipeline_mode = #tpu.pipeline_mode<synchronous>, transform_indices = @transform_2, window_bounds = array<i64: 64, 1>}, {pipeline_mode = #tpu.pipeline_mode<synchronous>, transform_indices = @transform_3, window_bounds = array<i64: 128, 64>}, {pipeline_mode = #tpu.pipeline_mode<synchronous>, transform_indices = @transform_4, window_bounds = array<i64: 128, 1>}, {transform_indices = @transform_5, window_bounds = array<i64: 1, 1, 128, 1>}, {transform_indices = @transform_6, window_bounds = array<i64: 1, 1, 128, 1>}]} {
    %c0 = arith.constant 0 : index
    %c0_0 = arith.constant 0 : index
    %c0_1 = arith.constant 0 : index
    %0 = vector.load %arg4[%c0, %c0_0, %c0_1] : memref<1x64x3xf32, #tpu.memory_space<vmem>>, vector<1x64x3xf32>
    %1 = vector.shape_cast %0 : vector<1x64x3xf32> to vector<64x3xf32>
    %c0_2 = arith.constant 0 : index
    %c0_3 = arith.constant 0 : index
    %c0_4 = arith.constant 0 : index
    %2 = vector.load %arg3[%c0_2, %c0_3, %c0_4] : memref<1x3x128xf32, #tpu.memory_space<vmem>>, vector<1x3x128xf32>
    %3 = vector.shape_cast %2 : vector<1x3x128xf32> to vector<3x128xf32>
    %c0_5 = arith.constant 0 : index
    %c0_6 = arith.constant 0 : index
    %4 = vector.load %arg5[%c0_5, %c0_6] : memref<64x1xf32, #tpu.memory_space<vmem>>, vector<64x1xf32>
    %5 = vector.extract_strided_slice %1 {offsets = [0, 0], sizes = [64, 1], strides = [1, 1]} : vector<64x3xf32> to vector<64x1xf32>
    %6 = vector.extract_strided_slice %3 {offsets = [0, 0], sizes = [1, 128], strides = [1, 1]} : vector<3x128xf32> to vector<1x128xf32>
    %7 = vector.broadcast %5 : vector<64x1xf32> to vector<64x128xf32>
    %8 = vector.broadcast %6 : vector<1x128xf32> to vector<64x128xf32>
    %9 = arith.mulf %7, %8 : vector<64x128xf32>
    %10 = vector.extract_strided_slice %1 {offsets = [0, 1], sizes = [64, 1], strides = [1, 1]} : vector<64x3xf32> to vector<64x1xf32>
    %11 = vector.extract_strided_slice %3 {offsets = [1, 0], sizes = [1, 128], strides = [1, 1]} : vector<3x128xf32> to vector<1x128xf32>
    %12 = vector.broadcast %10 : vector<64x1xf32> to vector<64x128xf32>
    %13 = vector.broadcast %11 : vector<1x128xf32> to vector<64x128xf32>
    %14 = arith.mulf %12, %13 : vector<64x128xf32>
    %15 = arith.addf %9, %14 : vector<64x128xf32>
    %16 = vector.extract_strided_slice %1 {offsets = [0, 2], sizes = [64, 1], strides = [1, 1]} : vector<64x3xf32> to vector<64x1xf32>
    %17 = vector.extract_strided_slice %3 {offsets = [2, 0], sizes = [1, 128], strides = [1, 1]} : vector<3x128xf32> to vector<1x128xf32>
    %18 = vector.broadcast %16 : vector<64x1xf32> to vector<64x128xf32>
    %19 = vector.broadcast %17 : vector<1x128xf32> to vector<64x128xf32>
    %20 = arith.mulf %18, %19 : vector<64x128xf32>
    %21 = arith.addf %15, %20 : vector<64x128xf32>
    %22 = vector.broadcast %4 : vector<64x1xf32> to vector<64x128xf32>
    %23 = arith.addf %21, %22 : vector<64x128xf32>
    %cst = arith.constant 0.000000e+00 : f32
    %24 = vector.broadcast %cst : f32 to vector<64x128xf32>
    %25 = arith.maximumf %23, %24 : vector<64x128xf32>
    %c0_7 = arith.constant 0 : index
    %c0_8 = arith.constant 0 : index
    %26 = vector.load %arg6[%c0_7, %c0_8] : memref<128x64xbf16, #tpu.memory_space<vmem>>, vector<128x64xbf16>
    %27 = arith.truncf %25 : vector<64x128xf32> to vector<64x128xbf16>
    %cst_9 = arith.constant dense<0.000000e+00> : vector<128x128xf32>
    %28 = tpu.matmul %26, %27, %cst_9 {dimension_numbers = #tpu.dot_dimension_numbers<[1], [0], [0], [1], [0, 0, 1, 1], [], []>} : vector<128x64xbf16>, vector<64x128xbf16>, vector<128x128xf32> -> vector<128x128xf32>
    %c0_10 = arith.constant 0 : index
    %c0_11 = arith.constant 0 : index
    %29 = vector.load %arg7[%c0_10, %c0_11] : memref<128x1xf32, #tpu.memory_space<vmem>>, vector<128x1xf32>
    %30 = vector.broadcast %29 : vector<128x1xf32> to vector<128x128xf32>
    %31 = arith.addf %28, %30 : vector<128x128xf32>
    %c1_i32 = arith.constant 1 : i32
    %32 = arith.muli %arg1, %c1_i32 : i32
    %33 = arith.addi %32, %arg2 : i32
    %c128_i32 = arith.constant 128 : i32
    %34 = arith.muli %33, %c128_i32 : i32
    %35 = tpu.iota {dimensions = array<i32: 1>} : vector<1x128xi32>
    %36 = vector.broadcast %34 : i32 to vector<1x128xi32>
    %37 = arith.addi %36, %35 : vector<1x128xi32>
    %c16_i32 = arith.constant 16 : i32
    %38 = vector.broadcast %c16_i32 : i32 to vector<1x128xi32>
    %39 = arith.cmpi slt, %37, %38 : vector<1x128xi32>
    %cst_12 = arith.constant 0.000000e+00 : f32
    %40 = vector.shape_cast %39 : vector<1x128xi1> to vector<1x128xi1>
    %41 = vector.broadcast %40 : vector<1x128xi1> to vector<128x128xi1>
    %42 = vector.broadcast %cst_12 : f32 to vector<128x128xf32>
    %43 = arith.select %41, %31, %42 : vector<128x128xi1>, vector<128x128xf32>
    %c0_i32 = arith.constant 0 : i32
    %44 = arith.cmpi eq, %arg2, %c0_i32 : i32
    %45 = arith.extui %44 : i1 to i32
    %c0_i32_13 = arith.constant 0 : i32
    %46 = arith.cmpi ne, %45, %c0_i32_13 : i32
    scf.if %46 {
      %cst_32 = arith.constant 0.000000e+00 : f32
      %60 = vector.broadcast %cst_32 : f32 to vector<1x1x128x1xf32>
      %c0_33 = arith.constant 0 : index
      %c0_34 = arith.constant 0 : index
      %c0_35 = arith.constant 0 : index
      %c0_36 = arith.constant 0 : index
      %61 = vector.load %arg8[%c0_33, %c0_34, %c0_35, %c0_36] : memref<1x1x128x1xf32, #tpu.memory_space<vmem>>, vector<1x1x128x1xf32>
      tpu.vector_store %arg8[%c0_33, %c0_34, %c0_35, %c0_36], %60 {strides = array<i32>} : memref<1x1x128x1xf32, #tpu.memory_space<vmem>>, vector<1x1x128x1xf32>,
      %cst_37 = arith.constant 0.000000e+00 : f32
      %62 = vector.broadcast %cst_37 : f32 to vector<1x1x128x1xf32>
      %c0_38 = arith.constant 0 : index
      %c0_39 = arith.constant 0 : index
      %c0_40 = arith.constant 0 : index
      %c0_41 = arith.constant 0 : index
      %63 = vector.load %arg9[%c0_38, %c0_39, %c0_40, %c0_41] : memref<1x1x128x1xf32, #tpu.memory_space<vmem>>, vector<1x1x128x1xf32>
      tpu.vector_store %arg9[%c0_38, %c0_39, %c0_40, %c0_41], %62 {strides = array<i32>} : memref<1x1x128x1xf32, #tpu.memory_space<vmem>>, vector<1x1x128x1xf32>,
    } else {
    }
    %c0_14 = arith.constant 0 : index
    %c0_15 = arith.constant 0 : index
    %c0_16 = arith.constant 0 : index
    %c0_17 = arith.constant 0 : index
    %47 = vector.load %arg8[%c0_14, %c0_15, %c0_16, %c0_17] : memref<1x1x128x1xf32, #tpu.memory_space<vmem>>, vector<1x1x128x1xf32>
    %cst_18 = arith.constant dense<0.000000e+00> : vector<128xf32>
    %48 = vector.multi_reduction <add>, %43, %cst_18 [1] : vector<128x128xf32> to vector<128xf32>
    %49 = vector.shape_cast %48 : vector<128xf32> to vector<128x1xf32>
    %50 = vector.shape_cast %49 : vector<128x1xf32> to vector<1x1x128x1xf32>
    %51 = arith.addf %47, %50 : vector<1x1x128x1xf32>
    %c0_19 = arith.constant 0 : index
    %c0_20 = arith.constant 0 : index
    %c0_21 = arith.constant 0 : index
    %c0_22 = arith.constant 0 : index
    %52 = vector.load %arg8[%c0_19, %c0_20, %c0_21, %c0_22] : memref<1x1x128x1xf32, #tpu.memory_space<vmem>>, vector<1x1x128x1xf32>
    tpu.vector_store %arg8[%c0_19, %c0_20, %c0_21, %c0_22], %51 {strides = array<i32>} : memref<1x1x128x1xf32, #tpu.memory_space<vmem>>, vector<1x1x128x1xf32>,
    %c0_23 = arith.constant 0 : index
    %c0_24 = arith.constant 0 : index
    %c0_25 = arith.constant 0 : index
    %c0_26 = arith.constant 0 : index
    %53 = vector.load %arg9[%c0_23, %c0_24, %c0_25, %c0_26] : memref<1x1x128x1xf32, #tpu.memory_space<vmem>>, vector<1x1x128x1xf32>
    %54 = arith.mulf %43, %43 : vector<128x128xf32>
    %cst_27 = arith.constant dense<0.000000e+00> : vector<128xf32>
    %55 = vector.multi_reduction <add>, %54, %cst_27 [1] : vector<128x128xf32> to vector<128xf32>
    %56 = vector.shape_cast %55 : vector<128xf32> to vector<128x1xf32>
    %57 = vector.shape_cast %56 : vector<128x1xf32> to vector<1x1x128x1xf32>
    %58 = arith.addf %53, %57 : vector<1x1x128x1xf32>
    %c0_28 = arith.constant 0 : index
    %c0_29 = arith.constant 0 : index
    %c0_30 = arith.constant 0 : index
    %c0_31 = arith.constant 0 : index
    %59 = vector.load %arg9[%c0_28, %c0_29, %c0_30, %c0_31] : memref<1x1x128x1xf32, #tpu.memory_space<vmem>>, vector<1x1x128x1xf32>
    tpu.vector_store %arg9[%c0_28, %c0_29, %c0_30, %c0_31], %58 {strides = array<i32>} : memref<1x1x128x1xf32, #tpu.memory_space<vmem>>, vector<1x1x128x1xf32>,
    return
  }
  func.func @transform_0(%arg0: i32, %arg1: i32, %arg2: i32) -> (i32, i32, i32) {
    %c1_i32 = arith.constant 1 : i32
    %0 = arith.muli %arg1, %c1_i32 : i32
    %1 = arith.addi %0, %arg2 : i32
    %c0_i32 = arith.constant 0 : i32
    %c0_i32_0 = arith.constant 0 : i32
    return %arg0, %c0_i32, %1 : i32, i32, i32
  }
  func.func @transform_1(%arg0: i32, %arg1: i32, %arg2: i32) -> (i32, i32, i32) {
    %c0_i32 = arith.constant 0 : i32
    %c0_i32_0 = arith.constant 0 : i32
    %c0_i32_1 = arith.constant 0 : i32
    return %arg0, %c0_i32, %c0_i32_0 : i32, i32, i32
  }
  func.func @transform_2(%arg0: i32, %arg1: i32, %arg2: i32) -> (i32, i32) {
    %c0_i32 = arith.constant 0 : i32
    %c0_i32_0 = arith.constant 0 : i32
    %c0_i32_1 = arith.constant 0 : i32
    return %c0_i32, %c0_i32_0 : i32, i32
  }
  func.func @transform_3(%arg0: i32, %arg1: i32, %arg2: i32) -> (i32, i32) {
    %c0_i32 = arith.constant 0 : i32
    %c0_i32_0 = arith.constant 0 : i32
    %c0_i32_1 = arith.constant 0 : i32
    return %c0_i32, %c0_i32_0 : i32, i32
  }
  func.func @transform_4(%arg0: i32, %arg1: i32, %arg2: i32) -> (i32, i32) {
    %c0_i32 = arith.constant 0 : i32
    %c0_i32_0 = arith.constant 0 : i32
    %c0_i32_1 = arith.constant 0 : i32
    return %c0_i32, %c0_i32_0 : i32, i32
  }
  func.func @transform_5(%arg0: i32, %arg1: i32, %arg2: i32) -> (i32, i32, i32, i32) {
    %c0_i32 = arith.constant 0 : i32
    %c0_i32_0 = arith.constant 0 : i32
    %c0_i32_1 = arith.constant 0 : i32
    return %arg0, %arg1, %c0_i32, %c0_i32_0 : i32, i32, i32, i32
  }
  func.func @transform_6(%arg0: i32, %arg1: i32, %arg2: i32) -> (i32, i32, i32, i32) {
    %c0_i32 = arith.constant 0 : i32
    %c0_i32_0 = arith.constant 0 : i32
    %c0_i32_1 = arith.constant 0 : i32
    return %arg0, %arg1, %c0_i32, %c0_i32_0 : i32, i32, i32, i32
  }
}

module attributes {stable_mosaic.version = 11 : i64} {
  func.func @_enc_final_kernel(%arg0: i32, %arg1: i32, %arg2: i32, %arg3: memref<1x3x128xf32, #tpu.memory_space<vmem>>, %arg4: memref<1x64x3xf32, #tpu.memory_space<vmem>>, %arg5: memref<64x1xf32, #tpu.memory_space<vmem>>, %arg6: memref<128x64xbf16, #tpu.memory_space<vmem>>, %arg7: memref<128x1xf32, #tpu.memory_space<vmem>>, %arg8: memref<5x128xf32, #tpu.memory_space<vmem>>, %arg9: memref<5x1xf32, #tpu.memory_space<vmem>>, %arg10: memref<1x1x5x1xf32, #tpu.memory_space<vmem>>, %arg11: memref<1x1x5x1xf32, #tpu.memory_space<vmem>>, %arg12: memref<1x1x5x1xf32, #tpu.memory_space<vmem>>, %arg13: memref<1x1x5x1xf32, #tpu.memory_space<vmem>>) attributes {dimension_semantics = [#tpu.dimension_semantics<parallel>, #tpu.dimension_semantics<parallel>, #tpu.dimension_semantics<arbitrary>], iteration_bounds = array<i64: 2, 2, 1>, scalar_prefetch = 0 : i64, scratch_operands = 0 : i64, tpu.core_type = #tpu.core_type<tc>, window_params = [{transform_indices = @transform_0, window_bounds = array<i64: 1, 3, 128>}, {transform_indices = @transform_1, window_bounds = array<i64: 1, 64, 3>}, {pipeline_mode = #tpu.pipeline_mode<synchronous>, transform_indices = @transform_2, window_bounds = array<i64: 64, 1>}, {pipeline_mode = #tpu.pipeline_mode<synchronous>, transform_indices = @transform_3, window_bounds = array<i64: 128, 64>}, {pipeline_mode = #tpu.pipeline_mode<synchronous>, transform_indices = @transform_4, window_bounds = array<i64: 128, 1>}, {pipeline_mode = #tpu.pipeline_mode<synchronous>, transform_indices = @transform_5, window_bounds = array<i64: 5, 128>}, {pipeline_mode = #tpu.pipeline_mode<synchronous>, transform_indices = @transform_6, window_bounds = array<i64: 5, 1>}, {transform_indices = @transform_7, window_bounds = array<i64: 1, 1, 5, 1>}, {transform_indices = @transform_8, window_bounds = array<i64: 1, 1, 5, 1>}, {transform_indices = @transform_9, window_bounds = array<i64: 1, 1, 5, 1>}, {transform_indices = @transform_10, window_bounds = array<i64: 1, 1, 5, 1>}]} {
    %c0 = arith.constant 0 : index
    %c0_0 = arith.constant 0 : index
    %c0_1 = arith.constant 0 : index
    %0 = vector.load %arg4[%c0, %c0_0, %c0_1] : memref<1x64x3xf32, #tpu.memory_space<vmem>>, vector<1x64x3xf32>
    %1 = vector.shape_cast %0 : vector<1x64x3xf32> to vector<64x3xf32>
    %c0_2 = arith.constant 0 : index
    %c0_3 = arith.constant 0 : index
    %c0_4 = arith.constant 0 : index
    %2 = vector.load %arg3[%c0_2, %c0_3, %c0_4] : memref<1x3x128xf32, #tpu.memory_space<vmem>>, vector<1x3x128xf32>
    %3 = vector.shape_cast %2 : vector<1x3x128xf32> to vector<3x128xf32>
    %c0_5 = arith.constant 0 : index
    %c0_6 = arith.constant 0 : index
    %4 = vector.load %arg5[%c0_5, %c0_6] : memref<64x1xf32, #tpu.memory_space<vmem>>, vector<64x1xf32>
    %5 = vector.extract_strided_slice %1 {offsets = [0, 0], sizes = [64, 1], strides = [1, 1]} : vector<64x3xf32> to vector<64x1xf32>
    %6 = vector.extract_strided_slice %3 {offsets = [0, 0], sizes = [1, 128], strides = [1, 1]} : vector<3x128xf32> to vector<1x128xf32>
    %7 = vector.broadcast %5 : vector<64x1xf32> to vector<64x128xf32>
    %8 = vector.broadcast %6 : vector<1x128xf32> to vector<64x128xf32>
    %9 = arith.mulf %7, %8 : vector<64x128xf32>
    %10 = vector.extract_strided_slice %1 {offsets = [0, 1], sizes = [64, 1], strides = [1, 1]} : vector<64x3xf32> to vector<64x1xf32>
    %11 = vector.extract_strided_slice %3 {offsets = [1, 0], sizes = [1, 128], strides = [1, 1]} : vector<3x128xf32> to vector<1x128xf32>
    %12 = vector.broadcast %10 : vector<64x1xf32> to vector<64x128xf32>
    %13 = vector.broadcast %11 : vector<1x128xf32> to vector<64x128xf32>
    %14 = arith.mulf %12, %13 : vector<64x128xf32>
    %15 = arith.addf %9, %14 : vector<64x128xf32>
    %16 = vector.extract_strided_slice %1 {offsets = [0, 2], sizes = [64, 1], strides = [1, 1]} : vector<64x3xf32> to vector<64x1xf32>
    %17 = vector.extract_strided_slice %3 {offsets = [2, 0], sizes = [1, 128], strides = [1, 1]} : vector<3x128xf32> to vector<1x128xf32>
    %18 = vector.broadcast %16 : vector<64x1xf32> to vector<64x128xf32>
    %19 = vector.broadcast %17 : vector<1x128xf32> to vector<64x128xf32>
    %20 = arith.mulf %18, %19 : vector<64x128xf32>
    %21 = arith.addf %15, %20 : vector<64x128xf32>
    %22 = vector.broadcast %4 : vector<64x1xf32> to vector<64x128xf32>
    %23 = arith.addf %21, %22 : vector<64x128xf32>
    %cst = arith.constant 0.000000e+00 : f32
    %24 = vector.broadcast %cst : f32 to vector<64x128xf32>
    %25 = arith.maximumf %23, %24 : vector<64x128xf32>
    %c0_7 = arith.constant 0 : index
    %c0_8 = arith.constant 0 : index
    %26 = vector.load %arg6[%c0_7, %c0_8] : memref<128x64xbf16, #tpu.memory_space<vmem>>, vector<128x64xbf16>
    %27 = arith.truncf %25 : vector<64x128xf32> to vector<64x128xbf16>
    %cst_9 = arith.constant dense<0.000000e+00> : vector<128x128xf32>
    %28 = tpu.matmul %26, %27, %cst_9 {dimension_numbers = #tpu.dot_dimension_numbers<[1], [0], [0], [1], [0, 0, 1, 1], [], []>} : vector<128x64xbf16>, vector<64x128xbf16>, vector<128x128xf32> -> vector<128x128xf32>
    %c0_10 = arith.constant 0 : index
    %c0_11 = arith.constant 0 : index
    %29 = vector.load %arg7[%c0_10, %c0_11] : memref<128x1xf32, #tpu.memory_space<vmem>>, vector<128x1xf32>
    %30 = vector.broadcast %29 : vector<128x1xf32> to vector<128x128xf32>
    %31 = arith.addf %28, %30 : vector<128x128xf32>
    %cst_12 = arith.constant 0.000000e+00 : f32
    %32 = vector.broadcast %cst_12 : f32 to vector<128x128xf32>
    %33 = arith.maximumf %31, %32 : vector<128x128xf32>
    %c0_13 = arith.constant 0 : index
    %c0_14 = arith.constant 0 : index
    %34 = vector.load %arg8[%c0_13, %c0_14] : memref<5x128xf32, #tpu.memory_space<vmem>>, vector<5x128xf32>
    %cst_15 = arith.constant dense<0.000000e+00> : vector<5x128xf32>
    %35 = tpu.matmul %34, %33, %cst_15 {dimension_numbers = #tpu.dot_dimension_numbers<[1], [0], [0], [1], [0, 0, 1, 1], [], []>} : vector<5x128xf32>, vector<128x128xf32>, vector<5x128xf32> -> vector<5x128xf32>
    %c0_16 = arith.constant 0 : index
    %c0_17 = arith.constant 0 : index
    %36 = vector.load %arg9[%c0_16, %c0_17] : memref<5x1xf32, #tpu.memory_space<vmem>>, vector<5x1xf32>
    %37 = vector.broadcast %36 : vector<5x1xf32> to vector<5x128xf32>
    %38 = arith.addf %35, %37 : vector<5x128xf32>
    %c1_i32 = arith.constant 1 : i32
    %39 = arith.muli %arg1, %c1_i32 : i32
    %40 = arith.addi %39, %arg2 : i32
    %c128_i32 = arith.constant 128 : i32
    %41 = arith.muli %40, %c128_i32 : i32
    %42 = tpu.iota {dimensions = array<i32: 1>} : vector<1x128xi32>
    %43 = vector.broadcast %41 : i32 to vector<1x128xi32>
    %44 = arith.addi %43, %42 : vector<1x128xi32>
    %c16_i32 = arith.constant 16 : i32
    %45 = vector.broadcast %c16_i32 : i32 to vector<1x128xi32>
    %46 = arith.cmpi slt, %44, %45 : vector<1x128xi32>
    %cst_18 = arith.constant 0.000000e+00 : f32
    %47 = vector.shape_cast %46 : vector<1x128xi1> to vector<1x128xi1>
    %48 = vector.broadcast %47 : vector<1x128xi1> to vector<5x128xi1>
    %49 = vector.broadcast %cst_18 : f32 to vector<5x128xf32>
    %50 = arith.select %48, %38, %49 : vector<5x128xi1>, vector<5x128xf32>
    %cst_19 = arith.constant 0xFF800000 : f32
    %51 = vector.shape_cast %46 : vector<1x128xi1> to vector<1x128xi1>
    %52 = vector.broadcast %51 : vector<1x128xi1> to vector<5x128xi1>
    %53 = vector.broadcast %cst_19 : f32 to vector<5x128xf32>
    %54 = arith.select %52, %38, %53 : vector<5x128xi1>, vector<5x128xf32>
    %cst_20 = arith.constant 0x7F800000 : f32
    %55 = vector.shape_cast %46 : vector<1x128xi1> to vector<1x128xi1>
    %56 = vector.broadcast %55 : vector<1x128xi1> to vector<5x128xi1>
    %57 = vector.broadcast %cst_20 : f32 to vector<5x128xf32>
    %58 = arith.select %56, %38, %57 : vector<5x128xi1>, vector<5x128xf32>
    %c0_i32 = arith.constant 0 : i32
    %59 = arith.cmpi eq, %arg2, %c0_i32 : i32
    %60 = arith.extui %59 : i1 to i32
    %c0_i32_21 = arith.constant 0 : i32
    %61 = arith.cmpi ne, %60, %c0_i32_21 : i32
    scf.if %61 {
      %cst_58 = arith.constant 0.000000e+00 : f32
      %87 = vector.broadcast %cst_58 : f32 to vector<1x1x5x1xf32>
      %c0_59 = arith.constant 0 : index
      %c0_60 = arith.constant 0 : index
      %c0_61 = arith.constant 0 : index
      %c0_62 = arith.constant 0 : index
      %88 = vector.load %arg10[%c0_59, %c0_60, %c0_61, %c0_62] : memref<1x1x5x1xf32, #tpu.memory_space<vmem>>, vector<1x1x5x1xf32>
      tpu.vector_store %arg10[%c0_59, %c0_60, %c0_61, %c0_62], %87 {strides = array<i32>} : memref<1x1x5x1xf32, #tpu.memory_space<vmem>>, vector<1x1x5x1xf32>,
      %cst_63 = arith.constant 0.000000e+00 : f32
      %89 = vector.broadcast %cst_63 : f32 to vector<1x1x5x1xf32>
      %c0_64 = arith.constant 0 : index
      %c0_65 = arith.constant 0 : index
      %c0_66 = arith.constant 0 : index
      %c0_67 = arith.constant 0 : index
      %90 = vector.load %arg11[%c0_64, %c0_65, %c0_66, %c0_67] : memref<1x1x5x1xf32, #tpu.memory_space<vmem>>, vector<1x1x5x1xf32>
      tpu.vector_store %arg11[%c0_64, %c0_65, %c0_66, %c0_67], %89 {strides = array<i32>} : memref<1x1x5x1xf32, #tpu.memory_space<vmem>>, vector<1x1x5x1xf32>,
      %cst_68 = arith.constant 0xFF800000 : f32
      %91 = vector.broadcast %cst_68 : f32 to vector<1x1x5x1xf32>
      %c0_69 = arith.constant 0 : index
      %c0_70 = arith.constant 0 : index
      %c0_71 = arith.constant 0 : index
      %c0_72 = arith.constant 0 : index
      %92 = vector.load %arg12[%c0_69, %c0_70, %c0_71, %c0_72] : memref<1x1x5x1xf32, #tpu.memory_space<vmem>>, vector<1x1x5x1xf32>
      tpu.vector_store %arg12[%c0_69, %c0_70, %c0_71, %c0_72], %91 {strides = array<i32>} : memref<1x1x5x1xf32, #tpu.memory_space<vmem>>, vector<1x1x5x1xf32>,
      %cst_73 = arith.constant 0x7F800000 : f32
      %93 = vector.broadcast %cst_73 : f32 to vector<1x1x5x1xf32>
      %c0_74 = arith.constant 0 : index
      %c0_75 = arith.constant 0 : index
      %c0_76 = arith.constant 0 : index
      %c0_77 = arith.constant 0 : index
      %94 = vector.load %arg13[%c0_74, %c0_75, %c0_76, %c0_77] : memref<1x1x5x1xf32, #tpu.memory_space<vmem>>, vector<1x1x5x1xf32>
      tpu.vector_store %arg13[%c0_74, %c0_75, %c0_76, %c0_77], %93 {strides = array<i32>} : memref<1x1x5x1xf32, #tpu.memory_space<vmem>>, vector<1x1x5x1xf32>,
    } else {
    }
    %c0_22 = arith.constant 0 : index
    %c0_23 = arith.constant 0 : index
    %c0_24 = arith.constant 0 : index
    %c0_25 = arith.constant 0 : index
    %62 = vector.load %arg10[%c0_22, %c0_23, %c0_24, %c0_25] : memref<1x1x5x1xf32, #tpu.memory_space<vmem>>, vector<1x1x5x1xf32>
    %cst_26 = arith.constant dense<0.000000e+00> : vector<5xf32>
    %63 = vector.multi_reduction <add>, %50, %cst_26 [1] : vector<5x128xf32> to vector<5xf32>
    %64 = vector.shape_cast %63 : vector<5xf32> to vector<5x1xf32>
    %65 = vector.shape_cast %64 : vector<5x1xf32> to vector<1x1x5x1xf32>
    %66 = arith.addf %62, %65 : vector<1x1x5x1xf32>
    %c0_27 = arith.constant 0 : index
    %c0_28 = arith.constant 0 : index
    %c0_29 = arith.constant 0 : index
    %c0_30 = arith.constant 0 : index
    %67 = vector.load %arg10[%c0_27, %c0_28, %c0_29, %c0_30] : memref<1x1x5x1xf32, #tpu.memory_space<vmem>>, vector<1x1x5x1xf32>
    tpu.vector_store %arg10[%c0_27, %c0_28, %c0_29, %c0_30], %66 {strides = array<i32>} : memref<1x1x5x1xf32, #tpu.memory_space<vmem>>, vector<1x1x5x1xf32>,
    %c0_31 = arith.constant 0 : index
    %c0_32 = arith.constant 0 : index
    %c0_33 = arith.constant 0 : index
    %c0_34 = arith.constant 0 : index
    %68 = vector.load %arg11[%c0_31, %c0_32, %c0_33, %c0_34] : memref<1x1x5x1xf32, #tpu.memory_space<vmem>>, vector<1x1x5x1xf32>
    %69 = arith.mulf %50, %50 : vector<5x128xf32>
    %cst_35 = arith.constant dense<0.000000e+00> : vector<5xf32>
    %70 = vector.multi_reduction <add>, %69, %cst_35 [1] : vector<5x128xf32> to vector<5xf32>
    %71 = vector.shape_cast %70 : vector<5xf32> to vector<5x1xf32>
    %72 = vector.shape_cast %71 : vector<5x1xf32> to vector<1x1x5x1xf32>
    %73 = arith.addf %68, %72 : vector<1x1x5x1xf32>
    %c0_36 = arith.constant 0 : index
    %c0_37 = arith.constant 0 : index
    %c0_38 = arith.constant 0 : index
    %c0_39 = arith.constant 0 : index
    %74 = vector.load %arg11[%c0_36, %c0_37, %c0_38, %c0_39] : memref<1x1x5x1xf32, #tpu.memory_space<vmem>>, vector<1x1x5x1xf32>
    tpu.vector_store %arg11[%c0_36, %c0_37, %c0_38, %c0_39], %73 {strides = array<i32>} : memref<1x1x5x1xf32, #tpu.memory_space<vmem>>, vector<1x1x5x1xf32>,
    %c0_40 = arith.constant 0 : index
    %c0_41 = arith.constant 0 : index
    %c0_42 = arith.constant 0 : index
    %c0_43 = arith.constant 0 : index
    %75 = vector.load %arg12[%c0_40, %c0_41, %c0_42, %c0_43] : memref<1x1x5x1xf32, #tpu.memory_space<vmem>>, vector<1x1x5x1xf32>
    %cst_44 = arith.constant dense<0xFF800000> : vector<5xf32>
    %76 = vector.multi_reduction <maximumf>, %54, %cst_44 [1] : vector<5x128xf32> to vector<5xf32>
    %77 = vector.shape_cast %76 : vector<5xf32> to vector<5x1xf32>
    %78 = vector.shape_cast %77 : vector<5x1xf32> to vector<1x1x5x1xf32>
    %79 = arith.maximumf %75, %78 : vector<1x1x5x1xf32>
    %c0_45 = arith.constant 0 : index
    %c0_46 = arith.constant 0 : index
    %c0_47 = arith.constant 0 : index
    %c0_48 = arith.constant 0 : index
    %80 = vector.load %arg12[%c0_45, %c0_46, %c0_47, %c0_48] : memref<1x1x5x1xf32, #tpu.memory_space<vmem>>, vector<1x1x5x1xf32>
    tpu.vector_store %arg12[%c0_45, %c0_46, %c0_47, %c0_48], %79 {strides = array<i32>} : memref<1x1x5x1xf32, #tpu.memory_space<vmem>>, vector<1x1x5x1xf32>,
    %c0_49 = arith.constant 0 : index
    %c0_50 = arith.constant 0 : index
    %c0_51 = arith.constant 0 : index
    %c0_52 = arith.constant 0 : index
    %81 = vector.load %arg13[%c0_49, %c0_50, %c0_51, %c0_52] : memref<1x1x5x1xf32, #tpu.memory_space<vmem>>, vector<1x1x5x1xf32>
    %cst_53 = arith.constant dense<0x7F800000> : vector<5xf32>
    %82 = vector.multi_reduction <minimumf>, %58, %cst_53 [1] : vector<5x128xf32> to vector<5xf32>
    %83 = vector.shape_cast %82 : vector<5xf32> to vector<5x1xf32>
    %84 = vector.shape_cast %83 : vector<5x1xf32> to vector<1x1x5x1xf32>
    %85 = arith.minimumf %81, %84 : vector<1x1x5x1xf32>
    %c0_54 = arith.constant 0 : index
    %c0_55 = arith.constant 0 : index
    %c0_56 = arith.constant 0 : index
    %c0_57 = arith.constant 0 : index
    %86 = vector.load %arg13[%c0_54, %c0_55, %c0_56, %c0_57] : memref<1x1x5x1xf32, #tpu.memory_space<vmem>>, vector<1x1x5x1xf32>
    tpu.vector_store %arg13[%c0_54, %c0_55, %c0_56, %c0_57], %85 {strides = array<i32>} : memref<1x1x5x1xf32, #tpu.memory_space<vmem>>, vector<1x1x5x1xf32>,
    return
  }
  func.func @transform_0(%arg0: i32, %arg1: i32, %arg2: i32) -> (i32, i32, i32) {
    %c1_i32 = arith.constant 1 : i32
    %0 = arith.muli %arg1, %c1_i32 : i32
    %1 = arith.addi %0, %arg2 : i32
    %c0_i32 = arith.constant 0 : i32
    %c0_i32_0 = arith.constant 0 : i32
    return %arg0, %c0_i32, %1 : i32, i32, i32
  }
  func.func @transform_1(%arg0: i32, %arg1: i32, %arg2: i32) -> (i32, i32, i32) {
    %c0_i32 = arith.constant 0 : i32
    %c0_i32_0 = arith.constant 0 : i32
    %c0_i32_1 = arith.constant 0 : i32
    return %arg0, %c0_i32, %c0_i32_0 : i32, i32, i32
  }
  func.func @transform_2(%arg0: i32, %arg1: i32, %arg2: i32) -> (i32, i32) {
    %c0_i32 = arith.constant 0 : i32
    %c0_i32_0 = arith.constant 0 : i32
    %c0_i32_1 = arith.constant 0 : i32
    return %c0_i32, %c0_i32_0 : i32, i32
  }
  func.func @transform_3(%arg0: i32, %arg1: i32, %arg2: i32) -> (i32, i32) {
    %c0_i32 = arith.constant 0 : i32
    %c0_i32_0 = arith.constant 0 : i32
    %c0_i32_1 = arith.constant 0 : i32
    return %c0_i32, %c0_i32_0 : i32, i32
  }
  func.func @transform_4(%arg0: i32, %arg1: i32, %arg2: i32) -> (i32, i32) {
    %c0_i32 = arith.constant 0 : i32
    %c0_i32_0 = arith.constant 0 : i32
    %c0_i32_1 = arith.constant 0 : i32
    return %c0_i32, %c0_i32_0 : i32, i32
  }
  func.func @transform_5(%arg0: i32, %arg1: i32, %arg2: i32) -> (i32, i32) {
    %c0_i32 = arith.constant 0 : i32
    %c0_i32_0 = arith.constant 0 : i32
    %c0_i32_1 = arith.constant 0 : i32
    return %c0_i32, %c0_i32_0 : i32, i32
  }
  func.func @transform_6(%arg0: i32, %arg1: i32, %arg2: i32) -> (i32, i32) {
    %c0_i32 = arith.constant 0 : i32
    %c0_i32_0 = arith.constant 0 : i32
    %c0_i32_1 = arith.constant 0 : i32
    return %c0_i32, %c0_i32_0 : i32, i32
  }
  func.func @transform_7(%arg0: i32, %arg1: i32, %arg2: i32) -> (i32, i32, i32, i32) {
    %c0_i32 = arith.constant 0 : i32
    %c0_i32_0 = arith.constant 0 : i32
    %c0_i32_1 = arith.constant 0 : i32
    return %arg0, %arg1, %c0_i32, %c0_i32_0 : i32, i32, i32, i32
  }
  func.func @transform_8(%arg0: i32, %arg1: i32, %arg2: i32) -> (i32, i32, i32, i32) {
    %c0_i32 = arith.constant 0 : i32
    %c0_i32_0 = arith.constant 0 : i32
    %c0_i32_1 = arith.constant 0 : i32
    return %arg0, %arg1, %c0_i32, %c0_i32_0 : i32, i32, i32, i32
  }
  func.func @transform_9(%arg0: i32, %arg1: i32, %arg2: i32) -> (i32, i32, i32, i32) {
    %c0_i32 = arith.constant 0 : i32
    %c0_i32_0 = arith.constant 0 : i32
    %c0_i32_1 = arith.constant 0 : i32
    return %arg0, %arg1, %c0_i32, %c0_i32_0 : i32, i32, i32, i32
  }
  func.func @transform_10(%arg0: i32, %arg1: i32, %arg2: i32) -> (i32, i32, i32, i32) {
    %c0_i32 = arith.constant 0 : i32
    %c0_i32_0 = arith.constant 0 : i32
    %c0_i32_1 = arith.constant 0 : i32
    return %arg0, %arg1, %c0_i32, %c0_i32_0 : i32, i32, i32, i32
  }
}

</mosaic_0001>

<bundles_post_ra>
// kernel: encoder_2f_forward.6
= control target key start
LH: loop header
LB: loop body
LE: loop exit
PB: predicated region body
PF: predicated region fallthrough
CT: control target
= control target key end

     0   :  { %v3472_v36 = vmov 1983009808   ;;  %v34_v38 = vlaneseq  ;;  %vm2563_vm0 = vcmask 66560   ;;  %s4659_s1 = inlined_call_operand.vmem [shape: bf16[1024,512], index: 1, kind: input, shape index: {}]   ;;  %s4660_s0 = inlined_call_operand.vmem [shape: f32[2,1024], index: 0, kind: input, shape index: {}]   ;;  %s4661_s3 = inlined_call_operand.vmem [shape: bf16[512,256], index: 3, kind: input, shape index: {}]   ;;  %s4662_s2 = inlined_call_operand.vmem [shape: f32[1,512], index: 2, kind: input, shape index: {}]   ;;  %s4663_s5 = inlined_call_operand.vmem [shape: f32[256,9], index: 5, kind: input, shape index: {}]   ;;  %s4664_s4 = inlined_call_operand.vmem [shape: f32[1,256], index: 4, kind: input, shape index: {}]   ;;  %s4665_s6 = inlined_call_operand.vmem [shape: f32[1,9], index: 6, kind: input, shape index: {}]   ;;  %s4666_s7 = inlined_call_operand.vmem [shape: f32[2,9], index: 7, kind: output, shape index: {}]  }
   0x1   :  { %v2990_v0 = vld [vmem:[%s4659_s1 + $0x4] ss:$16 sps:$4 sm:$0xff]   ;;  %v2994_v2 = vld [vmem:[%s4659_s1] ss:$16 sps:$4 sm:$0xff]   ;;  %v32_v37 = vunpack.c.l.s4 %v3472_v36 }
   0x2   :  { %v2992_v1 = vld [vmem:[%s4659_s1 + $0x204] ss:$16 sps:$4 sm:$0xff]   ;;  %1638 = vmatprep.subr.bf16.mxu1 %v2990_v0  ;;  %v2995_v3 = vld [vmem:[%s4659_s1 + $0x200] ss:$16 sps:$4 sm:$0xff]   ;;  %v3630_v43 = vshrl.u32 %v34_v38, 7 }
   0x3   :  { %1679 = vmatprep.subr.bf16.mxu0 %v2992_v1  ;;  %v2996_v4 = vld [vmem:[%s4659_s1 + $0x24] ss:$16 sps:$4 sm:$0xff]   ;;  %1639 = vmatpush1.bf16.msra.mxu1 %v2994_v2  ;;  %v3000_v6 = vld [vmem:[%s4659_s1 + $0x20] ss:$16 sps:$4 sm:$0xff]   ;;  %v33_v42 = vunpack.c.0.s8 %v32_v37  ;;  %v3117_v37 = vld [vmem:[%s4659_s1 + $0x8c] ss:$16 sps:$4 sm:$0xff]  }
   0x4   :  { %1680 = vmatpush1.bf16.msra.mxu0 %v2995_v3  ;;  %v2998_v5 = vld [vmem:[%s4659_s1 + $0x224] ss:$16 sps:$4 sm:$0xff]   ;;  %1640 = vmatprep.subr.bf16.mxu1 %v2996_v4  ;;  %v3001_v7 = vld [vmem:[%s4659_s1 + $0x220] ss:$16 sps:$4 sm:$0xff]  }
   0x5   :  { %1681 = vmatprep.subr.bf16.mxu0 %v2998_v5  ;;  %v3002_v8 = vld [vmem:[%s4659_s1 + $0x44] ss:$16 sps:$4 sm:$0xff]   ;;  %v3006_v10 = vld [vmem:[%s4659_s1 + $0x40] ss:$16 sps:$4 sm:$0xff]   ;;  %v3648_v49 = vsub.s32 %v33_v42, %v3630_v43 }
   0x6   :  { %v3004_v9 = vld [vmem:[%s4659_s1 + $0x244] ss:$16 sps:$4 sm:$0xff]   ;;  %v3007_v11 = vld [vmem:[%s4659_s1 + $0x240] ss:$16 sps:$4 sm:$0xff]  }
   0x7   :  { %1641 = vmatpush1.bf16.msra.mxu1 %v3000_v6  ;;  %v3008_v12 = vld [vmem:[%s4659_s1 + $0x64] ss:$16 sps:$4 sm:$0xff]   ;;  %v3012_v14 = vld [vmem:[%s4659_s1 + $0x60] ss:$16 sps:$4 sm:$0xff]  }
   0x8   :  { %1682 = vmatpush1.bf16.msra.mxu0 %v3001_v7  ;;  %1642 = vmatprep.subr.bf16.mxu1 %v3002_v8  ;;  %v3010_v13 = vld [vmem:[%s4659_s1 + $0x264] ss:$16 sps:$4 sm:$0xff]   ;;  %v3013_v15 = vld [vmem:[%s4659_s1 + $0x260] ss:$16 sps:$4 sm:$0xff]   ;;  %v3703_v8 = vld [vmem:[%s4660_s0 + $0x8] sm:$0xff] }
   0x9   :  { %1683 = vmatprep.subr.bf16.mxu0 %v3004_v9  ;;  %v3014_v16 = vld [vmem:[%s4659_s1 + $0x84] ss:$16 sps:$4 sm:$0xff]   ;;  %v3018_v18 = vld [vmem:[%s4659_s1 + $0x80] ss:$16 sps:$4 sm:$0xff]  }
   0xa   :  { %v3016_v17 = vld [vmem:[%s4659_s1 + $0x284] ss:$16 sps:$4 sm:$0xff]   ;;  %v3019_v19 = vld [vmem:[%s4659_s1 + $0x280] ss:$16 sps:$4 sm:$0xff]  }
   0xb   :  { %1643 = vmatpush1.bf16.msra.mxu1 %v3006_v10  ;;  %v3020_v20 = vld [vmem:[%s4659_s1 + $0xa4] ss:$16 sps:$4 sm:$0xff]   ;;  %v3024_v22 = vld [vmem:[%s4659_s1 + $0xa0] ss:$16 sps:$4 sm:$0xff]  }
   0xc   :  { %1684 = vmatpush1.bf16.msra.mxu0 %v3007_v11  ;;  %1644 = vmatprep.subr.bf16.mxu1 %v3008_v12  ;;  %v3022_v21 = vld [vmem:[%s4659_s1 + $0x2a4] ss:$16 sps:$4 sm:$0xff]   ;;  %v3025_v23 = vld [vmem:[%s4659_s1 + $0x2a0] ss:$16 sps:$4 sm:$0xff]  }
   0xd   :  { %1685 = vmatprep.subr.bf16.mxu0 %v3010_v13  ;;  %v3026_v24 = vld [vmem:[%s4659_s1 + $0xc4] ss:$16 sps:$4 sm:$0xff]   ;;  %v3030_v26 = vld [vmem:[%s4659_s1 + $0xc0] ss:$16 sps:$4 sm:$0xff]   ;;  %v3719_v13 = vrot.slane %v3703_v8, %v3648_v49 }
   0xe   :  { %v3028_v25 = vld [vmem:[%s4659_s1 + $0x2c4] ss:$16 sps:$4 sm:$0xff]   ;;  %v3031_v27 = vld [vmem:[%s4659_s1 + $0x2c0] ss:$16 sps:$4 sm:$0xff]  }
   0xf   :  { %1645 = vmatpush1.bf16.msra.mxu1 %v3012_v14  ;;  %v3032_v28 = vld [vmem:[%s4659_s1 + $0xe4] ss:$16 sps:$4 sm:$0xff]   ;;  %v3036_v30 = vld [vmem:[%s4659_s1 + $0xe0] ss:$16 sps:$4 sm:$0xff]  }
  0x10   :  { %1686 = vmatpush1.bf16.msra.mxu0 %v3013_v15  ;;  %1646 = vmatprep.subr.bf16.mxu1 %v3014_v16  ;;  %v3034_v29 = vld [vmem:[%s4659_s1 + $0x2e4] ss:$16 sps:$4 sm:$0xff]   ;;  %v3037_v31 = vld [vmem:[%s4659_s1 + $0x2e0] ss:$16 sps:$4 sm:$0xff]  }
  0x11   :  { %1687 = vmatprep.subr.bf16.mxu0 %v3016_v17  ;;  %v3038_v32 = vld [vmem:[%s4659_s1 + $0x104] ss:$16 sps:$4 sm:$0xff]   ;;  %v3042_v34 = vld [vmem:[%s4659_s1 + $0x100] ss:$16 sps:$4 sm:$0xff]   ;;  %v3093_v17 = vld [vmem:[%s4659_s1 + $0xc] ss:$16 sps:$4 sm:$0xff]  }
  0x12   :  { %v3040_v33 = vld [vmem:[%s4659_s1 + $0x304] ss:$16 sps:$4 sm:$0xff]   ;;  %v3043_v35 = vld [vmem:[%s4659_s1 + $0x300] ss:$16 sps:$4 sm:$0xff]  }
  0x13   :  { %1647 = vmatpush1.bf16.msra.mxu1 %v3018_v18  ;;  %v3044_v39 = vld [vmem:[%s4659_s1 + $0x124] ss:$16 sps:$4 sm:$0xff]   ;;  %v3048_v41 = vld [vmem:[%s4659_s1 + $0x120] ss:$16 sps:$4 sm:$0xff]   ;;  %v62_v18 = vcombine.high %v3719_v13, %v3719_v13 }
  0x14   :  { %1688 = vmatpush1.bf16.msra.mxu0 %v3019_v19  ;;  %1648 = vmatprep.subr.bf16.mxu1 %v3020_v20  ;;  %v3046_v40 = vld [vmem:[%s4659_s1 + $0x324] ss:$16 sps:$4 sm:$0xff]   ;;  %v3049_v44 = vld [vmem:[%s4659_s1 + $0x320] ss:$16 sps:$4 sm:$0xff]  }
  0x15   :  { %1689 = vmatprep.subr.bf16.mxu0 %v3022_v21  ;;  %v3050_v45 = vld [vmem:[%s4659_s1 + $0x144] ss:$16 sps:$4 sm:$0xff]   ;;  %v3054_v47 = vld [vmem:[%s4659_s1 + $0x140] ss:$16 sps:$4 sm:$0xff]  }
  0x16   :  { %v3052_v46 = vld [vmem:[%s4659_s1 + $0x344] ss:$16 sps:$4 sm:$0xff]   ;;  %v3055_v48 = vld [vmem:[%s4659_s1 + $0x340] ss:$16 sps:$4 sm:$0xff]  }
  0x17   :  { %1649 = vmatpush1.bf16.msra.mxu1 %v3024_v22  ;;  %v3056_v50 = vld [vmem:[%s4659_s1 + $0x164] ss:$16 sps:$4 sm:$0xff]   ;;  %v3060_v55 = vld [vmem:[%s4659_s1 + $0x160] ss:$16 sps:$4 sm:$0xff]   ;;  %v3091_v22 = vld [vmem:[%s4659_s1 + $0x8] ss:$16 sps:$4 sm:$0xff]  }
  0x18   :  { %1690 = vmatpush1.bf16.msra.mxu0 %v3025_v23  ;;  %1650 = vmatprep.subr.bf16.mxu1 %v3026_v24  ;;  %v3058_v51 = vld [vmem:[%s4659_s1 + $0x364] ss:$16 sps:$4 sm:$0xff]   ;;  %v3061_v56 = vld [vmem:[%s4659_s1 + $0x360] ss:$16 sps:$4 sm:$0xff]   ;;  %v3099_v24 = vld [vmem:[%s4659_s1 + $0x2c] ss:$16 sps:$4 sm:$0xff]  }
  0x19   :  { %1691 = vmatprep.subr.bf16.mxu0 %v3028_v25  ;;  %v26_v52 = vld [vmem:[%s4660_s0] sm:$0xff]  ;;  %v3751_v25 = vpack.c.bf16 %v62_v18, %v62_v18  ;;  %v3177_v18 = vld [vmem:[%s4659_s1 + $0x1cc] ss:$16 sps:$4 sm:$0xff]  }
  0x1a   :  { %v37_v53 = vrot.slane %v26_v52, %v3648_v49  ;;  %v30_v54 = vcombine.high %v26_v52, %v26_v52  ;;  %v3062_v57 = vld [vmem:[%s4659_s1 + $0x184] ss:$16 sps:$4 sm:$0xff]   ;;  %v3066_v63 = vld [vmem:[%s4659_s1 + $0x180] ss:$16 sps:$4 sm:$0xff]  }
  0x1b   :  { %1651 = vmatpush1.bf16.msra.mxu1 %v3030_v26  ;;  %v3064_v58 = vld [vmem:[%s4659_s1 + $0x384] ss:$16 sps:$4 sm:$0xff]   ;;  %v3067_v0 = vld [vmem:[%s4659_s1 + $0x380] ss:$16 sps:$4 sm:$0xff]  }
  0x1c   :  { %1692 = vmatpush1.bf16.msra.mxu0 %v3031_v27  ;;  %1652 = vmatprep.subr.bf16.mxu1 %v3032_v28  ;;  %v45_v59 = vcombine.high %v37_v53, %v37_v53  ;;  %v44_v60 = vrot.slane %v30_v54, %v3648_v49  ;;  %v3068_v1 = vld [vmem:[%s4659_s1 + $0x1a4] ss:$16 sps:$4 sm:$0xff]   ;;  %v3072_v4 = vld [vmem:[%s4659_s1 + $0x1a0] ss:$16 sps:$4 sm:$0xff]   ;;  %v3735_v19 = vpack.c.bf16 %v37_v53, %v37_v53  ;;  %v3097_v27 = vld [vmem:[%s4659_s1 + $0x28] ss:$16 sps:$4 sm:$0xff]  }
  0x1d   :  { %1693 = vmatprep.subr.bf16.mxu0 %v3034_v29  ;;  %v3070_v2 = vld [vmem:[%s4659_s1 + $0x3a4] ss:$16 sps:$4 sm:$0xff]   ;;  %v3073_v5 = vld [vmem:[%s4659_s1 + $0x3a0] ss:$16 sps:$4 sm:$0xff]   ;;  %v3105_v29 = vld [vmem:[%s4659_s1 + $0x4c] ss:$16 sps:$4 sm:$0xff]  }
  0x1e   :  { %v73_v61 = vpack.c.bf16 %v45_v59, %v45_v59  ;;  %v46_v62 = vcombine.high %v44_v60, %v44_v60  ;;  %v3074_v6 = vld [vmem:[%s4659_s1 + $0x1c4] ss:$16 sps:$4 sm:$0xff]   ;;  %v3078_v9 = vld [vmem:[%s4659_s1 + $0x1c0] ss:$16 sps:$4 sm:$0xff]   ;;  %v3737_v20 = vpack.c.bf16 %v44_v60, %v44_v60  ;;  %v3133_v53 = vld [vmem:[%s4659_s1 + $0xe8] ss:$16 sps:$4 sm:$0xff]  }
  0x1f   :  { %1653 = vmatpush1.bf16.msra.mxu1 %v3036_v30  ;;  %v3076_v7 = vld [vmem:[%s4659_s1 + $0x3c4] ss:$16 sps:$4 sm:$0xff]   ;;  %v3079_v10 = vld [vmem:[%s4659_s1 + $0x3c0] ss:$16 sps:$4 sm:$0xff]   ;;  %v3147_v59 = vld [vmem:[%s4659_s1 + $0x12c] ss:$16 sps:$4 sm:$0xff]  }
  0x20   :  { %1694 = vmatpush1.bf16.msra.mxu0 %v3037_v31  ;;  %1654 = vmatprep.subr.bf16.mxu1 %v3038_v32  ;;  %v3685_v3 = vpack.c.bf16 %v46_v62, %v46_v62  ;;  %v3080_v11 = vld [vmem:[%s4659_s1 + $0x1e4] ss:$16 sps:$4 sm:$0xff]   ;;  %v3084_v14 = vld [vmem:[%s4659_s1 + $0x1e0] ss:$16 sps:$4 sm:$0xff]   ;;  %v3103_v31 = vld [vmem:[%s4659_s1 + $0x48] ss:$16 sps:$4 sm:$0xff]  }
  0x21   :  { %1695 = vmatprep.subr.bf16.mxu0 %v3040_v33  ;;  %1670 = vmatprep.mubr.bf16.mxu1 %v73_v61  ;;  %v3082_v12 = vld [vmem:[%s4659_s1 + $0x3e4] ss:$16 sps:$4 sm:$0xff]   ;;  %v3085_v15 = vld [vmem:[%s4659_s1 + $0x3e0] ss:$16 sps:$4 sm:$0xff]   ;;  %v3111_v33 = vld [vmem:[%s4659_s1 + $0x6c] ss:$16 sps:$4 sm:$0xff]  }
  0x22   :  { %1711 = vmatprep.mubr.bf16.mxu0 %v3685_v3  ;;  %v3090_v16 = vld [vmem:[%s4659_s1 + $0x404] ss:$16 sps:$4 sm:$0xff]   ;;  %v3088_v21 = vld [vmem:[%s4659_s1 + $0x400] ss:$16 sps:$4 sm:$0xff]  }
  0x23   :  { %1655 = vmatpush1.bf16.msra.mxu1 %v3042_v34  ;;  %v3096_v23 = vld [vmem:[%s4659_s1 + $0x424] ss:$16 sps:$4 sm:$0xff]   ;;  %v3094_v26 = vld [vmem:[%s4659_s1 + $0x420] ss:$16 sps:$4 sm:$0xff]  }
  0x24   :  { %1696 = vmatpush1.bf16.msra.mxu0 %v3043_v35  ;;  %1656 = vmatprep.subr.bf16.mxu1 %v3044_v39  ;;  %v3102_v28 = vld [vmem:[%s4659_s1 + $0x444] ss:$16 sps:$4 sm:$0xff]   ;;  %v3100_v30 = vld [vmem:[%s4659_s1 + $0x440] ss:$16 sps:$4 sm:$0xff]   ;;  %v3109_v35 = vld [vmem:[%s4659_s1 + $0x68] ss:$16 sps:$4 sm:$0xff]  }
  0x25   :  { %1697 = vmatprep.subr.bf16.mxu0 %v3046_v40  ;;  %v3108_v32 = vld [vmem:[%s4659_s1 + $0x464] ss:$16 sps:$4 sm:$0xff]   ;;  %v3106_v34 = vld [vmem:[%s4659_s1 + $0x460] ss:$16 sps:$4 sm:$0xff]   ;;  %v3115_v39 = vld [vmem:[%s4659_s1 + $0x88] ss:$16 sps:$4 sm:$0xff]  }
  0x26   :  { %v3114_v36 = vld [vmem:[%s4659_s1 + $0x484] ss:$16 sps:$4 sm:$0xff]   ;;  %v3112_v38 = vld [vmem:[%s4659_s1 + $0x480] ss:$16 sps:$4 sm:$0xff]  }
  0x27   :  { %1657 = vmatpush1.bf16.msra.mxu1 %v3048_v41  ;;  %v3120_v40 = vld [vmem:[%s4659_s1 + $0x4a4] ss:$16 sps:$4 sm:$0xff]   ;;  %v3123_v41 = vld [vmem:[%s4659_s1 + $0xac] ss:$16 sps:$4 sm:$0xff]   ;;  %v3118_v42 = vld [vmem:[%s4659_s1 + $0x4a0] ss:$16 sps:$4 sm:$0xff]  }
  0x28   :  { %1698 = vmatpush1.bf16.msra.mxu0 %v3049_v44  ;;  %1658 = vmatprep.subr.bf16.mxu1 %v3050_v45  ;;  %v3121_v44 = vld [vmem:[%s4659_s1 + $0xa8] ss:$16 sps:$4 sm:$0xff]   ;;  %v3126_v45 = vld [vmem:[%s4659_s1 + $0x4c4] ss:$16 sps:$4 sm:$0xff]   ;;  %v3130_v52 = vld [vmem:[%s4659_s1 + $0x4e0] ss:$16 sps:$4 sm:$0xff]  }
  0x29   :  { %1699 = vmatprep.subr.bf16.mxu0 %v3052_v46  ;;  %v3129_v46 = vld [vmem:[%s4659_s1 + $0xcc] ss:$16 sps:$4 sm:$0xff]   ;;  %v3138_v54 = vld [vmem:[%s4659_s1 + $0x504] ss:$16 sps:$4 sm:$0xff]   ;;  %v3142_v60 = vld [vmem:[%s4659_s1 + $0x520] ss:$16 sps:$4 sm:$0xff]  }
  0x2a   :  { %v3150_v62 = vld [vmem:[%s4659_s1 + $0x544] ss:$16 sps:$4 sm:$0xff]  }
  0x2b   :  { %1659 = vmatpush1.bf16.msra.mxu1 %v3054_v47  ;;  %v3124_v47 = vld [vmem:[%s4659_s1 + $0x4c0] ss:$16 sps:$4 sm:$0xff]  }
  0x2c   :  { %1700 = vmatpush1.bf16.msra.mxu0 %v3055_v48  ;;  %1660 = vmatprep.subr.bf16.mxu1 %v3056_v50  ;;  %v3127_v48 = vld [vmem:[%s4659_s1 + $0xc8] ss:$16 sps:$4 sm:$0xff]   ;;  %v3132_v50 = vld [vmem:[%s4659_s1 + $0x4e4] ss:$16 sps:$4 sm:$0xff]  }
  0x2d   :  { %1701 = vmatprep.subr.bf16.mxu0 %v3058_v51  ;;  %v3135_v51 = vld [vmem:[%s4659_s1 + $0xec] ss:$16 sps:$4 sm:$0xff]  }
  0x2f   :  { %1661 = vmatpush1.bf16.msra.mxu1 %v3060_v55  ;;  %v3141_v55 = vld [vmem:[%s4659_s1 + $0x10c] ss:$16 sps:$4 sm:$0xff]  }
  0x30   :  { %1702 = vmatpush1.bf16.msra.mxu0 %v3061_v56  ;;  %1662 = vmatprep.subr.bf16.mxu1 %v3062_v57  ;;  %v3136_v56 = vld [vmem:[%s4659_s1 + $0x500] ss:$16 sps:$4 sm:$0xff]   ;;  %v3139_v57 = vld [vmem:[%s4659_s1 + $0x108] ss:$16 sps:$4 sm:$0xff]  }
  0x31   :  { %1703 = vmatprep.subr.bf16.mxu0 %v3064_v58  ;;  %v3144_v58 = vld [vmem:[%s4659_s1 + $0x524] ss:$16 sps:$4 sm:$0xff]  }
  0x33   :  { %1663 = vmatpush1.bf16.msra.mxu1 %v3066_v63  ;;  %v3153_v63 = vld [vmem:[%s4659_s1 + $0x14c] ss:$16 sps:$4 sm:$0xff]  }
  0x34   :  { %1704 = vmatpush1.bf16.msra.mxu0 %v3067_v0  ;;  %1664 = vmatprep.subr.bf16.mxu1 %v3068_v1  ;;  %v3148_v0 = vld [vmem:[%s4659_s1 + $0x540] ss:$16 sps:$4 sm:$0xff]   ;;  %v3151_v1 = vld [vmem:[%s4659_s1 + $0x148] ss:$16 sps:$4 sm:$0xff]  }
  0x35   :  { %1705 = vmatprep.subr.bf16.mxu0 %v3070_v2  ;;  %v3156_v2 = vld [vmem:[%s4659_s1 + $0x564] ss:$16 sps:$4 sm:$0xff]  }
  0x37   :  { %1665 = vmatpush1.bf16.msra.mxu1 %v3072_v4  ;;  %v3159_v4 = vld [vmem:[%s4659_s1 + $0x16c] ss:$16 sps:$4 sm:$0xff]  }
  0x38   :  { %1706 = vmatpush1.bf16.msra.mxu0 %v3073_v5  ;;  %1666 = vmatprep.subr.bf16.mxu1 %v3074_v6  ;;  %v3154_v5 = vld [vmem:[%s4659_s1 + $0x560] ss:$16 sps:$4 sm:$0xff]   ;;  %v3157_v6 = vld [vmem:[%s4659_s1 + $0x168] ss:$16 sps:$4 sm:$0xff]  }
  0x39   :  { %1707 = vmatprep.subr.bf16.mxu0 %v3076_v7  ;;  %v3162_v7 = vld [vmem:[%s4659_s1 + $0x584] ss:$16 sps:$4 sm:$0xff]  }
  0x3b   :  { %1667 = vmatpush1.bf16.msra.mxu1 %v3078_v9  ;;  %v3165_v9 = vld [vmem:[%s4659_s1 + $0x18c] ss:$16 sps:$4 sm:$0xff]  }
  0x3c   :  { %1708 = vmatpush1.bf16.msra.mxu0 %v3079_v10  ;;  %1668 = vmatprep.subr.bf16.mxu1 %v3080_v11  ;;  %v3160_v10 = vld [vmem:[%s4659_s1 + $0x580] ss:$16 sps:$4 sm:$0xff]   ;;  %v3163_v11 = vld [vmem:[%s4659_s1 + $0x188] ss:$16 sps:$4 sm:$0xff]  }
  0x3d   :  { %1709 = vmatprep.subr.bf16.mxu0 %v3082_v12  ;;  %v3168_v12 = vld [vmem:[%s4659_s1 + $0x5a4] ss:$16 sps:$4 sm:$0xff]  }
  0x3f   :  { %1669 = vmatpush1.bf16.msra.mxu1 %v3084_v14  ;;  %v3171_v14 = vld [vmem:[%s4659_s1 + $0x1ac] ss:$16 sps:$4 sm:$0xff]  }
  0x40   :  { %1710 = vmatpush1.bf16.msra.mxu0 %v3085_v15  ;;  %1802 = vmatprep.subr.bf16.mxu1 %v3093_v17  ;;  %v3166_v15 = vld [vmem:[%s4659_s1 + $0x5a0] ss:$16 sps:$4 sm:$0xff]   ;;  %v3174_v17 = vld [vmem:[%s4659_s1 + $0x5c4] ss:$16 sps:$4 sm:$0xff]  }
  0x41   :  { %1720 = vmatprep.subr.bf16.mxu0 %v3090_v16  ;;  %v3169_v16 = vld [vmem:[%s4659_s1 + $0x1a8] ss:$16 sps:$4 sm:$0xff]  }
  0x42   :  { %1671 = vmatmul.mubr.bf16.vlgmr.msra.gmra.mrb[0].mxu1 %v3735_v19 }
  0x43   :  { %1712 = vmatmul.mubr.bf16.vlgmr.msra.gmra.mrb[0].mxu0 %v3737_v20  ;;  %1803 = vmatpush1.bf16.msra.mxu1 %v3091_v22  ;;  %v3172_v22 = vld [vmem:[%s4659_s1 + $0x5c0] ss:$16 sps:$4 sm:$0xff]  }
  0x44   :  { %1721 = vmatpush1.bf16.msra.mxu0 %v3088_v21  ;;  %1804 = vmatprep.subr.bf16.mxu1 %v3099_v24  ;;  %v47_v21 = vcombine.high %v3703_v8, %v3703_v8  ;;  %v3180_v24 = vld [vmem:[%s4659_s1 + $0x5e4] ss:$16 sps:$4 sm:$0xff]   ;;  %v3183_v8 = vld [vmem:[%s4659_s1 + $0x1ec] ss:$16 sps:$4 sm:$0xff]  }
  0x45   :  { %1722 = vmatprep.subr.bf16.mxu0 %v3096_v23  ;;  %1752 = vmatprep.mubr.bf16.mxu0 %v3751_v25  ;;  %v3175_v23 = vld [vmem:[%s4659_s1 + $0x1c8] ss:$16 sps:$4 sm:$0xff]  }
  0x46   :  { %1834 = vmatprep.mubr.bf16.mxu1 %v73_v61  ;;  %v3145_v61 = vld [vmem:[%s4659_s1 + $0x128] ss:$16 sps:$4 sm:$0xff]  }
  0x47   :  { %1805 = vmatpush1.bf16.msra.mxu1 %v3097_v27  ;;  %v3178_v27 = vld [vmem:[%s4659_s1 + $0x5e0] ss:$16 sps:$4 sm:$0xff]  }
  0x48   :  { %1723 = vmatpush1.bf16.msra.mxu0 %v3094_v26  ;;  %1806 = vmatprep.subr.bf16.mxu1 %v3105_v29  ;;  %v3927_v26 = vrot.slane %v47_v21, %v3648_v49  ;;  %v3186_v29 = vld [vmem:[%s4659_s1 + $0x604] ss:$16 sps:$4 sm:$0xff]   ;;  %v3189_v49 = vld [vmem:[%s4659_s1 + $0x20c] ss:$16 sps:$4 sm:$0xff]   ;;  %v3256_v21 = vld [vmem:[%s4659_s1 + $0x780] ss:$16 sps:$4 sm:$0xff]  }
  0x49   :  { %1724 = vmatprep.subr.bf16.mxu0 %v3102_v28  ;;  %v3181_v28 = vld [vmem:[%s4659_s1 + $0x1e8] ss:$16 sps:$4 sm:$0xff]  }
  0x4b   :  { %1807 = vmatpush1.bf16.msra.mxu1 %v3103_v31  ;;  %v3945_v31 = vpack.c.bf16 %v3719_v13, %v3719_v13  ;;  %v3195_v13 = vld [vmem:[%s4659_s1 + $0x22c] ss:$16 sps:$4 sm:$0xff]  }
  0x4c   :  { %1725 = vmatpush1.bf16.msra.mxu0 %v3100_v30  ;;  %1808 = vmatprep.subr.bf16.mxu1 %v3111_v33  ;;  %v63_v30 = vcombine.high %v3927_v26, %v3927_v26  ;;  %v3187_v33 = vld [vmem:[%s4659_s1 + $0x208] ss:$16 sps:$4 sm:$0xff]  }
  0x4d   :  { %1726 = vmatprep.subr.bf16.mxu0 %v3108_v32  ;;  %v3184_v32 = vld [vmem:[%s4659_s1 + $0x600] ss:$16 sps:$4 sm:$0xff]  }
  0x4f   :  { %1809 = vmatpush1.bf16.msra.mxu1 %v3109_v35  ;;  %v3959_v35 = vpack.c.bf16 %v63_v30, %v63_v30  ;;  %v3271_v30 = vld [vmem:[%s4659_s1 + $0x3c8] ss:$16 sps:$4 sm:$0xff]  }
  0x50   :  { %1727 = vmatpush1.bf16.msra.mxu0 %v3106_v34  ;;  %1810 = vmatprep.subr.bf16.mxu1 %v3117_v37  ;;  %v3192_v34 = vld [vmem:[%s4659_s1 + $0x624] ss:$16 sps:$4 sm:$0xff]   ;;  %v3193_v37 = vld [vmem:[%s4659_s1 + $0x228] ss:$16 sps:$4 sm:$0xff]  }
  0x51   :  { %1728 = vmatprep.subr.bf16.mxu0 %v3114_v36  ;;  %v3190_v36 = vld [vmem:[%s4659_s1 + $0x620] ss:$16 sps:$4 sm:$0xff]  }
  0x53   :  { %1811 = vmatpush1.bf16.msra.mxu1 %v3115_v39  ;;  %v3196_v39 = vld [vmem:[%s4659_s1 + $0x640] ss:$16 sps:$4 sm:$0xff]  }
  0x54   :  { %1729 = vmatpush1.bf16.msra.mxu0 %v3112_v38  ;;  %1812 = vmatprep.subr.bf16.mxu1 %v3123_v41  ;;  %v3198_v38 = vld [vmem:[%s4659_s1 + $0x644] ss:$16 sps:$4 sm:$0xff]  }
  0x55   :  { %1730 = vmatprep.subr.bf16.mxu0 %v3120_v40  ;;  %v3199_v40 = vld [vmem:[%s4659_s1 + $0x248] ss:$16 sps:$4 sm:$0xff]   ;;  %v3204_v41 = vld [vmem:[%s4659_s1 + $0x664] ss:$16 sps:$4 sm:$0xff]  }
  0x57   :  { %1813 = vmatpush1.bf16.msra.mxu1 %v3121_v44  ;;  %v3205_v44 = vld [vmem:[%s4659_s1 + $0x268] ss:$16 sps:$4 sm:$0xff]  }
  0x58   :  { %1731 = vmatpush1.bf16.msra.mxu0 %v3118_v42  ;;  %1814 = vmatprep.subr.bf16.mxu1 %v3129_v46  ;;  %v3202_v42 = vld [vmem:[%s4659_s1 + $0x660] ss:$16 sps:$4 sm:$0xff]   ;;  %v3213_v46 = vld [vmem:[%s4659_s1 + $0x28c] ss:$16 sps:$4 sm:$0xff]  }
  0x59   :  { %1732 = vmatprep.subr.bf16.mxu0 %v3126_v45  ;;  %v3210_v45 = vld [vmem:[%s4659_s1 + $0x684] ss:$16 sps:$4 sm:$0xff]  }
  0x5b   :  { %1815 = vmatpush1.bf16.msra.mxu1 %v3127_v48  ;;  %v3211_v48 = vld [vmem:[%s4659_s1 + $0x288] ss:$16 sps:$4 sm:$0xff]  }
  0x5c   :  { %1733 = vmatpush1.bf16.msra.mxu0 %v3124_v47  ;;  %1816 = vmatprep.subr.bf16.mxu1 %v3135_v51  ;;  %v3208_v47 = vld [vmem:[%s4659_s1 + $0x680] ss:$16 sps:$4 sm:$0xff]   ;;  %v3219_v51 = vld [vmem:[%s4659_s1 + $0x2ac] ss:$16 sps:$4 sm:$0xff]  }
  0x5d   :  { %1734 = vmatprep.subr.bf16.mxu0 %v3132_v50  ;;  %v3216_v50 = vld [vmem:[%s4659_s1 + $0x6a4] ss:$16 sps:$4 sm:$0xff]  }
  0x5f   :  { %1817 = vmatpush1.bf16.msra.mxu1 %v3133_v53  ;;  %v3217_v53 = vld [vmem:[%s4659_s1 + $0x2a8] ss:$16 sps:$4 sm:$0xff]  }
  0x60   :  { %1735 = vmatpush1.bf16.msra.mxu0 %v3130_v52  ;;  %1818 = vmatprep.subr.bf16.mxu1 %v3141_v55  ;;  %v3214_v52 = vld [vmem:[%s4659_s1 + $0x6a0] ss:$16 sps:$4 sm:$0xff]   ;;  %v3225_v55 = vld [vmem:[%s4659_s1 + $0x2cc] ss:$16 sps:$4 sm:$0xff]  }
  0x61   :  { %1736 = vmatprep.subr.bf16.mxu0 %v3138_v54  ;;  %v3222_v54 = vld [vmem:[%s4659_s1 + $0x6c4] ss:$16 sps:$4 sm:$0xff]  }
  0x63   :  { %1819 = vmatpush1.bf16.msra.mxu1 %v3139_v57  ;;  %v3223_v57 = vld [vmem:[%s4659_s1 + $0x2c8] ss:$16 sps:$4 sm:$0xff]  }
  0x64   :  { %1737 = vmatpush1.bf16.msra.mxu0 %v3136_v56  ;;  %1820 = vmatprep.subr.bf16.mxu1 %v3147_v59  ;;  %v3220_v56 = vld [vmem:[%s4659_s1 + $0x6c0] ss:$16 sps:$4 sm:$0xff]   ;;  %v3231_v59 = vld [vmem:[%s4659_s1 + $0x2ec] ss:$16 sps:$4 sm:$0xff]  }
  0x65   :  { %1738 = vmatprep.subr.bf16.mxu0 %v3144_v58  ;;  %v3228_v58 = vld [vmem:[%s4659_s1 + $0x6e4] ss:$16 sps:$4 sm:$0xff]  }
  0x67   :  { %1821 = vmatpush1.bf16.msra.mxu1 %v3145_v61  ;;  %v3229_v61 = vld [vmem:[%s4659_s1 + $0x2e8] ss:$16 sps:$4 sm:$0xff]  }
  0x68   :  { %1739 = vmatpush1.bf16.msra.mxu0 %v3142_v60  ;;  %1822 = vmatprep.subr.bf16.mxu1 %v3153_v63  ;;  %v3226_v60 = vld [vmem:[%s4659_s1 + $0x6e0] ss:$16 sps:$4 sm:$0xff]   ;;  %v3237_v63 = vld [vmem:[%s4659_s1 + $0x30c] ss:$16 sps:$4 sm:$0xff]  }
  0x69   :  { %1740 = vmatprep.subr.bf16.mxu0 %v3150_v62  ;;  %v3234_v62 = vld [vmem:[%s4659_s1 + $0x704] ss:$16 sps:$4 sm:$0xff]  }
  0x6b   :  { %1823 = vmatpush1.bf16.msra.mxu1 %v3151_v1  ;;  %v3235_v1 = vld [vmem:[%s4659_s1 + $0x308] ss:$16 sps:$4 sm:$0xff]  }
  0x6c   :  { %1741 = vmatpush1.bf16.msra.mxu0 %v3148_v0  ;;  %1824 = vmatprep.subr.bf16.mxu1 %v3159_v4  ;;  %v3232_v0 = vld [vmem:[%s4659_s1 + $0x700] ss:$16 sps:$4 sm:$0xff]   ;;  %v3243_v4 = vld [vmem:[%s4659_s1 + $0x32c] ss:$16 sps:$4 sm:$0xff]  }
  0x6d   :  { %1742 = vmatprep.subr.bf16.mxu0 %v3156_v2  ;;  %v3240_v2 = vld [vmem:[%s4659_s1 + $0x724] ss:$16 sps:$4 sm:$0xff]  }
  0x6f   :  { %1825 = vmatpush1.bf16.msra.mxu1 %v3157_v6  ;;  %v3241_v6 = vld [vmem:[%s4659_s1 + $0x328] ss:$16 sps:$4 sm:$0xff]  }
  0x70   :  { %1743 = vmatpush1.bf16.msra.mxu0 %v3154_v5  ;;  %1826 = vmatprep.subr.bf16.mxu1 %v3165_v9  ;;  %v3238_v5 = vld [vmem:[%s4659_s1 + $0x720] ss:$16 sps:$4 sm:$0xff]   ;;  %v3249_v9 = vld [vmem:[%s4659_s1 + $0x34c] ss:$16 sps:$4 sm:$0xff]  }
  0x71   :  { %1744 = vmatprep.subr.bf16.mxu0 %v3162_v7  ;;  %v3246_v7 = vld [vmem:[%s4659_s1 + $0x744] ss:$16 sps:$4 sm:$0xff]  }
  0x73   :  { %1827 = vmatpush1.bf16.msra.mxu1 %v3163_v11  ;;  %v3247_v11 = vld [vmem:[%s4659_s1 + $0x348] ss:$16 sps:$4 sm:$0xff]  }
  0x74   :  { %1745 = vmatpush1.bf16.msra.mxu0 %v3160_v10  ;;  %1828 = vmatprep.subr.bf16.mxu1 %v3171_v14  ;;  %v3244_v10 = vld [vmem:[%s4659_s1 + $0x740] ss:$16 sps:$4 sm:$0xff]   ;;  %v3255_v14 = vld [vmem:[%s4659_s1 + $0x36c] ss:$16 sps:$4 sm:$0xff]  }
  0x75   :  { %1746 = vmatprep.subr.bf16.mxu0 %v3168_v12  ;;  %v3252_v12 = vld [vmem:[%s4659_s1 + $0x764] ss:$16 sps:$4 sm:$0xff]  }
  0x77   :  { %1829 = vmatpush1.bf16.msra.mxu1 %v3169_v16  ;;  %v3253_v16 = vld [vmem:[%s4659_s1 + $0x368] ss:$16 sps:$4 sm:$0xff]  }
  0x78   :  { %1747 = vmatpush1.bf16.msra.mxu0 %v3166_v15  ;;  %1830 = vmatprep.subr.bf16.mxu1 %v3177_v18  ;;  %v3250_v15 = vld [vmem:[%s4659_s1 + $0x760] ss:$16 sps:$4 sm:$0xff]   ;;  %v3261_v18 = vld [vmem:[%s4659_s1 + $0x38c] ss:$16 sps:$4 sm:$0xff]  }
  0x79   :  { %1748 = vmatprep.subr.bf16.mxu0 %v3174_v17  ;;  %v3258_v17 = vld [vmem:[%s4659_s1 + $0x784] ss:$16 sps:$4 sm:$0xff]  }
  0x7b   :  { %1831 = vmatpush1.bf16.msra.mxu1 %v3175_v23  ;;  %v3264_v23 = vld [vmem:[%s4659_s1 + $0x7a4] ss:$16 sps:$4 sm:$0xff]  }
  0x7c   :  { %1749 = vmatpush1.bf16.msra.mxu0 %v3172_v22  ;;  %1832 = vmatprep.subr.bf16.mxu1 %v3183_v8  ;;  %v3259_v22 = vld [vmem:[%s4659_s1 + $0x388] ss:$16 sps:$4 sm:$0xff]   ;;  %v3262_v8 = vld [vmem:[%s4659_s1 + $0x7a0] ss:$16 sps:$4 sm:$0xff]  }
  0x7d   :  { %1750 = vmatprep.subr.bf16.mxu0 %v3180_v24  ;;  %v3267_v24 = vld [vmem:[%s4659_s1 + $0x3ac] ss:$16 sps:$4 sm:$0xff]  }
  0x7f   :  { %1833 = vmatpush1.bf16.msra.mxu1 %v3181_v28  ;;  %v3270_v28 = vld [vmem:[%s4659_s1 + $0x7c4] ss:$16 sps:$4 sm:$0xff]  }
  0x80   :  { %1751 = vmatpush1.bf16.msra.mxu0 %v3178_v27  ;;  %1843 = vmatprep.subr.bf16.mxu1 %v3189_v49  ;;  %v3265_v27 = vld [vmem:[%s4659_s1 + $0x3a8] ss:$16 sps:$4 sm:$0xff]   ;;  %v3268_v49 = vld [vmem:[%s4659_s1 + $0x7c0] ss:$16 sps:$4 sm:$0xff]  }
  0x81   :  { %1761 = vmatprep.subr.bf16.mxu0 %v3186_v29  ;;  %v3273_v29 = vld [vmem:[%s4659_s1 + $0x3cc] ss:$16 sps:$4 sm:$0xff]  }
  0x82   :  { %1835 = vmatmul.mubr.bf16.vlgmr.msra.gmra.mrb[4].mxu1 %v3735_v19  ;;  %v3201_v19 = vld [vmem:[%s4659_s1 + $0x24c] ss:$16 sps:$4 sm:$0xff]  }
  0x83   :  { %1753 = vmatmul.mubr.bf16.vlgmr.msra.gmra.mrb[0].mxu0 %v3945_v31  ;;  %1844 = vmatpush1.bf16.msra.mxu1 %v3187_v33  ;;  %v3279_v33 = vld [vmem:[%s4659_s1 + $0x3ec] ss:$16 sps:$4 sm:$0xff]  }
  0x84   :  { %1762 = vmatpush1.bf16.msra.mxu0 %v3184_v32  ;;  %1845 = vmatprep.subr.bf16.mxu1 %v3195_v13  ;;  %v3276_v32 = vld [vmem:[%s4659_s1 + $0x7e4] ss:$16 sps:$4 sm:$0xff]   ;;  %v3277_v13 = vld [vmem:[%s4659_s1 + $0x3e8] ss:$16 sps:$4 sm:$0xff]  }
  0x85   :  { %1763 = vmatprep.subr.bf16.mxu0 %v3192_v34  ;;  %1793 = vmatprep.mubr.bf16.mxu0 %v3959_v35  ;;  %v3274_v34 = vld [vmem:[%s4659_s1 + $0x7e0] ss:$16 sps:$4 sm:$0xff]  }
  0x86   :  { %1875 = vmatprep.mubr.bf16.mxu1 %v3685_v3  ;;  %v3207_v3 = vld [vmem:[%s4659_s1 + $0x26c] ss:$16 sps:$4 sm:$0xff]  }
  0x87   :  { %1846 = vmatpush1.bf16.msra.mxu1 %v3193_v37  ;;  %v4144_v37 = vpack.c.bf16 %v3927_v26, %v3927_v26  ;;  %v3283_v26 = vld [vmem:[%s4659_s1 + $0x428] ss:$16 sps:$4 sm:$0xff]  }
  0x88   :  { %1764 = vmatpush1.bf16.msra.mxu0 %v3190_v36  ;;  %1847 = vmatprep.subr.bf16.mxu1 %v3201_v19  ;;  %v3282_v36 = vld [vmem:[%s4659_s1 + $0x40c] ss:$16 sps:$4 sm:$0xff]  }
  0x89   :  { %1765 = vmatprep.subr.bf16.mxu0 %v3198_v38  ;;  %v3280_v38 = vld [vmem:[%s4659_s1 + $0x408] ss:$16 sps:$4 sm:$0xff]   ;;  %v3285_v19 = vld [vmem:[%s4659_s1 + $0x42c] ss:$16 sps:$4 sm:$0xff]  }
  0x8b   :  { %1848 = vmatpush1.bf16.msra.mxu1 %v3199_v40  ;;  %v3376_v40 = vld [vmem:[%s4661_s3] ss:$8 sps:$4 sm:$0xff]  }
  0x8c   :  { %1766 = vmatpush1.bf16.msra.mxu0 %v3196_v39  ;;  %1849 = vmatprep.subr.bf16.mxu1 %v3207_v3  ;;  %v3288_v39 = vld [vmem:[%s4659_s1 + $0x44c] ss:$16 sps:$4 sm:$0xff]   ;;  %v3286_v3 = vld [vmem:[%s4659_s1 + $0x448] ss:$16 sps:$4 sm:$0xff]  }
  0x8d   :  { %1767 = vmatprep.subr.bf16.mxu0 %v3204_v41  ;;  %v3381_v41 = vld [vmem:[%s4661_s3 + $0x14] ss:$8 sps:$4 sm:$0xff]  }
  0x8f   :  { %1850 = vmatpush1.bf16.msra.mxu1 %v3205_v44  ;;  %v3384_v44 = vld [vmem:[%s4661_s3 + $0x24] ss:$8 sps:$4 sm:$0xff]  }
  0x90   :  { %1768 = vmatpush1.bf16.msra.mxu0 %v3202_v42  ;;  %1851 = vmatprep.subr.bf16.mxu1 %v3213_v46  ;;  %v3379_v42 = vld [vmem:[%s4661_s3 + $0x10] ss:$8 sps:$4 sm:$0xff]   ;;  %v3294_v46 = vld [vmem:[%s4659_s1 + $0x48c] ss:$16 sps:$4 sm:$0xff]  }
  0x91   :  { %1769 = vmatprep.subr.bf16.mxu0 %v3210_v45  ;;  %v3289_v45 = vld [vmem:[%s4659_s1 + $0x468] ss:$16 sps:$4 sm:$0xff]  }
  0x93   :  { %1852 = vmatpush1.bf16.msra.mxu1 %v3211_v48  ;;  %v3387_v48 = vld [vmem:[%s4661_s3 + $0x34] ss:$8 sps:$4 sm:$0xff]  }
  0x94   :  { %1770 = vmatpush1.bf16.msra.mxu0 %v3208_v47  ;;  %1853 = vmatprep.subr.bf16.mxu1 %v3219_v51  ;;  %v3382_v47 = vld [vmem:[%s4661_s3 + $0x20] ss:$8 sps:$4 sm:$0xff]   ;;  %v3297_v51 = vld [vmem:[%s4659_s1 + $0x4ac] ss:$16 sps:$4 sm:$0xff]  }
  0x95   :  { %1771 = vmatprep.subr.bf16.mxu0 %v3216_v50  ;;  %v3292_v50 = vld [vmem:[%s4659_s1 + $0x488] ss:$16 sps:$4 sm:$0xff]  }
  0x97   :  { %1854 = vmatpush1.bf16.msra.mxu1 %v3217_v53  ;;  %v3390_v53 = vld [vmem:[%s4661_s3 + $0x44] ss:$8 sps:$4 sm:$0xff]  }
  0x98   :  { %1772 = vmatpush1.bf16.msra.mxu0 %v3214_v52  ;;  %1855 = vmatprep.subr.bf16.mxu1 %v3225_v55  ;;  %v3385_v52 = vld [vmem:[%s4661_s3 + $0x30] ss:$8 sps:$4 sm:$0xff]   ;;  %v3300_v55 = vld [vmem:[%s4659_s1 + $0x4cc] ss:$16 sps:$4 sm:$0xff]  }
  0x99   :  { %1773 = vmatprep.subr.bf16.mxu0 %v3222_v54  ;;  %v3295_v54 = vld [vmem:[%s4659_s1 + $0x4a8] ss:$16 sps:$4 sm:$0xff]  }
  0x9b   :  { %1856 = vmatpush1.bf16.msra.mxu1 %v3223_v57  ;;  %v3393_v57 = vld [vmem:[%s4661_s3 + $0x54] ss:$8 sps:$4 sm:$0xff]  }
  0x9c   :  { %1774 = vmatpush1.bf16.msra.mxu0 %v3220_v56  ;;  %1857 = vmatprep.subr.bf16.mxu1 %v3231_v59  ;;  %v3388_v56 = vld [vmem:[%s4661_s3 + $0x40] ss:$8 sps:$4 sm:$0xff]   ;;  %v3391_v59 = vld [vmem:[%s4661_s3 + $0x50] ss:$8 sps:$4 sm:$0xff]  }
  0x9d   :  { %1775 = vmatprep.subr.bf16.mxu0 %v3228_v58  ;;  %v3298_v58 = vld [vmem:[%s4659_s1 + $0x4c8] ss:$16 sps:$4 sm:$0xff]  }
  0x9f   :  { %1858 = vmatpush1.bf16.msra.mxu1 %v3229_v61  ;;  %v3396_v61 = vld [vmem:[%s4661_s3 + $0x64] ss:$8 sps:$4 sm:$0xff]  }
  0xa0   :  { %1776 = vmatpush1.bf16.msra.mxu0 %v3226_v60  ;;  %1859 = vmatprep.subr.bf16.mxu1 %v3237_v63  ;;  %v3303_v60 = vld [vmem:[%s4659_s1 + $0x4ec] ss:$16 sps:$4 sm:$0xff]   ;;  %v3394_v63 = vld [vmem:[%s4661_s3 + $0x60] ss:$8 sps:$4 sm:$0xff]  }
  0xa1   :  { %1777 = vmatprep.subr.bf16.mxu0 %v3234_v62  ;;  %v3301_v62 = vld [vmem:[%s4659_s1 + $0x4e8] ss:$16 sps:$4 sm:$0xff]  }
  0xa3   :  { %1860 = vmatpush1.bf16.msra.mxu1 %v3235_v1  ;;  %v3399_v1 = vld [vmem:[%s4661_s3 + $0x74] ss:$8 sps:$4 sm:$0xff]  }
  0xa4   :  { %1778 = vmatpush1.bf16.msra.mxu0 %v3232_v0  ;;  %1861 = vmatprep.subr.bf16.mxu1 %v3243_v4  ;;  %v3306_v0 = vld [vmem:[%s4659_s1 + $0x50c] ss:$16 sps:$4 sm:$0xff]   ;;  %v3397_v4 = vld [vmem:[%s4661_s3 + $0x70] ss:$8 sps:$4 sm:$0xff]  }
  0xa5   :  { %1779 = vmatprep.subr.bf16.mxu0 %v3240_v2  ;;  %v3304_v2 = vld [vmem:[%s4659_s1 + $0x508] ss:$16 sps:$4 sm:$0xff]  }
  0xa7   :  { %1862 = vmatpush1.bf16.msra.mxu1 %v3241_v6  ;;  %v3402_v6 = vld [vmem:[%s4661_s3 + $0x84] ss:$8 sps:$4 sm:$0xff]  }
  0xa8   :  { %1780 = vmatpush1.bf16.msra.mxu0 %v3238_v5  ;;  %1863 = vmatprep.subr.bf16.mxu1 %v3249_v9  ;;  %v3309_v5 = vld [vmem:[%s4659_s1 + $0x52c] ss:$16 sps:$4 sm:$0xff]   ;;  %v3400_v9 = vld [vmem:[%s4661_s3 + $0x80] ss:$8 sps:$4 sm:$0xff]  }
  0xa9   :  { %1781 = vmatprep.subr.bf16.mxu0 %v3246_v7  ;;  %v3307_v7 = vld [vmem:[%s4659_s1 + $0x528] ss:$16 sps:$4 sm:$0xff]  }
  0xab   :  { %1864 = vmatpush1.bf16.msra.mxu1 %v3247_v11  ;;  %v3405_v11 = vld [vmem:[%s4661_s3 + $0x94] ss:$8 sps:$4 sm:$0xff]  }
  0xac   :  { %1782 = vmatpush1.bf16.msra.mxu0 %v3244_v10  ;;  %1865 = vmatprep.subr.bf16.mxu1 %v3255_v14  ;;  %v3312_v10 = vld [vmem:[%s4659_s1 + $0x54c] ss:$16 sps:$4 sm:$0xff]   ;;  %v3403_v14 = vld [vmem:[%s4661_s3 + $0x90] ss:$8 sps:$4 sm:$0xff]  }
  0xad   :  { %1783 = vmatprep.subr.bf16.mxu0 %v3252_v12  ;;  %v3310_v12 = vld [vmem:[%s4659_s1 + $0x548] ss:$16 sps:$4 sm:$0xff]  }
  0xaf   :  { %1866 = vmatpush1.bf16.msra.mxu1 %v3253_v16  ;;  %v3408_v16 = vld [vmem:[%s4661_s3 + $0xa4] ss:$8 sps:$4 sm:$0xff]  }
  0xb0   :  { %1784 = vmatpush1.bf16.msra.mxu0 %v3250_v15  ;;  %1867 = vmatprep.subr.bf16.mxu1 %v3261_v18  ;;  %v3315_v15 = vld [vmem:[%s4659_s1 + $0x56c] ss:$16 sps:$4 sm:$0xff]   ;;  %v3406_v18 = vld [vmem:[%s4661_s3 + $0xa0] ss:$8 sps:$4 sm:$0xff]  }
  0xb1   :  { %1785 = vmatprep.subr.bf16.mxu0 %v3258_v17  ;;  %v3313_v17 = vld [vmem:[%s4659_s1 + $0x568] ss:$16 sps:$4 sm:$0xff]  }
  0xb3   :  { %1868 = vmatpush1.bf16.msra.mxu1 %v3259_v22  ;;  %v3411_v22 = vld [vmem:[%s4661_s3 + $0xb4] ss:$8 sps:$4 sm:$0xff]  }
  0xb4   :  { %1786 = vmatpush1.bf16.msra.mxu0 %v3256_v21  ;;  %1869 = vmatprep.subr.bf16.mxu1 %v3267_v24  ;;  %v3318_v21 = vld [vmem:[%s4659_s1 + $0x58c] ss:$16 sps:$4 sm:$0xff]   ;;  %v3409_v24 = vld [vmem:[%s4661_s3 + $0xb0] ss:$8 sps:$4 sm:$0xff]  }
  0xb5   :  { %1787 = vmatprep.subr.bf16.mxu0 %v3264_v23  ;;  %v3316_v23 = vld [vmem:[%s4659_s1 + $0x588] ss:$16 sps:$4 sm:$0xff]  }
  0xb7   :  { %1870 = vmatpush1.bf16.msra.mxu1 %v3265_v27  ;;  %v3414_v27 = vld [vmem:[%s4661_s3 + $0xc4] ss:$8 sps:$4 sm:$0xff]  }
  0xb8   :  { %1788 = vmatpush1.bf16.msra.mxu0 %v3262_v8  ;;  %1871 = vmatprep.subr.bf16.mxu1 %v3273_v29  ;;  %v3321_v8 = vld [vmem:[%s4659_s1 + $0x5ac] ss:$16 sps:$4 sm:$0xff]   ;;  %v3412_v29 = vld [vmem:[%s4661_s3 + $0xc0] ss:$8 sps:$4 sm:$0xff]  }
  0xb9   :  { %1789 = vmatprep.subr.bf16.mxu0 %v3270_v28  ;;  %v3319_v28 = vld [vmem:[%s4659_s1 + $0x5a8] ss:$16 sps:$4 sm:$0xff]  }
  0xbb   :  { %1872 = vmatpush1.bf16.msra.mxu1 %v3271_v30  ;;  %v3417_v30 = vld [vmem:[%s4661_s3 + $0xd4] ss:$8 sps:$4 sm:$0xff]  }
  0xbc   :  { %1790 = vmatpush1.bf16.msra.mxu0 %v3268_v49  ;;  %1873 = vmatprep.subr.bf16.mxu1 %v3279_v33  ;;  %v3324_v49 = vld [vmem:[%s4659_s1 + $0x5cc] ss:$16 sps:$4 sm:$0xff]   ;;  %v3415_v33 = vld [vmem:[%s4661_s3 + $0xd0] ss:$8 sps:$4 sm:$0xff]  }
  0xbd   :  { %1791 = vmatprep.subr.bf16.mxu0 %v3276_v32  ;;  %v3322_v32 = vld [vmem:[%s4659_s1 + $0x5c8] ss:$16 sps:$4 sm:$0xff]  }
  0xbf   :  { %1874 = vmatpush1.bf16.msra.mxu1 %v3277_v13  ;;  %v3325_v13 = vld [vmem:[%s4659_s1 + $0x5e8] ss:$16 sps:$4 sm:$0xff]  }
  0xc0   :  { %1792 = vmatpush1.bf16.msra.mxu0 %v3274_v34  ;;  %1884 = vmatprep.subr.bf16.mxu1 %v3282_v36  ;;  %v3327_v34 = vld [vmem:[%s4659_s1 + $0x5ec] ss:$16 sps:$4 sm:$0xff]  }
  0xc1   :  { %v3330_v36 = vld [vmem:[%s4659_s1 + $0x60c] ss:$16 sps:$4 sm:$0xff]  }
  0xc2   :  { %1876 = vmatmul.mubr.bf16.vlgmr.msra.gmra.mrb[4].mxu1 %v3737_v20  ;;  %v3378_v20 = vld [vmem:[%s4661_s3 + $0x4] ss:$8 sps:$4 sm:$0xff]  }
  0xc3   :  { %1794 = vmatmul.mubr.bf16.vlgmr.msra.gmra.mrb[0].mxu0 %v4144_v37  ;;  %1885 = vmatpush1.bf16.msra.mxu1 %v3280_v38  ;;  %v3328_v38 = vld [vmem:[%s4659_s1 + $0x608] ss:$16 sps:$4 sm:$0xff]  }
  0xc4   :  { %1916 = vmatprep.mubr.bf16.mxu1 %v3751_v25  ;;  %1886 = vmatprep.subr.bf16.mxu1 %v3285_v19  ;;  %v3291_v25 = vld [vmem:[%s4659_s1 + $0x46c] ss:$16 sps:$4 sm:$0xff]  }
  0xc5   :  { %2370 = vmatprep.subr.bf16.mxu0 %v3378_v20  ;;  %v3333_v19 = vld [vmem:[%s4659_s1 + $0x62c] ss:$16 sps:$4 sm:$0xff]  }
  0xc6   :  { %2371 = vmatpush1.bf16.msra.mxu0 %v3376_v40  ;;  %v3334_v40 = vld [vmem:[%s4659_s1 + $0x648] ss:$16 sps:$4 sm:$0xff]   ;;  %v3342_v20 = vld [vmem:[%s4659_s1 + $0x68c] ss:$16 sps:$4 sm:$0xff]  }
  0xc7   :  { %1887 = vmatpush1.bf16.msra.mxu1 %v3283_v26  ;;  %2372 = vmatprep.subr.bf16.mxu0 %v3381_v41  ;;  %v3331_v26 = vld [vmem:[%s4659_s1 + $0x628] ss:$16 sps:$4 sm:$0xff]  }
  0xc8   :  { %1888 = vmatprep.subr.bf16.mxu1 %v3288_v39  ;;  %v3336_v39 = vld [vmem:[%s4659_s1 + $0x64c] ss:$16 sps:$4 sm:$0xff]   ;;  %v3340_v41 = vld [vmem:[%s4659_s1 + $0x688] ss:$16 sps:$4 sm:$0xff]  }
  0xca   :  { %2373 = vmatpush1.bf16.msra.mxu0 %v3379_v42  ;;  %v3348_v42 = vld [vmem:[%s4659_s1 + $0x6cc] ss:$16 sps:$4 sm:$0xff]  }
  0xcb   :  { %1889 = vmatpush1.bf16.msra.mxu1 %v3286_v3  ;;  %2374 = vmatprep.subr.bf16.mxu0 %v3384_v44  ;;  %v3345_v3 = vld [vmem:[%s4659_s1 + $0x6ac] ss:$16 sps:$4 sm:$0xff]  }
  0xcc   :  { %1890 = vmatprep.subr.bf16.mxu1 %v3291_v25  ;;  %v3343_v25 = vld [vmem:[%s4659_s1 + $0x6a8] ss:$16 sps:$4 sm:$0xff]   ;;  %v3420_v44 = vld [vmem:[%s4661_s3 + $0xe4] ss:$8 sps:$4 sm:$0xff]  }
  0xce   :  { %2375 = vmatpush1.bf16.msra.mxu0 %v3382_v47 }
  0xcf   :  { %1891 = vmatpush1.bf16.msra.mxu1 %v3289_v45  ;;  %2376 = vmatprep.subr.bf16.mxu0 %v3387_v48 }
  0xd0   :  { %1892 = vmatprep.subr.bf16.mxu1 %v3294_v46  ;;  %v3418_v46 = vld [vmem:[%s4661_s3 + $0xe0] ss:$8 sps:$4 sm:$0xff]  }
  0xd2   :  { %2377 = vmatpush1.bf16.msra.mxu0 %v3385_v52  ;;  %v3351_v52 = vld [vmem:[%s4659_s1 + $0x6ec] ss:$16 sps:$4 sm:$0xff]  }
  0xd3   :  { %1893 = vmatpush1.bf16.msra.mxu1 %v3292_v50  ;;  %2378 = vmatprep.subr.bf16.mxu0 %v3390_v53  ;;  %v3346_v50 = vld [vmem:[%s4659_s1 + $0x6c8] ss:$16 sps:$4 sm:$0xff]   ;;  %v3423_v53 = vld [vmem:[%s4661_s3 + $0xf4] ss:$8 sps:$4 sm:$0xff]  }
  0xd4   :  { %1894 = vmatprep.subr.bf16.mxu1 %v3297_v51 }
  0xd6   :  { %2379 = vmatpush1.bf16.msra.mxu0 %v3388_v56  ;;  %v3354_v56 = vld [vmem:[%s4659_s1 + $0x70c] ss:$16 sps:$4 sm:$0xff]  }
  0xd7   :  { %1895 = vmatpush1.bf16.msra.mxu1 %v3295_v54  ;;  %2380 = vmatprep.subr.bf16.mxu0 %v3393_v57  ;;  %v3421_v54 = vld [vmem:[%s4661_s3 + $0xf0] ss:$8 sps:$4 sm:$0xff]   ;;  %v3426_v57 = vld [vmem:[%s4661_s3 + $0x104] ss:$8 sps:$4 sm:$0xff]  }
  0xd8   :  { %1896 = vmatprep.subr.bf16.mxu1 %v3300_v55  ;;  %v3349_v55 = vld [vmem:[%s4659_s1 + $0x6e8] ss:$16 sps:$4 sm:$0xff]  }
  0xda   :  { %2381 = vmatpush1.bf16.msra.mxu0 %v3391_v59  ;;  %v3357_v59 = vld [vmem:[%s4659_s1 + $0x72c] ss:$16 sps:$4 sm:$0xff]  }
  0xdb   :  { %1897 = vmatpush1.bf16.msra.mxu1 %v3298_v58  ;;  %2382 = vmatprep.subr.bf16.mxu0 %v3396_v61  ;;  %v3352_v58 = vld [vmem:[%s4659_s1 + $0x708] ss:$16 sps:$4 sm:$0xff]   ;;  %v3360_v61 = vld [vmem:[%s4659_s1 + $0x74c] ss:$16 sps:$4 sm:$0xff]  }
  0xdc   :  { %1898 = vmatprep.subr.bf16.mxu1 %v3303_v60  ;;  %v3355_v60 = vld [vmem:[%s4659_s1 + $0x728] ss:$16 sps:$4 sm:$0xff]  }
  0xde   :  { %2383 = vmatpush1.bf16.msra.mxu0 %v3394_v63  ;;  %v3363_v63 = vld [vmem:[%s4659_s1 + $0x76c] ss:$16 sps:$4 sm:$0xff]  }
  0xdf   :  { %1899 = vmatpush1.bf16.msra.mxu1 %v3301_v62  ;;  %2384 = vmatprep.subr.bf16.mxu0 %v3399_v1  ;;  %v3358_v62 = vld [vmem:[%s4659_s1 + $0x748] ss:$16 sps:$4 sm:$0xff]   ;;  %v3366_v1 = vld [vmem:[%s4659_s1 + $0x78c] ss:$16 sps:$4 sm:$0xff]  }
  0xe0   :  { %1900 = vmatprep.subr.bf16.mxu1 %v3306_v0  ;;  %v3361_v0 = vld [vmem:[%s4659_s1 + $0x768] ss:$16 sps:$4 sm:$0xff]  }
  0xe2   :  { %2385 = vmatpush1.bf16.msra.mxu0 %v3397_v4  ;;  %v3369_v4 = vld [vmem:[%s4659_s1 + $0x7ac] ss:$16 sps:$4 sm:$0xff]  }
  0xe3   :  { %1901 = vmatpush1.bf16.msra.mxu1 %v3304_v2  ;;  %2386 = vmatprep.subr.bf16.mxu0 %v3402_v6  ;;  %v3364_v2 = vld [vmem:[%s4659_s1 + $0x788] ss:$16 sps:$4 sm:$0xff]   ;;  %v3372_v6 = vld [vmem:[%s4659_s1 + $0x7cc] ss:$16 sps:$4 sm:$0xff]  }
  0xe4   :  { %1902 = vmatprep.subr.bf16.mxu1 %v3309_v5  ;;  %v3367_v5 = vld [vmem:[%s4659_s1 + $0x7a8] ss:$16 sps:$4 sm:$0xff]  }
  0xe6   :  { %2387 = vmatpush1.bf16.msra.mxu0 %v3400_v9  ;;  %v3375_v9 = vld [vmem:[%s4659_s1 + $0x7ec] ss:$16 sps:$4 sm:$0xff]  }
  0xe7   :  { %1903 = vmatpush1.bf16.msra.mxu1 %v3307_v7  ;;  %2388 = vmatprep.subr.bf16.mxu0 %v3405_v11  ;;  %v3370_v7 = vld [vmem:[%s4659_s1 + $0x7c8] ss:$16 sps:$4 sm:$0xff]   ;;  %v340_v11 = vsub.s32 0, %v3630_v43 }
  0xe8   :  { %1904 = vmatprep.subr.bf16.mxu1 %v3312_v10  ;;  %v3373_v10 = vld [vmem:[%s4659_s1 + $0x7e8] ss:$16 sps:$4 sm:$0xff]  }
  0xea   :  { %2389 = vmatpush1.bf16.msra.mxu0 %v3403_v14  ;;  %v344_v14 = vsub.s32 1, %v3630_v43 }
  0xeb   :  { %1905 = vmatpush1.bf16.msra.mxu1 %v3310_v12  ;;  %2390 = vmatprep.subr.bf16.mxu0 %v3408_v16  ;;  %v4444_v12 = vld [vmem:[%s4662_s2] sm:$0xf] }
  0xec   :  { %1906 = vmatprep.subr.bf16.mxu1 %v3315_v15  ;;  %v341_v15 = vrot.slane %v4444_v12, %v340_v11  ;;  %v345_v16 = vrot.slane %v4444_v12, %v344_v14 }
  0xee   :  { %2391 = vmatpush1.bf16.msra.mxu0 %v3406_v18 }
  0xef   :  { %1907 = vmatpush1.bf16.msra.mxu1 %v3313_v17  ;;  %2392 = vmatprep.subr.bf16.mxu0 %v3411_v22 }
  0xf0   :  { %1908 = vmatprep.subr.bf16.mxu1 %v3318_v21 }
  0xf2   :  { %2393 = vmatpush1.bf16.msra.mxu0 %v3409_v24 }
  0xf3   :  { %1909 = vmatpush1.bf16.msra.mxu1 %v3316_v23  ;;  %2394 = vmatprep.subr.bf16.mxu0 %v3414_v27 }
  0xf4   :  { %1910 = vmatprep.subr.bf16.mxu1 %v3321_v8 }
  0xf6   :  { %2395 = vmatpush1.bf16.msra.mxu0 %v3412_v29 }
  0xf7   :  { %1911 = vmatpush1.bf16.msra.mxu1 %v3319_v28  ;;  %2396 = vmatprep.subr.bf16.mxu0 %v3417_v30 }
  0xf8   :  { %1912 = vmatprep.subr.bf16.mxu1 %v3324_v49  ;;  %v3424_v49 = vld [vmem:[%s4661_s3 + $0x100] ss:$8 sps:$4 sm:$0xff]  }
  0xfa   :  { %2397 = vmatpush1.bf16.msra.mxu0 %v3415_v33  ;;  %v3427_v33 = vld [vmem:[%s4661_s3 + $0x110] ss:$8 sps:$4 sm:$0xff]  }
  0xfb   :  { %1913 = vmatpush1.bf16.msra.mxu1 %v3322_v32  ;;  %2398 = vmatprep.subr.bf16.mxu0 %v3420_v44  ;;  %v3429_v32 = vld [vmem:[%s4661_s3 + $0x114] ss:$8 sps:$4 sm:$0xff]  }
  0xfc   :  { %1914 = vmatprep.subr.bf16.mxu1 %v3327_v34  ;;  %v3432_v34 = vld [vmem:[%s4661_s3 + $0x124] ss:$8 sps:$4 sm:$0xff]  }
  0xfe   :  { %2399 = vmatpush1.bf16.msra.mxu0 %v3418_v46 }
  0xff   :  { %1915 = vmatpush1.bf16.msra.mxu1 %v3325_v13  ;;  %2400 = vmatprep.subr.bf16.mxu0 %v3423_v53  ;;  %v2470_v13 = vld [vmem:[%s4663_s5 + $0x80] sm:$0xff] }
 0x100   :  { %1925 = vmatprep.subr.bf16.mxu1 %v3330_v36  ;;  %v2471_v36 = vld [vmem:[%s4663_s5 + $0x88] sm:$0xff] }
 0x102   :  { %1917 = vmatmul.mubr.bf16.vlgmr.msra.gmra.mrb[4].mxu1 %v3945_v31  ;;  %v3339_v31 = vld [vmem:[%s4659_s1 + $0x66c] ss:$16 sps:$4 sm:$0xff]   ;;  %2401 = vmatpush1.bf16.msra.mxu0 %v3421_v54 }
 0x103   :  { %1926 = vmatpush1.bf16.msra.mxu1 %v3328_v38  ;;  %1957 = vmatprep.mubr.bf16.mxu1 %v3959_v35  ;;  %v3337_v35 = vld [vmem:[%s4659_s1 + $0x668] ss:$16 sps:$4 sm:$0xff]   ;;  %v2454_v38 = vld [vmem:[%s4663_s5] sm:$0xff] }
 0x104   :  { %1927 = vmatprep.subr.bf16.mxu1 %v3333_v19  ;;  %2411 = vmatprep.subr.bf16.mxu0 %v3426_v57  ;;  %v2925_v19 = vpack.c.bf16 %v2471_v36, %v2470_v13  ;;  %v3438_v54 = vld [vmem:[%s4661_s3 + $0x144] ss:$8 sps:$4 sm:$0xff]   ;;  %v2461_v57 = vld [vmem:[%s4663_s5 + $0x38] sm:$0xff] }
 0x105   :  { %v3465_v13 = vld [vmem:[%s4661_s3 + $0x1d4] ss:$8 sps:$4 sm:$0xff]   ;;  %v3463_v36 = vld [vmem:[%s4661_s3 + $0x1d0] ss:$8 sps:$4 sm:$0xff]  }
 0x107   :  { %1928 = vmatpush1.bf16.msra.mxu1 %v3331_v26  ;;  %v2455_v26 = vld [vmem:[%s4663_s5 + $0x8] sm:$0xff] }
 0x108   :  { %1929 = vmatprep.subr.bf16.mxu1 %v3336_v39  ;;  %v2472_v39 = vld [vmem:[%s4663_s5 + $0x90] sm:$0xff] }
 0x10b   :  { %1930 = vmatpush1.bf16.msra.mxu1 %v3334_v40  ;;  %v2473_v40 = vld [vmem:[%s4663_s5 + $0x98] sm:$0xff] }
 0x10c   :  { %1931 = vmatprep.subr.bf16.mxu1 %v3339_v31  ;;  %v2927_v31 = vpack.c.bf16 %v2455_v26, %v2454_v38  ;;  %v3468_v38 = vld [vmem:[%s4661_s3 + $0x1e4] ss:$8 sps:$4 sm:$0xff]   ;;  %v3471_v26 = vld [vmem:[%s4661_s3 + $0x1f4] ss:$8 sps:$4 sm:$0xff]  }
 0x10f   :  { %1932 = vmatpush1.bf16.msra.mxu1 %v3337_v35  ;;  %v2929_v35 = vpack.c.bf16 %v2473_v40, %v2472_v39  ;;  %v3469_v39 = vld [vmem:[%s4661_s3 + $0x1f0] ss:$8 sps:$4 sm:$0xff]   ;;  %v348_v40 = vsub.s32 2, %v3630_v43 }
 0x110   :  { %1933 = vmatprep.subr.bf16.mxu1 %v3342_v20  ;;  %v2456_v20 = vld [vmem:[%s4663_s5 + $0x10] sm:$0xff] }
 0x113   :  { %1934 = vmatpush1.bf16.msra.mxu1 %v3340_v41  ;;  %v2457_v41 = vld [vmem:[%s4663_s5 + $0x18] sm:$0xff] }
 0x114   :  { %1935 = vmatprep.subr.bf16.mxu1 %v3345_v3  ;;  %v2474_v3 = vld [vmem:[%s4663_s5 + $0xa0] sm:$0xff]  ;;  %v2931_v44 = vpack.c.bf16 %v2457_v41, %v2456_v20 }
 0x115   :  { %v1672_v45 = vpop.f32.mrb[0].mxu1 }
 0x116   :  { %v1674_v47 = vpop.f32.mrb[1].mxu1  ;;  %v1673_v17 = vadd.f32 %v1672_v45, %v341_v15  ;;  %v3435_v45 = vld [vmem:[%s4661_s3 + $0x134] ss:$8 sps:$4 sm:$0xff]  }
 0x117   :  { %v1676_v48 = vpop.f32.mrb[2].mxu1  ;;  %1936 = vmatpush1.bf16.msra.mxu1 %v3343_v25  ;;  %v1675_v18 = vadd.f32 %v1674_v47, %v345_v16  ;;  %v2475_v25 = vld [vmem:[%s4663_s5 + $0xa8] sm:$0xff]  ;;  %v2458_v47 = vld [vmem:[%s4663_s5 + $0x20] sm:$0xff]  ;;  %v2465_v15 = vld [vmem:[%s4663_s5 + $0x58] sm:$0xff] }
 0x118   :  { %v1677_v51 = vpop.f32.mrb[3].mxu1  ;;  %1937 = vmatprep.subr.bf16.mxu1 %v3348_v42  ;;  %v3430_v42 = vld [vmem:[%s4661_s3 + $0x120] ss:$8 sps:$4 sm:$0xff]   ;;  %v2933_v46 = vpack.c.bf16 %v2475_v25, %v2474_v3 }
 0x119   :  { %v2459_v48 = vld [vmem:[%s4663_s5 + $0x28] sm:$0xff]  ;;  %v2477_v51 = vld [vmem:[%s4663_s5 + $0xb8] sm:$0xff]  ;;  %v2482_v16 = vld [vmem:[%s4663_s5 + $0xe0] sm:$0xff] }
 0x11a   :  { %v2935_v53 = vpack.c.bf16 %v2459_v48, %v2458_v47 }
 0x11b   :  { %1938 = vmatpush1.bf16.msra.mxu1 %v3346_v50  ;;  %v2476_v50 = vld [vmem:[%s4663_s5 + $0xb0] sm:$0xff] }
 0x11c   :  { %1939 = vmatprep.subr.bf16.mxu1 %v3351_v52  ;;  %v3433_v52 = vld [vmem:[%s4661_s3 + $0x130] ss:$8 sps:$4 sm:$0xff]  }
 0x11f   :  { %1940 = vmatpush1.bf16.msra.mxu1 %v3349_v55  ;;  %v2937_v55 = vpack.c.bf16 %v2477_v51, %v2476_v50  ;;  %v2466_v51 = vld [vmem:[%s4663_s5 + $0x60] sm:$0xff] }
 0x120   :  { %1941 = vmatprep.subr.bf16.mxu1 %v3354_v56  ;;  %v2460_v56 = vld [vmem:[%s4663_s5 + $0x30] sm:$0xff] }
 0x123   :  { %1942 = vmatpush1.bf16.msra.mxu1 %v3352_v58  ;;  %v2478_v58 = vld [vmem:[%s4663_s5 + $0xc0] sm:$0xff] }
 0x124   :  { %1943 = vmatprep.subr.bf16.mxu1 %v3357_v59  ;;  %v2479_v59 = vld [vmem:[%s4663_s5 + $0xc8] sm:$0xff] }
 0x127   :  { %1944 = vmatpush1.bf16.msra.mxu1 %v3355_v60  ;;  %v3436_v60 = vld [vmem:[%s4661_s3 + $0x140] ss:$8 sps:$4 sm:$0xff]  }
 0x128   :  { %1945 = vmatprep.subr.bf16.mxu1 %v3360_v61  ;;  %v2939_v61 = vpack.c.bf16 %v2461_v57, %v2460_v56  ;;  %v2468_v56 = vld [vmem:[%s4663_s5 + $0x70] sm:$0xff]  ;;  %v2469_v57 = vld [vmem:[%s4663_s5 + $0x78] sm:$0xff] }
 0x12b   :  { %1946 = vmatpush1.bf16.msra.mxu1 %v3358_v62  ;;  %v3441_v62 = vld [vmem:[%s4661_s3 + $0x154] ss:$8 sps:$4 sm:$0xff]  }
 0x12c   :  { %1947 = vmatprep.subr.bf16.mxu1 %v3363_v63  ;;  %v2941_v63 = vpack.c.bf16 %v2479_v59, %v2478_v58  ;;  %v2955_v58 = vpack.c.bf16 %v2469_v57, %v2468_v56  ;;  %v2038_v59 = vld [vmem:[%s4664_s4] sm:$0x3] }
 0x12f   :  { %1948 = vmatpush1.bf16.msra.mxu1 %v3361_v0  ;;  %v2462_v0 = vld [vmem:[%s4663_s5 + $0x40] sm:$0xff] }
 0x130   :  { %1949 = vmatprep.subr.bf16.mxu1 %v3366_v1  ;;  %v2463_v1 = vld [vmem:[%s4663_s5 + $0x48] sm:$0xff] }
 0x133   :  { %1950 = vmatpush1.bf16.msra.mxu1 %v3364_v2  ;;  %v2480_v2 = vld [vmem:[%s4663_s5 + $0xd0] sm:$0xff] }
 0x134   :  { %1951 = vmatprep.subr.bf16.mxu1 %v3369_v4  ;;  %v2481_v4 = vld [vmem:[%s4663_s5 + $0xd8] sm:$0xff] }
 0x137   :  { %1952 = vmatpush1.bf16.msra.mxu1 %v3367_v5  ;;  %v3439_v5 = vld [vmem:[%s4661_s3 + $0x150] ss:$8 sps:$4 sm:$0xff]  }
 0x138   :  { %1953 = vmatprep.subr.bf16.mxu1 %v3372_v6  ;;  %v2943_v6 = vpack.c.bf16 %v2463_v1, %v2462_v0 }
 0x13b   :  { %1954 = vmatpush1.bf16.msra.mxu1 %v3370_v7  ;;  %v3444_v7 = vld [vmem:[%s4661_s3 + $0x164] ss:$8 sps:$4 sm:$0xff]  }
 0x13c   :  { %1955 = vmatprep.subr.bf16.mxu1 %v3375_v9  ;;  %v2945_v9 = vpack.c.bf16 %v2481_v4, %v2480_v2 }
 0x13f   :  { %1956 = vmatpush1.bf16.msra.mxu1 %v3373_v10  ;;  %v2464_v10 = vld [vmem:[%s4663_s5 + $0x50] sm:$0xff] }
 0x140   :  { %2926 = vmatprep.subr.bf16.mxu1 %v2925_v19  ;;  %v3466_v19 = vld [vmem:[%s4661_s3 + $0x1e0] ss:$8 sps:$4 sm:$0xff]  }
 0x142   :  { %1958 = vmatmul.mubr.bf16.vlgmr.msra.gmra.mrb[4].mxu1 %v4144_v37 }
 0x143   :  { %2928 = vmatpush3.bf16.msra.mxu1 %v2927_v31  ;;  %v352_v31 = vsub.s32 3, %v3630_v43 }
 0x144   :  { %2930 = vmatprep.subr.bf16.mxu1 %v2929_v35  ;;  %v349_v35 = vrot.slane %v4444_v12, %v348_v40 }
 0x145   :  { %v353_v20 = vrot.slane %v4444_v12, %v352_v31  ;;  %v2467_v12 = vld [vmem:[%s4663_s5 + $0x68] sm:$0xff] }
 0x147   :  { %2932 = vmatpush3.bf16.msra.mxu1 %v2931_v44 }
 0x148   :  { %2934 = vmatprep.subr.bf16.mxu1 %v2933_v46 }
 0x14b   :  { %2936 = vmatpush3.bf16.msra.mxu1 %v2935_v53  ;;  %v2484_v53 = vld [vmem:[%s4663_s5 + $0xf0] sm:$0xff] }
 0x14c   :  { %2938 = vmatprep.subr.bf16.mxu1 %v2937_v55 }
 0x14f   :  { %2940 = vmatpush3.bf16.msra.mxu1 %v2939_v61  ;;  %v2047_v61 = vrot.slane %v2038_v59, %v344_v14 }
 0x150   :  { %2942 = vmatprep.subr.bf16.mxu1 %v2941_v63 }
 0x153   :  { %2944 = vmatpush3.bf16.msra.mxu1 %v2943_v6 }
 0x154   :  { %2946 = vmatprep.subr.bf16.mxu1 %v2945_v9  ;;  %v2889_v9 = vld [vmem:[%s4665_s6] ss:$0 sm:$0xff] }
 0x196   :  { %v1795_v37 = vpop.f32.mrb[0].mxu0 }
 0x197   :  { %v2958_v21 = vadd.f32 %v1795_v37, %v1673_v17  ;;  %v1797_v22 = vpop.f32.mrb[1].mxu0  ;;  %v2483_v17 = vld [vmem:[%s4663_s5 + $0xe8] sm:$0xff]  ;;  %v2947_v37 = vpack.c.bf16 %v2465_v15, %v2464_v10 }
 0x198   :  { %v2960_v23 = vadd.f32 %v1797_v22, %v1675_v18  ;;  %v1799_v24 = vpop.f32.mrb[2].mxu0  ;;  %v3442_v18 = vld [vmem:[%s4661_s3 + $0x160] ss:$8 sps:$4 sm:$0xff]   ;;  %v2949_v22 = vpack.c.bf16 %v2483_v17, %v2482_v16 }
 0x199   :  { %v1966_v8 = vmax.f32 %v2958_v21, 0.0  ;;  %v1800_v27 = vpop.f32.mrb[3].mxu0  ;;  %v3447_v21 = vld [vmem:[%s4661_s3 + $0x174] ss:$8 sps:$4 sm:$0xff]   ;;  %2948 = vmatpush3.bf16.msra.mxu1 %v2947_v37  ;;  %v3450_v24 = vld [vmem:[%s4661_s3 + $0x184] ss:$8 sps:$4 sm:$0xff]  }
 0x19a   :  { %v1967_v28 = vmax.f32 %v2960_v23, 0.0  ;;  %v3445_v23 = vld [vmem:[%s4661_s3 + $0x170] ss:$8 sps:$4 sm:$0xff]   ;;  %2950 = vmatprep.subr.bf16.mxu1 %v2949_v22  ;;  %v3453_v27 = vld [vmem:[%s4661_s3 + $0x194] ss:$8 sps:$4 sm:$0xff]  }
 0x19b   :  { %v1970_v30 = vpack.c.bf16 %v1966_v8, %v1966_v8  ;;  %v3448_v8 = vld [vmem:[%s4661_s3 + $0x180] ss:$8 sps:$4 sm:$0xff]  }
 0x19c   :  { %v1971_v29 = vpack.c.bf16 %v1967_v28, %v1967_v28  ;;  %v3451_v28 = vld [vmem:[%s4661_s3 + $0x190] ss:$8 sps:$4 sm:$0xff]  }
 0x19e   :  { %2402 = vmatprep.mubr.bf16.mxu0 %v1971_v29  ;;  %v3456_v29 = vld [vmem:[%s4661_s3 + $0x1a4] ss:$8 sps:$4 sm:$0xff]  }
 0x19f   :  { %2403 = vmatmul.mubr.bf16.vlgmr.msra.gmra.mrb[4].mxu0 %v1970_v30  ;;  %v3459_v30 = vld [vmem:[%s4661_s3 + $0x1b4] ss:$8 sps:$4 sm:$0xff]  }
 0x1a0   :  { %2412 = vmatpush1.bf16.msra.mxu0 %v3424_v49  ;;  %v3454_v49 = vld [vmem:[%s4661_s3 + $0x1a0] ss:$8 sps:$4 sm:$0xff]  }
 0x1a1   :  { %2413 = vmatprep.subr.bf16.mxu0 %v3429_v32  ;;  %v3457_v32 = vld [vmem:[%s4661_s3 + $0x1b0] ss:$8 sps:$4 sm:$0xff]  }
 0x1a4   :  { %2414 = vmatpush1.bf16.msra.mxu0 %v3427_v33  ;;  %v3462_v33 = vld [vmem:[%s4661_s3 + $0x1c4] ss:$8 sps:$4 sm:$0xff]  }
 0x1a5   :  { %2415 = vmatprep.subr.bf16.mxu0 %v3432_v34  ;;  %v3460_v34 = vld [vmem:[%s4661_s3 + $0x1c0] ss:$8 sps:$4 sm:$0xff]  }
 0x1a8   :  { %2416 = vmatpush1.bf16.msra.mxu0 %v3430_v42 }
 0x1a9   :  { %2417 = vmatprep.subr.bf16.mxu0 %v3435_v45 }
 0x1ac   :  { %2418 = vmatpush1.bf16.msra.mxu0 %v3433_v52  ;;  %v2951_v52 = vpack.c.bf16 %v2467_v12, %v2466_v51 }
 0x1ad   :  { %2419 = vmatprep.subr.bf16.mxu0 %v3438_v54  ;;  %v2485_v54 = vld [vmem:[%s4663_s5 + $0xf8] sm:$0xff] }
 0x1ae   :  { %2952 = vmatpush3.bf16.msra.mxu1 %v2951_v52  ;;  %v2953_v55 = vpack.c.bf16 %v2485_v54, %v2484_v53 }
 0x1b0   :  { %2420 = vmatpush1.bf16.msra.mxu0 %v3436_v60  ;;  %2954 = vmatprep.subr.bf16.mxu1 %v2953_v55  ;;  %v2043_v60 = vrot.slane %v2038_v59, %v340_v11 }
 0x1b1   :  { %2421 = vmatprep.subr.bf16.mxu0 %v3441_v62 }
 0x1b2   :  { %2956 = vmatpush3.bf16.msra.mxu1 %v2955_v58 }
 0x1b4   :  { %2422 = vmatpush1.bf16.msra.mxu0 %v3439_v5 }
 0x1b5   :  { %2423 = vmatprep.subr.bf16.mxu0 %v3444_v7 }
 0x1b8   :  { %2424 = vmatpush1.bf16.msra.mxu0 %v3442_v18 }
 0x1b9   :  { %2425 = vmatprep.subr.bf16.mxu0 %v3447_v21 }
 0x1bc   :  { %2426 = vmatpush1.bf16.msra.mxu0 %v3445_v23 }
 0x1bd   :  { %2427 = vmatprep.subr.bf16.mxu0 %v3450_v24 }
 0x1c0   :  { %2428 = vmatpush1.bf16.msra.mxu0 %v3448_v8 }
 0x1c1   :  { %2429 = vmatprep.subr.bf16.mxu0 %v3453_v27 }
 0x1c4   :  { %2430 = vmatpush1.bf16.msra.mxu0 %v3451_v28 }
 0x1c5   :  { %2431 = vmatprep.subr.bf16.mxu0 %v3456_v29 }
 0x1c8   :  { %2432 = vmatpush1.bf16.msra.mxu0 %v3454_v49 }
 0x1c9   :  { %2433 = vmatprep.subr.bf16.mxu0 %v3459_v30 }
 0x1cc   :  { %2434 = vmatpush1.bf16.msra.mxu0 %v3457_v32 }
 0x1cd   :  { %2435 = vmatprep.subr.bf16.mxu0 %v3462_v33 }
 0x1d0   :  { %2436 = vmatpush1.bf16.msra.mxu0 %v3460_v34 }
 0x1d1   :  { %2437 = vmatprep.subr.bf16.mxu0 %v3465_v13 }
 0x1d4   :  { %2438 = vmatpush1.bf16.msra.mxu0 %v3463_v36 }
 0x1d5   :  { %2439 = vmatprep.subr.bf16.mxu0 %v3468_v38 }
 0x1d8   :  { %2440 = vmatpush1.bf16.msra.mxu0 %v3466_v19 }
 0x1d9   :  { %2441 = vmatprep.subr.bf16.mxu0 %v3471_v26 }
 0x1dc   :  { %2442 = vmatpush1.bf16.msra.mxu0 %v3469_v39 }
 0x215   :  { %v1959_v41 = vpop.f32.mrb[4].mxu1 }
 0x216   :  { %v2961_v3 = vadd.f32 %v1959_v41, %v349_v35  ;;  %v1961_v25 = vpop.f32.mrb[5].mxu1 }
 0x217   :  { %v2962_v42 = vadd.f32 %v1961_v25, %v353_v20  ;;  %v1963_v44 = vpop.f32.mrb[6].mxu1 }
 0x218   :  { %v1968_v45 = vmax.f32 %v2961_v3, 0.0  ;;  %v1964_v46 = vpop.f32.mrb[7].mxu1 }
 0x219   :  { %v1969_v47 = vmax.f32 %v2962_v42, 0.0 }
 0x21a   :  { %v1972_v50 = vpack.c.bf16 %v1968_v45, %v1968_v45 }
 0x21b   :  { %v1973_v48 = vpack.c.bf16 %v1969_v47, %v1969_v47 }
 0x21d   :  { %2443 = vmatprep.mubr.bf16.mxu0 %v1973_v48 }
 0x21e   :  { %2444 = vmatmul.mubr.bf16.vlgmr.msra.gmra.mrb[4].mxu0 %v1972_v50 }
 0x2f1   :  { %v2445_v62 = vpop.f32.mrb[4].mxu0 }
 0x2f2   :  { %v2963_v63 = vadd.f32 %v2445_v62, %v2043_v60  ;;  %v2447_v0 = vpop.f32.mrb[5].mxu0 }
 0x2f3   :  { %v2964_v1 = vadd.f32 %v2447_v0, %v2047_v61  ;;  %v2449_v2 = vpop.f32.mrb[6].mxu0 }
 0x2f4   :  { %v2450_v4 = vpop.f32.mrb[7].mxu0  ;;  %v2452_v6 = vmax.f32 %v2963_v63, 0.0 }
 0x2f5   :  { %v2453_v5 = vmax.f32 %v2964_v1, 0.0 }
 0x2f7   :  { %2557 = vmatprep.mubr.f32.mxu1 %v2453_v5 }
 0x2f8   :  { %2558 = vmatmul.mubr.f32.vlgmr.msra.gmra.mrb[8].mxu1 %v2452_v6 }
 0x3cb   :  { %v2922_v7 = vpop.f32.mrb[8].mxu1 }
 0x3cc   :  { %v2923_v10 = vpop.f32.mrb[9].mxu1 }
 0x3cd   :  { %v2924_v11 = vadd.f32 %v2923_v10, %v2922_v7 }
 0x3cf   :  { %v2560_v43 = vadd.f32 %v2924_v11, %v2889_v9 }
 0x3d1   :  { %2564 = vst.msk [vmem:[%s4666_s7] sm:$0x3] %vm2563_vm0, %v2560_v43 }

// kernel: encoder_2f_forward.5
= control target key start
LH: loop header
LB: loop body
LE: loop exit
PB: predicated region body
PF: predicated region fallthrough
CT: control target
= control target key end

     0   :  { %s4385_s24 = smov 0   ;;  %s4387_s25 = smov 0   ;;  %s7023_s0 = inlined_call_operand.vmem [shape: f32[2,3,256], index: 0, kind: input, shape index: {}]   ;;  %s7024_s1 = inlined_call_operand.vmem [shape: f32[64,3], index: 1, kind: input, shape index: {}]   ;;  %s7025_s2 = inlined_call_operand.vmem [shape: f32[64,1], index: 2, kind: input, shape index: {}]   ;;  %s7026_s3 = inlined_call_operand.vmem [shape: bf16[128,64], index: 3, kind: input, shape index: {}]   ;;  %s7027_s4 = inlined_call_operand.vmem [shape: f32[128,1], index: 4, kind: input, shape index: {}]   ;;  %s7028_s5 = inlined_call_operand.vmem [shape: bf16[1024,128], index: 5, kind: input, shape index: {}]   ;;  %s7029_s6 = inlined_call_operand.vmem [shape: f32[1024,1], index: 6, kind: input, shape index: {}]   ;;  %s7030_s7 = inlined_call_operand.vmem [shape: f32[2,2,1024,1], index: 7, kind: output, shape index: {}]  }
   0x1   :  { %s4389_s26 = smov 0   ;;  %s4391_s27 = smov 0  }
   0x2   :  { %s4393_s28 = smov 0  }
   0x3 LB: > { %s32_s29 = sadd.s32 1, %s4331_s26  ;;  %s36_s30 = sadd.s32 1, %s4335_s27  ;;  %s4339_s28 = sphi %s4393_s28, %s17_s28   ;;  %s4335_s27 = sphi %s4391_s27, %s7209_s27   ;;  %s4331_s26 = sphi %s4389_s26, %s7208_s26   ;;  %s4327_s25 = sphi %s4387_s25, %s7207_s25   ;;  %s4323_s24 = sphi %s4385_s24, %s7206_s24  }
   0x4   : > { %p34_p0 = scmp.ge.s32.totalorder %s32_s29, 2  ;;  %p3821_p1 = scmp.ge.s32.totalorder %s4339_s28, 1 }
   0x5   : > { %p267_p2 = scmp.lt.s32.totalorder %s4339_s28, 5 }
   0x6   : > { %s7211_s29 = smov (%p34_p0, %s32_s29), 0  ;;  %s7213_s30 = smov (!%p34_p0, %s36_s30), %s4335_s27 }
   0x7   : > { %p268_p3 = pnand %p3821_p1, %p267_p2  ;;  %p38_p4 = scmp.ge.s32.totalorder %s7213_s30, 2 }
   0x9   : > { %s7215_s30 = smov (%p38_p4, %s7213_s30), 0  ;;  %271 = sbr.rel (%p268_p3) target bundleno = 1133 (0x46d), region = 48 }
  0x10   : > { %v330_v0 = vld [vmem:[%s7024_s1 + $0x10] sm:$0xff]  ;;  %v328_v1 = vld [vmem:[%s7024_s1] sm:$0xff]  ;;  %v4341_v2 = vmov 1   ;;  %v4342_v3 = vmov 0   ;;  %p308_p5 = scmp.lt.s32.totalorder %s4327_s25, 1  ;;  %p310_p6 = scmp.lt.s32.totalorder %s4323_s24, 1 }
  0x11   : > { %4223 = vset.pattern.permute.xlu0 %v4341_v2  ;;  %4222 = vset.pattern.permute.xlu1 %v4342_v3  ;;  %v331_v4 = vld [vmem:[%s7024_s1 + $0x18] sm:$0xff]  ;;  %v333_v5 = vld [vmem:[%s7024_s1 + $0x28] sm:$0xff]  ;;  %v4343_v8 = vmov 2   ;;  %v332_v9 = vld [vmem:[%s7024_s1 + $0x20] sm:$0xff]  ;;  %vm712_vm0 = vcmask 523264   ;;  %s3907_s20 = sshll.u32 %s4323_s24, 7 }
  0x12   : > { %356 = vperm.xlu1 %4222, %v330_v0   ;;  %397 = vperm.xlu0 %4223, %v328_v1   ;;  %s7217_s25 = smov (!%p308_p5, %s4327_s25), 1  ;;  %v335_v6 = vld [vmem:[%s7024_s1 + $0x38] sm:$0xff]  ;;  %v329_v7 = vld [vmem:[%s7024_s1 + $0x8] sm:$0xff]  ;;  %v334_v10 = vld [vmem:[%s7024_s1 + $0x30] sm:$0xff]  ;;  %vm3208_vm2 = vcmask 7168  }
  0x13   : > { %s4430_s14 = scalar_select %p310_p6, %s4323_s24, 1  ;;  %v336_v11 = vld [vmem:[%s7025_s2] sm:$0xff]  ;;  %v339_v12 = vld [vmem:[%s7025_s2 + $0x18] sm:$0xff]  ;;  %v341_v13 = vld [vmem:[%s7025_s2 + $0x28] sm:$0xff] }
  0x14   : > { %s3825_s15 = sshll.u32 %s7217_s25, 8  ;;  %v337_v14 = vld [vmem:[%s7025_s2 + $0x8] sm:$0xff]  ;;  %v343_v15 = vld [vmem:[%s7025_s2 + $0x38] sm:$0xff]  ;;  %v338_v16 = vld [vmem:[%s7025_s2 + $0x10] sm:$0xff]  ;;  %s3822_s12 = sshll.u32 %s7217_s25, 1 }
  0x15   : > { %s3824_s16 = sshll.u32 %s4430_s14, 7  ;;  %v577_v17 = vld [vmem:[%s7027_s4 + $0x8] sm:$0xff]  ;;  %v340_v18 = vld [vmem:[%s7025_s2 + $0x20] sm:$0xff]  ;;  %v579_v19 = vld [vmem:[%s7027_s4 + $0x18] sm:$0xff] }
  0x16   : > { %361 = vperm.xlu1 %4222, %v331_v4   ;;  %409 = vperm.xlu0 %4223, %v331_v4   ;;  %s4437_s19 = sadd.s32 %s3825_s15, %s3824_s16  ;;  %v342_v20 = vld [vmem:[%s7025_s2 + $0x30] sm:$0xff]  ;;  %v581_v21 = vld [vmem:[%s7027_s4 + $0x28] sm:$0xff]  ;;  %v576_v22 = vld [vmem:[%s7027_s4] sm:$0xff]  ;;  %s313_s16 = sadd.s32 %s3822_s12, %s4430_s14 }
  0x17   : > { %v583_v23 = vld [vmem:[%s7027_s4 + $0x38] sm:$0xff]  ;;  %v578_v24 = vld [vmem:[%s7027_s4 + $0x10] sm:$0xff]  ;;  %v4229_v25 = vld [vmem:[%s7026_s3] sm:$0xff]   ;;  %s3823_s25 = sshll.u32 %s313_s16, 2  ;;  %s3826_s24 = sshll.u32 %s4437_s19, 3 }
  0x18   : > { %v585_v26 = vld [vmem:[%s7027_s4 + $0x48] sm:$0xff]  ;;  %v580_v27 = vld [vmem:[%s7027_s4 + $0x20] sm:$0xff]  ;;  %4002 = vmatprep.mubr.msk.bf16.mxu0 %vm712_vm0, %v4229_v25  ;;  %v587_v28 = vld [vmem:[%s7027_s4 + $0x58] sm:$0xff]  ;;  %s315_s11 = scalar_lea.vmem %s7023_s0, %s3823_s25  ;;  %s5453_s19 = scalar_lea.vmem %s7030_s7, %s3826_s24 }
  0x19   : > { %v582_v29 = vld [vmem:[%s7027_s4 + $0x30] sm:$0xff]  ;;  %v589_v30 = vld [vmem:[%s7027_s4 + $0x68] sm:$0xff]  ;;  %v584_v31 = vld [vmem:[%s7027_s4 + $0x40] sm:$0xff] }
  0x1a   : > { %371 = vperm.xlu1 %4222, %v333_v5   ;;  %417 = vperm.xlu0 %4223, %v333_v5   ;;  %v591_v32 = vld [vmem:[%s7027_s4 + $0x78] sm:$0xff]  ;;  %v586_v33 = vld [vmem:[%s7027_s4 + $0x50] sm:$0xff]  ;;  %v987_v34 = vld [vmem:[%s7029_s6 + $0x8] sm:$0xff] }
  0x1b   : > { %v588_v35 = vld [vmem:[%s7027_s4 + $0x60] sm:$0xff]  ;;  %v989_v36 = vld [vmem:[%s7029_s6 + $0x18] sm:$0xff]  ;;  %v590_v37 = vld [vmem:[%s7027_s4 + $0x70] sm:$0xff] }
  0x1c   : > { %v991_v38 = vld [vmem:[%s7029_s6 + $0x28] sm:$0xff]  ;;  %v986_v39 = vld [vmem:[%s7029_s6] sm:$0xff]  ;;  %v993_v40 = vld [vmem:[%s7029_s6 + $0x38] sm:$0xff] }
  0x1d   : > { %v988_v41 = vld [vmem:[%s7029_s6 + $0x10] sm:$0xff]  ;;  %v995_v42 = vld [vmem:[%s7029_s6 + $0x48] sm:$0xff]  ;;  %v990_v43 = vld [vmem:[%s7029_s6 + $0x20] sm:$0xff] }
  0x1e   : > { %381 = vperm.xlu1 %4222, %v335_v6   ;;  %425 = vperm.xlu0 %4223, %v335_v6   ;;  %v997_v44 = vld [vmem:[%s7029_s6 + $0x58] sm:$0xff]  ;;  %v992_v45 = vld [vmem:[%s7029_s6 + $0x30] sm:$0xff]  ;;  %v999_v46 = vld [vmem:[%s7029_s6 + $0x68] sm:$0xff] }
  0x1f   : > { %v994_v47 = vld [vmem:[%s7029_s6 + $0x40] sm:$0xff]  ;;  %v1001_v48 = vld [vmem:[%s7029_s6 + $0x78] sm:$0xff]  ;;  %v996_v49 = vld [vmem:[%s7029_s6 + $0x50] sm:$0xff] }
  0x20   : > { %v1003_v50 = vld [vmem:[%s7029_s6 + $0x88] sm:$0xff]  ;;  %v998_v51 = vld [vmem:[%s7029_s6 + $0x60] sm:$0xff]  ;;  %v1005_v54 = vld [vmem:[%s7029_s6 + $0x98] sm:$0xff] }
  0x21   : > { %v1000_v55 = vld [vmem:[%s7029_s6 + $0x70] sm:$0xff]  ;;  %v1007_v58 = vld [vmem:[%s7029_s6 + $0xa8] sm:$0xff]  ;;  %v1002_v59 = vld [vmem:[%s7029_s6 + $0x80] sm:$0xff] }
  0x22   : > { %4224 = vset.pattern.permute.xlu1 %v4341_v2  ;;  %4226 = vset.pattern.permute.xlu0 %v4343_v8  ;;  %v1009_v62 = vld [vmem:[%s7029_s6 + $0xb8] sm:$0xff]  ;;  %v1004_v63 = vld [vmem:[%s7029_s6 + $0x90] sm:$0xff] }
  0x23   : > { %401 = vperm.xlu1 %4224, %v329_v7   ;;  %453 = vperm.xlu0 %4226, %v329_v7  }
  0x27   : > { %405 = vperm.xlu1 %4224, %v330_v0   ;;  %465 = vperm.xlu0 %4226, %v332_v9  }
  0x2b   : > { %413 = vperm.xlu1 %4224, %v332_v9   ;;  %473 = vperm.xlu0 %4226, %v334_v10  }
  0x2f   : > { %421 = vperm.xlu1 %4224, %v334_v10   ;;  %4227 = vset.pattern.permute.xlu0 %v4342_v3 }
  0x30   : > { %346 = vperm.xlu0 %4227, %v328_v1  }
  0x33   : > { %4225 = vset.pattern.permute.xlu1 %v4343_v8  ;;  %v1015_v8 = vld [vmem:[%s7029_s6 + $0xe8] sm:$0xff] }
  0x34   : > { %449 = vperm.xlu1 %4225, %v328_v1   ;;  %351 = vperm.xlu0 %4227, %v329_v7   ;;  %v1011_v1 = vld [vmem:[%s7029_s6 + $0xc8] sm:$0xff]  ;;  %v1008_v7 = vld [vmem:[%s7029_s6 + $0xb0] sm:$0xff] }
  0x38   : > { %457 = vperm.xlu1 %4225, %v330_v0   ;;  %366 = vperm.xlu0 %4227, %v332_v9  }
  0x3c   : > { %461 = vperm.xlu1 %4225, %v331_v4   ;;  %376 = vperm.xlu0 %4227, %v334_v10   ;;  %v1013_v4 = vld [vmem:[%s7029_s6 + $0xd8] sm:$0xff] }
  0x40   : > { %469 = vperm.xlu1 %4225, %v333_v5   ;;  %502 = vperm.xlu0 %4227, %v336_v11   ;;  %v1010_v11 = vld [vmem:[%s7029_s6 + $0xc0] sm:$0xff] }
  0x44   : > { %477 = vperm.xlu1 %4225, %v335_v6   ;;  %517 = vperm.xlu0 %4227, %v339_v12   ;;  %v1017_v12 = vld [vmem:[%s7029_s6 + $0xf8] sm:$0xff] }
  0x48   : > { %4228 = vset.pattern.permute.xlu1 %v4342_v3  ;;  %527 = vperm.xlu0 %4227, %v341_v13   ;;  %v1006_v3 = vld [vmem:[%s7029_s6 + $0xa0] sm:$0xff] }
  0x49   : > { %507 = vperm.xlu1 %4228, %v337_v14  }
  0x4c   : > { %537 = vperm.xlu0 %4227, %v343_v15   ;;  %v1012_v15 = vld [vmem:[%s7029_s6 + $0xd0] sm:$0xff] }
  0x4d   : > { %512 = vperm.xlu1 %4228, %v338_v16   ;;  %v1019_v16 = vld [vmem:[%s7029_s6 + $0x108] sm:$0xff] }
  0x50   : > { %599 = vperm.xlu0 %4227, %v577_v17  }
  0x51   : > { %522 = vperm.xlu1 %4228, %v340_v18   ;;  %v1014_v18 = vld [vmem:[%s7029_s6 + $0xe0] sm:$0xff] }
  0x54   : > { %609 = vperm.xlu0 %4227, %v579_v19  }
  0x55   : > { %532 = vperm.xlu1 %4228, %v342_v20   ;;  %v7031_v20 = vlaneseq }
  0x57   : > { %v385_v25 = vshrl.u32 %v7031_v20, 7 }
  0x58   : > { %619 = vperm.xlu0 %4227, %v581_v21   ;;  %v1021_v21 = vld [vmem:[%s7029_s6 + $0x118] sm:$0xff] }
  0x59   : > { %594 = vperm.xlu1 %4228, %v576_v22   ;;  %v1016_v22 = vld [vmem:[%s7029_s6 + $0xf0] sm:$0xff] }
  0x5c   : > { %629 = vperm.xlu0 %4227, %v583_v23  }
  0x5d   : > { %604 = vperm.xlu1 %4228, %v578_v24  }
  0x60   : > { %639 = vperm.xlu0 %4227, %v585_v26   ;;  %v1023_v26 = vld [vmem:[%s7029_s6 + $0x128] sm:$0xff] }
  0x61   : > { %614 = vperm.xlu1 %4228, %v580_v27   ;;  %v1018_v27 = vld [vmem:[%s7029_s6 + $0x100] sm:$0xff] }
  0x64   : > { %649 = vperm.xlu0 %4227, %v587_v28  }
  0x65   : > { %624 = vperm.xlu1 %4228, %v582_v29  }
  0x68   : > { %659 = vperm.xlu0 %4227, %v589_v30   ;;  %v386_v30 = vsub.s32 0, %v385_v25 }
  0x69   : > { %634 = vperm.xlu1 %4228, %v584_v31   ;;  %v1025_v31 = vld [vmem:[%s7029_s6 + $0x138] sm:$0xff] }
  0x6c   : > { %669 = vperm.xlu0 %4227, %v591_v32   ;;  %v327_v32 = vld [vmem:[%s315_s11] sm:$0x7] }
  0x6d   : > { %644 = vperm.xlu1 %4228, %v586_v33   ;;  %v1020_v33 = vld [vmem:[%s7029_s6 + $0x110] sm:$0xff] }
  0x70   : > { %1121 = vperm.xlu0 %4227, %v987_v34   ;;  %v430_v34 = vsub.s32 1, %v385_v25 }
  0x71   : > { %654 = vperm.xlu1 %4228, %v588_v35   ;;  %v482_v35 = vsub.s32 2, %v385_v25 }
  0x74   : > { %1131 = vperm.xlu0 %4227, %v989_v36  }
  0x75   : > { %664 = vperm.xlu1 %4228, %v590_v37  }
  0x78   : > { %1141 = vperm.xlu0 %4227, %v991_v38   ;;  %v387_v38 = vrot.slane %v327_v32, %v386_v30 }
  0x79   : > { %1116 = vperm.xlu1 %4228, %v986_v39   ;;  %v1027_v39 = vld [vmem:[%s7029_s6 + $0x148] sm:$0xff] }
  0x7c   : > { %1151 = vperm.xlu0 %4227, %v993_v40   ;;  %v1022_v40 = vld [vmem:[%s7029_s6 + $0x120] sm:$0xff] }
  0x7d   : > { %1126 = vperm.xlu1 %4228, %v988_v41   ;;  %v431_v41 = vrot.slane %v327_v32, %v430_v34 }
  0x80   : > { %1161 = vperm.xlu0 %4227, %v995_v42   ;;  %v4681_v42 = vrot.slane %v327_v32, %v482_v35 }
  0x81   : > { %1136 = vperm.xlu1 %4228, %v990_v43  }
  0x84   : > { %1171 = vperm.xlu0 %4227, %v997_v44  }
  0x85   : > { %1146 = vperm.xlu1 %4228, %v992_v45  }
  0x88   : > { %1181 = vperm.xlu0 %4227, %v999_v46  }
  0x89   : > { %1156 = vperm.xlu1 %4228, %v994_v47  }
  0x8c   : > { %1191 = vperm.xlu0 %4227, %v1001_v48  }
  0x8d   : > { %1166 = vperm.xlu1 %4228, %v996_v49  }
  0x90   : > { %1201 = vperm.xlu0 %4227, %v1003_v50   ;;  %v1029_v50 = vld [vmem:[%s7029_s6 + $0x158] sm:$0xff] }
  0x91   : > { %v4575_v52 = vpop.permute.xlu1 %356  ;;  %1176 = vperm.xlu1 %4228, %v998_v51   ;;  %v4577_v53 = vpop.permute.xlu0 %397  ;;  %v1024_v51 = vld [vmem:[%s7029_s6 + $0x130] sm:$0xff] }
  0x92   : > { %v432_v47 = vmul.f32 %v431_v41, %v4577_v53 }
  0x94   : > { %1211 = vperm.xlu0 %4227, %v1005_v54  }
  0x95   : > { %v4585_v56 = vpop.permute.xlu1 %361  ;;  %1186 = vperm.xlu1 %4228, %v1000_v55   ;;  %v4587_v57 = vpop.permute.xlu0 %409 }
  0x96   : > { %v391_v54 = vmul.f32 %v387_v38, %v4585_v56  ;;  %v435_v55 = vmul.f32 %v431_v41, %v4587_v57  ;;  %v1031_v56 = vld [vmem:[%s7029_s6 + $0x168] sm:$0xff]  ;;  %v390_v57 = vmul.f32 %v387_v38, %v4575_v52 }
  0x98   : > { %1221 = vperm.xlu0 %4227, %v1007_v58  }
  0x99   : > { %v4595_v60 = vpop.permute.xlu1 %371  ;;  %1196 = vperm.xlu1 %4228, %v1002_v59   ;;  %v4597_v61 = vpop.permute.xlu0 %417 }
  0x9a   : > { %v393_v53 = vmul.f32 %v387_v38, %v4595_v60 }
  0x9c   : > { %1231 = vperm.xlu0 %4227, %v1009_v62  }
  0x9d   : > { %v4605_v0 = vpop.permute.xlu1 %381  ;;  %1206 = vperm.xlu1 %4228, %v1004_v63   ;;  %v4610_v2 = vpop.permute.xlu0 %425 }
  0xa0   : > { %1241 = vperm.xlu0 %4227, %v1011_v1  }
  0xa1   : > { %1216 = vperm.xlu1 %4228, %v1006_v3   ;;  %v437_v3 = vmul.f32 %v431_v41, %v4597_v61  ;;  %v1026_v61 = vld [vmem:[%s7029_s6 + $0x140] sm:$0xff] }
  0xa2   : > { %v402_v5 = vpop.permute.xlu1 %401  ;;  %v4618_v6 = vpop.permute.xlu0 %453 }
  0xa3   : > { %v433_v48 = vmul.f32 %v431_v41, %v402_v5 }
  0xa4   : > { %1251 = vperm.xlu0 %4227, %v1013_v4   ;;  %v485_v4 = vmul.f32 %v4681_v42, %v4618_v6 }
  0xa5   : > { %1226 = vperm.xlu1 %4228, %v1008_v7  }
  0xa6   : > { %v4626_v9 = vpop.permute.xlu1 %405  ;;  %v4628_v10 = vpop.permute.xlu0 %465 }
  0xa7   : > { %v434_v63 = vmul.f32 %v431_v41, %v4626_v9  ;;  %v443_v9 = vadd.f32 %v435_v55, %v391_v54  ;;  %v488_v32 = vmul.f32 %v4681_v42, %v4628_v10  ;;  %v1030_v10 = vld [vmem:[%s7029_s6 + $0x160] sm:$0xff] }
  0xa8   : > { %1261 = vperm.xlu0 %4227, %v1015_v8  }
  0xa9   : > { %1236 = vperm.xlu1 %4228, %v1010_v11  }
  0xaa   : > { %v4636_v13 = vpop.permute.xlu1 %413  ;;  %v4638_v14 = vpop.permute.xlu0 %473 }
  0xac   : > { %1271 = vperm.xlu0 %4227, %v1017_v12   ;;  %v442_v12 = vadd.f32 %v434_v63, %v390_v57  ;;  %v1034_v63 = vld [vmem:[%s7029_s6 + $0x180] sm:$0xff]  ;;  %v4231_v57 = vld [vmem:[%s7026_s3 + $0x10] sm:$0xff]  }
  0xad   : > { %1246 = vperm.xlu1 %4228, %v1012_v15   ;;  %v436_v15 = vmul.f32 %v431_v41, %v4636_v13  ;;  %v1028_v13 = vld [vmem:[%s7029_s6 + $0x150] sm:$0xff] }
  0xae   : > { %v4647_v17 = vpop.permute.xlu1 %421 }
  0xaf   : > { %v347_v19 = vpop.permute.xlu0 %346 }
  0xb0   : > { %1281 = vperm.xlu0 %4227, %v1019_v16   ;;  %v388_v43 = vmul.f32 %v387_v38, %v347_v19 }
  0xb1   : > { %1256 = vperm.xlu1 %4228, %v1014_v18   ;;  %v445_v18 = vadd.f32 %v437_v3, %v393_v53  ;;  %v1039_v53 = vld [vmem:[%s7029_s6 + $0x1a8] sm:$0xff] }
  0xb2   : > { %v440_v58 = vadd.f32 %v432_v47, %v388_v43 }
  0xb3   : > { %v450_v23 = vpop.permute.xlu1 %449  ;;  %v352_v24 = vpop.permute.xlu0 %351 }
  0xb4   : > { %1291 = vperm.xlu0 %4227, %v1021_v21   ;;  %v389_v44 = vmul.f32 %v387_v38, %v352_v24  ;;  %v484_v49 = vmul.f32 %v4681_v42, %v450_v23  ;;  %v395_v23 = vmul.f32 %v387_v38, %v4605_v0  ;;  %v439_v24 = vmul.f32 %v431_v41, %v4610_v2 }
  0xb5   : > { %1266 = vperm.xlu1 %4228, %v1016_v22   ;;  %v1033_v22 = vld [vmem:[%s7029_s6 + $0x178] sm:$0xff] }
  0xb6   : > { %v441_v59 = vadd.f32 %v433_v48, %v389_v44  ;;  %v492_v7 = vadd.f32 %v484_v49, %v440_v58 }
  0xb7   : > { %v458_v28 = vpop.permute.xlu1 %457  ;;  %v367_v29 = vpop.permute.xlu0 %366 }
  0xb8   : > { %1301 = vperm.xlu0 %4227, %v1023_v26   ;;  %v486_v60 = vmul.f32 %v4681_v42, %v458_v28  ;;  %v392_v8 = vmul.f32 %v387_v38, %v367_v29  ;;  %v493_v6 = vadd.f32 %v485_v4, %v441_v59 }
  0xb9   : > { %1276 = vperm.xlu1 %4228, %v1018_v27  }
  0xba   : > { %v444_v25 = vadd.f32 %v436_v15, %v392_v8  ;;  %v494_v27 = vadd.f32 %v486_v60, %v442_v12  ;;  %v1043_v60 = vld [vmem:[%s7029_s6 + $0x1c8] sm:$0xff]  ;;  %v1038_v8 = vld [vmem:[%s7029_s6 + $0x1a0] sm:$0xff] }
  0xbb   : > { %v462_v36 = vpop.permute.xlu1 %461  ;;  %v377_v37 = vpop.permute.xlu0 %376  ;;  %v1047_v12 = vld [vmem:[%s7029_s6 + $0x1e8] sm:$0xff]  ;;  %v1042_v15 = vld [vmem:[%s7029_s6 + $0x1c0] sm:$0xff] }
  0xbc   : > { %1311 = vperm.xlu0 %4227, %v1025_v31   ;;  %v487_v5 = vmul.f32 %v4681_v42, %v462_v36  ;;  %v394_v28 = vmul.f32 %v387_v38, %v377_v37  ;;  %v1035_v37 = vld [vmem:[%s7029_s6 + $0x188] sm:$0xff]  ;;  %v447_v38 = vadd.f32 %v439_v24, %v395_v23  ;;  %v1046_v24 = vld [vmem:[%s7029_s6 + $0x1e0] sm:$0xff] }
  0xbd   : > { %1286 = vperm.xlu1 %4228, %v1020_v33   ;;  %v438_v33 = vmul.f32 %v431_v41, %v4647_v17 }
  0xbe   : > { %v495_v21 = vadd.f32 %v487_v5, %v443_v9  ;;  %v1041_v5 = vld [vmem:[%s7029_s6 + $0x1b8] sm:$0xff]  ;;  %v1040_v9 = vld [vmem:[%s7029_s6 + $0x1b0] sm:$0xff] }
  0xbf   : > { %v470_v45 = vpop.permute.xlu1 %469  ;;  %v503_v46 = vpop.permute.xlu0 %502 }
  0xc0   : > { %1321 = vperm.xlu0 %4227, %v1027_v39   ;;  %v540_v11 = vadd.f32 %v503_v46, %v492_v7  ;;  %v489_v19 = vmul.f32 %v4681_v42, %v470_v45  ;;  %v496_v39 = vadd.f32 %v488_v32, %v444_v25  ;;  %v490_v46 = vmul.f32 %v4681_v42, %v4638_v14  ;;  %v1036_v7 = vld [vmem:[%s7029_s6 + $0x190] sm:$0xff]  ;;  %v1057_v32 = vld [vmem:[%s7029_s6 + $0x238] sm:$0xff] }
  0xc1   : > { %1296 = vperm.xlu1 %4228, %v1022_v40   ;;  %v446_v40 = vadd.f32 %v438_v33, %v394_v28 }
  0xc2   : > { %v548_v29 = vmax.f32 %v540_v11, 0.0  ;;  %v497_v2 = vadd.f32 %v489_v19, %v445_v18  ;;  %v4232_v11 = vld [vmem:[%s7026_s3 + $0x18] sm:$0xff]   ;;  %v1044_v19 = vld [vmem:[%s7029_s6 + $0x1d0] sm:$0xff] }
  0xc3   : > { %v478_v62 = vpop.permute.xlu1 %477  ;;  %v518_v1 = vpop.permute.xlu0 %517  ;;  %v498_v59 = vadd.f32 %v490_v46, %v446_v40  ;;  %v1049_v18 = vld [vmem:[%s7029_s6 + $0x1f8] sm:$0xff]  ;;  %v1067_v46 = vld [vmem:[%s7029_s6 + $0x288] sm:$0xff] }
  0xc4   : > { %1331 = vperm.xlu0 %4227, %v1029_v50   ;;  %v543_v30 = vadd.f32 %v518_v1, %v495_v21  ;;  %v491_v0 = vmul.f32 %v4681_v42, %v478_v62  ;;  %v1037_v50 = vld [vmem:[%s7029_s6 + $0x198] sm:$0xff]  ;;  %v4234_v21 = vld [vmem:[%s7026_s3 + $0x28] sm:$0xff]  }
  0xc5   : > { %1306 = vperm.xlu1 %4228, %v1024_v51   ;;  %v1032_v51 = vld [vmem:[%s7029_s6 + $0x170] sm:$0xff] }
  0xc6   : > { %v551_v17 = vmax.f32 %v543_v30, 0.0  ;;  %v499_v47 = vadd.f32 %v491_v0, %v447_v38  ;;  %v1050_v30 = vld [vmem:[%s7029_s6 + $0x200] sm:$0xff]  ;;  %v1056_v38 = vld [vmem:[%s7029_s6 + $0x230] sm:$0xff] }
  0xc7   : > { %v528_v26 = vpop.permute.xlu0 %527 }
  0xc8   : > { %v508_v16 = vpop.permute.xlu1 %507  ;;  %1341 = vperm.xlu0 %4227, %v1031_v56   ;;  %v545_v41 = vadd.f32 %v528_v26, %v497_v2  ;;  %v4230_v56 = vld [vmem:[%s7026_s3 + $0x8] sm:$0xff]   ;;  %v1053_v26 = vld [vmem:[%s7029_s6 + $0x218] sm:$0xff] }
  0xc9   : > { %v541_v52 = vadd.f32 %v508_v16, %v493_v6  ;;  %1316 = vperm.xlu1 %4228, %v1026_v61   ;;  %v1045_v61 = vld [vmem:[%s7029_s6 + $0x1d8] sm:$0xff]  ;;  %v4233_v6 = vld [vmem:[%s7026_s3 + $0x20] sm:$0xff]   ;;  %v1059_v2 = vld [vmem:[%s7029_s6 + $0x248] sm:$0xff] }
  0xca   : > { %v553_v54 = vmax.f32 %v545_v41, 0.0 }
  0xcb   : > { %v549_v31 = vmax.f32 %v541_v52, 0.0  ;;  %v538_v44 = vpop.permute.xlu0 %537  ;;  %v4235_v52 = vld [vmem:[%s7026_s3 + $0x30] sm:$0xff]  }
  0xcc   : > { %v513_v34 = vpop.permute.xlu1 %512  ;;  %1351 = vperm.xlu0 %4227, %v1033_v22   ;;  %v547_v55 = vadd.f32 %v538_v44, %v499_v47  ;;  %v1051_v22 = vld [vmem:[%s7029_s6 + $0x208] sm:$0xff]  ;;  %v1060_v44 = vld [vmem:[%s7029_s6 + $0x250] sm:$0xff]  ;;  %v1062_v47 = vld [vmem:[%s7029_s6 + $0x260] sm:$0xff] }
  0xcd   : > { %v542_v35 = vadd.f32 %v513_v34, %v494_v27  ;;  %1326 = vperm.xlu1 %4228, %v1028_v13   ;;  %v572_v36 = vpack.c.bf16 %v549_v31, %v548_v29  ;;  %v1048_v27 = vld [vmem:[%s7029_s6 + $0x1f0] sm:$0xff]  ;;  %v4236_v13 = vld [vmem:[%s7026_s3 + $0x38] sm:$0xff]   ;;  %v1055_v29 = vld [vmem:[%s7029_s6 + $0x228] sm:$0xff] }
  0xce   : > { %v555_v1 = vmax.f32 %v547_v55, 0.0  ;;  %v1052_v34 = vld [vmem:[%s7029_s6 + $0x210] sm:$0xff]  ;;  %v1071_v55 = vld [vmem:[%s7029_s6 + $0x2a8] sm:$0xff] }
  0xcf   : > { %v550_v43 = vmax.f32 %v542_v35, 0.0  ;;  %3994 = vmatprep.subr.bf16.mxu0 %v572_v36  ;;  %v4780_v16 = vpop.permute.xlu0 %599  ;;  %v1054_v35 = vld [vmem:[%s7029_s6 + $0x220] sm:$0xff] }
  0xd0   : > { %v523_v45 = vpop.permute.xlu1 %522  ;;  %1361 = vperm.xlu0 %4227, %v1035_v37   ;;  %3995 = vmatpush3.bf16.msra.mxu0 %v572_v36  ;;  %v1061_v37 = vld [vmem:[%s7029_s6 + $0x258] sm:$0xff] }
  0xd1   : > { %v544_v48 = vadd.f32 %v523_v45, %v496_v39  ;;  %1336 = vperm.xlu1 %4228, %v1030_v10   ;;  %v573_v49 = vpack.c.bf16 %v551_v17, %v550_v43  ;;  %v1063_v10 = vld [vmem:[%s7029_s6 + $0x268] sm:$0xff]  ;;  %v1058_v17 = vld [vmem:[%s7029_s6 + $0x240] sm:$0xff]  ;;  %v1065_v43 = vld [vmem:[%s7029_s6 + $0x278] sm:$0xff] }
  0xd3   : > { %v552_v58 = vmax.f32 %v544_v48, 0.0  ;;  %3996 = vmatprep.subr.bf16.mxu0 %v573_v49  ;;  %v4798_v23 = vpop.permute.xlu0 %609 }
  0xd4   : > { %v533_v62 = vpop.permute.xlu1 %532  ;;  %1371 = vperm.xlu0 %4227, %v1037_v50   ;;  %3997 = vmatpush3.bf16.msra.mxu0 %v573_v49  ;;  %v1069_v49 = vld [vmem:[%s7029_s6 + $0x298] sm:$0xff] }
  0xd5   : > { %v546_v14 = vadd.f32 %v533_v62, %v498_v59  ;;  %1346 = vperm.xlu1 %4228, %v1032_v51   ;;  %v574_v42 = vpack.c.bf16 %v553_v54, %v552_v58  ;;  %v1064_v51 = vld [vmem:[%s7029_s6 + $0x270] sm:$0xff]  ;;  %v1066_v58 = vld [vmem:[%s7029_s6 + $0x280] sm:$0xff]  ;;  %v1073_v62 = vld [vmem:[%s7029_s6 + $0x2b8] sm:$0xff] }
  0xd7   : > { %v554_v3 = vmax.f32 %v546_v14, 0.0  ;;  %3998 = vmatprep.subr.bf16.mxu0 %v574_v42  ;;  %v4816_v28 = vpop.permute.xlu0 %619  ;;  %v1068_v14 = vld [vmem:[%s7029_s6 + $0x290] sm:$0xff] }
  0xd8   : > { %1381 = vperm.xlu0 %4227, %v1039_v53   ;;  %3999 = vmatpush3.bf16.msra.mxu0 %v574_v42  ;;  %v4805_v25 = vpop.permute.xlu1 %594  ;;  %v1075_v53 = vld [vmem:[%s7029_s6 + $0x2c8] sm:$0xff] }
  0xd9   : > { %1356 = vperm.xlu1 %4228, %v1034_v63   ;;  %v575_v4 = vpack.c.bf16 %v555_v1, %v554_v3  ;;  %v1070_v1 = vld [vmem:[%s7029_s6 + $0x2a0] sm:$0xff] }
  0xdb   : > { %4000 = vmatprep.subr.bf16.mxu0 %v575_v4  ;;  %v4830_v33 = vpop.permute.xlu0 %629 }
  0xdc   : > { %1391 = vperm.xlu0 %4227, %v1041_v5   ;;  %4001 = vmatpush3.bf16.msra.mxu0 %v575_v4  ;;  %v4824_v31 = vpop.permute.xlu1 %604  ;;  %v1077_v4 = vld [vmem:[%s7029_s6 + $0x2d8] sm:$0xff]  ;;  %v1072_v5 = vld [vmem:[%s7029_s6 + $0x2b0] sm:$0xff] }
  0xdd   : > { %1366 = vperm.xlu1 %4228, %v1036_v7  }
  0xdf   : > { %4003 = vmatmul.mubr.msk.bf16.vlgmr.msra.gmra.mrb[0].mxu0 %vm712_vm0, %v4230_v56  ;;  %v4843_v36 = vpop.permute.xlu0 %639  ;;  %v1079_v56 = vld [vmem:[%s7029_s6 + $0x2e8] sm:$0xff] }
  0xe0   : > { %1401 = vperm.xlu0 %4227, %v1043_v60   ;;  %4006 = vmatprep.mubr.msk.bf16.mxu0 %vm712_vm0, %v4231_v57  ;;  %v4835_v0 = vpop.permute.xlu1 %614  ;;  %v1074_v57 = vld [vmem:[%s7029_s6 + $0x2c0] sm:$0xff] }
  0xe1   : > { %1376 = vperm.xlu1 %4228, %v1038_v8   ;;  %v1081_v8 = vld [vmem:[%s7029_s6 + $0x2f8] sm:$0xff] }
  0xe3   : > { %v4856_v40 = vpop.permute.xlu0 %649 }
  0xe4   : > { %1411 = vperm.xlu0 %4227, %v1045_v61   ;;  %v4851_v39 = vpop.permute.xlu1 %624 }
  0xe5   : > { %1386 = vperm.xlu1 %4228, %v1040_v9   ;;  %v1076_v9 = vld [vmem:[%s7029_s6 + $0x2d0] sm:$0xff] }
  0xe7   : > { %4007 = vmatmul.mubr.msk.bf16.gmra.mrb[4].mxu0 %vm712_vm0, %v4232_v11  ;;  %v4869_v45 = vpop.permute.xlu0 %659 }
  0xe8   : > { %1421 = vperm.xlu0 %4227, %v1047_v12   ;;  %4010 = vmatprep.mubr.msk.bf16.mxu0 %vm712_vm0, %v4233_v6  ;;  %v4861_v41 = vpop.permute.xlu1 %634  ;;  %v1083_v6 = vld [vmem:[%s7029_s6 + $0x308] sm:$0xff]  ;;  %v1078_v12 = vld [vmem:[%s7029_s6 + $0x2e0] sm:$0xff] }
  0xe9   : > { %1396 = vperm.xlu1 %4228, %v1042_v15  }
  0xeb   : > { %v4882_v50 = vpop.permute.xlu0 %669 }
  0xec   : > { %1431 = vperm.xlu0 %4227, %v1049_v18   ;;  %v4877_v48 = vpop.permute.xlu1 %644  ;;  %v1085_v18 = vld [vmem:[%s7029_s6 + $0x318] sm:$0xff] }
  0xed   : > { %1406 = vperm.xlu1 %4228, %v1044_v19   ;;  %v1080_v19 = vld [vmem:[%s7029_s6 + $0x2f0] sm:$0xff] }
  0xef   : > { %4011 = vmatmul.mubr.msk.bf16.gmra.mrb[8].mxu0 %vm712_vm0, %v4234_v21  ;;  %v4895_v59 = vpop.permute.xlu0 %1121 }
  0xf0   : > { %1441 = vperm.xlu0 %4227, %v1051_v22   ;;  %4014 = vmatprep.mubr.msk.bf16.mxu0 %vm712_vm0, %v4235_v52  ;;  %v4887_v54 = vpop.permute.xlu1 %654  ;;  %v1087_v52 = vld [vmem:[%s7029_s6 + $0x328] sm:$0xff] }
  0xf1   : > { %1416 = vperm.xlu1 %4228, %v1046_v24   ;;  %v1082_v24 = vld [vmem:[%s7029_s6 + $0x300] sm:$0xff] }
  0xf3   : > { %v4908_v63 = vpop.permute.xlu0 %1131 }
  0xf4   : > { %1451 = vperm.xlu0 %4227, %v1053_v26   ;;  %v4903_v42 = vpop.permute.xlu1 %664 }
  0xf5   : > { %1426 = vperm.xlu1 %4228, %v1048_v27   ;;  %v1089_v27 = vld [vmem:[%s7029_s6 + $0x338] sm:$0xff] }
  0xf7   : > { %4015 = vmatmul.mubr.msk.bf16.gmra.mrb[12].mxu0 %vm712_vm0, %v4236_v13  ;;  %v4921_v7 = vpop.permute.xlu0 %1141  ;;  %v1084_v13 = vld [vmem:[%s7029_s6 + $0x310] sm:$0xff] }
  0xf8   : > { %1461 = vperm.xlu0 %4227, %v1055_v29   ;;  %v4913_v3 = vpop.permute.xlu1 %1116 }
  0xf9   : > { %1436 = vperm.xlu1 %4228, %v1050_v30   ;;  %v1091_v30 = vld [vmem:[%s7029_s6 + $0x348] sm:$0xff] }
  0xfb   : > { %v4934_v61 = vpop.permute.xlu0 %1151 }
  0xfc   : > { %1471 = vperm.xlu0 %4227, %v1057_v32   ;;  %v4929_v60 = vpop.permute.xlu1 %1126  ;;  %v1086_v32 = vld [vmem:[%s7029_s6 + $0x320] sm:$0xff] }
  0xfd   : > { %1446 = vperm.xlu1 %4228, %v1052_v34  }
  0xff   : > { %v4947_v15 = vpop.permute.xlu0 %1161 }
 0x100   : > { %1481 = vperm.xlu0 %4227, %v1059_v2   ;;  %v4939_v11 = vpop.permute.xlu1 %1136  ;;  %v1093_v2 = vld [vmem:[%s7029_s6 + $0x358] sm:$0xff] }
 0x101   : > { %1456 = vperm.xlu1 %4228, %v1054_v35  }
 0x103   : > { %v4960_v22 = vpop.permute.xlu0 %1171 }
 0x104   : > { %1491 = vperm.xlu0 %4227, %v1061_v37   ;;  %v4955_v21 = vpop.permute.xlu1 %1146  ;;  %v1088_v37 = vld [vmem:[%s7029_s6 + $0x330] sm:$0xff] }
 0x105   : > { %1466 = vperm.xlu1 %4228, %v1056_v38  }
 0x107   : > { %v4973_v29 = vpop.permute.xlu0 %1181 }
 0x108   : > { %1501 = vperm.xlu0 %4227, %v1063_v10   ;;  %v4965_v26 = vpop.permute.xlu1 %1156  ;;  %v1095_v10 = vld [vmem:[%s7029_s6 + $0x368] sm:$0xff] }
 0x109   : > { %1476 = vperm.xlu1 %4228, %v1058_v17   ;;  %v1090_v17 = vld [vmem:[%s7029_s6 + $0x340] sm:$0xff] }
 0x10b   : > { %v4986_v35 = vpop.permute.xlu0 %1191 }
 0x10c   : > { %1511 = vperm.xlu0 %4227, %v1065_v43   ;;  %v4981_v34 = vpop.permute.xlu1 %1166 }
 0x10d   : > { %1486 = vperm.xlu1 %4228, %v1060_v44   ;;  %v1097_v44 = vld [vmem:[%s7029_s6 + $0x378] sm:$0xff] }
 0x10f   : > { %v4999_v43 = vpop.permute.xlu0 %1201 }
 0x110   : > { %1521 = vperm.xlu0 %4227, %v1067_v46   ;;  %v4991_v38 = vpop.permute.xlu1 %1176  ;;  %v1092_v46 = vld [vmem:[%s7029_s6 + $0x350] sm:$0xff] }
 0x111   : > { %1496 = vperm.xlu1 %4228, %v1062_v47  }
 0x114   : > { %1531 = vperm.xlu0 %4227, %v1069_v49   ;;  %v5007_v47 = vpop.permute.xlu1 %1186  ;;  %v1099_v49 = vld [vmem:[%s7029_s6 + $0x388] sm:$0xff] }
 0x115   : > { %1506 = vperm.xlu1 %4228, %v1064_v51   ;;  %v5012_v51 = vpop.permute.xlu0 %1211 }
 0x118   : > { %1541 = vperm.xlu0 %4227, %v1071_v55   ;;  %v1094_v55 = vld [vmem:[%s7029_s6 + $0x360] sm:$0xff] }
 0x119   : > { %1516 = vperm.xlu1 %4228, %v1066_v58   ;;  %v5017_v58 = vpop.permute.xlu1 %1196 }
 0x11c   : > { %1551 = vperm.xlu0 %4227, %v1073_v62   ;;  %v1101_v62 = vld [vmem:[%s7029_s6 + $0x398] sm:$0xff] }
 0x11d   : > { %1526 = vperm.xlu1 %4228, %v1068_v14   ;;  %v1096_v14 = vld [vmem:[%s7029_s6 + $0x370] sm:$0xff] }
 0x120   : > { %1561 = vperm.xlu0 %4227, %v1075_v53   ;;  %v5025_v53 = vpop.permute.xlu0 %1221 }
 0x121   : > { %1536 = vperm.xlu1 %4228, %v1070_v1   ;;  %v1103_v1 = vld [vmem:[%s7029_s6 + $0x3a8] sm:$0xff] }
 0x124   : > { %1571 = vperm.xlu0 %4227, %v1077_v4   ;;  %v1098_v4 = vld [vmem:[%s7029_s6 + $0x380] sm:$0xff] }
 0x125   : > { %1546 = vperm.xlu1 %4228, %v1072_v5   ;;  %v5033_v5 = vpop.permute.xlu1 %1206 }
 0x128   : > { %1581 = vperm.xlu0 %4227, %v1079_v56   ;;  %v1105_v56 = vld [vmem:[%s7029_s6 + $0x3b8] sm:$0xff] }
 0x129   : > { %1556 = vperm.xlu1 %4228, %v1074_v57   ;;  %v4237_v57 = vld [vmem:[%s7028_s5 + $0xf0] sm:$0xff]  }
 0x12a   : > { %4094 = vmatprep.mubr.bf16.mxu1 %v4237_v57 }
 0x12c   : > { %1591 = vperm.xlu0 %4227, %v1081_v8   ;;  %v4238_v8 = vld [vmem:[%s7028_s5] sm:$0xff]  }
 0x12d   : > { %1566 = vperm.xlu1 %4228, %v1076_v9   ;;  %v5044_v9 = vpop.permute.xlu0 %1231  ;;  %4034 = vmatprep.mubr.bf16.mxu0 %v4238_v8 }
 0x130   : > { %1601 = vperm.xlu0 %4227, %v1083_v6   ;;  %v1100_v6 = vld [vmem:[%s7029_s6 + $0x390] sm:$0xff] }
 0x131   : > { %1576 = vperm.xlu1 %4228, %v1078_v12   ;;  %v5049_v12 = vpop.permute.xlu1 %1216 }
 0x134   : > { %1611 = vperm.xlu0 %4227, %v1085_v18   ;;  %v1107_v18 = vld [vmem:[%s7029_s6 + $0x3c8] sm:$0xff] }
 0x135   : > { %1586 = vperm.xlu1 %4228, %v1080_v19   ;;  %v1102_v19 = vld [vmem:[%s7029_s6 + $0x3a0] sm:$0xff] }
 0x138   : > { %1621 = vperm.xlu0 %4227, %v1087_v52   ;;  %v5057_v52 = vpop.permute.xlu0 %1241 }
 0x139   : > { %1596 = vperm.xlu1 %4228, %v1082_v24   ;;  %7032 = vst [vmem:[#allocation2_spill] sm:$0xff] %v5057_v52  ;;  %v1109_v24 = vld [vmem:[%s7029_s6 + $0x3d8] sm:$0xff] }
 0x13c   : > { %1631 = vperm.xlu0 %4227, %v1089_v27   ;;  %v1104_v27 = vld [vmem:[%s7029_s6 + $0x3b0] sm:$0xff] }
 0x13d   : > { %1606 = vperm.xlu1 %4228, %v1084_v13   ;;  %v5065_v13 = vpop.permute.xlu1 %1226 }
 0x140   : > { %1641 = vperm.xlu0 %4227, %v1091_v30   ;;  %v1111_v30 = vld [vmem:[%s7029_s6 + $0x3e8] sm:$0xff] }
 0x141   : > { %1616 = vperm.xlu1 %4228, %v1086_v32   ;;  %v5070_v32 = vpop.permute.xlu0 %1251 }
 0x142   : > { %7033 = vst [vmem:[#allocation3_spill] sm:$0xff] %v5070_v32 }
 0x144   : > { %1651 = vperm.xlu0 %4227, %v1093_v2   ;;  %v1106_v2 = vld [vmem:[%s7029_s6 + $0x3c0] sm:$0xff] }
 0x145   : > { %1626 = vperm.xlu1 %4228, %v1088_v37   ;;  %v5075_v37 = vpop.permute.xlu1 %1236 }
 0x146   : > { %7034 = vst [vmem:[#allocation4_spill] sm:$0xff] %v5075_v37 }
 0x148   : > { %1661 = vperm.xlu0 %4227, %v1095_v10   ;;  %v1113_v10 = vld [vmem:[%s7029_s6 + $0x3f8] sm:$0xff] }
 0x149   : > { %1636 = vperm.xlu1 %4228, %v1090_v17   ;;  %v1108_v17 = vld [vmem:[%s7029_s6 + $0x3d0] sm:$0xff] }
 0x14c   : > { %1671 = vperm.xlu0 %4227, %v1097_v44   ;;  %v5083_v44 = vpop.permute.xlu0 %1261 }
 0x14d   : > { %1646 = vperm.xlu1 %4228, %v1092_v46   ;;  %7035 = vst [vmem:[#allocation5_spill] sm:$0xff] %v5083_v44  ;;  %v1110_v46 = vld [vmem:[%s7029_s6 + $0x3e0] sm:$0xff] }
 0x150   : > { %1681 = vperm.xlu0 %4227, %v1099_v49   ;;  %v5088_v49 = vpop.permute.xlu1 %1246 }
 0x151   : > { %1656 = vperm.xlu1 %4228, %v1094_v55   ;;  %7036 = vst [vmem:[#allocation6_spill] sm:$0xff] %v5088_v49  ;;  %v1112_v55 = vld [vmem:[%s7029_s6 + $0x3f0] sm:$0xff] }
 0x154   : > { %1691 = vperm.xlu0 %4227, %v1101_v62   ;;  %v5093_v62 = vpop.permute.xlu1 %1256 }
 0x155   : > { %1666 = vperm.xlu1 %4228, %v1096_v14   ;;  %7037 = vst [vmem:[#allocation7_spill] sm:$0xff] %v5093_v62 }
 0x158   : > { %1701 = vperm.xlu0 %4227, %v1103_v1  }
 0x159   : > { %1676 = vperm.xlu1 %4228, %v1098_v4  }
 0x15c   : > { %1711 = vperm.xlu0 %4227, %v1105_v56  }
 0x15d   : > { %1686 = vperm.xlu1 %4228, %v1100_v6  }
 0x160   : > { %1721 = vperm.xlu0 %4227, %v1107_v18  }
 0x161   : > { %1696 = vperm.xlu1 %4228, %v1102_v19  }
 0x164   : > { %1731 = vperm.xlu0 %4227, %v1109_v24  }
 0x165   : > { %1706 = vperm.xlu1 %4228, %v1104_v27  }
 0x168   : > { %1741 = vperm.xlu0 %4227, %v1111_v30  }
 0x169   : > { %1716 = vperm.xlu1 %4228, %v1106_v2  }
 0x16c   : > { %1751 = vperm.xlu0 %4227, %v1113_v10  }
 0x16d   : > { %1726 = vperm.xlu1 %4228, %v1108_v17  }
 0x171   : > { %1736 = vperm.xlu1 %4228, %v1110_v46  }
 0x175   : > { %1746 = vperm.xlu1 %4228, %v1112_v55  }
 0x1b2   : > { %v4004_v14 = vpop.f32.mrb[0].mxu0 }
 0x1b3   : > { %v780_v1 = vadd.f32 %v4004_v14, %v4824_v31  ;;  %v771_v4 = vpop.f32.mrb[1].mxu0 }
 0x1b4   : > { %v772_v56 = vadd.f32 %v771_v4, %v4805_v25  ;;  %v4005_v57 = vpop.f32.mrb[2].mxu0 }
 0x1b5   : > { %v783_v8 = vadd.f32 %v4005_v57, %v4798_v23  ;;  %v774_v6 = vpop.f32.mrb[3].mxu0  ;;  %v836_v19 = vmax.f32 %v780_v1, 0.0 }
 0x1b6   : > { %v775_v18 = vadd.f32 %v774_v6, %v4780_v16  ;;  %v834_v27 = vmax.f32 %v772_v56, 0.0 }
 0x1b7   : > { %v837_v24 = vmax.f32 %v783_v8, 0.0 }
 0x1b8   : > { %v835_v30 = vmax.f32 %v775_v18, 0.0 }
 0x1b9   : > { %v979_v2 = vpack.c.bf16 %v837_v24, %v836_v19 }
 0x1ba   : > { %v978_v10 = vpack.c.bf16 %v835_v30, %v834_v27  ;;  %v4008_v17 = vpop.f32.mrb[4].mxu0 }
 0x1bb   : > { %v796_v46 = vadd.f32 %v4008_v17, %v4851_v39  ;;  %v787_v55 = vpop.f32.mrb[5].mxu0 }
 0x1bc   : > { %v788_v31 = vadd.f32 %v787_v55, %v4835_v0  ;;  %v4009_v14 = vpop.f32.mrb[6].mxu0  ;;  %4018 = vmatprep.subr.bf16.mxu0 %v978_v10  ;;  %4162 = vmatprep.subr.bf16.mxu1 %v978_v10 }
 0x1bd   : > { %v799_v23 = vadd.f32 %v4009_v14, %v4830_v33  ;;  %v790_v25 = vpop.f32.mrb[7].mxu0  ;;  %4019 = vmatpush3.bf16.msra.mxu0 %v978_v10  ;;  %4170 = vmatpush3.bf16.msra.mxu1 %v978_v10  ;;  %v840_v1 = vmax.f32 %v796_v46, 0.0 }
 0x1be   : > { %v791_v16 = vadd.f32 %v790_v25, %v4816_v28  ;;  %4020 = vmatprep.subr.bf16.mxu0 %v979_v2  ;;  %4163 = vmatprep.subr.bf16.mxu1 %v979_v2  ;;  %v838_v56 = vmax.f32 %v788_v31, 0.0 }
 0x1bf   : > { %v841_v4 = vmax.f32 %v799_v23, 0.0 }
 0x1c0   : > { %v839_v57 = vmax.f32 %v791_v16, 0.0 }
 0x1c1   : > { %v981_v39 = vpack.c.bf16 %v841_v4, %v840_v1  ;;  %4021 = vmatpush3.bf16.msra.mxu0 %v979_v2  ;;  %4171 = vmatpush3.bf16.msra.mxu1 %v979_v2 }
 0x1c2   : > { %v980_v0 = vpack.c.bf16 %v839_v57, %v838_v56  ;;  %v4012_v8 = vpop.f32.mrb[8].mxu0  ;;  %v4241_v57 = vld [vmem:[%s7028_s5 + $0x10] sm:$0xff]  }
 0x1c3   : > { %v812_v6 = vadd.f32 %v4012_v8, %v4877_v48  ;;  %v803_v18 = vpop.f32.mrb[9].mxu0  ;;  %v4244_v8 = vld [vmem:[%s7028_s5 + $0x108] sm:$0xff]  }
 0x1c4   : > { %v804_v33 = vadd.f32 %v803_v18, %v4861_v41  ;;  %v4013_v19 = vpop.f32.mrb[10].mxu0  ;;  %4022 = vmatprep.subr.bf16.mxu0 %v980_v0  ;;  %4164 = vmatprep.subr.bf16.mxu1 %v980_v0  ;;  %v4246_v18 = vld [vmem:[%s7028_s5 + $0x110] sm:$0xff]  }
 0x1c5   : > { %v815_v28 = vadd.f32 %v4013_v19, %v4856_v40  ;;  %v806_v24 = vpop.f32.mrb[11].mxu0  ;;  %4023 = vmatpush3.bf16.msra.mxu0 %v980_v0  ;;  %4172 = vmatpush3.bf16.msra.mxu1 %v980_v0  ;;  %v844_v30 = vmax.f32 %v812_v6, 0.0  ;;  %v4243_v0 = vld [vmem:[%s7028_s5 + $0x18] sm:$0xff]   ;;  %v4245_v6 = vld [vmem:[%s7028_s5 + $0x20] sm:$0xff]  }
 0x1c6   : > { %v807_v27 = vadd.f32 %v806_v24, %v4843_v36  ;;  %4024 = vmatprep.subr.bf16.mxu0 %v981_v39  ;;  %4165 = vmatprep.subr.bf16.mxu1 %v981_v39  ;;  %v842_v10 = vmax.f32 %v804_v33, 0.0  ;;  %v4247_v33 = vld [vmem:[%s7028_s5 + $0x28] sm:$0xff]   ;;  %v4248_v19 = vld [vmem:[%s7028_s5 + $0x118] sm:$0xff]   ;;  %v4250_v24 = vld [vmem:[%s7028_s5 + $0x120] sm:$0xff]  }
 0x1c7   : > { %v845_v2 = vmax.f32 %v815_v28, 0.0  ;;  %v4249_v28 = vld [vmem:[%s7028_s5 + $0x30] sm:$0xff]  }
 0x1c8   : > { %v843_v17 = vmax.f32 %v807_v27, 0.0  ;;  %v4251_v27 = vld [vmem:[%s7028_s5 + $0x38] sm:$0xff]  }
 0x1c9   : > { %v983_v48 = vpack.c.bf16 %v845_v2, %v844_v30  ;;  %4025 = vmatpush3.bf16.msra.mxu0 %v981_v39  ;;  %4173 = vmatpush3.bf16.msra.mxu1 %v981_v39  ;;  %v4242_v39 = vld [vmem:[%s7028_s5 + $0x100] sm:$0xff]   ;;  %v4252_v30 = vld [vmem:[%s7028_s5 + $0x128] sm:$0xff]  }
 0x1ca   : > { %v982_v41 = vpack.c.bf16 %v843_v17, %v842_v10  ;;  %v4016_v46 = vpop.f32.mrb[12].mxu0  ;;  %v4253_v2 = vld [vmem:[%s7028_s5 + $0x40] sm:$0xff]   ;;  %v4254_v10 = vld [vmem:[%s7028_s5 + $0x130] sm:$0xff]   ;;  %v4255_v17 = vld [vmem:[%s7028_s5 + $0x48] sm:$0xff]  }
 0x1cb   : > { %v828_v55 = vadd.f32 %v4016_v46, %v4903_v42  ;;  %v819_v31 = vpop.f32.mrb[13].mxu0  ;;  %v4258_v46 = vld [vmem:[%s7028_s5 + $0x140] sm:$0xff]  }
 0x1cc   : > { %v820_v40 = vadd.f32 %v819_v31, %v4887_v54  ;;  %v4017_v14 = vpop.f32.mrb[14].mxu0  ;;  %4026 = vmatprep.subr.bf16.mxu0 %v982_v41  ;;  %4166 = vmatprep.subr.bf16.mxu1 %v982_v41  ;;  %v5173_v31 = vpop.permute.xlu1 %1266 }
 0x1cd   : > { %v831_v36 = vadd.f32 %v4017_v14, %v4882_v50  ;;  %v822_v23 = vpop.f32.mrb[15].mxu0  ;;  %4027 = vmatpush3.bf16.msra.mxu0 %v982_v41  ;;  %4174 = vmatpush3.bf16.msra.mxu1 %v982_v41  ;;  %v848_v16 = vmax.f32 %v828_v55, 0.0  ;;  %v4240_v50 = vld [vmem:[%s7028_s5 + $0xf8] sm:$0xff]   ;;  %v4257_v41 = vld [vmem:[%s7028_s5 + $0x50] sm:$0xff]   ;;  %v5171_v55 = vpop.permute.xlu0 %1271  ;;  %7039 = vst [vmem:[#allocation9_spill] sm:$0xff] %v5173_v31  ;;  %v4260_v14 = vld [vmem:[%s7028_s5 + $0x148] sm:$0xff]  }
 0x1ce   : > { %v823_v25 = vadd.f32 %v822_v23, %v4869_v45  ;;  %4028 = vmatprep.subr.bf16.mxu0 %v983_v48  ;;  %4167 = vmatprep.subr.bf16.mxu1 %v983_v48  ;;  %v846_v4 = vmax.f32 %v820_v40, 0.0  ;;  %v4239_v45 = vld [vmem:[%s7028_s5 + $0x8] sm:$0xff]   ;;  %7038 = vst [vmem:[#allocation8_spill] sm:$0xff] %v5171_v55  ;;  %v4259_v40 = vld [vmem:[%s7028_s5 + $0x58] sm:$0xff]   ;;  %v4262_v23 = vld [vmem:[%s7028_s5 + $0x150] sm:$0xff]  }
 0x1cf   : > { %v849_v1 = vmax.f32 %v831_v36, 0.0  ;;  %v4261_v36 = vld [vmem:[%s7028_s5 + $0x60] sm:$0xff]  }
 0x1d0   : > { %v847_v56 = vmax.f32 %v823_v25, 0.0 }
 0x1d1   : > { %v985_v42 = vpack.c.bf16 %v849_v1, %v848_v16  ;;  %4029 = vmatpush3.bf16.msra.mxu0 %v983_v48  ;;  %4175 = vmatpush3.bf16.msra.mxu1 %v983_v48  ;;  %v4256_v48 = vld [vmem:[%s7028_s5 + $0x138] sm:$0xff]   ;;  %v5187_v25 = vpop.permute.xlu0 %1281  ;;  %v5189_v16 = vpop.permute.xlu1 %1276  ;;  %v4263_v1 = vld [vmem:[%s7028_s5 + $0x68] sm:$0xff]  }
 0x1d2   : > { %v984_v54 = vpack.c.bf16 %v847_v56, %v846_v4  ;;  %7040 = vst [vmem:[#allocation10_spill] sm:$0xff] %v5187_v25  ;;  %7041 = vst [vmem:[#allocation11_spill] sm:$0xff] %v5189_v16  ;;  %v4264_v4 = vld [vmem:[%s7028_s5 + $0x158] sm:$0xff]   ;;  %v4265_v56 = vld [vmem:[%s7028_s5 + $0x70] sm:$0xff]   ;;  %v7073_v25 = vlaneseq }
 0x1d4   : > { %4030 = vmatprep.subr.bf16.mxu0 %v984_v54  ;;  %4168 = vmatprep.subr.bf16.mxu1 %v984_v54  ;;  %v2814_v16 = vand.u32 127, %v7073_v25 }
 0x1d5   : > { %4031 = vmatpush3.bf16.msra.mxu0 %v984_v54  ;;  %4176 = vmatpush3.bf16.msra.mxu1 %v984_v54  ;;  %v5203_v54 = vpop.permute.xlu0 %1291 }
 0x1d6   : > { %4032 = vmatprep.subr.bf16.mxu0 %v985_v42  ;;  %4169 = vmatprep.subr.bf16.mxu1 %v985_v42  ;;  %7042 = vst [vmem:[#allocation12_spill] sm:$0xff] %v5203_v54  ;;  %v2815_v54 = vstv %s3907_s20 }
 0x1d9   : > { %4033 = vmatpush3.bf16.msra.mxu0 %v985_v42  ;;  %4177 = vmatpush3.bf16.msra.mxu1 %v985_v42  ;;  %v4266_v42 = vld [vmem:[%s7028_s5 + $0x160] sm:$0xff]  }
 0x1dc   : > { %4035 = vmatmul.mubr.bf16.vlgmr.msra.gmra.mrb[16].mxu0 %v4239_v45  ;;  %4095 = vmatmul.mubr.bf16.vlgmr.msra.gmra.mrb[0].mxu1 %v4240_v50  ;;  %v5205_v45 = vpop.permute.xlu1 %1286  ;;  %v4267_v50 = vld [vmem:[%s7028_s5 + $0x78] sm:$0xff]  }
 0x1dd   : > { %4038 = vmatprep.mubr.bf16.mxu0 %v4241_v57  ;;  %4098 = vmatprep.mubr.bf16.mxu1 %v4242_v39  ;;  %7043 = vst [vmem:[#allocation13_spill] sm:$0xff] %v5205_v45  ;;  %v4268_v57 = vld [vmem:[%s7028_s5 + $0x168] sm:$0xff]   ;;  %v4269_v39 = vld [vmem:[%s7028_s5 + $0x80] sm:$0xff]   ;;  %v5409_v45 = vadd.s32 %v2815_v54, %v2814_v16 }
 0x1df   : > { %vm2817_vm1 = vcmp.lt.s32.totalorder %v5409_v45, 16 }
 0x1e4   : > { %4039 = vmatmul.mubr.bf16.gmra.mrb[20].mxu0 %v4243_v0  ;;  %4099 = vmatmul.mubr.bf16.gmra.mrb[4].mxu1 %v4244_v8  ;;  %v4270_v0 = vld [vmem:[%s7028_s5 + $0x170] sm:$0xff]   ;;  %v5219_v8 = vpop.permute.xlu0 %1301 }
 0x1e5   : > { %4042 = vmatprep.mubr.bf16.mxu0 %v4245_v6  ;;  %4102 = vmatprep.mubr.bf16.mxu1 %v4246_v18  ;;  %7044 = vst [vmem:[#allocation14_spill] sm:$0xff] %v5219_v8  ;;  %v5221_v6 = vpop.permute.xlu1 %1296 }
 0x1e6   : > { %7045 = vst [vmem:[#allocation15_spill] sm:$0xff] %v5221_v6 }
 0x1e8   : > { %v5223_v18 = vpop.permute.xlu0 %1311 }
 0x1e9   : > { %7046 = vst [vmem:[#allocation16_spill] sm:$0xff] %v5223_v18 }
 0x1ec   : > { %4043 = vmatmul.mubr.bf16.gmra.mrb[24].mxu0 %v4247_v33  ;;  %4103 = vmatmul.mubr.bf16.gmra.mrb[8].mxu1 %v4248_v19  ;;  %v5225_v33 = vpop.permute.xlu1 %1306  ;;  %v4271_v19 = vld [vmem:[%s7028_s5 + $0x88] sm:$0xff]  }
 0x1ed   : > { %4046 = vmatprep.mubr.bf16.mxu0 %v4249_v28  ;;  %4106 = vmatprep.mubr.bf16.mxu1 %v4250_v24  ;;  %7047 = vst [vmem:[#allocation17_spill] sm:$0xff] %v5225_v33  ;;  %v4272_v28 = vld [vmem:[%s7028_s5 + $0x178] sm:$0xff]   ;;  %v4273_v24 = vld [vmem:[%s7028_s5 + $0x90] sm:$0xff]  }
 0x1f4   : > { %4047 = vmatmul.mubr.bf16.gmra.mrb[28].mxu0 %v4251_v27  ;;  %4107 = vmatmul.mubr.bf16.gmra.mrb[12].mxu1 %v4252_v30  ;;  %v4274_v27 = vld [vmem:[%s7028_s5 + $0x180] sm:$0xff]   ;;  %v5239_v30 = vpop.permute.xlu0 %1321 }
 0x1f5   : > { %4050 = vmatprep.mubr.bf16.mxu0 %v4253_v2  ;;  %4110 = vmatprep.mubr.bf16.mxu1 %v4254_v10  ;;  %7048 = vst [vmem:[#allocation18_spill] sm:$0xff] %v5239_v30  ;;  %v5241_v2 = vpop.permute.xlu1 %1316  ;;  %v4275_v10 = vld [vmem:[%s7028_s5 + $0x98] sm:$0xff]  }
 0x1f6   : > { %7049 = vst [vmem:[#allocation19_spill] sm:$0xff] %v5241_v2 }
 0x1fc   : > { %4051 = vmatmul.mubr.bf16.gmra.mrb[32].mxu0 %v4255_v17  ;;  %4111 = vmatmul.mubr.bf16.gmra.mrb[16].mxu1 %v4256_v48  ;;  %v4276_v17 = vld [vmem:[%s7028_s5 + $0x188] sm:$0xff]   ;;  %v4277_v48 = vld [vmem:[%s7028_s5 + $0xa0] sm:$0xff]  }
 0x1fd   : > { %4054 = vmatprep.mubr.bf16.mxu0 %v4257_v41  ;;  %4114 = vmatprep.mubr.bf16.mxu1 %v4258_v46  ;;  %v4278_v41 = vld [vmem:[%s7028_s5 + $0x190] sm:$0xff]   ;;  %v5255_v46 = vpop.permute.xlu0 %1331 }
 0x1fe   : > { %7050 = vst [vmem:[#allocation20_spill] sm:$0xff] %v5255_v46 }
 0x204   : > { %4055 = vmatmul.mubr.bf16.gmra.mrb[36].mxu0 %v4259_v40  ;;  %4115 = vmatmul.mubr.bf16.gmra.mrb[20].mxu1 %v4260_v14  ;;  %v5257_v40 = vpop.permute.xlu1 %1326  ;;  %v4279_v14 = vld [vmem:[%s7028_s5 + $0xa8] sm:$0xff]  }
 0x205   : > { %4058 = vmatprep.mubr.bf16.mxu0 %v4261_v36  ;;  %4118 = vmatprep.mubr.bf16.mxu1 %v4262_v23  ;;  %7051 = vst [vmem:[#allocation21_spill] sm:$0xff] %v5257_v40  ;;  %v4280_v36 = vld [vmem:[%s7028_s5 + $0x198] sm:$0xff]   ;;  %v4281_v23 = vld [vmem:[%s7028_s5 + $0xb0] sm:$0xff]  }
 0x20c   : > { %4059 = vmatmul.mubr.bf16.gmra.mrb[40].mxu0 %v4263_v1  ;;  %4119 = vmatmul.mubr.bf16.gmra.mrb[24].mxu1 %v4264_v4  ;;  %v4282_v1 = vld [vmem:[%s7028_s5 + $0x1a0] sm:$0xff]   ;;  %v5271_v4 = vpop.permute.xlu0 %1341 }
 0x20d   : > { %4062 = vmatprep.mubr.bf16.mxu0 %v4265_v56  ;;  %4122 = vmatprep.mubr.bf16.mxu1 %v4266_v42  ;;  %7052 = vst [vmem:[#allocation22_spill] sm:$0xff] %v5271_v4  ;;  %v5273_v56 = vpop.permute.xlu1 %1336 }
 0x20e   : > { %7053 = vst [vmem:[#allocation23_spill] sm:$0xff] %v5273_v56 }
 0x210   : > { %v5275_v42 = vpop.permute.xlu0 %1351 }
 0x211   : > { %7054 = vst [vmem:[#allocation24_spill] sm:$0xff] %v5275_v42 }
 0x214   : > { %4063 = vmatmul.mubr.bf16.gmra.mrb[44].mxu0 %v4267_v50  ;;  %4123 = vmatmul.mubr.bf16.gmra.mrb[28].mxu1 %v4268_v57  ;;  %v5277_v50 = vpop.permute.xlu1 %1346  ;;  %v4283_v57 = vld [vmem:[%s7028_s5 + $0xb8] sm:$0xff]  }
 0x215   : > { %4066 = vmatprep.mubr.bf16.mxu0 %v4269_v39  ;;  %4126 = vmatprep.mubr.bf16.mxu1 %v4270_v0  ;;  %7055 = vst [vmem:[#allocation25_spill] sm:$0xff] %v5277_v50  ;;  %v4284_v39 = vld [vmem:[%s7028_s5 + $0x1a8] sm:$0xff]   ;;  %v4285_v0 = vld [vmem:[%s7028_s5 + $0xc0] sm:$0xff]  }
 0x21c   : > { %4067 = vmatmul.mubr.bf16.gmra.mrb[48].mxu0 %v4271_v19  ;;  %4127 = vmatmul.mubr.bf16.gmra.mrb[32].mxu1 %v4272_v28  ;;  %v4286_v19 = vld [vmem:[%s7028_s5 + $0x1b0] sm:$0xff]   ;;  %v5291_v28 = vpop.permute.xlu0 %1361 }
 0x21d   : > { %4070 = vmatprep.mubr.bf16.mxu0 %v4273_v24  ;;  %4130 = vmatprep.mubr.bf16.mxu1 %v4274_v27  ;;  %7056 = vst [vmem:[#allocation26_spill] sm:$0xff] %v5291_v28  ;;  %v5293_v24 = vpop.permute.xlu1 %1356  ;;  %v4287_v27 = vld [vmem:[%s7028_s5 + $0xc8] sm:$0xff]  }
 0x21e   : > { %7057 = vst [vmem:[#allocation27_spill] sm:$0xff] %v5293_v24 }
 0x224   : > { %4071 = vmatmul.mubr.bf16.gmra.mrb[52].mxu0 %v4275_v10  ;;  %4131 = vmatmul.mubr.bf16.gmra.mrb[36].mxu1 %v4276_v17  ;;  %v4288_v10 = vld [vmem:[%s7028_s5 + $0x1b8] sm:$0xff]   ;;  %v4289_v17 = vld [vmem:[%s7028_s5 + $0xd0] sm:$0xff]  }
 0x225   : > { %4074 = vmatprep.mubr.bf16.mxu0 %v4277_v48  ;;  %4134 = vmatprep.mubr.bf16.mxu1 %v4278_v41  ;;  %v4290_v48 = vld [vmem:[%s7028_s5 + $0x1c0] sm:$0xff]   ;;  %v5307_v41 = vpop.permute.xlu0 %1371 }
 0x226   : > { %7058 = vst [vmem:[#allocation28_spill] sm:$0xff] %v5307_v41 }
 0x22c   : > { %4075 = vmatmul.mubr.bf16.gmra.mrb[56].mxu0 %v4279_v14  ;;  %4135 = vmatmul.mubr.bf16.gmra.mrb[40].mxu1 %v4280_v36  ;;  %v5309_v14 = vpop.permute.xlu1 %1366  ;;  %v4291_v36 = vld [vmem:[%s7028_s5 + $0xd8] sm:$0xff]  }
 0x22d   : > { %4078 = vmatprep.mubr.bf16.mxu0 %v4281_v23  ;;  %4138 = vmatprep.mubr.bf16.mxu1 %v4282_v1  ;;  %7059 = vst [vmem:[#allocation29_spill] sm:$0xff] %v5309_v14  ;;  %v4292_v23 = vld [vmem:[%s7028_s5 + $0x1c8] sm:$0xff]   ;;  %v4293_v1 = vld [vmem:[%s7028_s5 + $0xe0] sm:$0xff]  }
 0x234   : > { %4079 = vmatmul.mubr.bf16.gmra.mrb[60].mxu0 %v4283_v57  ;;  %4139 = vmatmul.mubr.bf16.gmra.mrb[44].mxu1 %v4284_v39  ;;  %v4294_v57 = vld [vmem:[%s7028_s5 + $0x1d0] sm:$0xff]   ;;  %v5323_v39 = vpop.permute.xlu0 %1381 }
 0x235   : > { %4082 = vmatprep.mubr.bf16.mxu0 %v4285_v0  ;;  %4142 = vmatprep.mubr.bf16.mxu1 %v4286_v19  ;;  %7060 = vst [vmem:[#allocation30_spill] sm:$0xff] %v5323_v39  ;;  %v5325_v0 = vpop.permute.xlu1 %1376 }
 0x236   : > { %7061 = vst [vmem:[#allocation31_spill] sm:$0xff] %v5325_v0 }
 0x238   : > { %v5327_v19 = vpop.permute.xlu0 %1391 }
 0x239   : > { %7062 = vst [vmem:[#allocation32_spill] sm:$0xff] %v5327_v19 }
 0x23c   : > { %4083 = vmatmul.mubr.bf16.gmra.mrb[64].mxu0 %v4287_v27  ;;  %4143 = vmatmul.mubr.bf16.gmra.mrb[48].mxu1 %v4288_v10  ;;  %v5329_v27 = vpop.permute.xlu1 %1386  ;;  %v4295_v10 = vld [vmem:[%s7028_s5 + $0xe8] sm:$0xff]  }
 0x23d   : > { %4086 = vmatprep.mubr.bf16.mxu0 %v4289_v17  ;;  %4146 = vmatprep.mubr.bf16.mxu1 %v4290_v48  ;;  %7063 = vst [vmem:[#allocation33_spill] sm:$0xff] %v5329_v27  ;;  %v4296_v17 = vld [vmem:[%s7028_s5 + $0x1d8] sm:$0xff]   ;;  %v4297_v48 = vld [vmem:[%s7028_s5 + $0x1e0] sm:$0xff]  }
 0x244   : > { %4087 = vmatmul.mubr.bf16.gmra.mrb[68].mxu0 %v4291_v36  ;;  %4147 = vmatmul.mubr.bf16.gmra.mrb[52].mxu1 %v4292_v23  ;;  %v5340_v36 = vpop.permute.xlu0 %1401  ;;  %v5342_v23 = vpop.permute.xlu1 %1396 }
 0x245   : > { %4090 = vmatprep.mubr.bf16.mxu0 %v4293_v1  ;;  %4150 = vmatprep.mubr.bf16.mxu1 %v4294_v57  ;;  %7064 = vst [vmem:[#allocation34_spill] sm:$0xff] %v5340_v36  ;;  %7065 = vst [vmem:[#allocation35_spill] sm:$0xff] %v5342_v23  ;;  %v4298_v1 = vld [vmem:[%s7028_s5 + $0x1e8] sm:$0xff]   ;;  %v4299_v57 = vld [vmem:[%s7028_s5 + $0x1f0] sm:$0xff]  }
 0x248   : > { %v5350_v20 = vpop.permute.xlu0 %1411  ;;  %v5352_v39 = vpop.permute.xlu1 %1406 }
 0x249   : > { %7066 = vst [vmem:[#allocation36_spill] sm:$0xff] %v5350_v20  ;;  %7067 = vst [vmem:[#allocation37_spill] sm:$0xff] %v5352_v39 }
 0x24c   : > { %4091 = vmatmul.mubr.bf16.gmra.mrb[72].mxu0 %v4295_v10  ;;  %4151 = vmatmul.mubr.bf16.gmra.mrb[56].mxu1 %v4296_v17  ;;  %v4300_v10 = vld [vmem:[%s7028_s5 + $0x1f8] sm:$0xff]   ;;  %v5357_v17 = vpop.permute.xlu0 %1421 }
 0x24d   : > { %4154 = vmatprep.mubr.bf16.mxu1 %v4297_v48  ;;  %v1417_v48 = vpop.permute.xlu1 %1416 }
 0x250   : > { %v1432_v36 = vpop.permute.xlu0 %1431 }
 0x251   : > { %v1427_v23 = vpop.permute.xlu1 %1426 }
 0x254   : > { %4155 = vmatmul.mubr.bf16.gmra.mrb[60].mxu1 %v4298_v1  ;;  %v5359_v0 = vpop.permute.xlu0 %1441 }
 0x255   : > { %4158 = vmatprep.mubr.bf16.mxu1 %v4299_v57  ;;  %v5361_v19 = vpop.permute.xlu1 %1436 }
 0x258   : > { %v5363_v27 = vpop.permute.xlu0 %1451 }
 0x259   : > { %v5365_v20 = vpop.permute.xlu1 %1446 }
 0x25c   : > { %4159 = vmatmul.mubr.bf16.gmra.mrb[64].mxu1 %v4300_v10  ;;  %v5367_v1 = vpop.permute.xlu0 %1461 }
 0x25d   : > { %v5369_v57 = vpop.permute.xlu1 %1456 }
 0x260   : > { %v5371_v39 = vpop.permute.xlu0 %1471 }
 0x261   : > { %v5373_v28 = vpop.permute.xlu1 %1466 }
 0x264   : > { %v5375_v10 = vpop.permute.xlu0 %1481 }
 0x265   : > { %v5377_v24 = vpop.permute.xlu1 %1476 }
 0x268   : > { %v5379_v41 = vpop.permute.xlu0 %1491 }
 0x269   : > { %v5381_v14 = vpop.permute.xlu1 %1486 }
 0x26c   : > { %v5383_v4 = vpop.permute.xlu0 %1501 }
 0x26d   : > { %v5385_v56 = vpop.permute.xlu1 %1496 }
 0x270   : > { %v5387_v42 = vpop.permute.xlu0 %1511 }
 0x271   : > { %v5389_v50 = vpop.permute.xlu1 %1506 }
 0x274   : > { %v5391_v30 = vpop.permute.xlu0 %1521 }
 0x275   : > { %7068 = vst [vmem:[#allocation38_spill] sm:$0xff] %v5391_v30  ;;  %v5393_v2 = vpop.permute.xlu1 %1516 }
 0x278   : > { %v5395_v46 = vpop.permute.xlu0 %1531 }
 0x279   : > { %v5397_v40 = vpop.permute.xlu1 %1526 }
 0x27c   : > { %v5399_v8 = vpop.permute.xlu0 %1541 }
 0x27d   : > { %7069 = vst [vmem:[#allocation39_spill] sm:$0xff] %v5399_v8  ;;  %v5401_v6 = vpop.permute.xlu1 %1536 }
 0x27e   : > { %7070 = vst [vmem:[#allocation40_spill] sm:$0xff] %v5401_v6 }
 0x280   : > { %v5404_v18 = vpop.permute.xlu0 %1551 }
 0x281   : > { %7071 = vst [vmem:[#allocation41_spill] sm:$0xff] %v5404_v18  ;;  %v5406_v33 = vpop.permute.xlu1 %1546 }
 0x282   : > { %7072 = vst [vmem:[#allocation42_spill] sm:$0xff] %v5406_v33 }
 0x284   : > { %v5411_v44 = vpop.permute.xlu0 %1561 }
 0x285   : > { %7074 = vst [vmem:[#allocation43_spill] sm:$0xff] %v5411_v44  ;;  %v5413_v62 = vpop.permute.xlu1 %1556 }
 0x286   : > { %7075 = vst [vmem:[#allocation44_spill] sm:$0xff] %v5413_v62 }
 0x2af   : > { %v4036_v55 = vpop.f32.mrb[16].mxu0  ;;  %v4096_v31 = vpop.f32.mrb[0].mxu1 }
 0x2b0   : > { %v2181_v8 = vadd.f32 %v4036_v55, %v4929_v60  ;;  %v2421_v52 = vadd.f32 %v4096_v31, %v1427_v23  ;;  %v2172_v6 = vpop.f32.mrb[17].mxu0  ;;  %v2412_v37 = vpop.f32.mrb[1].mxu1 }
 0x2b1   : > { %v2173_v18 = vadd.f32 %v2172_v6, %v4913_v3  ;;  %v4037_v33 = vpop.f32.mrb[18].mxu0  ;;  %v4097_v25 = vpop.f32.mrb[2].mxu1  ;;  %v2413_v30 = vadd.f32 %v2412_v37, %v1417_v48 }
 0x2b2   : > { %v2685_v32 = vmax.f32 %v2181_v8, 0.0  ;;  %v2184_v16 = vadd.f32 %v4037_v33, %v4908_v63  ;;  %v2175_v54 = vpop.f32.mrb[19].mxu0  ;;  %v2415_v44 = vpop.f32.mrb[3].mxu1  ;;  %v2745_v62 = vmax.f32 %v2421_v52, 0.0  ;;  %v2424_v31 = vadd.f32 %v4097_v25, %v1432_v36 }
 0x2b3   : > { %v2683_v49 = vmax.f32 %v2173_v18, 0.0  ;;  %v5423_v6 = vpop.permute.xlu0 %1571  ;;  %v5425_v8 = vpop.permute.xlu1 %1566  ;;  %v2743_v52 = vmax.f32 %v2413_v30, 0.0  ;;  %v5430_v37 = vadd.f32 %v2175_v54, %v4895_v59  ;;  %v5440_v23 = vadd.f32 %v2415_v44, %v5357_v17 }
 0x2b4   : > { %v2822_v60 = vsel %vm2817_vm1, %v2685_v32, -inf  ;;  %v2686_v55 = vmax.f32 %v2184_v16, 0.0  ;;  %7076 = vst [vmem:[#allocation45_spill] sm:$0xff] %v5423_v6  ;;  %v2882_v36 = vsel %vm2817_vm1, %v2745_v62, -inf }
 0x2b5   : > { %2952 = vmax.xlane.f32.xlu0 %v2822_v60  ;;  %v2820_v3 = vsel %vm2817_vm1, %v2683_v49, -inf  ;;  %v2746_v49 = vmax.f32 %v2424_v31, 0.0  ;;  %v2684_v44 = vmax.f32 %v5430_v37, 0.0  ;;  %v2880_v17 = vsel %vm2817_vm1, %v2743_v52, -inf }
 0x2b6   : > { %2948 = vmax.xlane.f32.xlu1 %v2820_v3  ;;  %v2823_v59 = vsel %vm2817_vm1, %v2686_v55, -inf }
 0x2b7   : > { %v4040_v63 = vpop.f32.mrb[20].mxu0  ;;  %v5427_v33 = vpop.f32.mrb[4].mxu1  ;;  %v2883_v55 = vsel %vm2817_vm1, %v2746_v49, -inf }
 0x2b8   : > { %v5432_v18 = vpop.f32.mrb[21].mxu0  ;;  %v5434_v32 = vpop.f32.mrb[5].mxu1  ;;  %v5457_v62 = vadd.f32 %v4040_v63, %v4955_v21  ;;  %v4344_v63 = vmov -inf  }
 0x2b9   : > { %v5442_v48 = vpop.f32.mrb[6].mxu1  ;;  %3072 = vmax.xlane.f32.xlu0 %v2882_v36  ;;  %v4041_v25 = vpop.f32.mrb[22].mxu0  ;;  %3211 = vst.msk [vmem:[%s5453_s19 + $0x10] sm:$0xff] %vm3208_vm2, %v4344_v63  ;;  %3209 = vst.msk [vmem:[%s5453_s19] sm:$0xff] %vm3208_vm2, %v4344_v63  ;;  %v2437_v36 = vadd.f32 %v5427_v33, %v5365_v20 }
 0x2ba   : > { %v5446_v30 = vpop.f32.mrb[23].mxu0  ;;  %v5448_v16 = vpop.f32.mrb[7].mxu1  ;;  %2954 = vmax.xlane.f32.xlu1 %v2823_v59  ;;  %v5463_v60 = vadd.f32 %v4041_v25, %v4934_v61  ;;  %3210 = vst.msk [vmem:[%s5453_s19 + $0x8] sm:$0xff] %vm3208_vm2, %v4344_v63  ;;  %3212 = vst.msk [vmem:[%s5453_s19 + $0x18] sm:$0xff] %vm3208_vm2, %v4344_v63  ;;  %v2689_v52 = vmax.f32 %v5457_v62, 0.0  ;;  %v2821_v59 = vsel %vm2817_vm1, %v2684_v44, -inf  ;;  %v2189_v44 = vadd.f32 %v5432_v18, %v4939_v11 }
 0x2bb   : > { %v5467_v21 = vpop.permute.xlu0 %1581  ;;  %v5469_v31 = vpop.permute.xlu1 %1576  ;;  %3213 = vst.msk [vmem:[%s5453_s19 + $0x20] sm:$0xff] %vm3208_vm2, %v4344_v63  ;;  %3214 = vst.msk [vmem:[%s5453_s19 + $0x28] sm:$0xff] %vm3208_vm2, %v4344_v63  ;;  %v7077_v62 = vmax.f32 %v5440_v23, 0.0  ;;  %v2749_v37 = vmax.f32 %v2437_v36, 0.0  ;;  %v2429_v18 = vadd.f32 %v5434_v32, %v5361_v19 }
 0x2bc   : > { %3215 = vst.msk [vmem:[%s5453_s19 + $0x30] sm:$0xff] %vm3208_vm2, %v4344_v63  ;;  %3216 = vst.msk [vmem:[%s5453_s19 + $0x38] sm:$0xff] %vm3208_vm2, %v4344_v63  ;;  %v2687_v11 = vmax.f32 %v2189_v44, 0.0 }
 0x2bd   : > { %3068 = vmax.xlane.f32.xlu0 %v2880_v17  ;;  %3217 = vst.msk [vmem:[%s5453_s19 + $0x40] sm:$0xff] %vm3208_vm2, %v4344_v63  ;;  %3218 = vst.msk [vmem:[%s5453_s19 + $0x48] sm:$0xff] %vm3208_vm2, %v4344_v63  ;;  %v2440_v17 = vadd.f32 %v5442_v48, %v5363_v27  ;;  %v2881_v20 = vsel %vm2817_vm1, %v7077_v62, -inf  ;;  %v2826_v27 = vsel %vm2817_vm1, %v2689_v52, -inf }
 0x2be   : > { %3074 = vmax.xlane.f32.xlu1 %v2883_v55  ;;  %3219 = vst.msk [vmem:[%s5453_s19 + $0x50] sm:$0xff] %vm3208_vm2, %v4344_v63  ;;  %3220 = vst.msk [vmem:[%s5453_s19 + $0x58] sm:$0xff] %vm3208_vm2, %v4344_v63  ;;  %v2690_v55 = vmax.f32 %v5463_v60, 0.0  ;;  %v2192_v60 = vadd.f32 %v5446_v30, %v4921_v7  ;;  %v2886_v30 = vsel %vm2817_vm1, %v2749_v37, -inf }
 0x2bf   : > { %v5471_v3 = vpop.f32.mrb[24].mxu0  ;;  %v5473_v61 = vpop.f32.mrb[8].mxu1  ;;  %3221 = vst.msk [vmem:[%s5453_s19 + $0x60] sm:$0xff] %vm3208_vm2, %v4344_v63  ;;  %3222 = vst.msk [vmem:[%s5453_s19 + $0x68] sm:$0xff] %vm3208_vm2, %v4344_v63  ;;  %v2750_v48 = vmax.f32 %v2440_v17, 0.0 }
 0x2c0   : > { %3223 = vst.msk [vmem:[%s5453_s19 + $0x70] sm:$0xff] %vm3208_vm2, %v4344_v63  ;;  %3224 = vst.msk [vmem:[%s5453_s19 + $0x78] sm:$0xff] %vm3208_vm2, %v4344_v63  ;;  %v5862_v49 = vpop.f32.mrb[25].mxu0  ;;  %v5864_v25 = vpop.f32.mrb[9].mxu1  ;;  %v2827_v23 = vsel %vm2817_vm1, %v2690_v55, -inf  ;;  %v2688_v17 = vmax.f32 %v2192_v60, 0.0  ;;  %v2432_v55 = vadd.f32 %v5448_v16, %v5359_v0  ;;  %v2213_v37 = vadd.f32 %v5471_v3, %v4981_v34 }
 0x2c1   : > { %3225 = vst.msk [vmem:[%s5453_s19 + $0x80] sm:$0xff] %vm3208_vm2, %v4344_v63  ;;  %3226 = vst.msk [vmem:[%s5453_s19 + $0x88] sm:$0xff] %vm3208_vm2, %v4344_v63  ;;  %v4105_v54 = vpop.f32.mrb[10].mxu1  ;;  %2950 = vmax.xlane.f32.xlu0 %v2821_v59  ;;  %v5887_v59 = vpop.permute.xlu0 %1591  ;;  %v2887_v44 = vsel %vm2817_vm1, %v2750_v48, -inf  ;;  %v2824_v0 = vsel %vm2817_vm1, %v2687_v11, -inf  ;;  %v2453_v3 = vadd.f32 %v5473_v61, %v5373_v28 }
 0x2c2   : > { %3227 = vst.msk [vmem:[%s5453_s19 + $0x90] sm:$0xff] %vm3208_vm2, %v4344_v63  ;;  %3228 = vst.msk [vmem:[%s5453_s19 + $0x98] sm:$0xff] %vm3208_vm2, %v4344_v63  ;;  %v5877_v6 = vpop.f32.mrb[11].mxu1  ;;  %3070 = vmax.xlane.f32.xlu1 %v2881_v20  ;;  %v5889_v62 = vpop.permute.xlu1 %1586  ;;  %v2748_v16 = vmax.f32 %v2432_v55, 0.0  ;;  %v2693_v34 = vmax.f32 %v2213_v37, 0.0  ;;  %v2456_v55 = vadd.f32 %v4105_v54, %v5371_v39 }
 0x2c3   : > { %3229 = vst.msk [vmem:[%s5453_s19 + $0xa0] sm:$0xff] %vm3208_vm2, %v4344_v63  ;;  %3230 = vst.msk [vmem:[%s5453_s19 + $0xa8] sm:$0xff] %vm3208_vm2, %v4344_v63  ;;  %v2753_v61 = vmax.f32 %v2453_v3, 0.0 }
 0x2c4   : > { %3231 = vst.msk [vmem:[%s5453_s19 + $0xb0] sm:$0xff] %vm3208_vm2, %v4344_v63  ;;  %3232 = vst.msk [vmem:[%s5453_s19 + $0xb8] sm:$0xff] %vm3208_vm2, %v4344_v63  ;;  %v2885_v37 = vsel %vm2817_vm1, %v2748_v16, -inf  ;;  %v2830_v39 = vsel %vm2817_vm1, %v2693_v34, -inf  ;;  %v2754_v54 = vmax.f32 %v2456_v55, 0.0  ;;  %v2448_v55 = vadd.f32 %v5877_v6, %v5367_v1 }
 0x2c5   : > { %3233 = vst.msk [vmem:[%s5453_s19 + $0xc0] sm:$0xff] %vm3208_vm2, %v4344_v63  ;;  %3234 = vst.msk [vmem:[%s5453_s19 + $0xc8] sm:$0xff] %vm3208_vm2, %v4344_v63  ;;  %2960 = vmax.xlane.f32.xlu0 %v2826_v27  ;;  %v5922_v48 = vpop.permute.xlu0 %1601 }
 0x2c6   : > { %3235 = vst.msk [vmem:[%s5453_s19 + $0xd0] sm:$0xff] %vm3208_vm2, %v4344_v63  ;;  %3236 = vst.msk [vmem:[%s5453_s19 + $0xd8] sm:$0xff] %vm3208_vm2, %v4344_v63  ;;  %2962 = vmax.xlane.f32.xlu1 %v2827_v23  ;;  %v2752_v6 = vmax.f32 %v2448_v55, 0.0 }
 0x2c7   : > { %3237 = vst.msk [vmem:[%s5453_s19 + $0xe0] sm:$0xff] %vm3208_vm2, %v4344_v63  ;;  %3238 = vst.msk [vmem:[%s5453_s19 + $0xe8] sm:$0xff] %vm3208_vm2, %v4344_v63  ;;  %v5893_v20 = vpop.f32.mrb[12].mxu1 }
 0x2c8   : > { %3239 = vst.msk [vmem:[%s5453_s19 + $0xf0] sm:$0xff] %vm3208_vm2, %v4344_v63  ;;  %3240 = vst.msk [vmem:[%s5453_s19 + $0xf8] sm:$0xff] %vm3208_vm2, %v4344_v63  ;;  %v5899_v7 = vpop.f32.mrb[13].mxu1 }
 0x2c9   : > { %3241 = vst.msk [vmem:[%s5453_s19 + $0x100] sm:$0xff] %vm3208_vm2, %v4344_v63  ;;  %3242 = vst.msk [vmem:[%s5453_s19 + $0x108] sm:$0xff] %vm3208_vm2, %v4344_v63  ;;  %v5907_v23 = vpop.f32.mrb[14].mxu1  ;;  %3080 = vmax.xlane.f32.xlu0 %v2886_v30  ;;  %v2825_v30 = vsel %vm2817_vm1, %v2688_v17, -inf  ;;  %v5956_v16 = vpop.permute.xlu0 %1611 }
 0x2ca   : > { %3243 = vst.msk [vmem:[%s5453_s19 + $0x110] sm:$0xff] %vm3208_vm2, %v4344_v63  ;;  %3244 = vst.msk [vmem:[%s5453_s19 + $0x118] sm:$0xff] %vm3208_vm2, %v4344_v63  ;;  %v5913_v32 = vpop.f32.mrb[15].mxu1  ;;  %3082 = vmax.xlane.f32.xlu1 %v2887_v44  ;;  %v2472_v55 = vadd.f32 %v5907_v23, %v5379_v41 }
 0x2cb   : > { %3245 = vst.msk [vmem:[%s5453_s19 + $0x120] sm:$0xff] %vm3208_vm2, %v4344_v63  ;;  %3246 = vst.msk [vmem:[%s5453_s19 + $0x128] sm:$0xff] %vm3208_vm2, %v4344_v63 }
 0x2cc   : > { %3247 = vst.msk [vmem:[%s5453_s19 + $0x130] sm:$0xff] %vm3208_vm2, %v4344_v63  ;;  %3248 = vst.msk [vmem:[%s5453_s19 + $0x138] sm:$0xff] %vm3208_vm2, %v4344_v63  ;;  %v2758_v23 = vmax.f32 %v2472_v55, 0.0  ;;  %v2464_v55 = vadd.f32 %v5913_v32, %v5375_v10 }
 0x2cd   : > { %3249 = vst.msk [vmem:[%s5453_s19 + $0x140] sm:$0xff] %vm3208_vm2, %v4344_v63  ;;  %3250 = vst.msk [vmem:[%s5453_s19 + $0x148] sm:$0xff] %vm3208_vm2, %v4344_v63  ;;  %2956 = vmax.xlane.f32.xlu0 %v2824_v0 }
 0x2ce   : > { %3251 = vst.msk [vmem:[%s5453_s19 + $0x150] sm:$0xff] %vm3208_vm2, %v4344_v63  ;;  %3252 = vst.msk [vmem:[%s5453_s19 + $0x158] sm:$0xff] %vm3208_vm2, %v4344_v63  ;;  %2958 = vmax.xlane.f32.xlu1 %v2825_v30  ;;  %v2756_v32 = vmax.f32 %v2464_v55, 0.0 }
 0x2cf   : > { %3253 = vst.msk [vmem:[%s5453_s19 + $0x160] sm:$0xff] %vm3208_vm2, %v4344_v63  ;;  %3254 = vst.msk [vmem:[%s5453_s19 + $0x168] sm:$0xff] %vm3208_vm2, %v4344_v63 }
 0x2d0   : > { %3255 = vst.msk [vmem:[%s5453_s19 + $0x170] sm:$0xff] %vm3208_vm2, %v4344_v63  ;;  %3256 = vst.msk [vmem:[%s5453_s19 + $0x178] sm:$0xff] %vm3208_vm2, %v4344_v63 }
 0x2d1   : > { %3257 = vst.msk [vmem:[%s5453_s19 + $0x180] sm:$0xff] %vm3208_vm2, %v4344_v63  ;;  %3258 = vst.msk [vmem:[%s5453_s19 + $0x188] sm:$0xff] %vm3208_vm2, %v4344_v63 }
 0x2d2   : > { %3259 = vst.msk [vmem:[%s5453_s19 + $0x190] sm:$0xff] %vm3208_vm2, %v4344_v63  ;;  %3260 = vst.msk [vmem:[%s5453_s19 + $0x198] sm:$0xff] %vm3208_vm2, %v4344_v63  ;;  %3078 = vmax.xlane.f32.xlu1 %v2885_v37 }
 0x2d3   : > { %3261 = vst.msk [vmem:[%s5453_s19 + $0x1a0] sm:$0xff] %vm3208_vm2, %v4344_v63  ;;  %3262 = vst.msk [vmem:[%s5453_s19 + $0x1a8] sm:$0xff] %vm3208_vm2, %v4344_v63 }
 0x2d4   : > { %3263 = vst.msk [vmem:[%s5453_s19 + $0x1b0] sm:$0xff] %vm3208_vm2, %v4344_v63  ;;  %3264 = vst.msk [vmem:[%s5453_s19 + $0x1b8] sm:$0xff] %vm3208_vm2, %v4344_v63 }
 0x2d5   : > { %3265 = vst.msk [vmem:[%s5453_s19 + $0x1c0] sm:$0xff] %vm3208_vm2, %v4344_v63  ;;  %3266 = vst.msk [vmem:[%s5453_s19 + $0x1c8] sm:$0xff] %vm3208_vm2, %v4344_v63 }
 0x2d6   : > { %3267 = vst.msk [vmem:[%s5453_s19 + $0x1d0] sm:$0xff] %vm3208_vm2, %v4344_v63  ;;  %3268 = vst.msk [vmem:[%s5453_s19 + $0x1d8] sm:$0xff] %vm3208_vm2, %v4344_v63 }
 0x2d7   : > { %3269 = vst.msk [vmem:[%s5453_s19 + $0x1e0] sm:$0xff] %vm3208_vm2, %v4344_v63  ;;  %3270 = vst.msk [vmem:[%s5453_s19 + $0x1e8] sm:$0xff] %vm3208_vm2, %v4344_v63 }
 0x2d8   : > { %3271 = vst.msk [vmem:[%s5453_s19 + $0x1f0] sm:$0xff] %vm3208_vm2, %v4344_v63  ;;  %3272 = vst.msk [vmem:[%s5453_s19 + $0x1f8] sm:$0xff] %vm3208_vm2, %v4344_v63 }
 0x2d9   : > { %3273 = vst.msk [vmem:[%s5453_s19 + $0x200] sm:$0xff] %vm3208_vm2, %v4344_v63  ;;  %3274 = vst.msk [vmem:[%s5453_s19 + $0x208] sm:$0xff] %vm3208_vm2, %v4344_v63 }
 0x2da   : > { %3275 = vst.msk [vmem:[%s5453_s19 + $0x210] sm:$0xff] %vm3208_vm2, %v4344_v63  ;;  %3276 = vst.msk [vmem:[%s5453_s19 + $0x218] sm:$0xff] %vm3208_vm2, %v4344_v63 }
 0x2db   : > { %3277 = vst.msk [vmem:[%s5453_s19 + $0x220] sm:$0xff] %vm3208_vm2, %v4344_v63  ;;  %3278 = vst.msk [vmem:[%s5453_s19 + $0x228] sm:$0xff] %vm3208_vm2, %v4344_v63 }
 0x2dc   : > { %3279 = vst.msk [vmem:[%s5453_s19 + $0x230] sm:$0xff] %vm3208_vm2, %v4344_v63  ;;  %3280 = vst.msk [vmem:[%s5453_s19 + $0x238] sm:$0xff] %vm3208_vm2, %v4344_v63 }
 0x2dd   : > { %3281 = vst.msk [vmem:[%s5453_s19 + $0x240] sm:$0xff] %vm3208_vm2, %v4344_v63  ;;  %3282 = vst.msk [vmem:[%s5453_s19 + $0x248] sm:$0xff] %vm3208_vm2, %v4344_v63 }
 0x2de   : > { %3283 = vst.msk [vmem:[%s5453_s19 + $0x250] sm:$0xff] %vm3208_vm2, %v4344_v63  ;;  %3284 = vst.msk [vmem:[%s5453_s19 + $0x258] sm:$0xff] %vm3208_vm2, %v4344_v63 }
 0x2df   : > { %3285 = vst.msk [vmem:[%s5453_s19 + $0x260] sm:$0xff] %vm3208_vm2, %v4344_v63  ;;  %3286 = vst.msk [vmem:[%s5453_s19 + $0x268] sm:$0xff] %vm3208_vm2, %v4344_v63 }
 0x2e0   : > { %3287 = vst.msk [vmem:[%s5453_s19 + $0x270] sm:$0xff] %vm3208_vm2, %v4344_v63  ;;  %3288 = vst.msk [vmem:[%s5453_s19 + $0x278] sm:$0xff] %vm3208_vm2, %v4344_v63 }
 0x2e1   : > { %3289 = vst.msk [vmem:[%s5453_s19 + $0x280] sm:$0xff] %vm3208_vm2, %v4344_v63  ;;  %3290 = vst.msk [vmem:[%s5453_s19 + $0x288] sm:$0xff] %vm3208_vm2, %v4344_v63 }
 0x2e2   : > { %3291 = vst.msk [vmem:[%s5453_s19 + $0x290] sm:$0xff] %vm3208_vm2, %v4344_v63  ;;  %3292 = vst.msk [vmem:[%s5453_s19 + $0x298] sm:$0xff] %vm3208_vm2, %v4344_v63 }
 0x2e3   : > { %3293 = vst.msk [vmem:[%s5453_s19 + $0x2a0] sm:$0xff] %vm3208_vm2, %v4344_v63  ;;  %3294 = vst.msk [vmem:[%s5453_s19 + $0x2a8] sm:$0xff] %vm3208_vm2, %v4344_v63 }
 0x2e4   : > { %3295 = vst.msk [vmem:[%s5453_s19 + $0x2b0] sm:$0xff] %vm3208_vm2, %v4344_v63  ;;  %3296 = vst.msk [vmem:[%s5453_s19 + $0x2b8] sm:$0xff] %vm3208_vm2, %v4344_v63 }
 0x2e5   : > { %3297 = vst.msk [vmem:[%s5453_s19 + $0x2c0] sm:$0xff] %vm3208_vm2, %v4344_v63  ;;  %3298 = vst.msk [vmem:[%s5453_s19 + $0x2c8] sm:$0xff] %vm3208_vm2, %v4344_v63 }
 0x2e6   : > { %3299 = vst.msk [vmem:[%s5453_s19 + $0x2d0] sm:$0xff] %vm3208_vm2, %v4344_v63  ;;  %3300 = vst.msk [vmem:[%s5453_s19 + $0x2d8] sm:$0xff] %vm3208_vm2, %v4344_v63 }
 0x2e7   : > { %3301 = vst.msk [vmem:[%s5453_s19 + $0x2e0] sm:$0xff] %vm3208_vm2, %v4344_v63  ;;  %3302 = vst.msk [vmem:[%s5453_s19 + $0x2e8] sm:$0xff] %vm3208_vm2, %v4344_v63 }
 0x2e8   : > { %3303 = vst.msk [vmem:[%s5453_s19 + $0x2f0] sm:$0xff] %vm3208_vm2, %v4344_v63  ;;  %3304 = vst.msk [vmem:[%s5453_s19 + $0x2f8] sm:$0xff] %vm3208_vm2, %v4344_v63 }
 0x2e9   : > { %3305 = vst.msk [vmem:[%s5453_s19 + $0x300] sm:$0xff] %vm3208_vm2, %v4344_v63  ;;  %3306 = vst.msk [vmem:[%s5453_s19 + $0x308] sm:$0xff] %vm3208_vm2, %v4344_v63 }
 0x2ea   : > { %3307 = vst.msk [vmem:[%s5453_s19 + $0x310] sm:$0xff] %vm3208_vm2, %v4344_v63  ;;  %3308 = vst.msk [vmem:[%s5453_s19 + $0x318] sm:$0xff] %vm3208_vm2, %v4344_v63 }
 0x2eb   : > { %3309 = vst.msk [vmem:[%s5453_s19 + $0x320] sm:$0xff] %vm3208_vm2, %v4344_v63  ;;  %3310 = vst.msk [vmem:[%s5453_s19 + $0x328] sm:$0xff] %vm3208_vm2, %v4344_v63 }
 0x2ec   : > { %3311 = vst.msk [vmem:[%s5453_s19 + $0x330] sm:$0xff] %vm3208_vm2, %v4344_v63  ;;  %3312 = vst.msk [vmem:[%s5453_s19 + $0x338] sm:$0xff] %vm3208_vm2, %v4344_v63 }
 0x2ed   : > { %3313 = vst.msk [vmem:[%s5453_s19 + $0x340] sm:$0xff] %vm3208_vm2, %v4344_v63  ;;  %3314 = vst.msk [vmem:[%s5453_s19 + $0x348] sm:$0xff] %vm3208_vm2, %v4344_v63 }
 0x2ee   : > { %3315 = vst.msk [vmem:[%s5453_s19 + $0x350] sm:$0xff] %vm3208_vm2, %v4344_v63  ;;  %3316 = vst.msk [vmem:[%s5453_s19 + $0x358] sm:$0xff] %vm3208_vm2, %v4344_v63 }
 0x2ef   : > { %3317 = vst.msk [vmem:[%s5453_s19 + $0x360] sm:$0xff] %vm3208_vm2, %v4344_v63  ;;  %3318 = vst.msk [vmem:[%s5453_s19 + $0x368] sm:$0xff] %vm3208_vm2, %v4344_v63 }
 0x2f0   : > { %3319 = vst.msk [vmem:[%s5453_s19 + $0x370] sm:$0xff] %vm3208_vm2, %v4344_v63  ;;  %3320 = vst.msk [vmem:[%s5453_s19 + $0x378] sm:$0xff] %vm3208_vm2, %v4344_v63 }
 0x2f1   : > { %3321 = vst.msk [vmem:[%s5453_s19 + $0x380] sm:$0xff] %vm3208_vm2, %v4344_v63  ;;  %3322 = vst.msk [vmem:[%s5453_s19 + $0x388] sm:$0xff] %vm3208_vm2, %v4344_v63 }
 0x2f2   : > { %3323 = vst.msk [vmem:[%s5453_s19 + $0x390] sm:$0xff] %vm3208_vm2, %v4344_v63  ;;  %3324 = vst.msk [vmem:[%s5453_s19 + $0x398] sm:$0xff] %vm3208_vm2, %v4344_v63 }
 0x2f3   : > { %3325 = vst.msk [vmem:[%s5453_s19 + $0x3a0] sm:$0xff] %vm3208_vm2, %v4344_v63  ;;  %3326 = vst.msk [vmem:[%s5453_s19 + $0x3a8] sm:$0xff] %vm3208_vm2, %v4344_v63 }
 0x2f4   : > { %3327 = vst.msk [vmem:[%s5453_s19 + $0x3b0] sm:$0xff] %vm3208_vm2, %v4344_v63  ;;  %3328 = vst.msk [vmem:[%s5453_s19 + $0x3b8] sm:$0xff] %vm3208_vm2, %v4344_v63 }
 0x2f5   : > { %3329 = vst.msk [vmem:[%s5453_s19 + $0x3c0] sm:$0xff] %vm3208_vm2, %v4344_v63  ;;  %3330 = vst.msk [vmem:[%s5453_s19 + $0x3c8] sm:$0xff] %vm3208_vm2, %v4344_v63 }
 0x2f6   : > { %3331 = vst.msk [vmem:[%s5453_s19 + $0x3d0] sm:$0xff] %vm3208_vm2, %v4344_v63  ;;  %3332 = vst.msk [vmem:[%s5453_s19 + $0x3d8] sm:$0xff] %vm3208_vm2, %v4344_v63 }
 0x2f7   : > { %3333 = vst.msk [vmem:[%s5453_s19 + $0x3e0] sm:$0xff] %vm3208_vm2, %v4344_v63  ;;  %3334 = vst.msk [vmem:[%s5453_s19 + $0x3e8] sm:$0xff] %vm3208_vm2, %v4344_v63 }
 0x2f8   : > { %3335 = vst.msk [vmem:[%s5453_s19 + $0x3f0] sm:$0xff] %vm3208_vm2, %v4344_v63  ;;  %3336 = vst.msk [vmem:[%s5453_s19 + $0x3f8] sm:$0xff] %vm3208_vm2, %v4344_v63  ;;  %v4045_v63 = vpop.f32.mrb[26].mxu0 }
 0x2f9   : > { %v2207_v33 = vpop.f32.mrb[27].mxu0  ;;  %7078 = vst [vmem:[#allocation46_spill] sm:$0xff] %v5887_v59  ;;  %7079 = vst [vmem:[#allocation47_spill] sm:$0xff] %v5889_v62  ;;  %v2747_v59 = vmax.f32 %v2429_v18, 0.0  ;;  %v2216_v60 = vadd.f32 %v4045_v63, %v4960_v22  ;;  %v5924_v62 = vpop.permute.xlu1 %1596 }
 0x2fa   : > { %v5891_v36 = vpop.f32.mrb[28].mxu0  ;;  %7080 = vst [vmem:[#allocation48_spill] sm:$0xff] %v5922_v48  ;;  %7081 = vst [vmem:[#allocation49_spill] sm:$0xff] %v5924_v62  ;;  %v5928_v18 = vpop.f32.mrb[16].mxu1 }
 0x2fb   : > { %v5897_v52 = vpop.f32.mrb[29].mxu0  ;;  %v5934_v22 = vpop.f32.mrb[17].mxu1  ;;  %v2884_v63 = vsel %vm2817_vm1, %v2747_v59, -inf  ;;  %v2694_v17 = vmax.f32 %v2216_v60, 0.0  ;;  %v2205_v59 = vadd.f32 %v5862_v49, %v4965_v26  ;;  %v2208_v60 = vadd.f32 %v2207_v33, %v4947_v15  ;;  %7082 = vst [vmem:[#allocation50_spill] sm:$0xff] %v5956_v16 }
 0x2fc   : > { %v5905_v27 = vpop.f32.mrb[30].mxu0  ;;  %v5941_v30 = vpop.f32.mrb[18].mxu1  ;;  %3076 = vmax.xlane.f32.xlu0 %v2884_v63  ;;  %v2445_v49 = vadd.f32 %v5864_v25, %v5369_v57  ;;  %v2890_v33 = vsel %vm2817_vm1, %v2753_v61, -inf  ;;  %v2229_v61 = vadd.f32 %v5891_v36, %v5007_v47  ;;  %v2469_v36 = vadd.f32 %v5893_v20, %v5381_v14 }
 0x2fd   : > { %v5911_v19 = vpop.f32.mrb[31].mxu0  ;;  %v5947_v28 = vpop.f32.mrb[19].mxu1  ;;  %v2831_v63 = vsel %vm2817_vm1, %v2694_v17, -inf  ;;  %v2691_v26 = vmax.f32 %v2205_v59, 0.0  ;;  %v2692_v17 = vmax.f32 %v2208_v60, 0.0  ;;  %v2891_v59 = vsel %vm2817_vm1, %v2754_v54, -inf }
 0x2fe   : > { %v5926_v44 = vpop.f32.mrb[32].mxu0  ;;  %v5958_v62 = vpop.permute.xlu1 %1606  ;;  %2970 = vmax.xlane.f32.xlu1 %v2831_v63  ;;  %v2751_v16 = vmax.f32 %v2445_v49, 0.0  ;;  %v2232_v60 = vadd.f32 %v5905_v27, %v4986_v35  ;;  %v2697_v47 = vmax.f32 %v2229_v61, 0.0  ;;  %v2889_v61 = vsel %vm2817_vm1, %v2752_v6, -inf }
 0x2ff   : > { %v5932_v11 = vpop.f32.mrb[33].mxu0  ;;  %7083 = vst [vmem:[#allocation51_spill] sm:$0xff] %v5958_v62  ;;  %v5962_v3 = vpop.f32.mrb[20].mxu1  ;;  %v2828_v1 = vsel %vm2817_vm1, %v2691_v26, -inf  ;;  %v2829_v54 = vsel %vm2817_vm1, %v2692_v17, -inf  ;;  %v2488_v55 = vadd.f32 %v5941_v30, %v5387_v42 }
 0x300   : > { %v5939_v0 = vpop.f32.mrb[34].mxu0  ;;  %2968 = vmax.xlane.f32.xlu0 %v2830_v39  ;;  %v5968_v15 = vpop.f32.mrb[21].mxu1  ;;  %v2888_v27 = vsel %vm2817_vm1, %v2751_v16, -inf  ;;  %v2698_v17 = vmax.f32 %v2232_v60, 0.0  ;;  %v2221_v16 = vadd.f32 %v5897_v52, %v4991_v38  ;;  %v2834_v41 = vsel %vm2817_vm1, %v2697_v47, -inf }
 0x301   : > { %v5945_v48 = vpop.f32.mrb[35].mxu0  ;;  %v5976_v63 = vpop.f32.mrb[22].mxu1  ;;  %v2224_v60 = vadd.f32 %v5911_v19, %v4973_v29  ;;  %v2461_v52 = vadd.f32 %v5899_v7, %v5377_v24  ;;  %v2237_v42 = vadd.f32 %v5932_v11, %v5017_v58  ;;  %v2762_v30 = vmax.f32 %v2488_v55, 0.0 }
 0x302   : > { %v5960_v37 = vpop.f32.mrb[36].mxu0  ;;  %v5982_v25 = vpop.f32.mrb[23].mxu1  ;;  %3090 = vmax.xlane.f32.xlu1 %v2891_v59  ;;  %v2835_v6 = vsel %vm2817_vm1, %v2698_v17, -inf  ;;  %v2695_v38 = vmax.f32 %v2221_v16, 0.0  ;;  %v2895_v16 = vsel %vm2817_vm1, %v2758_v23, -inf  ;;  %v2477_v11 = vadd.f32 %v5934_v22, %v5385_v56 }
 0x303   : > { %v5966_v34 = vpop.f32.mrb[37].mxu0  ;;  %v5994_v62 = vpop.permute.xlu1 %1616  ;;  %v2696_v17 = vmax.f32 %v2224_v60, 0.0  ;;  %v2248_v60 = vadd.f32 %v5939_v0, %v5012_v51  ;;  %v2699_v58 = vmax.f32 %v2237_v42, 0.0  ;;  %v2480_v55 = vadd.f32 %v5947_v28, %v5383_v4 }
 0x304   : > { %v5974_v39 = vpop.f32.mrb[38].mxu0  ;;  %3088 = vmax.xlane.f32.xlu0 %v2890_v33  ;;  %v5992_v33 = vpop.permute.xlu0 %1621  ;;  %7085 = vst [vmem:[#allocation53_spill] sm:$0xff] %v5994_v62  ;;  %v2832_v10 = vsel %vm2817_vm1, %v2695_v38, -inf  ;;  %v2899_v42 = vsel %vm2817_vm1, %v2762_v30, -inf }
 0x305   : > { %v5980_v57 = vpop.f32.mrb[39].mxu0  ;;  %7084 = vst [vmem:[#allocation52_spill] sm:$0xff] %v5992_v33  ;;  %v5998_v59 = vpop.f32.mrb[24].mxu1  ;;  %v2757_v33 = vmax.f32 %v2469_v36, 0.0  ;;  %v2833_v23 = vsel %vm2817_vm1, %v2696_v17, -inf  ;;  %v2702_v17 = vmax.f32 %v2248_v60, 0.0 }
 0x306   : > { %2966 = vmax.xlane.f32.xlu1 %v2829_v54  ;;  %v5996_v49 = vpop.f32.mrb[40].mxu0  ;;  %v6004_v35 = vpop.f32.mrb[25].mxu1  ;;  %v2836_v4 = vsel %vm2817_vm1, %v2699_v58, -inf  ;;  %v2760_v28 = vmax.f32 %v2480_v55, 0.0  ;;  %v2504_v55 = vadd.f32 %v5976_v63, %v5395_v46 }
 0x307   : > { %v6002_v26 = vpop.f32.mrb[41].mxu0  ;;  %v6012_v54 = vpop.f32.mrb[26].mxu1  ;;  %v2894_v19 = vsel %vm2817_vm1, %v2757_v33, -inf  ;;  %v2245_v33 = vadd.f32 %v5926_v44, %v5033_v5  ;;  %v2485_v44 = vadd.f32 %v5928_v18, %v5389_v50  ;;  %v2893_v50 = vsel %vm2817_vm1, %v2756_v32, -inf }
 0x308   : > { %2964 = vmax.xlane.f32.xlu0 %v2828_v1  ;;  %v6010_v1 = vpop.f32.mrb[42].mxu0  ;;  %v6018_v20 = vpop.f32.mrb[27].mxu1  ;;  %v2839_v32 = vsel %vm2817_vm1, %v2702_v17, -inf  ;;  %v2766_v63 = vmax.f32 %v2504_v55, 0.0  ;;  %v7096_v55 = vld [vmem:[#allocation38_spill] sm:$0xff] }
 0x309   : > { %v6016_v14 = vpop.f32.mrb[43].mxu0  ;;  %v6030_v62 = vpop.permute.xlu1 %1626  ;;  %v2701_v5 = vmax.f32 %v2245_v33, 0.0  ;;  %v2761_v60 = vmax.f32 %v2485_v44, 0.0 }
 0x30a   : > { %3086 = vmax.xlane.f32.xlu1 %v2889_v61  ;;  %7087 = vst [vmem:[#allocation55_spill] sm:$0xff] %v6030_v62  ;;  %v6032_v36 = vpop.f32.mrb[44].mxu0  ;;  %v6034_v61 = vpop.f32.mrb[28].mxu1 }
 0x30b   : > { %v6038_v47 = vpop.f32.mrb[45].mxu0  ;;  %v6040_v29 = vpop.f32.mrb[29].mxu1 }
 0x30c   : > { %3084 = vmax.xlane.f32.xlu0 %v2888_v27  ;;  %v6028_v27 = vpop.permute.xlu0 %1631 }
 0x30d   : > { %7086 = vst [vmem:[#allocation54_spill] sm:$0xff] %v6028_v27  ;;  %v2755_v27 = vmax.f32 %v2461_v52, 0.0  ;;  %v6066_v62 = vpop.permute.xlu1 %1636 }
 0x30e   : > { %2978 = vmax.xlane.f32.xlu1 %v2835_v6  ;;  %v6048_v6 = vpop.f32.mrb[30].mxu1  ;;  %7089 = vst [vmem:[#allocation57_spill] sm:$0xff] %v6066_v62 }
 0x30f   : > { %v6054_v7 = vpop.f32.mrb[31].mxu1  ;;  %v2892_v0 = vsel %vm2817_vm1, %v2755_v27, -inf }
 0x310   : > { %2976 = vmax.xlane.f32.xlu0 %v2834_v41  ;;  %v6046_v41 = vpop.f32.mrb[46].mxu0 }
 0x311   : > { %v6052_v24 = vpop.f32.mrb[47].mxu0 }
 0x312   : > { %3098 = vmax.xlane.f32.xlu1 %v2895_v16  ;;  %v6068_v52 = vpop.f32.mrb[48].mxu0  ;;  %v6070_v16 = vpop.f32.mrb[32].mxu1 }
 0x313   : > { %v6074_v38 = vpop.f32.mrb[49].mxu0  ;;  %v2540_v51 = vpop.f32.mrb[33].mxu1 }
 0x314   : > { %3096 = vmax.xlane.f32.xlu0 %v2894_v19  ;;  %v6064_v19 = vpop.permute.xlu0 %1641 }
 0x315   : > { %7088 = vst [vmem:[#allocation56_spill] sm:$0xff] %v6064_v19  ;;  %v6085_v19 = vpop.f32.mrb[34].mxu1 }
 0x316   : > { %2974 = vmax.xlane.f32.xlu1 %v2833_v23  ;;  %v6083_v23 = vpop.f32.mrb[50].mxu0  ;;  %v2543_v33 = vpop.f32.mrb[35].mxu1 }
 0x317   : > { %v6089_v18 = vpop.f32.mrb[51].mxu0  ;;  %v6092_v27 = vadd.f32 %v2543_v33, %v5467_v21  ;;  %v6108_v44 = vpop.f32.mrb[36].mxu1 }
 0x318   : > { %2972 = vmax.xlane.f32.xlu0 %v2832_v10  ;;  %v6081_v10 = vadd.f32 %v2540_v51, %v5469_v31  ;;  %v2838_v31 = vsel %vm2817_vm1, %v2701_v5, -inf  ;;  %v2240_v51 = vadd.f32 %v5945_v48, %v4999_v43  ;;  %v6106_v21 = vpop.f32.mrb[52].mxu0  ;;  %v6114_v43 = vpop.f32.mrb[37].mxu1  ;;  %v2898_v48 = vsel %vm2817_vm1, %v2761_v60, -inf }
 0x319   : > { %v6112_v5 = vpop.f32.mrb[53].mxu0  ;;  %v2261_v60 = vadd.f32 %v5960_v37, %v5065_v13  ;;  %v2501_v37 = vadd.f32 %v5962_v3, %v5397_v40 }
 0x31a   : > { %3094 = vmax.xlane.f32.xlu1 %v2893_v50  ;;  %v6104_v50 = vpop.permute.xlu1 %1646  ;;  %v2700_v17 = vmax.f32 %v2240_v51, 0.0  ;;  %v6120_v33 = vpop.f32.mrb[54].mxu0  ;;  %v2264_v51 = vadd.f32 %v5974_v39, %v5044_v9 }
 0x31b   : > { %v6126_v56 = vpop.f32.mrb[55].mxu0  ;;  %v2705_v13 = vmax.f32 %v2261_v60, 0.0  ;;  %v2897_v60 = vsel %vm2817_vm1, %v2760_v28, -inf }
 0x31c   : > { %3092 = vmax.xlane.f32.xlu0 %v2892_v0  ;;  %v6102_v0 = vpop.permute.xlu0 %1651  ;;  %v2837_v30 = vsel %vm2817_vm1, %v2700_v17, -inf  ;;  %v2706_v17 = vmax.f32 %v2264_v51, 0.0  ;;  %v2256_v51 = vadd.f32 %v5980_v57, %v5025_v53 }
 0x31d   : > { %v2842_v46 = vsel %vm2817_vm1, %v2705_v13, -inf }
 0x31e   : > { %2986 = vmax.xlane.f32.xlu1 %v2839_v32  ;;  %v2759_v32 = vmax.f32 %v2477_v11, 0.0  ;;  %v6140_v62 = vpop.permute.xlu1 %1656  ;;  %v6142_v11 = vpop.f32.mrb[56].mxu0  ;;  %v2843_v28 = vsel %vm2817_vm1, %v2706_v17, -inf  ;;  %v2704_v17 = vmax.f32 %v2256_v51, 0.0 }
 0x31f   : > { %7091 = vst [vmem:[#allocation59_spill] sm:$0xff] %v6140_v62  ;;  %v6148_v58 = vpop.f32.mrb[57].mxu0 }
 0x320   : > { %2984 = vmax.xlane.f32.xlu0 %v2838_v31  ;;  %v6122_v31 = vpop.f32.mrb[38].mxu1  ;;  %v2896_v39 = vsel %vm2817_vm1, %v2759_v32, -inf  ;;  %v2253_v32 = vadd.f32 %v5966_v34, %v5049_v12  ;;  %v2493_v34 = vadd.f32 %v5968_v15, %v5393_v2 }
 0x321   : > { %v6128_v22 = vpop.f32.mrb[39].mxu1 }
 0x322   : > { %3106 = vmax.xlane.f32.xlu1 %v2899_v42  ;;  %v6144_v42 = vpop.f32.mrb[40].mxu1  ;;  %v6176_v62 = vpop.permute.xlu1 %1666  ;;  %v2703_v12 = vmax.f32 %v2253_v32, 0.0  ;;  %v2903_v32 = vsel %vm2817_vm1, %v2766_v63, -inf  ;;  %v2841_v63 = vsel %vm2817_vm1, %v2704_v17, -inf }
 0x323   : > { %v6150_v9 = vpop.f32.mrb[41].mxu1  ;;  %7093 = vst [vmem:[#allocation61_spill] sm:$0xff] %v6176_v62  ;;  %v2763_v62 = vmax.f32 %v2493_v34, 0.0 }
 0x324   : > { %3104 = vmax.xlane.f32.xlu0 %v2898_v48  ;;  %v6138_v48 = vpop.permute.xlu0 %1661 }
 0x325   : > { %7090 = vst [vmem:[#allocation58_spill] sm:$0xff] %v6138_v48  ;;  %v2765_v48 = vmax.f32 %v2501_v37, 0.0  ;;  %v2900_v17 = vsel %vm2817_vm1, %v2763_v62, -inf }
 0x326   : > { %2982 = vmax.xlane.f32.xlu1 %v2837_v30  ;;  %v6158_v30 = vpop.f32.mrb[42].mxu1 }
 0x327   : > { %v6164_v3 = vpop.f32.mrb[43].mxu1  ;;  %v2902_v57 = vsel %vm2817_vm1, %v2765_v48, -inf }
 0x328   : > { %2980 = vmax.xlane.f32.xlu0 %v2836_v4  ;;  %v6156_v4 = vpop.f32.mrb[58].mxu0 }
 0x329   : > { %v6162_v40 = vpop.f32.mrb[59].mxu0 }
 0x32a   : > { %3102 = vmax.xlane.f32.xlu1 %v2897_v60  ;;  %v6178_v37 = vpop.f32.mrb[60].mxu0  ;;  %v6180_v60 = vpop.f32.mrb[44].mxu1 }
 0x32b   : > { %v6184_v13 = vpop.f32.mrb[61].mxu0  ;;  %v6186_v53 = vpop.f32.mrb[45].mxu1 }
 0x32c   : > { %3100 = vmax.xlane.f32.xlu0 %v2896_v39  ;;  %v6174_v39 = vpop.permute.xlu0 %1671  ;;  %7094 = vst [vmem:[#allocation62_spill] sm:$0xff] %v6184_v13  ;;  %7095 = vst [vmem:[#allocation63_spill] sm:$0xff] %v6186_v53  ;;  %v7098_v53 = vld [vmem:[#allocation6_spill] sm:$0xff] }
 0x32d   : > { %7092 = vst [vmem:[#allocation60_spill] sm:$0xff] %v6174_v39  ;;  %v6194_v39 = vpop.f32.mrb[46].mxu1  ;;  %v2277_v48 = vadd.f32 %v5996_v49, %v7098_v53  ;;  %v7102_v53 = vld [vmem:[#allocation42_spill] sm:$0xff] }
 0x32e   : > { %2994 = vmax.xlane.f32.xlu1 %v2843_v28  ;;  %v6192_v28 = vpop.f32.mrb[62].mxu0  ;;  %v6200_v15 = vpop.f32.mrb[47].mxu1 }
 0x32f   : > { %v6198_v2 = vpop.f32.mrb[63].mxu0  ;;  %v2709_v49 = vmax.f32 %v2277_v48, 0.0 }
 0x330   : > { %2992 = vmax.xlane.f32.xlu0 %v2842_v46  ;;  %v2496_v46 = vadd.f32 %v5982_v25, %v7096_v55  ;;  %7097 = vst [vmem:[#allocation38_spill] sm:$0xff] %v6198_v2  ;;  %v2840_v25 = vsel %vm2817_vm1, %v2703_v12, -inf  ;;  %v7099_v55 = vld [vmem:[#allocation3_spill] sm:$0xff]  ;;  %v6212_v2 = vpop.permute.xlu1 %1676  ;;  %v6214_v34 = vpop.f32.mrb[64].mxu0  ;;  %v2517_v12 = vadd.f32 %v5998_v59, %v7102_v53 }
 0x331   : > { %v2280_v13 = vadd.f32 %v6010_v1, %v7099_v55  ;;  %7101 = vst [vmem:[#allocation3_spill] sm:$0xff] %v6212_v2  ;;  %v7105_v55 = vld [vmem:[#allocation41_spill] sm:$0xff] }
 0x332   : > { %3114 = vmax.xlane.f32.xlu1 %v2903_v32  ;;  %v2764_v51 = vmax.f32 %v2496_v46, 0.0  ;;  %v6216_v32 = vpop.f32.mrb[48].mxu1  ;;  %v6220_v46 = vpop.f32.mrb[65].mxu0 }
 0x333   : > { %7103 = vst [vmem:[#allocation42_spill] sm:$0xff] %v6220_v46  ;;  %v6222_v1 = vpop.f32.mrb[49].mxu1  ;;  %v7108_v46 = vld [vmem:[#allocation4_spill] sm:$0xff] }
 0x334   : > { %3112 = vmax.xlane.f32.xlu0 %v2902_v57  ;;  %v6210_v57 = vpop.permute.xlu0 %1681  ;;  %7104 = vst [vmem:[#allocation64_spill] sm:$0xff] %v6222_v1  ;;  %v6230_v2 = vpop.f32.mrb[50].mxu1  ;;  %v2901_v48 = vsel %vm2817_vm1, %v2764_v51, -inf  ;;  %v2769_v1 = vmax.f32 %v2517_v12, 0.0  ;;  %v2269_v62 = vadd.f32 %v6002_v26, %v7108_v46  ;;  %v7112_v46 = vld [vmem:[#allocation40_spill] sm:$0xff] }
 0x335   : > { %7100 = vst [vmem:[#allocation6_spill] sm:$0xff] %v6210_v57  ;;  %v2520_v57 = vadd.f32 %v6012_v54, %v7105_v55  ;;  %7106 = vst [vmem:[#allocation41_spill] sm:$0xff] %v6230_v2  ;;  %v6236_v53 = vpop.f32.mrb[51].mxu1  ;;  %v2846_v54 = vsel %vm2817_vm1, %v2709_v49, -inf  ;;  %v7109_v55 = vld [vmem:[#allocation2_spill] sm:$0xff] }
 0x336   : > { %2990 = vmax.xlane.f32.xlu1 %v2841_v63  ;;  %v6228_v63 = vpop.f32.mrb[66].mxu0  ;;  %v2272_v2 = vadd.f32 %v6016_v14, %v7109_v55  ;;  %v2707_v26 = vmax.f32 %v2269_v62, 0.0  ;;  %v7115_v55 = vld [vmem:[#allocation39_spill] sm:$0xff] }
 0x337   : > { %v6234_v59 = vpop.f32.mrb[67].mxu0 }
 0x338   : > { %2988 = vmax.xlane.f32.xlu0 %v2840_v25  ;;  %v2710_v25 = vmax.f32 %v2280_v13, 0.0  ;;  %7107 = vst [vmem:[#allocation65_spill] sm:$0xff] %v6234_v59  ;;  %v2770_v13 = vmax.f32 %v2520_v57, 0.0  ;;  %v6248_v59 = vpop.permute.xlu1 %1686  ;;  %v6250_v12 = vpop.f32.mrb[68].mxu0  ;;  %v2509_v57 = vadd.f32 %v6004_v35, %v7112_v46 }
 0x339   : > { %7111 = vst [vmem:[#allocation2_spill] sm:$0xff] %v6248_v59  ;;  %v6256_v49 = vpop.f32.mrb[69].mxu0 }
 0x33a   : > { %3110 = vmax.xlane.f32.xlu1 %v2901_v48  ;;  %v2847_v51 = vsel %vm2817_vm1, %v2710_v25, -inf  ;;  %v6252_v48 = vpop.f32.mrb[52].mxu1  ;;  %7113 = vst [vmem:[#allocation40_spill] sm:$0xff] %v6256_v49  ;;  %v2906_v25 = vsel %vm2817_vm1, %v2769_v1, -inf  ;;  %v2907_v62 = vsel %vm2817_vm1, %v2770_v13, -inf  ;;  %v7118_v49 = vld [vmem:[#allocation9_spill] sm:$0xff] }
 0x33b   : > { %v6258_v14 = vpop.f32.mrb[53].mxu1 }
 0x33c   : > { %3108 = vmax.xlane.f32.xlu0 %v2900_v17  ;;  %v6246_v17 = vpop.permute.xlu0 %1691  ;;  %7114 = vst [vmem:[#allocation66_spill] sm:$0xff] %v6258_v14  ;;  %v6266_v59 = vpop.f32.mrb[54].mxu1  ;;  %v2767_v14 = vmax.f32 %v2509_v57, 0.0 }
 0x33d   : > { %7110 = vst [vmem:[#allocation4_spill] sm:$0xff] %v6246_v17  ;;  %v2512_v17 = vadd.f32 %v6018_v20, %v7115_v55  ;;  %7116 = vst [vmem:[#allocation39_spill] sm:$0xff] %v6266_v59  ;;  %v6272_v46 = vpop.f32.mrb[55].mxu1  ;;  %v2844_v20 = vsel %vm2817_vm1, %v2707_v26, -inf  ;;  %v7119_v55 = vld [vmem:[#allocation8_spill] sm:$0xff] }
 0x33e   : > { %3002 = vmax.xlane.f32.xlu1 %v2847_v51  ;;  %v6264_v51 = vpop.f32.mrb[70].mxu0  ;;  %v2296_v59 = vadd.f32 %v6046_v41, %v7119_v55 }
 0x33f   : > { %v6270_v35 = vpop.f32.mrb[71].mxu0  ;;  %v2768_v1 = vmax.f32 %v2512_v17, 0.0  ;;  %v2533_v17 = vadd.f32 %v6034_v61, %v5425_v8 }
 0x340   : > { %3000 = vmax.xlane.f32.xlu0 %v2846_v54  ;;  %v2708_v54 = vmax.f32 %v2272_v2, 0.0  ;;  %7117 = vst [vmem:[#allocation67_spill] sm:$0xff] %v6270_v35  ;;  %v2293_v2 = vadd.f32 %v6032_v36, %v7118_v49  ;;  %v6284_v35 = vpop.permute.xlu1 %1696  ;;  %v6286_v57 = vpop.f32.mrb[72].mxu0  ;;  %v2904_v49 = vsel %vm2817_vm1, %v2767_v14, -inf }
 0x341   : > { %7121 = vst [vmem:[#allocation8_spill] sm:$0xff] %v6284_v35  ;;  %v6292_v26 = vpop.f32.mrb[73].mxu0  ;;  %v7126_v35 = vld [vmem:[#allocation7_spill] sm:$0xff] }
 0x342   : > { %3122 = vmax.xlane.f32.xlu1 %v2907_v62  ;;  %v2845_v13 = vsel %vm2817_vm1, %v2708_v54, -inf  ;;  %v6288_v62 = vpop.f32.mrb[56].mxu1  ;;  %v2713_v36 = vmax.f32 %v2293_v2, 0.0  ;;  %7122 = vst [vmem:[#allocation68_spill] sm:$0xff] %v6292_v26  ;;  %v2714_v54 = vmax.f32 %v2296_v59, 0.0  ;;  %v2905_v2 = vsel %vm2817_vm1, %v2768_v1, -inf }
 0x343   : > { %v6294_v41 = vpop.f32.mrb[57].mxu1  ;;  %v2285_v59 = vadd.f32 %v6038_v47, %v7126_v35  ;;  %v7129_v47 = vld [vmem:[#allocation44_spill] sm:$0xff] }
 0x344   : > { %3120 = vmax.xlane.f32.xlu0 %v2906_v25  ;;  %v6282_v25 = vpop.permute.xlu0 %1701  ;;  %7123 = vst [vmem:[#allocation69_spill] sm:$0xff] %v6294_v41  ;;  %v2773_v41 = vmax.f32 %v2533_v17, 0.0  ;;  %v2851_v1 = vsel %vm2817_vm1, %v2714_v54, -inf  ;;  %v2525_v35 = vadd.f32 %v6040_v29, %v7129_v47  ;;  %v7134_v47 = vld [vmem:[#allocation13_spill] sm:$0xff] }
 0x345   : > { %7120 = vst [vmem:[#allocation9_spill] sm:$0xff] %v6282_v25  ;;  %v6302_v25 = vpop.f32.mrb[58].mxu1 }
 0x346   : > { %2998 = vmax.xlane.f32.xlu1 %v2845_v13  ;;  %v6300_v13 = vpop.f32.mrb[74].mxu0  ;;  %v6308_v61 = vpop.f32.mrb[59].mxu1  ;;  %v2771_v29 = vmax.f32 %v2525_v35, 0.0 }
 0x347   : > { %v6306_v8 = vpop.f32.mrb[75].mxu0  ;;  %v6322_v17 = vpop.f32.mrb[60].mxu1 }
 0x348   : > { %2996 = vmax.xlane.f32.xlu0 %v2844_v20  ;;  %v7124_v20 = vld [vmem:[#allocation45_spill] sm:$0xff]  ;;  %7128 = vst [vmem:[#allocation7_spill] sm:$0xff] %v6322_v17 }
 0x349   : > { %v2536_v55 = vadd.f32 %v6048_v6, %v7124_v20  ;;  %7125 = vst [vmem:[#allocation45_spill] sm:$0xff] %v6308_v61  ;;  %v2850_v6 = vsel %vm2817_vm1, %v2713_v36, -inf  ;;  %v7127_v20 = vld [vmem:[#allocation5_spill] sm:$0xff]  ;;  %v6320_v61 = vpop.permute.xlu1 %1706  ;;  %v6326_v36 = vpop.f32.mrb[61].mxu1 }
 0x34a   : > { %3118 = vmax.xlane.f32.xlu1 %v2905_v2  ;;  %v2288_v26 = vadd.f32 %v6052_v24, %v7127_v20  ;;  %v2711_v2 = vmax.f32 %v2285_v59, 0.0  ;;  %7130 = vst [vmem:[#allocation5_spill] sm:$0xff] %v6326_v36  ;;  %v2910_v24 = vsel %vm2817_vm1, %v2773_v41, -inf  ;;  %v6332_v20 = vpop.f32.mrb[62].mxu1  ;;  %v2309_v36 = vadd.f32 %v6068_v52, %v7134_v47 }
 0x34b   : > { %v2774_v14 = vmax.f32 %v2536_v55, 0.0  ;;  %v6336_v17 = vpop.f32.mrb[63].mxu1 }
 0x34c   : > { %3116 = vmax.xlane.f32.xlu0 %v2904_v49  ;;  %v6318_v49 = vpop.permute.xlu0 %1711  ;;  %v2712_v55 = vmax.f32 %v2288_v26, 0.0  ;;  %7132 = vst [vmem:[#allocation44_spill] sm:$0xff] %v6336_v17  ;;  %v2848_v26 = vsel %vm2817_vm1, %v2711_v2, -inf  ;;  %v2717_v35 = vmax.f32 %v2309_v36, 0.0  ;;  %v7137_v17 = vld [vmem:[#allocation47_spill] sm:$0xff]  ;;  %v2908_v2 = vsel %vm2817_vm1, %v2771_v29, -inf }
 0x34d   : > { %v6344_v41 = vpop.permute.xlu1 %1716  ;;  %v2549_v52 = vadd.f32 %v6070_v16, %v7137_v17 }
 0x34e   : > { %3010 = vmax.xlane.f32.xlu1 %v2851_v1  ;;  %v2911_v1 = vsel %vm2817_vm1, %v2774_v14, -inf  ;;  %v2849_v14 = vsel %vm2817_vm1, %v2712_v55, -inf }
 0x34f   : > { %v2777_v17 = vmax.f32 %v2549_v52, 0.0 }
 0x350   : > { %3008 = vmax.xlane.f32.xlu0 %v2850_v6  ;;  %v7131_v6 = vld [vmem:[#allocation43_spill] sm:$0xff]  ;;  %v6338_v59 = vpop.permute.xlu0 %1721 }
 0x351   : > { %v2528_v54 = vadd.f32 %v6054_v7, %v7131_v6  ;;  %7133 = vst [vmem:[#allocation43_spill] sm:$0xff] %v6338_v59  ;;  %v7135_v6 = vld [vmem:[#allocation12_spill] sm:$0xff]  ;;  %v7138_v59 = vld [vmem:[#allocation46_spill] sm:$0xff]  ;;  %v6368_v16 = vpop.permute.xlu1 %1726  ;;  %v2914_v52 = vsel %vm2817_vm1, %v2777_v17, -inf  ;;  %v2776_v17 = vmax.f32 %v6092_v27, 0.0 }
 0x352   : > { %3130 = vmax.xlane.f32.xlu1 %v2911_v1  ;;  %v6350_v1 = vpop.f32.mrb[64].mxu1 }
 0x353   : > { %v2772_v7 = vmax.f32 %v2528_v54, 0.0  ;;  %7136 = vst [vmem:[#allocation13_spill] sm:$0xff] %v6350_v1  ;;  %v6354_v47 = vpop.f32.mrb[65].mxu1 }
 0x354   : > { %3128 = vmax.xlane.f32.xlu0 %v2910_v24  ;;  %v2312_v24 = vadd.f32 %v6083_v23, %v7135_v6  ;;  %v2552_v23 = vadd.f32 %v6085_v19, %v7138_v59  ;;  %v6364_v6 = vpop.permute.xlu0 %1731  ;;  %v2854_v19 = vsel %vm2817_vm1, %v2717_v35, -inf }
 0x355   : > { %v2909_v55 = vsel %vm2817_vm1, %v2772_v7, -inf  ;;  %v6382_v1 = vpop.permute.xlu1 %1736 }
 0x356   : > { %3006 = vmax.xlane.f32.xlu1 %v2849_v14  ;;  %v2718_v54 = vmax.f32 %v2312_v24, 0.0  ;;  %v7140_v14 = vld [vmem:[#allocation11_spill] sm:$0xff]  ;;  %v2778_v59 = vmax.f32 %v2552_v23, 0.0  ;;  %v7141_v24 = vld [vmem:[#allocation10_spill] sm:$0xff]  ;;  %v7142_v23 = vld [vmem:[#allocation17_spill] sm:$0xff] }
 0x357   : > { %v2301_v29 = vadd.f32 %v6074_v38, %v7140_v14 }
 0x358   : > { %3004 = vmax.xlane.f32.xlu0 %v2848_v26  ;;  %v6360_v26 = vpop.f32.mrb[66].mxu1  ;;  %v2855_v7 = vsel %vm2817_vm1, %v2718_v54, -inf  ;;  %v2915_v35 = vsel %vm2817_vm1, %v2778_v59, -inf  ;;  %v2325_v54 = vadd.f32 %v6106_v21, %v7142_v23  ;;  %v7144_v21 = vld [vmem:[#allocation51_spill] sm:$0xff]  ;;  %v3337_v23 = vld [vmem:[%s5453_s19] sm:$0xff] }
 0x359   : > { %7139 = vst [vmem:[#allocation12_spill] sm:$0xff] %v6360_v26  ;;  %v6366_v36 = vpop.f32.mrb[67].mxu1  ;;  %v6378_v26 = vpop.permute.xlu0 %1741 }
 0x35a   : > { %3126 = vmax.xlane.f32.xlu1 %v2909_v55  ;;  %v2715_v55 = vmax.f32 %v2301_v29, 0.0  ;;  %v7143_v29 = vld [vmem:[#allocation16_spill] sm:$0xff] }
 0x35c   : > { %3124 = vmax.xlane.f32.xlu0 %v2908_v2  ;;  %v2304_v2 = vadd.f32 %v6089_v18, %v7141_v24  ;;  %v2775_v18 = vmax.f32 %v6081_v10, 0.0  ;;  %v2852_v14 = vsel %vm2817_vm1, %v2715_v55, -inf  ;;  %v6398_v10 = vpop.permute.xlu1 %1746  ;;  %v3339_v55 = vld [vmem:[%s5453_s19 + $0x10] sm:$0xff] }
 0x35d   : > { %v6396_v59 = vpop.permute.xlu0 %1751 }
 0x35e   : > { %3018 = vmax.xlane.f32.xlu1 %v2855_v7  ;;  %v2716_v38 = vmax.f32 %v2304_v2, 0.0  ;;  %v2721_v2 = vmax.f32 %v2325_v54, 0.0  ;;  %v2565_v7 = vadd.f32 %v6108_v44, %v7144_v21  ;;  %v2912_v27 = vsel %vm2817_vm1, %v2775_v18, -inf }
 0x360   : > { %3016 = vmax.xlane.f32.xlu0 %v2854_v19  ;;  %v2328_v19 = vadd.f32 %v6120_v33, %v7143_v29  ;;  %v2853_v24 = vsel %vm2817_vm1, %v2716_v38, -inf  ;;  %v7145_v33 = vld [vmem:[#allocation50_spill] sm:$0xff]  ;;  %v2913_v38 = vsel %vm2817_vm1, %v2776_v17, -inf  ;;  %v2781_v29 = vmax.f32 %v2565_v7, 0.0 }
 0x361   : > { %v2953_v54 = vpop.xlane.xlu0 %2952  ;;  %v2858_v21 = vsel %vm2817_vm1, %v2721_v2, -inf }
 0x362   : > { %3138 = vmax.xlane.f32.xlu1 %v2915_v35  ;;  %v2568_v35 = vadd.f32 %v6122_v31, %v7145_v33  ;;  %v3467_v44 = vmax.f32 %v3339_v55, %v2953_v54  ;;  %v3399_v31 = vld [vmem:[%s5453_s19 + $0x1f0] sm:$0xff]  ;;  %v7147_v33 = vld [vmem:[#allocation14_spill] sm:$0xff]  ;;  %v3340_v55 = vld [vmem:[%s5453_s19 + $0x18] sm:$0xff] }
 0x363   : > { %v2320_v17 = vadd.f32 %v6126_v56, %v7147_v33 }
 0x364   : > { %3136 = vmax.xlane.f32.xlu0 %v2914_v52  ;;  %v2722_v52 = vmax.f32 %v2328_v19, 0.0  ;;  %3596 = vst.msk [vmem:[%s5453_s19 + $0x10] sm:$0xff] %vm3208_vm2, %v3467_v44  ;;  %v2918_v44 = vsel %vm2817_vm1, %v2781_v29, -inf }
 0x366   : > { %3014 = vmax.xlane.f32.xlu1 %v2853_v24  ;;  %v7146_v24 = vld [vmem:[#allocation15_spill] sm:$0xff]  ;;  %v2859_v7 = vsel %vm2817_vm1, %v2722_v52, -inf  ;;  %v2720_v52 = vmax.f32 %v2320_v17, 0.0  ;;  %v7150_v17 = vld [vmem:[#allocation21_spill] sm:$0xff] }
 0x367   : > { %v2317_v18 = vadd.f32 %v6112_v5, %v7146_v24  ;;  %v3073_v5 = vpop.xlane.xlu0 %3072  ;;  %v7149_v24 = vld [vmem:[#allocation48_spill] sm:$0xff] }
 0x368   : > { %3012 = vmax.xlane.f32.xlu0 %v2852_v14  ;;  %v2949_v14 = vpop.xlane.xlu1 %2948  ;;  %v3527_v2 = vmax.f32 %v3399_v31, %v3073_v5  ;;  %v3338_v5 = vld [vmem:[%s5453_s19 + $0x8] sm:$0xff] }
 0x369   : > { %v3465_v19 = vmax.f32 %v3337_v23, %v2949_v14  ;;  %v7148_v23 = vld [vmem:[#allocation49_spill] sm:$0xff]  ;;  %v3397_v14 = vld [vmem:[%s5453_s19 + $0x1e0] sm:$0xff] }
 0x36a   : > { %3134 = vmax.xlane.f32.xlu1 %v2913_v38  ;;  %v2557_v56 = vadd.f32 %v6114_v43, %v7148_v23  ;;  %3656 = vst.msk [vmem:[%s5453_s19 + $0x1f0] sm:$0xff] %vm3208_vm2, %v3527_v2  ;;  %v7151_v2 = vld [vmem:[#allocation20_spill] sm:$0xff]  ;;  %v2857_v23 = vsel %vm2817_vm1, %v2720_v52, -inf }
 0x36b   : > { %3594 = vst.msk [vmem:[%s5453_s19] sm:$0xff] %vm3208_vm2, %v3465_v19  ;;  %v3400_v19 = vld [vmem:[%s5453_s19 + $0x1f8] sm:$0xff]  ;;  %v3069_v43 = vpop.xlane.xlu0 %3068 }
 0x36c   : > { %3132 = vmax.xlane.f32.xlu0 %v2912_v27  ;;  %v2782_v27 = vmax.f32 %v2568_v35, 0.0  ;;  %v2955_v38 = vpop.xlane.xlu1 %2954  ;;  %v2719_v35 = vmax.f32 %v2317_v18, 0.0  ;;  %v3525_v29 = vmax.f32 %v3397_v14, %v3069_v43  ;;  %v2779_v33 = vmax.f32 %v2557_v56, 0.0  ;;  %v3398_v56 = vld [vmem:[%s5453_s19 + $0x1e8] sm:$0xff] }
 0x36d   : > { %v3468_v54 = vmax.f32 %v3340_v55, %v2955_v38  ;;  %v2344_v38 = vadd.f32 %v6156_v4, %v7151_v2  ;;  %v7152_v14 = vld [vmem:[#allocation55_spill] sm:$0xff]  ;;  %v3403_v2 = vld [vmem:[%s5453_s19 + $0x210] sm:$0xff] }
 0x36e   : > { %3026 = vmax.xlane.f32.xlu1 %v2859_v7  ;;  %v2919_v18 = vsel %vm2817_vm1, %v2782_v27, -inf  ;;  %v2856_v55 = vsel %vm2817_vm1, %v2719_v35, -inf  ;;  %3654 = vst.msk [vmem:[%s5453_s19 + $0x1e0] sm:$0xff] %vm3208_vm2, %v3525_v29  ;;  %v2581_v4 = vadd.f32 %v6144_v42, %v7152_v14  ;;  %v7156_v14 = vld [vmem:[#allocation53_spill] sm:$0xff] }
 0x36f   : > { %3597 = vst.msk [vmem:[%s5453_s19 + $0x18] sm:$0xff] %vm3208_vm2, %v3468_v54  ;;  %v2726_v52 = vmax.f32 %v2344_v38, 0.0  ;;  %v7155_v38 = vld [vmem:[#allocation18_spill] sm:$0xff] }
 0x370   : > { %3024 = vmax.xlane.f32.xlu0 %v2858_v21  ;;  %v2560_v21 = vadd.f32 %v6128_v22, %v7149_v24  ;;  %v3075_v31 = vpop.xlane.xlu1 %3074  ;;  %v2341_v22 = vadd.f32 %v6142_v11, %v7150_v17  ;;  %v2951_v11 = vpop.xlane.xlu0 %2950 }
 0x371   : > { %v3528_v7 = vmax.f32 %v3400_v19, %v3075_v31  ;;  %v3466_v35 = vmax.f32 %v3338_v5, %v2951_v11  ;;  %v7153_v19 = vld [vmem:[#allocation54_spill] sm:$0xff]  ;;  %v3344_v31 = vld [vmem:[%s5453_s19 + $0x38] sm:$0xff] }
 0x372   : > { %3146 = vmax.xlane.f32.xlu1 %v2919_v18  ;;  %v2780_v27 = vmax.f32 %v2560_v21, 0.0  ;;  %v2916_v21 = vsel %vm2817_vm1, %v2779_v33, -inf  ;;  %v3343_v18 = vld [vmem:[%s5453_s19 + $0x30] sm:$0xff]  ;;  %v2584_v43 = vadd.f32 %v6158_v30, %v7153_v19  ;;  %v3404_v11 = vld [vmem:[%s5453_s19 + $0x218] sm:$0xff] }
 0x373   : > { %3657 = vst.msk [vmem:[%s5453_s19 + $0x1f8] sm:$0xff] %vm3208_vm2, %v3528_v7  ;;  %3595 = vst.msk [vmem:[%s5453_s19 + $0x8] sm:$0xff] %vm3208_vm2, %v3466_v35  ;;  %v7154_v7 = vld [vmem:[#allocation19_spill] sm:$0xff] }
 0x374   : > { %3144 = vmax.xlane.f32.xlu0 %v2918_v44  ;;  %v3071_v54 = vpop.xlane.xlu1 %3070  ;;  %v2725_v44 = vmax.f32 %v2341_v22, 0.0  ;;  %v2917_v29 = vsel %vm2817_vm1, %v2780_v27, -inf  ;;  %v2961_v42 = vpop.xlane.xlu0 %2960  ;;  %v2785_v22 = vmax.f32 %v2581_v4, 0.0  ;;  %v2333_v30 = vadd.f32 %v6148_v58, %v7154_v7 }
 0x375   : > { %v3526_v24 = vmax.f32 %v3398_v56, %v3071_v54  ;;  %v3471_v33 = vmax.f32 %v3343_v18, %v2961_v42  ;;  %v2786_v27 = vmax.f32 %v2584_v43, 0.0  ;;  %v2863_v56 = vsel %vm2817_vm1, %v2726_v52, -inf  ;;  %v7157_v52 = vld [vmem:[#allocation52_spill] sm:$0xff] }
 0x376   : > { %3022 = vmax.xlane.f32.xlu1 %v2857_v23  ;;  %v2862_v5 = vsel %vm2817_vm1, %v2725_v44, -inf  ;;  %v2336_v23 = vadd.f32 %v6162_v40, %v7155_v38  ;;  %v2723_v44 = vmax.f32 %v2333_v30, 0.0  ;;  %v2573_v40 = vadd.f32 %v6150_v9, %v7156_v14  ;;  %v3401_v30 = vld [vmem:[%s5453_s19 + $0x200] sm:$0xff]  ;;  %v3402_v38 = vld [vmem:[%s5453_s19 + $0x208] sm:$0xff] }
 0x377   : > { %3655 = vst.msk [vmem:[%s5453_s19 + $0x1e8] sm:$0xff] %vm3208_vm2, %v3526_v24  ;;  %3600 = vst.msk [vmem:[%s5453_s19 + $0x30] sm:$0xff] %vm3208_vm2, %v3471_v33  ;;  %v2922_v24 = vsel %vm2817_vm1, %v2785_v22, -inf  ;;  %v2576_v19 = vadd.f32 %v6164_v3, %v7157_v52  ;;  %v2923_v43 = vsel %vm2817_vm1, %v2786_v27, -inf  ;;  %v2600_v14 = vadd.f32 %v6194_v39, %v6102_v0  ;;  %v7161_v52 = vld [vmem:[#allocation62_spill] sm:$0xff] }
 0x378   : > { %3020 = vmax.xlane.f32.xlu0 %v2856_v55  ;;  %v2963_v17 = vpop.xlane.xlu1 %2962  ;;  %v3081_v58 = vpop.xlane.xlu0 %3080  ;;  %v2724_v18 = vmax.f32 %v2336_v23, 0.0  ;;  %v2783_v33 = vmax.f32 %v2573_v40, 0.0  ;;  %v2860_v7 = vsel %vm2817_vm1, %v2723_v44, -inf }
 0x379   : > { %v3472_v55 = vmax.f32 %v3344_v31, %v2963_v17  ;;  %v3531_v35 = vmax.f32 %v3403_v2, %v3081_v58  ;;  %v7158_v17 = vld [vmem:[#allocation25_spill] sm:$0xff] }
 0x37a   : > { %3142 = vmax.xlane.f32.xlu1 %v2917_v29  ;;  %v3342_v29 = vld [vmem:[%s5453_s19 + $0x28] sm:$0xff]  ;;  %v2357_v3 = vadd.f32 %v6178_v37, %v7158_v17  ;;  %v2861_v27 = vsel %vm2817_vm1, %v2724_v18, -inf  ;;  %v3408_v17 = vld [vmem:[%s5453_s19 + $0x238] sm:$0xff] }
 0x37b   : > { %3601 = vst.msk [vmem:[%s5453_s19 + $0x38] sm:$0xff] %vm3208_vm2, %v3472_v55  ;;  %3660 = vst.msk [vmem:[%s5453_s19 + $0x210] sm:$0xff] %vm3208_vm2, %v3531_v35  ;;  %v2784_v55 = vmax.f32 %v2576_v19, 0.0  ;;  %v2920_v35 = vsel %vm2817_vm1, %v2783_v33, -inf  ;;  %v7160_v18 = vld [vmem:[#allocation23_spill] sm:$0xff] }
 0x37c   : > { %3140 = vmax.xlane.f32.xlu0 %v2916_v21  ;;  %v3083_v54 = vpop.xlane.xlu1 %3082  ;;  %v3341_v21 = vld [vmem:[%s5453_s19 + $0x20] sm:$0xff]  ;;  %v2957_v9 = vpop.xlane.xlu0 %2956  ;;  %v2349_v0 = vadd.f32 %v7161_v52, %v7160_v18 }
 0x37d   : > { %v3532_v4 = vmax.f32 %v3404_v11, %v3083_v54  ;;  %v3469_v31 = vmax.f32 %v3341_v21, %v2957_v9  ;;  %v2729_v11 = vmax.f32 %v2357_v3, 0.0  ;;  %v3347_v54 = vld [vmem:[%s5453_s19 + $0x50] sm:$0xff]  ;;  %v2921_v40 = vsel %vm2817_vm1, %v2784_v55, -inf  ;;  %v7162_v9 = vld [vmem:[#allocation22_spill] sm:$0xff]  ;;  %v7164_v55 = vld [vmem:[#allocation57_spill] sm:$0xff] }
 0x37e   : > { %3034 = vmax.xlane.f32.xlu1 %v2863_v56 }
 0x37f   : > { %3661 = vst.msk [vmem:[%s5453_s19 + $0x218] sm:$0xff] %vm3208_vm2, %v3532_v4  ;;  %3598 = vst.msk [vmem:[%s5453_s19 + $0x20] sm:$0xff] %vm3208_vm2, %v3469_v31  ;;  %v3348_v4 = vld [vmem:[%s5453_s19 + $0x58] sm:$0xff]  ;;  %v2866_v19 = vsel %vm2817_vm1, %v2729_v11, -inf  ;;  %v7163_v31 = vld [vmem:[#allocation38_spill] sm:$0xff] }
 0x380   : > { %3032 = vmax.xlane.f32.xlu0 %v2862_v5  ;;  %v2959_v42 = vpop.xlane.xlu1 %2958  ;;  %v7159_v5 = vld [vmem:[#allocation24_spill] sm:$0xff] }
 0x381   : > { %v3470_v22 = vmax.f32 %v3342_v29, %v2959_v42  ;;  %v2360_v2 = vadd.f32 %v6192_v28, %v7159_v5  ;;  %v2597_v28 = vadd.f32 %v6180_v60, %v6104_v50  ;;  %v2790_v29 = vmax.f32 %v2600_v14, 0.0  ;;  %v7165_v5 = vld [vmem:[#allocation63_spill] sm:$0xff] }
 0x382   : > { %3154 = vmax.xlane.f32.xlu1 %v2923_v43  ;;  %v3407_v43 = vld [vmem:[%s5453_s19 + $0x230] sm:$0xff]  ;;  %v2352_v42 = vadd.f32 %v7163_v31, %v7162_v9 }
 0x383   : > { %3599 = vst.msk [vmem:[%s5453_s19 + $0x28] sm:$0xff] %vm3208_vm2, %v3470_v22  ;;  %v2730_v44 = vmax.f32 %v2360_v2, 0.0  ;;  %v2789_v21 = vmax.f32 %v2597_v28, 0.0  ;;  %v2589_v2 = vadd.f32 %v7165_v5, %v7164_v55  ;;  %v2927_v28 = vsel %vm2817_vm1, %v2790_v29, -inf  ;;  %v7169_v29 = vld [vmem:[#allocation61_spill] sm:$0xff] }
 0x384   : > { %3152 = vmax.xlane.f32.xlu0 %v2922_v24  ;;  %v3079_v56 = vpop.xlane.xlu1 %3078 }
 0x385   : > { %v3530_v58 = vmax.f32 %v3402_v38, %v3079_v56  ;;  %v2867_v33 = vsel %vm2817_vm1, %v2730_v44, -inf  ;;  %v2926_v38 = vsel %vm2817_vm1, %v2789_v21, -inf  ;;  %v7166_v56 = vld [vmem:[#allocation56_spill] sm:$0xff]  ;;  %v2787_v14 = vmax.f32 %v2589_v2, 0.0 }
 0x386   : > { %3030 = vmax.xlane.f32.xlu1 %v2861_v27  ;;  %v2592_v11 = vadd.f32 %v6200_v15, %v7166_v56  ;;  %v7168_v21 = vld [vmem:[#allocation28_spill] sm:$0xff] }
 0x387   : > { %3659 = vst.msk [vmem:[%s5453_s19 + $0x208] sm:$0xff] %vm3208_vm2, %v3530_v58  ;;  %v3346_v58 = vld [vmem:[%s5453_s19 + $0x48] sm:$0xff]  ;;  %v2376_v18 = vadd.f32 %v6228_v63, %v7168_v21  ;;  %v2613_v63 = vadd.f32 %v6216_v32, %v7169_v29  ;;  %v2924_v31 = vsel %vm2817_vm1, %v2787_v14, -inf  ;;  %v3412_v14 = vld [vmem:[%s5453_s19 + $0x258] sm:$0xff] }
 0x388   : > { %3028 = vmax.xlane.f32.xlu0 %v2860_v7  ;;  %v3350_v29 = vld [vmem:[%s5453_s19 + $0x68] sm:$0xff] }
 0x389   : > { %v3077_v37 = vpop.xlane.xlu0 %3076  ;;  %v2793_v2 = vmax.f32 %v2613_v63, 0.0 }
 0x38a   : > { %v3529_v23 = vmax.f32 %v3401_v30, %v3077_v37  ;;  %3150 = vmax.xlane.f32.xlu1 %v2921_v40  ;;  %v2727_v30 = vmax.f32 %v2349_v0, 0.0  ;;  %v3345_v37 = vld [vmem:[%s5453_s19 + $0x40] sm:$0xff]  ;;  %v7167_v40 = vld [vmem:[#allocation29_spill] sm:$0xff]  ;;  %v3406_v0 = vld [vmem:[%s5453_s19 + $0x228] sm:$0xff] }
 0x38b   : > { %v2971_v24 = vpop.xlane.xlu1 %2970  ;;  %v2373_v15 = vadd.f32 %v6214_v34, %v7167_v40 }
 0x38c   : > { %3658 = vst.msk [vmem:[%s5453_s19 + $0x200] sm:$0xff] %vm3208_vm2, %v3529_v23  ;;  %3148 = vmax.xlane.f32.xlu0 %v2920_v35  ;;  %v3476_v39 = vmax.f32 %v3348_v4, %v2971_v24  ;;  %v2728_v23 = vmax.f32 %v2352_v42, 0.0  ;;  %v2788_v24 = vmax.f32 %v2592_v11, 0.0  ;;  %v3351_v42 = vld [vmem:[%s5453_s19 + $0x70] sm:$0xff] }
 0x38d   : > { %v2969_v50 = vpop.xlane.xlu0 %2968  ;;  %v3411_v11 = vld [vmem:[%s5453_s19 + $0x250] sm:$0xff] }
 0x38e   : > { %v3475_v60 = vmax.f32 %v3347_v54, %v2969_v50  ;;  %3605 = vst.msk [vmem:[%s5453_s19 + $0x58] sm:$0xff] %vm3208_vm2, %v3476_v39  ;;  %3042 = vmax.xlane.f32.xlu1 %v2867_v33  ;;  %v2864_v50 = vsel %vm2817_vm1, %v2727_v30, -inf  ;;  %v2865_v52 = vsel %vm2817_vm1, %v2728_v23, -inf  ;;  %v2734_v33 = vmax.f32 %v2376_v18, 0.0  ;;  %v3352_v30 = vld [vmem:[%s5453_s19 + $0x78] sm:$0xff] }
 0x38f   : > { %v3091_v7 = vpop.xlane.xlu1 %3090 }
 0x390   : > { %3604 = vst.msk [vmem:[%s5453_s19 + $0x50] sm:$0xff] %vm3208_vm2, %v3475_v60  ;;  %3040 = vmax.xlane.f32.xlu0 %v2866_v19  ;;  %v3536_v27 = vmax.f32 %v3408_v17, %v3091_v7  ;;  %v3405_v60 = vld [vmem:[%s5453_s19 + $0x220] sm:$0xff]  ;;  %v7170_v17 = vld [vmem:[#allocation60_spill] sm:$0xff]  ;;  %v2925_v7 = vsel %vm2817_vm1, %v2788_v24, -inf }
 0x391   : > { %v3089_v3 = vpop.xlane.xlu0 %3088  ;;  %v7177_v24 = vld [vmem:[#allocation64_spill] sm:$0xff] }
 0x392   : > { %v3535_v22 = vmax.f32 %v3407_v43, %v3089_v3  ;;  %3665 = vst.msk [vmem:[%s5453_s19 + $0x238] sm:$0xff] %vm3208_vm2, %v3536_v27  ;;  %3162 = vmax.xlane.f32.xlu1 %v2927_v28  ;;  %v2733_v43 = vmax.f32 %v2373_v15, 0.0  ;;  %v7171_v3 = vld [vmem:[#allocation41_spill] sm:$0xff]  ;;  %v7172_v27 = vld [vmem:[#allocation27_spill] sm:$0xff] }
 0x393   : > { %v2967_v44 = vpop.xlane.xlu1 %2966 }
 0x394   : > { %3664 = vst.msk [vmem:[%s5453_s19 + $0x230] sm:$0xff] %vm3208_vm2, %v3535_v22  ;;  %3160 = vmax.xlane.f32.xlu0 %v2926_v38  ;;  %v3474_v4 = vmax.f32 %v3346_v58, %v2967_v44  ;;  %v2616_v22 = vadd.f32 %v7171_v3, %v7170_v17  ;;  %v7173_v38 = vld [vmem:[#allocation42_spill] sm:$0xff]  ;;  %v2870_v56 = vsel %vm2817_vm1, %v2733_v43, -inf  ;;  %v2871_v44 = vsel %vm2817_vm1, %v2734_v33, -inf  ;;  %v7179_v33 = vld [vmem:[#allocation33_spill] sm:$0xff] }
 0x395   : > { %v2965_v35 = vpop.xlane.xlu0 %2964  ;;  %v7174_v58 = vld [vmem:[#allocation26_spill] sm:$0xff] }
 0x396   : > { %v3473_v54 = vmax.f32 %v3345_v37, %v2965_v35  ;;  %3603 = vst.msk [vmem:[%s5453_s19 + $0x48] sm:$0xff] %vm3208_vm2, %v3474_v4  ;;  %3038 = vmax.xlane.f32.xlu1 %v2865_v52  ;;  %v2365_v37 = vadd.f32 %v7173_v38, %v7172_v27  ;;  %v2794_v28 = vmax.f32 %v2616_v22, 0.0  ;;  %v7175_v35 = vld [vmem:[#allocation65_spill] sm:$0xff]  ;;  %v2930_v52 = vsel %vm2817_vm1, %v2793_v2, -inf  ;;  %v3409_v22 = vld [vmem:[%s5453_s19 + $0x240] sm:$0xff] }
 0x397   : > { %v3087_v19 = vpop.xlane.xlu1 %3086 }
 0x398   : > { %3602 = vst.msk [vmem:[%s5453_s19 + $0x40] sm:$0xff] %vm3208_vm2, %v3473_v54  ;;  %3036 = vmax.xlane.f32.xlu0 %v2864_v50  ;;  %v3534_v9 = vmax.f32 %v3406_v0, %v3087_v19  ;;  %v2368_v54 = vadd.f32 %v7175_v35, %v7174_v58  ;;  %v2731_v50 = vmax.f32 %v2365_v37, 0.0  ;;  %v3349_v0 = vld [vmem:[%s5453_s19 + $0x60] sm:$0xff]  ;;  %v2931_v43 = vsel %vm2817_vm1, %v2794_v28, -inf  ;;  %v7182_v58 = vld [vmem:[#allocation4_spill] sm:$0xff]  ;;  %v7183_v35 = vld [vmem:[#allocation39_spill] sm:$0xff] }
 0x399   : > { %v3085_v34 = vpop.xlane.xlu0 %3084  ;;  %v7181_v37 = vld [vmem:[#allocation2_spill] sm:$0xff] }
 0x39a   : > { %v3533_v39 = vmax.f32 %v3405_v60, %v3085_v34  ;;  %3663 = vst.msk [vmem:[%s5453_s19 + $0x228] sm:$0xff] %vm3208_vm2, %v3534_v9  ;;  %3158 = vmax.xlane.f32.xlu1 %v2925_v7  ;;  %v7176_v60 = vld [vmem:[#allocation59_spill] sm:$0xff]  ;;  %v2732_v34 = vmax.f32 %v2368_v54, 0.0  ;;  %v2868_v3 = vsel %vm2817_vm1, %v2731_v50, -inf  ;;  %v2632_v54 = vadd.f32 %v7183_v35, %v7182_v58  ;;  %v7192_v58 = vld [vmem:[#allocation36_spill] sm:$0xff] }
 0x39b   : > { %v2979_v5 = vpop.xlane.xlu1 %2978  ;;  %v2605_v21 = vadd.f32 %v7177_v24, %v7176_v60  ;;  %v7184_v50 = vld [vmem:[#allocation31_spill] sm:$0xff]  ;;  %v7185_v60 = vld [vmem:[#allocation40_spill] sm:$0xff]  ;;  %v2408_v35 = vadd.f32 %v6300_v13, %v7192_v58  ;;  %v2645_v13 = vadd.f32 %v6288_v62, %v6320_v61 }
 0x39c   : > { %3662 = vst.msk [vmem:[%s5453_s19 + $0x220] sm:$0xff] %vm3208_vm2, %v3533_v39  ;;  %3156 = vmax.xlane.f32.xlu0 %v2924_v31  ;;  %v3480_v23 = vmax.f32 %v3352_v30, %v2979_v5  ;;  %v7178_v39 = vld [vmem:[#allocation58_spill] sm:$0xff]  ;;  %v7180_v30 = vld [vmem:[#allocation32_spill] sm:$0xff]  ;;  %v3410_v5 = vld [vmem:[%s5453_s19 + $0x248] sm:$0xff]  ;;  %v2381_v24 = vadd.f32 %v7185_v60, %v7184_v50 }
 0x39d   : > { %v2977_v32 = vpop.xlane.xlu0 %2976  ;;  %v2608_v19 = vadd.f32 %v6236_v53, %v7178_v39  ;;  %v2389_v53 = vadd.f32 %v6250_v12, %v7179_v33  ;;  %v7187_v39 = vld [vmem:[#allocation67_spill] sm:$0xff]  ;;  %v3359_v50 = vld [vmem:[%s5453_s19 + $0xb0] sm:$0xff]  ;;  %v2742_v60 = vmax.f32 %v2408_v35, 0.0 }
 0x39e   : > { %v3479_v55 = vmax.f32 %v3351_v42, %v2977_v32  ;;  %3609 = vst.msk [vmem:[%s5453_s19 + $0x78] sm:$0xff] %vm3208_vm2, %v3480_v23  ;;  %3050 = vmax.xlane.f32.xlu1 %v2871_v44  ;;  %v2791_v42 = vmax.f32 %v2605_v21, 0.0  ;;  %v2392_v32 = vadd.f32 %v6264_v51, %v7180_v30  ;;  %v2629_v51 = vadd.f32 %v6252_v48, %v7181_v37  ;;  %v7188_v33 = vld [vmem:[#allocation3_spill] sm:$0xff] }
 0x39f   : > { %v3099_v4 = vpop.xlane.xlu1 %3098  ;;  %v2792_v7 = vmax.f32 %v2608_v19, 0.0  ;;  %v2737_v38 = vmax.f32 %v2389_v53, 0.0  ;;  %v7189_v53 = vld [vmem:[#allocation66_spill] sm:$0xff] }
 0x3a0   : > { %3608 = vst.msk [vmem:[%s5453_s19 + $0x70] sm:$0xff] %vm3208_vm2, %v3479_v55  ;;  %3048 = vmax.xlane.f32.xlu0 %v2870_v56  ;;  %v3540_v18 = vmax.f32 %v3412_v14, %v3099_v4  ;;  %v2869_v55 = vsel %vm2817_vm1, %v2732_v34, -inf  ;;  %v2928_v56 = vsel %vm2817_vm1, %v2791_v42, -inf  ;;  %v2738_v28 = vmax.f32 %v2392_v32, 0.0  ;;  %v3356_v14 = vld [vmem:[%s5453_s19 + $0x98] sm:$0xff]  ;;  %v7186_v34 = vld [vmem:[#allocation30_spill] sm:$0xff] }
 0x3a1   : > { %v3097_v40 = vpop.xlane.xlu0 %3096  ;;  %v2929_v44 = vsel %vm2817_vm1, %v2792_v7, -inf  ;;  %v2797_v4 = vmax.f32 %v2629_v51, 0.0  ;;  %v2384_v19 = vadd.f32 %v7187_v39, %v7186_v34  ;;  %v2735_v42 = vmax.f32 %v2381_v24, 0.0  ;;  %v3353_v7 = vld [vmem:[%s5453_s19 + $0x80] sm:$0xff]  ;;  %v7191_v51 = vld [vmem:[#allocation37_spill] sm:$0xff]  ;;  %v7193_v34 = vld [vmem:[#allocation35_spill] sm:$0xff] }
 0x3a2   : > { %v3539_v15 = vmax.f32 %v3411_v11, %v3097_v40  ;;  %3669 = vst.msk [vmem:[%s5453_s19 + $0x258] sm:$0xff] %vm3208_vm2, %v3540_v18  ;;  %3170 = vmax.xlane.f32.xlu1 %v2931_v43  ;;  %v3355_v11 = vld [vmem:[%s5453_s19 + $0x90] sm:$0xff]  ;;  %v2874_v18 = vsel %vm2817_vm1, %v2737_v38, -inf  ;;  %v2875_v43 = vsel %vm2817_vm1, %v2738_v28, -inf  ;;  %v7190_v32 = vld [vmem:[#allocation6_spill] sm:$0xff]  ;;  %v2648_v24 = vadd.f32 %v6302_v25, %v6318_v49 }
 0x3a3   : > { %v2975_v31 = vpop.xlane.xlu1 %2974  ;;  %v2736_v30 = vmax.f32 %v2384_v19, 0.0  ;;  %v7194_v39 = vld [vmem:[#allocation68_spill] sm:$0xff] }
 0x3a4   : > { %3668 = vst.msk [vmem:[%s5453_s19 + $0x250] sm:$0xff] %vm3208_vm2, %v3539_v15  ;;  %3168 = vmax.xlane.f32.xlu0 %v2930_v52  ;;  %v3478_v17 = vmax.f32 %v3350_v29, %v2975_v31  ;;  %v3415_v52 = vld [vmem:[%s5453_s19 + $0x270] sm:$0xff]  ;;  %v3416_v29 = vld [vmem:[%s5453_s19 + $0x278] sm:$0xff]  ;;  %v2397_v25 = vadd.f32 %v7194_v39, %v7193_v34 }
 0x3a5   : > { %v2973_v63 = vpop.xlane.xlu0 %2972 }
 0x3a6   : > { %v3477_v9 = vmax.f32 %v3349_v0, %v2973_v63  ;;  %3607 = vst.msk [vmem:[%s5453_s19 + $0x68] sm:$0xff] %vm3208_vm2, %v3478_v17  ;;  %3046 = vmax.xlane.f32.xlu1 %v2869_v55  ;;  %v2798_v0 = vmax.f32 %v2632_v54, 0.0  ;;  %v2621_v17 = vadd.f32 %v7189_v53, %v7188_v33  ;;  %v2624_v55 = vadd.f32 %v6272_v46, %v7190_v32 }
 0x3a7   : > { %v3095_v27 = vpop.xlane.xlu1 %3094  ;;  %v2405_v46 = vadd.f32 %v6286_v57, %v7191_v51  ;;  %v2873_v54 = vsel %vm2817_vm1, %v2736_v30, -inf }
 0x3a8   : > { %3606 = vst.msk [vmem:[%s5453_s19 + $0x60] sm:$0xff] %vm3208_vm2, %v3477_v9  ;;  %3044 = vmax.xlane.f32.xlu0 %v2868_v3  ;;  %v3538_v23 = vmax.f32 %v3410_v5, %v3095_v27  ;;  %v2935_v5 = vsel %vm2817_vm1, %v2798_v0, -inf  ;;  %v2795_v37 = vmax.f32 %v2621_v17, 0.0  ;;  %v2796_v28 = vmax.f32 %v2624_v55, 0.0  ;;  %v3357_v55 = vld [vmem:[%s5453_s19 + $0xa0] sm:$0xff] }
 0x3a9   : > { %v3093_v12 = vpop.xlane.xlu0 %3092  ;;  %v2801_v0 = vmax.f32 %v2645_v13, 0.0 }
 0x3aa   : > { %v3537_v2 = vmax.f32 %v3409_v22, %v3093_v12  ;;  %3667 = vst.msk [vmem:[%s5453_s19 + $0x248] sm:$0xff] %vm3208_vm2, %v3538_v23  ;;  %3166 = vmax.xlane.f32.xlu1 %v2929_v44  ;;  %v2934_v22 = vsel %vm2817_vm1, %v2797_v4, -inf  ;;  %v3354_v12 = vld [vmem:[%s5453_s19 + $0x88] sm:$0xff]  ;;  %v2932_v4 = vsel %vm2817_vm1, %v2795_v37, -inf }
 0x3ab   : > { %v2987_v15 = vpop.xlane.xlu1 %2986  ;;  %v3414_v44 = vld [vmem:[%s5453_s19 + $0x268] sm:$0xff]  ;;  %v2938_v32 = vsel %vm2817_vm1, %v2801_v0, -inf }
 0x3ac   : > { %3666 = vst.msk [vmem:[%s5453_s19 + $0x240] sm:$0xff] %vm3208_vm2, %v3537_v2  ;;  %3164 = vmax.xlane.f32.xlu0 %v2928_v56  ;;  %v3484_v21 = vmax.f32 %v3356_v14, %v2987_v15  ;;  %v2872_v56 = vsel %vm2817_vm1, %v2735_v42, -inf  ;;  %v3420_v42 = vld [vmem:[%s5453_s19 + $0x298] sm:$0xff]  ;;  %v3358_v37 = vld [vmem:[%s5453_s19 + $0xa8] sm:$0xff] }
 0x3ad   : > { %v2985_v48 = vpop.xlane.xlu0 %2984 }
 0x3ae   : > { %v3483_v40 = vmax.f32 %v3355_v11, %v2985_v48  ;;  %3613 = vst.msk [vmem:[%s5453_s19 + $0x98] sm:$0xff] %vm3208_vm2, %v3484_v21  ;;  %3058 = vmax.xlane.f32.xlu1 %v2875_v43  ;;  %v3413_v11 = vld [vmem:[%s5453_s19 + $0x260] sm:$0xff]  ;;  %v2933_v21 = vsel %vm2817_vm1, %v2796_v28, -inf  ;;  %v3419_v43 = vld [vmem:[%s5453_s19 + $0x290] sm:$0xff] }
 0x3af   : > { %v3107_v31 = vpop.xlane.xlu1 %3106 }
 0x3b0   : > { %3612 = vst.msk [vmem:[%s5453_s19 + $0x90] sm:$0xff] %vm3208_vm2, %v3483_v40  ;;  %3056 = vmax.xlane.f32.xlu0 %v2874_v18  ;;  %v3544_v3 = vmax.f32 %v3416_v29, %v3107_v31  ;;  %v2741_v40 = vmax.f32 %v2405_v46, 0.0  ;;  %v3360_v18 = vld [vmem:[%s5453_s19 + $0xb8] sm:$0xff]  ;;  %v2802_v29 = vmax.f32 %v2648_v24, 0.0  ;;  %v2879_v31 = vsel %vm2817_vm1, %v2742_v60, -inf  ;;  %v3363_v60 = vld [vmem:[%s5453_s19 + $0xd0] sm:$0xff] }
 0x3b1   : > { %v3105_v63 = vpop.xlane.xlu0 %3104 }
 0x3b2   : > { %v3543_v9 = vmax.f32 %v3415_v52, %v3105_v63  ;;  %3673 = vst.msk [vmem:[%s5453_s19 + $0x278] sm:$0xff] %vm3208_vm2, %v3544_v3  ;;  %3178 = vmax.xlane.f32.xlu1 %v2935_v5  ;;  %v2878_v19 = vsel %vm2817_vm1, %v2741_v40, -inf  ;;  %v7195_v63 = vld [vmem:[#allocation34_spill] sm:$0xff]  ;;  %v2739_v3 = vmax.f32 %v2397_v25, 0.0  ;;  %v2669_v25 = vadd.f32 %v6354_v47, %v6382_v1 }
 0x3b3   : > { %v2983_v38 = vpop.xlane.xlu1 %2982 }
 0x3b4   : > { %3672 = vst.msk [vmem:[%s5453_s19 + $0x270] sm:$0xff] %vm3208_vm2, %v3543_v9  ;;  %3176 = vmax.xlane.f32.xlu0 %v2934_v22  ;;  %v3482_v23 = vmax.f32 %v3354_v12, %v2983_v38  ;;  %v2400_v9 = vadd.f32 %v6306_v8, %v7195_v63  ;;  %v7196_v22 = vld [vmem:[#allocation8_spill] sm:$0xff]  ;;  %v7198_v12 = vld [vmem:[#allocation9_spill] sm:$0xff]  ;;  %v2939_v38 = vsel %vm2817_vm1, %v2802_v29, -inf  ;;  %v2876_v35 = vsel %vm2817_vm1, %v2739_v3, -inf  ;;  %v3361_v3 = vld [vmem:[%s5453_s19 + $0xc0] sm:$0xff] }
 0x3b5   : > { %v2981_v2 = vpop.xlane.xlu0 %2980  ;;  %v2672_v63 = vadd.f32 %v6366_v36, %v6378_v26  ;;  %v2807_v26 = vmax.f32 %v2669_v25, 0.0 }
 0x3b6   : > { %v3481_v27 = vmax.f32 %v3353_v7, %v2981_v2  ;;  %3611 = vst.msk [vmem:[%s5453_s19 + $0x88] sm:$0xff] %vm3208_vm2, %v3482_v23  ;;  %3054 = vmax.xlane.f32.xlu1 %v2873_v54  ;;  %v7197_v7 = vld [vmem:[#allocation69_spill] sm:$0xff]  ;;  %v2740_v5 = vmax.f32 %v2400_v9, 0.0  ;;  %v3417_v54 = vld [vmem:[%s5453_s19 + $0x280] sm:$0xff] }
 0x3b7   : > { %v3103_v48 = vpop.xlane.xlu1 %3102  ;;  %v2637_v8 = vadd.f32 %v7197_v7, %v7196_v22  ;;  %v7199_v2 = vld [vmem:[#allocation45_spill] sm:$0xff]  ;;  %v7205_v22 = vld [vmem:[#allocation12_spill] sm:$0xff] }
 0x3b8   : > { %3610 = vst.msk [vmem:[%s5453_s19 + $0x80] sm:$0xff] %vm3208_vm2, %v3481_v27  ;;  %3052 = vmax.xlane.f32.xlu0 %v2872_v56  ;;  %v3542_v15 = vmax.f32 %v3414_v44, %v3103_v48  ;;  %v2640_v27 = vadd.f32 %v7199_v2, %v7198_v12  ;;  %v3418_v48 = vld [vmem:[%s5453_s19 + $0x288] sm:$0xff]  ;;  %v2680_v7 = vadd.f32 %v7205_v22, %v6396_v59  ;;  %v2944_v2 = vsel %vm2817_vm1, %v2807_v26, -inf }
 0x3b9   : > { %v3101_v57 = vpop.xlane.xlu0 %3100  ;;  %v2799_v56 = vmax.f32 %v2637_v8, 0.0  ;;  %v2808_v8 = vmax.f32 %v2672_v63, 0.0  ;;  %v3432_v63 = vld [vmem:[%s5453_s19 + $0x2f8] sm:$0xff]  ;;  %v3430_v22 = vld [vmem:[%s5453_s19 + $0x2e8] sm:$0xff] }
 0x3ba   : > { %v3541_v14 = vmax.f32 %v3413_v11, %v3101_v57  ;;  %3671 = vst.msk [vmem:[%s5453_s19 + $0x268] sm:$0xff] %vm3208_vm2, %v3542_v15  ;;  %3174 = vmax.xlane.f32.xlu1 %v2933_v21  ;;  %v7200_v11 = vld [vmem:[#allocation7_spill] sm:$0xff]  ;;  %v2800_v44 = vmax.f32 %v2640_v27, 0.0  ;;  %v2664_v57 = vadd.f32 %v6332_v20, %v6364_v6  ;;  %v3421_v27 = vld [vmem:[%s5453_s19 + $0x2a0] sm:$0xff] }
 0x3bb   : > { %v2995_v52 = vpop.xlane.xlu1 %2994  ;;  %v2661_v28 = vadd.f32 %v7200_v11, %v6368_v16  ;;  %v7202_v21 = vld [vmem:[#allocation43_spill] sm:$0xff] }
 0x3bc   : > { %3670 = vst.msk [vmem:[%s5453_s19 + $0x260] sm:$0xff] %vm3208_vm2, %v3541_v14  ;;  %3172 = vmax.xlane.f32.xlu0 %v2932_v4  ;;  %v3488_v49 = vmax.f32 %v3360_v18, %v2995_v52  ;;  %v2877_v14 = vsel %vm2817_vm1, %v2740_v5, -inf  ;;  %v7201_v4 = vld [vmem:[#allocation5_spill] sm:$0xff]  ;;  %v2806_v24 = vmax.f32 %v2664_v57, 0.0  ;;  %v7203_v18 = vld [vmem:[#allocation44_spill] sm:$0xff] }
 0x3bd   : > { %v2993_v62 = vpop.xlane.xlu0 %2992  ;;  %v2805_v15 = vmax.f32 %v2661_v28, 0.0  ;;  %v2653_v20 = vadd.f32 %v7201_v4, %v6344_v41  ;;  %v3364_v52 = vld [vmem:[%s5453_s19 + $0xd8] sm:$0xff] }
 0x3be   : > { %v3487_v61 = vmax.f32 %v3359_v50, %v2993_v62  ;;  %3617 = vst.msk [vmem:[%s5453_s19 + $0xb8] sm:$0xff] %vm3208_vm2, %v3488_v49  ;;  %3066 = vmax.xlane.f32.xlu1 %v2879_v31  ;;  %v2936_v50 = vsel %vm2817_vm1, %v2799_v56, -inf  ;;  %v2656_v62 = vadd.f32 %v7203_v18, %v7202_v21  ;;  %v2943_v9 = vsel %vm2817_vm1, %v2806_v24, -inf  ;;  %v3424_v31 = vld [vmem:[%s5453_s19 + $0x2b8] sm:$0xff]  ;;  %v3425_v18 = vld [vmem:[%s5453_s19 + $0x2c0] sm:$0xff] }
 0x3bf   : > { %v3115_v17 = vpop.xlane.xlu1 %3114  ;;  %v2803_v39 = vmax.f32 %v2653_v20, 0.0  ;;  %v3365_v20 = vld [vmem:[%s5453_s19 + $0xe0] sm:$0xff] }
 0x3c0   : > { %3616 = vst.msk [vmem:[%s5453_s19 + $0xb0] sm:$0xff] %vm3208_vm2, %v3487_v61  ;;  %3064 = vmax.xlane.f32.xlu0 %v2878_v19  ;;  %v3548_v30 = vmax.f32 %v3420_v42, %v3115_v17  ;;  %v2937_v61 = vsel %vm2817_vm1, %v2800_v44, -inf  ;;  %v2942_v19 = vsel %vm2817_vm1, %v2805_v15, -inf  ;;  %v2804_v29 = vmax.f32 %v2656_v62, 0.0  ;;  %v3426_v62 = vld [vmem:[%s5453_s19 + $0x2c8] sm:$0xff] }
 0x3c1   : > { %v3113_v33 = vpop.xlane.xlu0 %3112  ;;  %v2940_v17 = vsel %vm2817_vm1, %v2803_v39, -inf  ;;  %v3372_v39 = vld [vmem:[%s5453_s19 + $0x118] sm:$0xff] }
 0x3c2   : > { %v3547_v53 = vmax.f32 %v3419_v43, %v3113_v33  ;;  %3677 = vst.msk [vmem:[%s5453_s19 + $0x298] sm:$0xff] %vm3208_vm2, %v3548_v30  ;;  %3186 = vmax.xlane.f32.xlu1 %v2939_v38  ;;  %v3423_v43 = vld [vmem:[%s5453_s19 + $0x2b0] sm:$0xff]  ;;  %v7204_v33 = vld [vmem:[#allocation13_spill] sm:$0xff]  ;;  %v2941_v30 = vsel %vm2817_vm1, %v2804_v29, -inf  ;;  %v2810_v38 = vmax.f32 %v2680_v7, 0.0 }
 0x3c3   : > { %v2991_v23 = vpop.xlane.xlu1 %2990  ;;  %v3431_v29 = vld [vmem:[%s5453_s19 + $0x2f0] sm:$0xff] }
 0x3c4   : > { %3676 = vst.msk [vmem:[%s5453_s19 + $0x290] sm:$0xff] %vm3208_vm2, %v3547_v53  ;;  %3184 = vmax.xlane.f32.xlu0 %v2938_v32  ;;  %v3486_v58 = vmax.f32 %v3358_v37, %v2991_v23  ;;  %v2677_v53 = vadd.f32 %v7204_v33, %v6398_v10  ;;  %v3362_v10 = vld [vmem:[%s5453_s19 + $0xc8] sm:$0xff]  ;;  %v2945_v37 = vsel %vm2817_vm1, %v2808_v8, -inf }
 0x3c5   : > { %v2989_v51 = vpop.xlane.xlu0 %2988  ;;  %v3370_v33 = vld [vmem:[%s5453_s19 + $0x108] sm:$0xff] }
 0x3c6   : > { %v3485_v46 = vmax.f32 %v3357_v55, %v2989_v51  ;;  %3615 = vst.msk [vmem:[%s5453_s19 + $0xa8] sm:$0xff] %vm3208_vm2, %v3486_v58  ;;  %3062 = vmax.xlane.f32.xlu1 %v2877_v14  ;;  %v2809_v12 = vmax.f32 %v2677_v53, 0.0  ;;  %v3422_v51 = vld [vmem:[%s5453_s19 + $0x2a8] sm:$0xff]  ;;  %v3367_v58 = vld [vmem:[%s5453_s19 + $0xf0] sm:$0xff] }
 0x3c7   : > { %v3111_v13 = vpop.xlane.xlu1 %3110 }
 0x3c8   : > { %3614 = vst.msk [vmem:[%s5453_s19 + $0xa0] sm:$0xff] %vm3208_vm2, %v3485_v46  ;;  %3060 = vmax.xlane.f32.xlu0 %v2876_v35  ;;  %v3546_v6 = vmax.f32 %v3418_v48, %v3111_v13  ;;  %v2946_v28 = vsel %vm2817_vm1, %v2809_v12, -inf  ;;  %v2947_v35 = vsel %vm2817_vm1, %v2810_v38, -inf  ;;  %v3436_v38 = vld [vmem:[%s5453_s19 + $0x318] sm:$0xff] }
 0x3c9   : > { %v3109_v16 = vpop.xlane.xlu0 %3108 }
 0x3ca   : > { %v3545_v40 = vmax.f32 %v3417_v54, %v3109_v16  ;;  %3675 = vst.msk [vmem:[%s5453_s19 + $0x288] sm:$0xff] %vm3208_vm2, %v3546_v6  ;;  %3182 = vmax.xlane.f32.xlu1 %v2937_v61  ;;  %v3368_v54 = vld [vmem:[%s5453_s19 + $0xf8] sm:$0xff]  ;;  %v3427_v16 = vld [vmem:[%s5453_s19 + $0x2d0] sm:$0xff]  ;;  %v3366_v6 = vld [vmem:[%s5453_s19 + $0xe8] sm:$0xff] }
 0x3cb   : > { %v3003_v34 = vpop.xlane.xlu1 %3002 }
 0x3cc   : > { %3674 = vst.msk [vmem:[%s5453_s19 + $0x280] sm:$0xff] %vm3208_vm2, %v3545_v40  ;;  %3180 = vmax.xlane.f32.xlu0 %v2936_v50  ;;  %v3492_v49 = vmax.f32 %v3364_v52, %v3003_v34  ;;  %v3428_v40 = vld [vmem:[%s5453_s19 + $0x2d8] sm:$0xff]  ;;  %v3371_v34 = vld [vmem:[%s5453_s19 + $0x110] sm:$0xff] }
 0x3cd   : > { %v3001_v41 = vpop.xlane.xlu0 %3000 }
 0x3ce   : > { %v3491_v0 = vmax.f32 %v3363_v60, %v3001_v41  ;;  %3621 = vst.msk [vmem:[%s5453_s19 + $0xd8] sm:$0xff] %vm3208_vm2, %v3492_v49  ;;  %3194 = vmax.xlane.f32.xlu1 %v2943_v9 }
 0x3cf   : > { %v3123_v42 = vpop.xlane.xlu1 %3122 }
 0x3d0   : > { %3620 = vst.msk [vmem:[%s5453_s19 + $0xd0] sm:$0xff] %vm3208_vm2, %v3491_v0  ;;  %3192 = vmax.xlane.f32.xlu0 %v2942_v19  ;;  %v3552_v36 = vmax.f32 %v3424_v31, %v3123_v42  ;;  %v3369_v42 = vld [vmem:[%s5453_s19 + $0x100] sm:$0xff] }
 0x3d1   : > { %v3121_v1 = vpop.xlane.xlu0 %3120 }
 0x3d2   : > { %v3551_v47 = vmax.f32 %v3423_v43, %v3121_v1  ;;  %3681 = vst.msk [vmem:[%s5453_s19 + $0x2b8] sm:$0xff] %vm3208_vm2, %v3552_v36  ;;  %3190 = vmax.xlane.f32.xlu1 %v2941_v30 }
 0x3d3   : > { %v2999_v5 = vpop.xlane.xlu1 %2998 }
 0x3d4   : > { %3680 = vst.msk [vmem:[%s5453_s19 + $0x2b0] sm:$0xff] %vm3208_vm2, %v3551_v47  ;;  %3188 = vmax.xlane.f32.xlu0 %v2940_v17  ;;  %v3490_v59 = vmax.f32 %v3362_v10, %v2999_v5 }
 0x3d5   : > { %v2997_v32 = vpop.xlane.xlu0 %2996 }
 0x3d6   : > { %v3489_v55 = vmax.f32 %v3361_v3, %v2997_v32  ;;  %3619 = vst.msk [vmem:[%s5453_s19 + $0xc8] sm:$0xff] %vm3208_vm2, %v3490_v59  ;;  %3198 = vmax.xlane.f32.xlu1 %v2945_v37  ;;  %v3429_v3 = vld [vmem:[%s5453_s19 + $0x2e0] sm:$0xff]  ;;  %v3375_v32 = vld [vmem:[%s5453_s19 + $0x130] sm:$0xff] }
 0x3d7   : > { %v3119_v56 = vpop.xlane.xlu1 %3118 }
 0x3d8   : > { %3618 = vst.msk [vmem:[%s5453_s19 + $0xc0] sm:$0xff] %vm3208_vm2, %v3489_v55  ;;  %3196 = vmax.xlane.f32.xlu0 %v2944_v2  ;;  %v3550_v11 = vmax.f32 %v3422_v51, %v3119_v56  ;;  %v3376_v55 = vld [vmem:[%s5453_s19 + $0x138] sm:$0xff]  ;;  %v3373_v56 = vld [vmem:[%s5453_s19 + $0x120] sm:$0xff] }
 0x3d9   : > { %v3117_v46 = vpop.xlane.xlu0 %3116 }
 0x3da   : > { %v3549_v23 = vmax.f32 %v3421_v27, %v3117_v46  ;;  %3679 = vst.msk [vmem:[%s5453_s19 + $0x2a8] sm:$0xff] %vm3208_vm2, %v3550_v11  ;;  %3202 = vmax.xlane.f32.xlu1 %v2947_v35  ;;  %v3435_v27 = vld [vmem:[%s5453_s19 + $0x310] sm:$0xff]  ;;  %v3374_v11 = vld [vmem:[%s5453_s19 + $0x128] sm:$0xff] }
 0x3db   : > { %v3011_v14 = vpop.xlane.xlu1 %3010 }
 0x3dc   : > { %3678 = vst.msk [vmem:[%s5453_s19 + $0x2a0] sm:$0xff] %vm3208_vm2, %v3549_v23  ;;  %3200 = vmax.xlane.f32.xlu0 %v2946_v28  ;;  %v3496_v48 = vmax.f32 %v3368_v54, %v3011_v14 }
 0x3dd   : > { %v3009_v44 = vpop.xlane.xlu0 %3008 }
 0x3de   : > { %v3495_v57 = vmax.f32 %v3367_v58, %v3009_v44  ;;  %3625 = vst.msk [vmem:[%s5453_s19 + $0xf8] sm:$0xff] %vm3208_vm2, %v3496_v48  ;;  %v3433_v44 = vld [vmem:[%s5453_s19 + $0x300] sm:$0xff] }
 0x3df   : > { %v3131_v15 = vpop.xlane.xlu1 %3130 }
 0x3e0   : > { %3624 = vst.msk [vmem:[%s5453_s19 + $0xf0] sm:$0xff] %vm3208_vm2, %v3495_v57  ;;  %v3556_v4 = vmax.f32 %v3428_v40, %v3131_v15  ;;  %v3434_v57 = vld [vmem:[%s5453_s19 + $0x308] sm:$0xff] }
 0x3e1   : > { %v3129_v45 = vpop.xlane.xlu0 %3128 }
 0x3e2   : > { %v3555_v13 = vmax.f32 %v3427_v16, %v3129_v45  ;;  %3685 = vst.msk [vmem:[%s5453_s19 + $0x2d8] sm:$0xff] %vm3208_vm2, %v3556_v4  ;;  %v3379_v45 = vld [vmem:[%s5453_s19 + $0x150] sm:$0xff] }
 0x3e3   : > { %v3007_v24 = vpop.xlane.xlu1 %3006 }
 0x3e4   : > { %3684 = vst.msk [vmem:[%s5453_s19 + $0x2d0] sm:$0xff] %vm3208_vm2, %v3555_v13  ;;  %v3494_v21 = vmax.f32 %v3366_v6, %v3007_v24  ;;  %v3380_v13 = vld [vmem:[%s5453_s19 + $0x158] sm:$0xff] }
 0x3e5   : > { %v3005_v50 = vpop.xlane.xlu0 %3004 }
 0x3e6   : > { %v3493_v60 = vmax.f32 %v3365_v20, %v3005_v50  ;;  %3623 = vst.msk [vmem:[%s5453_s19 + $0xe8] sm:$0xff] %vm3208_vm2, %v3494_v21  ;;  %v3439_v50 = vld [vmem:[%s5453_s19 + $0x330] sm:$0xff] }
 0x3e7   : > { %v3127_v41 = vpop.xlane.xlu1 %3126 }
 0x3e8   : > { %3622 = vst.msk [vmem:[%s5453_s19 + $0xe0] sm:$0xff] %vm3208_vm2, %v3493_v60  ;;  %v3554_v0 = vmax.f32 %v3426_v62, %v3127_v41  ;;  %v3440_v60 = vld [vmem:[%s5453_s19 + $0x338] sm:$0xff] }
 0x3e9   : > { %v3125_v61 = vpop.xlane.xlu0 %3124 }
 0x3ea   : > { %v3553_v52 = vmax.f32 %v3425_v18, %v3125_v61  ;;  %3683 = vst.msk [vmem:[%s5453_s19 + $0x2c8] sm:$0xff] %vm3208_vm2, %v3554_v0  ;;  %v3377_v61 = vld [vmem:[%s5453_s19 + $0x140] sm:$0xff] }
 0x3eb   : > { %v3019_v19 = vpop.xlane.xlu1 %3018 }
 0x3ec   : > { %3682 = vst.msk [vmem:[%s5453_s19 + $0x2c0] sm:$0xff] %vm3208_vm2, %v3553_v52  ;;  %v3500_v43 = vmax.f32 %v3372_v39, %v3019_v19  ;;  %v3378_v52 = vld [vmem:[%s5453_s19 + $0x148] sm:$0xff] }
 0x3ed   : > { %v3017_v25 = vpop.xlane.xlu0 %3016 }
 0x3ee   : > { %v3499_v49 = vmax.f32 %v3371_v34, %v3017_v25  ;;  %3629 = vst.msk [vmem:[%s5453_s19 + $0x118] sm:$0xff] %vm3208_vm2, %v3500_v43  ;;  %v3437_v25 = vld [vmem:[%s5453_s19 + $0x320] sm:$0xff] }
 0x3ef   : > { %v3139_v1 = vpop.xlane.xlu1 %3138 }
 0x3f0   : > { %3628 = vst.msk [vmem:[%s5453_s19 + $0x110] sm:$0xff] %vm3208_vm2, %v3499_v49  ;;  %v3560_v47 = vmax.f32 %v3432_v63, %v3139_v1  ;;  %v3438_v49 = vld [vmem:[%s5453_s19 + $0x328] sm:$0xff] }
 0x3f1   : > { %v3137_v9 = vpop.xlane.xlu0 %3136 }
 0x3f2   : > { %v3559_v31 = vmax.f32 %v3431_v29, %v3137_v9  ;;  %3689 = vst.msk [vmem:[%s5453_s19 + $0x2f8] sm:$0xff] %vm3208_vm2, %v3560_v47  ;;  %v3383_v9 = vld [vmem:[%s5453_s19 + $0x170] sm:$0xff] }
 0x3f3   : > { %v3015_v36 = vpop.xlane.xlu1 %3014 }
 0x3f4   : > { %3688 = vst.msk [vmem:[%s5453_s19 + $0x2f0] sm:$0xff] %vm3208_vm2, %v3559_v31  ;;  %v3498_v17 = vmax.f32 %v3370_v33, %v3015_v36  ;;  %v3384_v31 = vld [vmem:[%s5453_s19 + $0x178] sm:$0xff] }
 0x3f5   : > { %v3013_v53 = vpop.xlane.xlu0 %3012 }
 0x3f6   : > { %v3497_v26 = vmax.f32 %v3369_v42, %v3013_v53  ;;  %3627 = vst.msk [vmem:[%s5453_s19 + $0x108] sm:$0xff] %vm3208_vm2, %v3498_v17  ;;  %v3443_v53 = vld [vmem:[%s5453_s19 + $0x350] sm:$0xff] }
 0x3f7   : > { %v3135_v30 = vpop.xlane.xlu1 %3134 }
 0x3f8   : > { %3626 = vst.msk [vmem:[%s5453_s19 + $0x100] sm:$0xff] %vm3208_vm2, %v3497_v26  ;;  %v3558_v10 = vmax.f32 %v3430_v22, %v3135_v30  ;;  %v3444_v26 = vld [vmem:[%s5453_s19 + $0x358] sm:$0xff] }
 0x3f9   : > { %v3133_v7 = vpop.xlane.xlu0 %3132 }
 0x3fa   : > { %v3557_v8 = vmax.f32 %v3429_v3, %v3133_v7  ;;  %3687 = vst.msk [vmem:[%s5453_s19 + $0x2e8] sm:$0xff] %vm3208_vm2, %v3558_v10  ;;  %v3381_v7 = vld [vmem:[%s5453_s19 + $0x160] sm:$0xff] }
 0x3fb   : > { %v3027_v59 = vpop.xlane.xlu1 %3026 }
 0x3fc   : > { %3686 = vst.msk [vmem:[%s5453_s19 + $0x2e0] sm:$0xff] %vm3208_vm2, %v3557_v8  ;;  %v3504_v2 = vmax.f32 %v3376_v55, %v3027_v59  ;;  %v3382_v8 = vld [vmem:[%s5453_s19 + $0x168] sm:$0xff] }
 0x3fd   : > { %v3025_v5 = vpop.xlane.xlu0 %3024 }
 0x3fe   : > { %v3503_v12 = vmax.f32 %v3375_v32, %v3025_v5  ;;  %3633 = vst.msk [vmem:[%s5453_s19 + $0x138] sm:$0xff] %vm3208_vm2, %v3504_v2  ;;  %v3441_v5 = vld [vmem:[%s5453_s19 + $0x340] sm:$0xff] }
 0x3ff   : > { %v3147_v46 = vpop.xlane.xlu1 %3146 }
 0x400   : > { %3632 = vst.msk [vmem:[%s5453_s19 + $0x130] sm:$0xff] %vm3208_vm2, %v3503_v12  ;;  %v3564_v23 = vmax.f32 %v3436_v38, %v3147_v46  ;;  %v3442_v12 = vld [vmem:[%s5453_s19 + $0x348] sm:$0xff] }
 0x401   : > { %v3145_v37 = vpop.xlane.xlu0 %3144 }
 0x402   : > { %v3563_v51 = vmax.f32 %v3435_v27, %v3145_v37  ;;  %3693 = vst.msk [vmem:[%s5453_s19 + $0x318] sm:$0xff] %vm3208_vm2, %v3564_v23  ;;  %v3387_v37 = vld [vmem:[%s5453_s19 + $0x190] sm:$0xff] }
 0x403   : > { %v3023_v35 = vpop.xlane.xlu1 %3022 }
 0x404   : > { %3692 = vst.msk [vmem:[%s5453_s19 + $0x310] sm:$0xff] %vm3208_vm2, %v3563_v51  ;;  %v3502_v54 = vmax.f32 %v3374_v11, %v3023_v35  ;;  %v3388_v51 = vld [vmem:[%s5453_s19 + $0x198] sm:$0xff] }
 0x405   : > { %v3021_v28 = vpop.xlane.xlu0 %3020 }
 0x406   : > { %v3501_v58 = vmax.f32 %v3373_v56, %v3021_v28  ;;  %3631 = vst.msk [vmem:[%s5453_s19 + $0x128] sm:$0xff] %vm3208_vm2, %v3502_v54  ;;  %v3447_v28 = vld [vmem:[%s5453_s19 + $0x370] sm:$0xff] }
 0x407   : > { %v3143_v16 = vpop.xlane.xlu1 %3142 }
 0x408   : > { %3630 = vst.msk [vmem:[%s5453_s19 + $0x120] sm:$0xff] %vm3208_vm2, %v3501_v58  ;;  %v3562_v40 = vmax.f32 %v3434_v57, %v3143_v16  ;;  %v3448_v58 = vld [vmem:[%s5453_s19 + $0x378] sm:$0xff] }
 0x409   : > { %v3141_v14 = vpop.xlane.xlu0 %3140 }
 0x40a   : > { %v3561_v48 = vmax.f32 %v3433_v44, %v3141_v14  ;;  %3691 = vst.msk [vmem:[%s5453_s19 + $0x308] sm:$0xff] %vm3208_vm2, %v3562_v40  ;;  %v3385_v14 = vld [vmem:[%s5453_s19 + $0x180] sm:$0xff] }
 0x40b   : > { %v3035_v20 = vpop.xlane.xlu1 %3034 }
 0x40c   : > { %3690 = vst.msk [vmem:[%s5453_s19 + $0x300] sm:$0xff] %vm3208_vm2, %v3561_v48  ;;  %v3508_v6 = vmax.f32 %v3380_v13, %v3035_v20  ;;  %v3386_v48 = vld [vmem:[%s5453_s19 + $0x188] sm:$0xff] }
 0x40d   : > { %v3033_v15 = vpop.xlane.xlu0 %3032 }
 0x40e   : > { %v3507_v4 = vmax.f32 %v3379_v45, %v3033_v15  ;;  %3637 = vst.msk [vmem:[%s5453_s19 + $0x158] sm:$0xff] %vm3208_vm2, %v3508_v6  ;;  %v3445_v15 = vld [vmem:[%s5453_s19 + $0x360] sm:$0xff] }
 0x40f   : > { %v3155_v18 = vpop.xlane.xlu1 %3154 }
 0x410   : > { %3636 = vst.msk [vmem:[%s5453_s19 + $0x150] sm:$0xff] %vm3208_vm2, %v3507_v4  ;;  %v3568_v62 = vmax.f32 %v3440_v60, %v3155_v18  ;;  %v3446_v4 = vld [vmem:[%s5453_s19 + $0x368] sm:$0xff] }
 0x411   : > { %v3153_v24 = vpop.xlane.xlu0 %3152 }
 0x412   : > { %v3567_v21 = vmax.f32 %v3439_v50, %v3153_v24  ;;  %3697 = vst.msk [vmem:[%s5453_s19 + $0x338] sm:$0xff] %vm3208_vm2, %v3568_v62  ;;  %v3391_v24 = vld [vmem:[%s5453_s19 + $0x1b0] sm:$0xff] }
 0x413   : > { %v3031_v34 = vpop.xlane.xlu1 %3030 }
 0x414   : > { %3696 = vst.msk [vmem:[%s5453_s19 + $0x330] sm:$0xff] %vm3208_vm2, %v3567_v21  ;;  %v3506_v39 = vmax.f32 %v3378_v52, %v3031_v34  ;;  %v3392_v21 = vld [vmem:[%s5453_s19 + $0x1b8] sm:$0xff] }
 0x415   : > { %v3029_v41 = vpop.xlane.xlu0 %3028 }
 0x416   : > { %v3505_v0 = vmax.f32 %v3377_v61, %v3029_v41  ;;  %3635 = vst.msk [vmem:[%s5453_s19 + $0x148] sm:$0xff] %vm3208_vm2, %v3506_v39  ;;  %v3451_v41 = vld [vmem:[%s5453_s19 + $0x390] sm:$0xff] }
 0x417   : > { %v3151_v29 = vpop.xlane.xlu1 %3150 }
 0x418   : > { %3634 = vst.msk [vmem:[%s5453_s19 + $0x140] sm:$0xff] %vm3208_vm2, %v3505_v0  ;;  %v3566_v63 = vmax.f32 %v3438_v49, %v3151_v29  ;;  %v3452_v0 = vld [vmem:[%s5453_s19 + $0x398] sm:$0xff] }
 0x419   : > { %v3149_v19 = vpop.xlane.xlu0 %3148 }
 0x41a   : > { %v3565_v43 = vmax.f32 %v3437_v25, %v3149_v19  ;;  %3695 = vst.msk [vmem:[%s5453_s19 + $0x328] sm:$0xff] %vm3208_vm2, %v3566_v63  ;;  %v3389_v19 = vld [vmem:[%s5453_s19 + $0x1a0] sm:$0xff] }
 0x41b   : > { %v3043_v42 = vpop.xlane.xlu1 %3042 }
 0x41c   : > { %3694 = vst.msk [vmem:[%s5453_s19 + $0x320] sm:$0xff] %vm3208_vm2, %v3565_v43  ;;  %v3512_v33 = vmax.f32 %v3384_v31, %v3043_v42  ;;  %v3390_v43 = vld [vmem:[%s5453_s19 + $0x1a8] sm:$0xff] }
 0x41d   : > { %v3041_v1 = vpop.xlane.xlu0 %3040 }
 0x41e   : > { %v3511_v47 = vmax.f32 %v3383_v9, %v3041_v1  ;;  %3641 = vst.msk [vmem:[%s5453_s19 + $0x178] sm:$0xff] %vm3208_vm2, %v3512_v33  ;;  %v3449_v1 = vld [vmem:[%s5453_s19 + $0x380] sm:$0xff] }
 0x41f   : > { %v3163_v3 = vpop.xlane.xlu1 %3162 }
 0x420   : > { %3640 = vst.msk [vmem:[%s5453_s19 + $0x170] sm:$0xff] %vm3208_vm2, %v3511_v47  ;;  %v3572_v22 = vmax.f32 %v3444_v26, %v3163_v3  ;;  %v3450_v47 = vld [vmem:[%s5453_s19 + $0x388] sm:$0xff] }
 0x421   : > { %v3161_v36 = vpop.xlane.xlu0 %3160 }
 0x422   : > { %v3571_v17 = vmax.f32 %v3443_v53, %v3161_v36  ;;  %3701 = vst.msk [vmem:[%s5453_s19 + $0x358] sm:$0xff] %vm3208_vm2, %v3572_v22  ;;  %v3395_v36 = vld [vmem:[%s5453_s19 + $0x1d0] sm:$0xff] }
 0x423   : > { %v3039_v32 = vpop.xlane.xlu1 %3038 }
 0x424   : > { %3700 = vst.msk [vmem:[%s5453_s19 + $0x350] sm:$0xff] %vm3208_vm2, %v3571_v17  ;;  %v3510_v55 = vmax.f32 %v3382_v8, %v3039_v32  ;;  %v3396_v17 = vld [vmem:[%s5453_s19 + $0x1d8] sm:$0xff] }
 0x425   : > { %v3037_v30 = vpop.xlane.xlu0 %3036 }
 0x426   : > { %v3509_v10 = vmax.f32 %v3381_v7, %v3037_v30  ;;  %3639 = vst.msk [vmem:[%s5453_s19 + $0x168] sm:$0xff] %vm3208_vm2, %v3510_v55  ;;  %v3455_v30 = vld [vmem:[%s5453_s19 + $0x3b0] sm:$0xff] }
 0x427   : > { %v3159_v27 = vpop.xlane.xlu1 %3158 }
 0x428   : > { %3638 = vst.msk [vmem:[%s5453_s19 + $0x160] sm:$0xff] %vm3208_vm2, %v3509_v10  ;;  %v3570_v38 = vmax.f32 %v3442_v12, %v3159_v27  ;;  %v3456_v10 = vld [vmem:[%s5453_s19 + $0x3b8] sm:$0xff] }
 0x429   : > { %v3157_v59 = vpop.xlane.xlu0 %3156 }
 0x42a   : > { %v3569_v2 = vmax.f32 %v3441_v5, %v3157_v59  ;;  %3699 = vst.msk [vmem:[%s5453_s19 + $0x348] sm:$0xff] %vm3208_vm2, %v3570_v38  ;;  %v3393_v59 = vld [vmem:[%s5453_s19 + $0x1c0] sm:$0xff] }
 0x42b   : > { %v3051_v56 = vpop.xlane.xlu1 %3050 }
 0x42c   : > { %3698 = vst.msk [vmem:[%s5453_s19 + $0x340] sm:$0xff] %vm3208_vm2, %v3569_v2  ;;  %v3516_v11 = vmax.f32 %v3388_v51, %v3051_v56  ;;  %v3394_v2 = vld [vmem:[%s5453_s19 + $0x1c8] sm:$0xff] }
 0x42d   : > { %v3049_v46 = vpop.xlane.xlu0 %3048 }
 0x42e   : > { %v3515_v23 = vmax.f32 %v3387_v37, %v3049_v46  ;;  %3645 = vst.msk [vmem:[%s5453_s19 + $0x198] sm:$0xff] %vm3208_vm2, %v3516_v11  ;;  %v3453_v46 = vld [vmem:[%s5453_s19 + $0x3a0] sm:$0xff] }
 0x42f   : > { %v3171_v44 = vpop.xlane.xlu1 %3170 }
 0x430   : > { %3644 = vst.msk [vmem:[%s5453_s19 + $0x190] sm:$0xff] %vm3208_vm2, %v3515_v23  ;;  %v3576_v57 = vmax.f32 %v3448_v58, %v3171_v44  ;;  %v3454_v23 = vld [vmem:[%s5453_s19 + $0x3a8] sm:$0xff] }
 0x431   : > { %v3169_v35 = vpop.xlane.xlu0 %3168 }
 0x432   : > { %v3575_v54 = vmax.f32 %v3447_v28, %v3169_v35  ;;  %3705 = vst.msk [vmem:[%s5453_s19 + $0x378] sm:$0xff] %vm3208_vm2, %v3576_v57  ;;  %v3459_v35 = vld [vmem:[%s5453_s19 + $0x3d0] sm:$0xff] }
 0x433   : > { %v3047_v45 = vpop.xlane.xlu1 %3046 }
 0x434   : > { %3704 = vst.msk [vmem:[%s5453_s19 + $0x370] sm:$0xff] %vm3208_vm2, %v3575_v54  ;;  %v3514_v13 = vmax.f32 %v3386_v48, %v3047_v45  ;;  %v3460_v54 = vld [vmem:[%s5453_s19 + $0x3d8] sm:$0xff] }
 0x435   : > { %v3045_v16 = vpop.xlane.xlu0 %3044 }
 0x436   : > { %v3513_v40 = vmax.f32 %v3385_v14, %v3045_v16  ;;  %3643 = vst.msk [vmem:[%s5453_s19 + $0x188] sm:$0xff] %vm3208_vm2, %v3514_v13  ;;  %v3457_v16 = vld [vmem:[%s5453_s19 + $0x3c0] sm:$0xff] }
 0x437   : > { %v3167_v50 = vpop.xlane.xlu1 %3166 }
 0x438   : > { %3642 = vst.msk [vmem:[%s5453_s19 + $0x180] sm:$0xff] %vm3208_vm2, %v3513_v40  ;;  %v3574_v60 = vmax.f32 %v3446_v4, %v3167_v50  ;;  %v3458_v40 = vld [vmem:[%s5453_s19 + $0x3c8] sm:$0xff] }
 0x439   : > { %v3165_v20 = vpop.xlane.xlu0 %3164 }
 0x43a   : > { %v3573_v6 = vmax.f32 %v3445_v15, %v3165_v20  ;;  %3703 = vst.msk [vmem:[%s5453_s19 + $0x368] sm:$0xff] %vm3208_vm2, %v3574_v60  ;;  %v3461_v20 = vld [vmem:[%s5453_s19 + $0x3e0] sm:$0xff] }
 0x43b   : > { %v3059_v61 = vpop.xlane.xlu1 %3058 }
 0x43c   : > { %3702 = vst.msk [vmem:[%s5453_s19 + $0x360] sm:$0xff] %vm3208_vm2, %v3573_v6  ;;  %v3520_v52 = vmax.f32 %v3392_v21, %v3059_v61  ;;  %v3462_v6 = vld [vmem:[%s5453_s19 + $0x3e8] sm:$0xff] }
 0x43d   : > { %v3057_v18 = vpop.xlane.xlu0 %3056 }
 0x43e   : > { %v3519_v62 = vmax.f32 %v3391_v24, %v3057_v18  ;;  %3649 = vst.msk [vmem:[%s5453_s19 + $0x1b8] sm:$0xff] %vm3208_vm2, %v3520_v52  ;;  %v3463_v18 = vld [vmem:[%s5453_s19 + $0x3f0] sm:$0xff] }
 0x43f   : > { %v3179_v25 = vpop.xlane.xlu1 %3178 }
 0x440   : > { %3648 = vst.msk [vmem:[%s5453_s19 + $0x1b0] sm:$0xff] %vm3208_vm2, %v3519_v62  ;;  %v3580_v49 = vmax.f32 %v3452_v0, %v3179_v25  ;;  %v3464_v62 = vld [vmem:[%s5453_s19 + $0x3f8] sm:$0xff] }
 0x441   : > { %v3177_v34 = vpop.xlane.xlu0 %3176 }
 0x442   : > { %v3579_v39 = vmax.f32 %v3451_v41, %v3177_v34  ;;  %3709 = vst.msk [vmem:[%s5453_s19 + $0x398] sm:$0xff] %vm3208_vm2, %v3580_v49 }
 0x443   : > { %v3055_v9 = vpop.xlane.xlu1 %3054 }
 0x444   : > { %3708 = vst.msk [vmem:[%s5453_s19 + $0x390] sm:$0xff] %vm3208_vm2, %v3579_v39  ;;  %v3518_v31 = vmax.f32 %v3390_v43, %v3055_v9 }
 0x445   : > { %v3053_v29 = vpop.xlane.xlu0 %3052 }
 0x446   : > { %v3517_v63 = vmax.f32 %v3389_v19, %v3053_v29  ;;  %3647 = vst.msk [vmem:[%s5453_s19 + $0x1a8] sm:$0xff] %vm3208_vm2, %v3518_v31 }
 0x447   : > { %v3175_v53 = vpop.xlane.xlu1 %3174 }
 0x448   : > { %3646 = vst.msk [vmem:[%s5453_s19 + $0x1a0] sm:$0xff] %vm3208_vm2, %v3517_v63  ;;  %v3578_v26 = vmax.f32 %v3450_v47, %v3175_v53 }
 0x449   : > { %v3173_v42 = vpop.xlane.xlu0 %3172 }
 0x44a   : > { %v3577_v33 = vmax.f32 %v3449_v1, %v3173_v42  ;;  %3707 = vst.msk [vmem:[%s5453_s19 + $0x388] sm:$0xff] %vm3208_vm2, %v3578_v26 }
 0x44b   : > { %v3067_v7 = vpop.xlane.xlu1 %3066 }
 0x44c   : > { %3706 = vst.msk [vmem:[%s5453_s19 + $0x380] sm:$0xff] %vm3208_vm2, %v3577_v33  ;;  %v3524_v8 = vmax.f32 %v3396_v17, %v3067_v7 }
 0x44d   : > { %v3065_v3 = vpop.xlane.xlu0 %3064 }
 0x44e   : > { %v3523_v22 = vmax.f32 %v3395_v36, %v3065_v3  ;;  %3653 = vst.msk [vmem:[%s5453_s19 + $0x1d8] sm:$0xff] %vm3208_vm2, %v3524_v8 }
 0x44f   : > { %v3187_v5 = vpop.xlane.xlu1 %3186 }
 0x450   : > { %3652 = vst.msk [vmem:[%s5453_s19 + $0x1d0] sm:$0xff] %vm3208_vm2, %v3523_v22  ;;  %v3584_v12 = vmax.f32 %v3456_v10, %v3187_v5 }
 0x451   : > { %v3185_v32 = vpop.xlane.xlu0 %3184 }
 0x452   : > { %v3583_v55 = vmax.f32 %v3455_v30, %v3185_v32  ;;  %3713 = vst.msk [vmem:[%s5453_s19 + $0x3b8] sm:$0xff] %vm3208_vm2, %v3584_v12 }
 0x453   : > { %v3063_v37 = vpop.xlane.xlu1 %3062 }
 0x454   : > { %3712 = vst.msk [vmem:[%s5453_s19 + $0x3b0] sm:$0xff] %vm3208_vm2, %v3583_v55  ;;  %v3522_v51 = vmax.f32 %v3394_v2, %v3063_v37 }
 0x455   : > { %v3061_v27 = vpop.xlane.xlu0 %3060 }
 0x456   : > { %v3521_v38 = vmax.f32 %v3393_v59, %v3061_v27  ;;  %3651 = vst.msk [vmem:[%s5453_s19 + $0x1c8] sm:$0xff] %vm3208_vm2, %v3522_v51 }
 0x457   : > { %v3183_v28 = vpop.xlane.xlu1 %3182 }
 0x458   : > { %3650 = vst.msk [vmem:[%s5453_s19 + $0x1c0] sm:$0xff] %vm3208_vm2, %v3521_v38  ;;  %v3582_v58 = vmax.f32 %v3454_v23, %v3183_v28 }
 0x459   : > { %v3181_v56 = vpop.xlane.xlu0 %3180 }
 0x45a   : > { %v3581_v11 = vmax.f32 %v3453_v46, %v3181_v56  ;;  %3711 = vst.msk [vmem:[%s5453_s19 + $0x3a8] sm:$0xff] %vm3208_vm2, %v3582_v58 }
 0x45b   : > { %v3195_v14 = vpop.xlane.xlu1 %3194 }
 0x45c   : > { %3710 = vst.msk [vmem:[%s5453_s19 + $0x3a0] sm:$0xff] %vm3208_vm2, %v3581_v11  ;;  %v3588_v48 = vmax.f32 %v3460_v54, %v3195_v14 }
 0x45d   : > { %v3193_v44 = vpop.xlane.xlu0 %3192 }
 0x45e   : > { %v3587_v57 = vmax.f32 %v3459_v35, %v3193_v44  ;;  %3717 = vst.msk [vmem:[%s5453_s19 + $0x3d8] sm:$0xff] %vm3208_vm2, %v3588_v48 }
 0x45f   : > { %v3191_v15 = vpop.xlane.xlu1 %3190 }
 0x460   : > { %3716 = vst.msk [vmem:[%s5453_s19 + $0x3d0] sm:$0xff] %vm3208_vm2, %v3587_v57  ;;  %v3586_v4 = vmax.f32 %v3458_v40, %v3191_v15 }
 0x461   : > { %v3189_v45 = vpop.xlane.xlu0 %3188 }
 0x462   : > { %v3585_v13 = vmax.f32 %v3457_v16, %v3189_v45  ;;  %3715 = vst.msk [vmem:[%s5453_s19 + $0x3c8] sm:$0xff] %vm3208_vm2, %v3586_v4 }
 0x463   : > { %v3199_v24 = vpop.xlane.xlu1 %3198 }
 0x464   : > { %3714 = vst.msk [vmem:[%s5453_s19 + $0x3c0] sm:$0xff] %vm3208_vm2, %v3585_v13  ;;  %v3590_v21 = vmax.f32 %v3462_v6, %v3199_v24 }
 0x465   : > { %v3197_v50 = vpop.xlane.xlu0 %3196 }
 0x466   : > { %v3589_v60 = vmax.f32 %v3461_v20, %v3197_v50  ;;  %3719 = vst.msk [vmem:[%s5453_s19 + $0x3e8] sm:$0xff] %vm3208_vm2, %v3590_v21 }
 0x467   : > { %v3203_v41 = vpop.xlane.xlu1 %3202 }
 0x468   : > { %3718 = vst.msk [vmem:[%s5453_s19 + $0x3e0] sm:$0xff] %vm3208_vm2, %v3589_v60  ;;  %v3592_v0 = vmax.f32 %v3464_v62, %v3203_v41 }
 0x469   : > { %v3201_v61 = vpop.xlane.xlu0 %3200 }
 0x46a   : > { %v3591_v52 = vmax.f32 %v3463_v18, %v3201_v61  ;;  %3721 = vst.msk [vmem:[%s5453_s19 + $0x3f8] sm:$0xff] %vm3208_vm2, %v3592_v0 }
 0x46c   : > { %3720 = vst.msk [vmem:[%s5453_s19 + $0x3f0] sm:$0xff] %vm3208_vm2, %v3591_v52 }
 0x46d PF: > { %s17_s28 = sadd.s32 1, %s4339_s28   ;;  %s7206_s24 = smov %s4331_s26 }
 0x46e   : > { %p14_p7 = scmp.ge.s32.totalorder %s17_s28, 6   ;;  %s7207_s25 = smov %s4335_s27 }
 0x46f   : > { %s7208_s26 = smov %s7211_s29  ;;  %s7209_s27 = smov %s7215_s30 }
 0x470   :  { %16 = sbr.rel (!%p14_p7) target bundleno = 3 (0x3), region = 82 }

// kernel: encoder_2f_forward.7
= control target key start
LH: loop header
LB: loop body
LE: loop exit
PB: predicated region body
PF: predicated region fallthrough
CT: control target
= control target key end

     0   :  { %s935_s15 = smov 0   ;;  %s937_s16 = smov 0   ;;  %s1171_s0 = inlined_call_operand.vmem [shape: f32[2,3,256], index: 0, kind: input, shape index: {}]   ;;  %s1172_s1 = inlined_call_operand.vmem [shape: f32[2,64,3], index: 1, kind: input, shape index: {}]   ;;  %s1173_s2 = inlined_call_operand.vmem [shape: f32[64,1], index: 2, kind: input, shape index: {}]   ;;  %s1174_s3 = inlined_call_operand.vmem [shape: f32[2,2,64,1], index: 3, kind: output, shape index: {0}]   ;;  %s1175_s4 = inlined_call_operand.vmem [shape: f32[2,2,64,1], index: 4, kind: output, shape index: {1}]  }
   0x1   :  { %s939_s17 = smov 0   ;;  %s941_s18 = smov 0  }
   0x2   :  { %s943_s19 = smov 0  }
   0x3 LB: > { %s30_s20 = sadd.s32 1, %s896_s17  ;;  %s34_s21 = sadd.s32 1, %s900_s18  ;;  %s904_s19 = sphi %s943_s19, %s15_s19   ;;  %s900_s18 = sphi %s941_s18, %s1179_s18   ;;  %s896_s17 = sphi %s939_s17, %s1178_s17   ;;  %s892_s16 = sphi %s937_s16, %s1177_s16   ;;  %s888_s15 = sphi %s935_s15, %s1176_s15  }
   0x4   : > { %p32_p0 = scmp.ge.s32.totalorder %s30_s20, 2  ;;  %p800_p1 = scmp.ge.s32.totalorder %s904_s19, 1 }
   0x5   : > { %p207_p2 = scmp.lt.s32.totalorder %s904_s19, 5 }
   0x6   : > { %s1181_s20 = smov (%p32_p0, %s30_s20), 0  ;;  %s1183_s21 = smov (!%p32_p0, %s34_s21), %s900_s18 }
   0x7   : > { %p208_p3 = pnand %p800_p1, %p207_p2  ;;  %p36_p4 = scmp.ge.s32.totalorder %s1183_s21, 2 }
   0x8   : > { %p256_p5 = scmp.lt.s32.totalorder (!%p208_p3), %s892_s16, 1  ;;  %p258_p6 = scmp.lt.s32.totalorder (!%p208_p3), %s888_s15, 1  ;;  %v906_v0 = vmov (!%p208_p3), 1   ;;  %v907_v1 = vmov (!%p208_p3), 0   ;;  %v908_v8 = vmov (!%p208_p3), 2   ;;  %v297_v11 = vld [vmem:[%s1173_s2] sm:$0xff] (!%p208_p3)  ;;  %v345_v32 = vlaneseq (!%p208_p3) }
   0x9   : > { %s1185_s21 = smov (%p36_p4, %s1183_s21), 0  ;;  %211 = sbr.rel (%p208_p3) target bundleno = 380 (0x17c), region = 32 }
   0xa   : > { %860 = vset.pattern.permute.xlu0 (!%p208_p3), %v906_v0  ;;  %859 = vset.pattern.permute.xlu1 (!%p208_p3), %v907_v1  ;;  %v300_v12 = vld [vmem:[%s1173_s2 + $0x18] sm:$0xff] (!%p208_p3)  ;;  %v302_v13 = vld [vmem:[%s1173_s2 + $0x28] sm:$0xff] (!%p208_p3)  ;;  %v299_v16 = vld [vmem:[%s1173_s2 + $0x10] sm:$0xff] (!%p208_p3)  ;;  %vm530_vm0 = vcmask (!%p208_p3), 7168   ;;  %v909_v19 = vmov (!%p208_p3), 0.0   ;;  %v346_v35 = vshrl.u32 (!%p208_p3), %v345_v32, 7 }
   0xb   : > { %v298_v14 = vld [vmem:[%s1173_s2 + $0x8] sm:$0xff] (!%p208_p3)  ;;  %v304_v15 = vld [vmem:[%s1173_s2 + $0x38] sm:$0xff] (!%p208_p3)  ;;  %v301_v17 = vld [vmem:[%s1173_s2 + $0x20] sm:$0xff] (!%p208_p3)  ;;  %s811_s14 = sshll.u32 (!%p208_p3), %s888_s15, 7  ;;  %v512_v47 = vand.u32 (!%p208_p3), 127, %v345_v32 }
   0xc   : > { %v303_v18 = vld [vmem:[%s1173_s2 + $0x30] sm:$0xff] (!%p208_p3)  ;;  %v347_v38 = vsub.s32 (!%p208_p3), 0, %v346_v35  ;;  %v391_v42 = vsub.s32 (!%p208_p3), 1, %v346_v35  ;;  %v443_v43 = vsub.s32 (!%p208_p3), 2, %v346_v35  ;;  %v513_v51 = vstv (!%p208_p3), %s811_s14 }
   0xd   : > { %v1070_v56 = vadd.s32 (!%p208_p3), %v513_v51, %v512_v47 }
   0xf   : > { %vm515_vm1 = vcmp.lt.s32.totalorder (!%p208_p3), %v1070_v56, 16 }
  0x10   : > { %s1187_s16 = smov (!%p256_p5, %s892_s16), 1 }
  0x11   : > { %s971_s22 = scalar_select %p258_p6, %s888_s15, 1 }
  0x12   : > { %s814_s23 = sshll.u32 %s1187_s16, 6  ;;  %s801_s27 = sshll.u32 %s1187_s16, 1 }
  0x13   : > { %s269_s26 = scalar_lea.vmem %s1172_s1, %s814_s23  ;;  %s979_s28 = sadd.s32 %s801_s27, %s971_s22 }
  0x14   : > { %v290_v2 = vld [vmem:[%s269_s26 + $0x10] sm:$0xff]  ;;  %v288_v3 = vld [vmem:[%s269_s26] sm:$0xff]  ;;  %v291_v4 = vld [vmem:[%s269_s26 + $0x18] sm:$0xff]  ;;  %s805_s27 = sshll.u32 %s971_s22, 3  ;;  %s806_s29 = sshll.u32 %s1187_s16, 4 }
  0x15   : > { %317 = vperm.xlu1 %859, %v290_v2   ;;  %358 = vperm.xlu0 %860, %v288_v3   ;;  %v293_v5 = vld [vmem:[%s269_s26 + $0x28] sm:$0xff]  ;;  %v295_v6 = vld [vmem:[%s269_s26 + $0x38] sm:$0xff]  ;;  %v292_v9 = vld [vmem:[%s269_s26 + $0x20] sm:$0xff]  ;;  %s276_s30 = sadd.s32 %s806_s29, %s805_s27  ;;  %s802_s16 = sshll.u32 %s979_s28, 2 }
  0x16   : > { %v289_v7 = vld [vmem:[%s269_s26 + $0x8] sm:$0xff]  ;;  %v294_v10 = vld [vmem:[%s269_s26 + $0x30] sm:$0xff]  ;;  %s807_s5 = sshll.u32 %s276_s30, 3  ;;  %s263_s13 = scalar_lea.vmem %s1171_s0, %s802_s16 }
  0x17   : > { %s1010_s8 = scalar_lea.vmem %s1174_s3, %s807_s5  ;;  %s1015_s22 = scalar_lea.vmem %s1175_s4, %s807_s5  ;;  %v296_v39 = vld [vmem:[%s263_s13] sm:$0x7] }
  0x18   : > { %531 = vst.msk [vmem:[%s1010_s8] sm:$0xff] %vm530_vm0, %v909_v19  ;;  %532 = vst.msk [vmem:[%s1010_s8 + $0x8] sm:$0xff] %vm530_vm0, %v909_v19  ;;  %v348_v44 = vrot.slane %v296_v39, %v347_v38  ;;  %v1064_v48 = vrot.slane %v296_v39, %v391_v42  ;;  %v1066_v49 = vrot.slane %v296_v39, %v443_v43 }
  0x19   : > { %322 = vperm.xlu1 %859, %v291_v4   ;;  %370 = vperm.xlu0 %860, %v291_v4   ;;  %533 = vst.msk [vmem:[%s1010_s8 + $0x10] sm:$0xff] %vm530_vm0, %v909_v19  ;;  %534 = vst.msk [vmem:[%s1010_s8 + $0x18] sm:$0xff] %vm530_vm0, %v909_v19 }
  0x1a   : > { %535 = vst.msk [vmem:[%s1010_s8 + $0x20] sm:$0xff] %vm530_vm0, %v909_v19  ;;  %536 = vst.msk [vmem:[%s1010_s8 + $0x28] sm:$0xff] %vm530_vm0, %v909_v19 }
  0x1b   : > { %537 = vst.msk [vmem:[%s1010_s8 + $0x30] sm:$0xff] %vm530_vm0, %v909_v19  ;;  %538 = vst.msk [vmem:[%s1010_s8 + $0x38] sm:$0xff] %vm530_vm0, %v909_v19 }
  0x1c   : > { %539 = vst.msk [vmem:[%s1015_s22] sm:$0xff] %vm530_vm0, %v909_v19  ;;  %540 = vst.msk [vmem:[%s1015_s22 + $0x8] sm:$0xff] %vm530_vm0, %v909_v19 }
  0x1d   : > { %332 = vperm.xlu1 %859, %v293_v5   ;;  %378 = vperm.xlu0 %860, %v293_v5   ;;  %541 = vst.msk [vmem:[%s1015_s22 + $0x10] sm:$0xff] %vm530_vm0, %v909_v19  ;;  %542 = vst.msk [vmem:[%s1015_s22 + $0x18] sm:$0xff] %vm530_vm0, %v909_v19 }
  0x1e   : > { %543 = vst.msk [vmem:[%s1015_s22 + $0x20] sm:$0xff] %vm530_vm0, %v909_v19  ;;  %544 = vst.msk [vmem:[%s1015_s22 + $0x28] sm:$0xff] %vm530_vm0, %v909_v19 }
  0x1f   : > { %545 = vst.msk [vmem:[%s1015_s22 + $0x30] sm:$0xff] %vm530_vm0, %v909_v19  ;;  %546 = vst.msk [vmem:[%s1015_s22 + $0x38] sm:$0xff] %vm530_vm0, %v909_v19  ;;  %v547_v56 = vld [vmem:[%s1010_s8] sm:$0xff] }
  0x21   : > { %342 = vperm.xlu1 %859, %v295_v6   ;;  %386 = vperm.xlu0 %860, %v295_v6  }
  0x25   : > { %861 = vset.pattern.permute.xlu1 %v906_v0  ;;  %863 = vset.pattern.permute.xlu0 %v908_v8 }
  0x26   : > { %362 = vperm.xlu1 %861, %v289_v7   ;;  %414 = vperm.xlu0 %863, %v289_v7  }
  0x2a   : > { %366 = vperm.xlu1 %861, %v290_v2   ;;  %426 = vperm.xlu0 %863, %v292_v9  }
  0x2e   : > { %374 = vperm.xlu1 %861, %v292_v9   ;;  %434 = vperm.xlu0 %863, %v294_v10  }
  0x32   : > { %382 = vperm.xlu1 %861, %v294_v10   ;;  %864 = vset.pattern.permute.xlu0 %v907_v1 }
  0x33   : > { %307 = vperm.xlu0 %864, %v288_v3  }
  0x36   : > { %862 = vset.pattern.permute.xlu1 %v908_v8 }
  0x37   : > { %410 = vperm.xlu1 %862, %v288_v3   ;;  %312 = vperm.xlu0 %864, %v289_v7  }
  0x3b   : > { %418 = vperm.xlu1 %862, %v290_v2   ;;  %327 = vperm.xlu0 %864, %v292_v9  }
  0x3f   : > { %422 = vperm.xlu1 %862, %v291_v4   ;;  %337 = vperm.xlu0 %864, %v294_v10  }
  0x43   : > { %430 = vperm.xlu1 %862, %v293_v5   ;;  %463 = vperm.xlu0 %864, %v297_v11  }
  0x47   : > { %438 = vperm.xlu1 %862, %v295_v6   ;;  %478 = vperm.xlu0 %864, %v300_v12  }
  0x4b   : > { %865 = vset.pattern.permute.xlu1 %v907_v1  ;;  %488 = vperm.xlu0 %864, %v302_v13  }
  0x4c   : > { %468 = vperm.xlu1 %865, %v298_v14  }
  0x4f   : > { %498 = vperm.xlu0 %864, %v304_v15  }
  0x50   : > { %473 = vperm.xlu1 %865, %v299_v16  }
  0x54   : > { %483 = vperm.xlu1 %865, %v301_v17  }
  0x58   : > { %493 = vperm.xlu1 %865, %v303_v18  }
  0x94   : > { %v1049_v20 = vpop.permute.xlu1 %317  ;;  %v359_v21 = vpop.permute.xlu0 %358 }
  0x95   : > { %v393_v52 = vmul.f32 %v1064_v48, %v359_v21 }
  0x98   : > { %v323_v22 = vpop.permute.xlu1 %322  ;;  %v371_v23 = vpop.permute.xlu0 %370 }
  0x99   : > { %v352_v57 = vmul.f32 %v348_v44, %v323_v22  ;;  %v396_v58 = vmul.f32 %v1064_v48, %v371_v23  ;;  %v351_v22 = vmul.f32 %v348_v44, %v1049_v20 }
  0x9b   : > { %v404_v1 = vadd.f32 %v396_v58, %v352_v57 }
  0x9c   : > { %v333_v24 = vpop.permute.xlu1 %332  ;;  %v379_v25 = vpop.permute.xlu0 %378 }
  0x9d   : > { %v354_v2 = vmul.f32 %v348_v44, %v333_v24  ;;  %v398_v3 = vmul.f32 %v1064_v48, %v379_v25 }
  0x9f   : > { %v406_v12 = vadd.f32 %v398_v3, %v354_v2  ;;  %v550_v3 = vld [vmem:[%s1010_s8 + $0x18] sm:$0xff] }
  0xa0   : > { %v343_v26 = vpop.permute.xlu1 %342  ;;  %v387_v27 = vpop.permute.xlu0 %386 }
  0xa1   : > { %v356_v13 = vmul.f32 %v348_v44, %v343_v26  ;;  %v400_v14 = vmul.f32 %v1064_v48, %v387_v27 }
  0xa3   : > { %v408_v27 = vadd.f32 %v400_v14, %v356_v13  ;;  %v549_v13 = vld [vmem:[%s1010_s8 + $0x10] sm:$0xff] }
  0xa5   : > { %v363_v28 = vpop.permute.xlu1 %362  ;;  %v415_v29 = vpop.permute.xlu0 %414 }
  0xa6   : > { %v394_v5 = vmul.f32 %v1064_v48, %v363_v28  ;;  %v446_v16 = vmul.f32 %v1066_v49, %v415_v29 }
  0xa9   : > { %v367_v30 = vpop.permute.xlu1 %366  ;;  %v1051_v31 = vpop.permute.xlu0 %426 }
  0xaa   : > { %v395_v17 = vmul.f32 %v1064_v48, %v367_v30 }
  0xac   : > { %v403_v29 = vadd.f32 %v395_v17, %v351_v22 }
  0xad   : > { %v1053_v33 = vpop.permute.xlu1 %374  ;;  %v1055_v34 = vpop.permute.xlu0 %434 }
  0xae   : > { %v397_v30 = vmul.f32 %v1064_v48, %v1053_v33 }
  0xb1   : > { %v1058_v36 = vpop.permute.xlu1 %382 }
  0xb2   : > { %v308_v37 = vpop.permute.xlu0 %307  ;;  %v399_v33 = vmul.f32 %v1064_v48, %v1058_v36 }
  0xb3   : > { %v349_v50 = vmul.f32 %v348_v44, %v308_v37 }
  0xb5   : > { %v401_v59 = vadd.f32 %v393_v52, %v349_v50 }
  0xb6   : > { %v411_v40 = vpop.permute.xlu1 %410  ;;  %v313_v41 = vpop.permute.xlu0 %312 }
  0xb7   : > { %v445_v53 = vmul.f32 %v1066_v49, %v411_v40  ;;  %v350_v62 = vmul.f32 %v348_v44, %v313_v41 }
  0xb9   : > { %v453_v61 = vadd.f32 %v445_v53, %v401_v59  ;;  %v402_v9 = vadd.f32 %v394_v5, %v350_v62 }
  0xba   : > { %v419_v45 = vpop.permute.xlu1 %418  ;;  %v328_v46 = vpop.permute.xlu0 %327 }
  0xbb   : > { %v447_v23 = vmul.f32 %v1066_v49, %v419_v45  ;;  %v353_v24 = vmul.f32 %v348_v44, %v328_v46  ;;  %v454_v26 = vadd.f32 %v446_v16, %v402_v9  ;;  %v449_v46 = vmul.f32 %v1066_v49, %v1051_v31 }
  0xbd   : > { %v405_v39 = vadd.f32 %v397_v30, %v353_v24  ;;  %v455_v41 = vadd.f32 %v447_v23, %v403_v29  ;;  %v593_v30 = vld [vmem:[%s1015_s22 + $0x28] sm:$0xff] }
  0xbe   : > { %v423_v54 = vpop.permute.xlu1 %422  ;;  %v338_v55 = vpop.permute.xlu0 %337 }
  0xbf   : > { %v448_v60 = vmul.f32 %v1066_v49, %v423_v54  ;;  %v355_v20 = vmul.f32 %v348_v44, %v338_v55  ;;  %v457_v51 = vadd.f32 %v449_v46, %v405_v39  ;;  %v451_v54 = vmul.f32 %v1066_v49, %v1055_v34 }
  0xc1   : > { %v456_v7 = vadd.f32 %v448_v60, %v404_v1  ;;  %v407_v44 = vadd.f32 %v399_v33, %v355_v20  ;;  %v592_v33 = vld [vmem:[%s1015_s22 + $0x20] sm:$0xff] }
  0xc2   : > { %v431_v63 = vpop.permute.xlu1 %430  ;;  %v464_v0 = vpop.permute.xlu0 %463 }
  0xc3   : > { %v501_v4 = vadd.f32 %v464_v0, %v453_v61  ;;  %v450_v6 = vmul.f32 %v1066_v49, %v431_v63  ;;  %v459_v57 = vadd.f32 %v451_v54, %v407_v44  ;;  %v594_v44 = vld [vmem:[%s1015_s22 + $0x30] sm:$0xff] }
  0xc5   : > { %v518_v8 = vsel %vm515_vm1, %v501_v4, 0.0  ;;  %v458_v19 = vadd.f32 %v450_v6, %v406_v12  ;;  %v552_v6 = vld [vmem:[%s1010_s8 + $0x28] sm:$0xff]  ;;  %v554_v12 = vld [vmem:[%s1010_s8 + $0x38] sm:$0xff] }
  0xc6   : > { %v439_v10 = vpop.permute.xlu1 %438  ;;  %v479_v11 = vpop.permute.xlu0 %478  ;;  %555 = vadd.xlane.f32.xlu1 %v518_v8  ;;  %v596_v34 = vmul.f32 %v518_v8, %v518_v8 }
  0xc7   : > { %v504_v15 = vadd.f32 %v479_v11, %v456_v7  ;;  %v452_v18 = vmul.f32 %v1066_v49, %v439_v10  ;;  %v548_v7 = vld [vmem:[%s1010_s8 + $0x8] sm:$0xff] }
  0xc9   : > { %v521_v21 = vsel %vm515_vm1, %v504_v15, 0.0  ;;  %v460_v37 = vadd.f32 %v452_v18, %v408_v27  ;;  %v589_v18 = vld [vmem:[%s1015_s22 + $0x8] sm:$0xff] }
  0xca   : > { %v489_v25 = vpop.permute.xlu0 %488  ;;  %561 = vadd.xlane.f32.xlu1 %v521_v21  ;;  %v599_v59 = vmul.f32 %v521_v21, %v521_v21 }
  0xcb   : > { %v506_v28 = vadd.f32 %v489_v25, %v458_v19  ;;  %v469_v32 = vpop.permute.xlu1 %468  ;;  %v551_v19 = vld [vmem:[%s1010_s8 + $0x20] sm:$0xff]  ;;  %v591_v25 = vld [vmem:[%s1015_s22 + $0x18] sm:$0xff] }
  0xcc   : > { %v502_v35 = vadd.f32 %v469_v32, %v454_v26  ;;  %v553_v26 = vld [vmem:[%s1010_s8 + $0x30] sm:$0xff] }
  0xcd   : > { %v523_v38 = vsel %vm515_vm1, %v506_v28, 0.0 }
  0xce   : > { %v499_v40 = vpop.permute.xlu0 %498  ;;  %565 = vadd.xlane.f32.xlu1 %v523_v38  ;;  %v519_v42 = vsel %vm515_vm1, %v502_v35, 0.0  ;;  %v601_v61 = vmul.f32 %v523_v38, %v523_v38  ;;  %v588_v35 = vld [vmem:[%s1015_s22] sm:$0xff] }
  0xcf   : > { %v508_v43 = vadd.f32 %v499_v40, %v460_v37  ;;  %v474_v45 = vpop.permute.xlu1 %473  ;;  %557 = vadd.xlane.f32.xlu0 %v519_v42  ;;  %v597_v31 = vmul.f32 %v519_v42, %v519_v42  ;;  %v595_v40 = vld [vmem:[%s1015_s22 + $0x38] sm:$0xff] }
  0xd0   : > { %v503_v47 = vadd.f32 %v474_v45, %v455_v41  ;;  %v590_v41 = vld [vmem:[%s1015_s22 + $0x10] sm:$0xff] }
  0xd1   : > { %v525_v50 = vsel %vm515_vm1, %v508_v43, 0.0 }
  0xd2   : > { %569 = vadd.xlane.f32.xlu1 %v525_v50  ;;  %v520_v52 = vsel %vm515_vm1, %v503_v47, 0.0  ;;  %v603_v49 = vmul.f32 %v525_v50, %v525_v50 }
  0xd3   : > { %v484_v53 = vpop.permute.xlu1 %483  ;;  %559 = vadd.xlane.f32.xlu0 %v520_v52  ;;  %v598_v62 = vmul.f32 %v520_v52, %v520_v52 }
  0xd4   : > { %v505_v55 = vadd.f32 %v484_v53, %v457_v51 }
  0xd6   : > { %606 = vadd.xlane.f32.xlu1 %v597_v31  ;;  %v522_v36 = vsel %vm515_vm1, %v505_v55, 0.0 }
  0xd7   : > { %v494_v48 = vpop.permute.xlu1 %493  ;;  %563 = vadd.xlane.f32.xlu0 %v522_v36  ;;  %v600_v63 = vmul.f32 %v522_v36, %v522_v36 }
  0xd8   : > { %v507_v58 = vadd.f32 %v494_v48, %v459_v57 }
  0xda   : > { %610 = vadd.xlane.f32.xlu1 %v599_v59  ;;  %v524_v60 = vsel %vm515_vm1, %v507_v58, 0.0 }
  0xdb   : > { %567 = vadd.xlane.f32.xlu0 %v524_v60  ;;  %v602_v0 = vmul.f32 %v524_v60, %v524_v60 }
  0xde   : > { %614 = vadd.xlane.f32.xlu1 %v601_v61 }
  0xdf   : > { %604 = vadd.xlane.f32.xlu0 %v596_v34 }
  0xe2   : > { %618 = vadd.xlane.f32.xlu1 %v603_v49 }
  0xe3   : > { %608 = vadd.xlane.f32.xlu0 %v598_v62 }
  0xe7   : > { %612 = vadd.xlane.f32.xlu0 %v600_v63 }
  0xeb   : > { %616 = vadd.xlane.f32.xlu0 %v602_v0 }
 0x153   : > { %v556_v1 = vpop.xlane.xlu1 %555 }
 0x154   : > { %v571_v2 = vadd.f32 %v556_v1, %v547_v56 }
 0x156   : > { %580 = vst.msk [vmem:[%s1010_s8] sm:$0xff] %vm530_vm0, %v571_v2 }
 0x157   : > { %v562_v4 = vpop.xlane.xlu1 %561 }
 0x158   : > { %v574_v5 = vadd.f32 %v562_v4, %v550_v3 }
 0x15a   : > { %583 = vst.msk [vmem:[%s1010_s8 + $0x18] sm:$0xff] %vm530_vm0, %v574_v5 }
 0x15b   : > { %v566_v8 = vpop.xlane.xlu1 %565 }
 0x15c   : > { %v576_v9 = vadd.f32 %v566_v8, %v552_v6  ;;  %v558_v10 = vpop.xlane.xlu0 %557 }
 0x15d   : > { %v572_v11 = vadd.f32 %v558_v10, %v548_v7 }
 0x15e   : > { %585 = vst.msk [vmem:[%s1010_s8 + $0x28] sm:$0xff] %vm530_vm0, %v576_v9 }
 0x15f   : > { %581 = vst.msk [vmem:[%s1010_s8 + $0x8] sm:$0xff] %vm530_vm0, %v572_v11  ;;  %v570_v14 = vpop.xlane.xlu1 %569 }
 0x160   : > { %v578_v15 = vadd.f32 %v570_v14, %v554_v12  ;;  %v560_v16 = vpop.xlane.xlu0 %559 }
 0x161   : > { %v573_v17 = vadd.f32 %v560_v16, %v549_v13 }
 0x162   : > { %587 = vst.msk [vmem:[%s1010_s8 + $0x38] sm:$0xff] %vm530_vm0, %v578_v15 }
 0x163   : > { %582 = vst.msk [vmem:[%s1010_s8 + $0x10] sm:$0xff] %vm530_vm0, %v573_v17  ;;  %v607_v21 = vpop.xlane.xlu1 %606 }
 0x164   : > { %v621_v22 = vadd.f32 %v607_v21, %v589_v18  ;;  %v564_v23 = vpop.xlane.xlu0 %563 }
 0x165   : > { %v575_v24 = vadd.f32 %v564_v23, %v551_v19 }
 0x166   : > { %629 = vst.msk [vmem:[%s1015_s22 + $0x8] sm:$0xff] %vm530_vm0, %v621_v22 }
 0x167   : > { %584 = vst.msk [vmem:[%s1010_s8 + $0x20] sm:$0xff] %vm530_vm0, %v575_v24  ;;  %v611_v27 = vpop.xlane.xlu1 %610 }
 0x168   : > { %v623_v28 = vadd.f32 %v611_v27, %v591_v25  ;;  %v568_v32 = vpop.xlane.xlu0 %567 }
 0x169   : > { %v577_v29 = vadd.f32 %v568_v32, %v553_v26 }
 0x16a   : > { %631 = vst.msk [vmem:[%s1015_s22 + $0x18] sm:$0xff] %vm530_vm0, %v623_v28 }
 0x16b   : > { %586 = vst.msk [vmem:[%s1010_s8 + $0x30] sm:$0xff] %vm530_vm0, %v577_v29  ;;  %v615_v37 = vpop.xlane.xlu1 %614 }
 0x16c   : > { %v625_v38 = vadd.f32 %v615_v37, %v593_v30  ;;  %v605_v39 = vpop.xlane.xlu0 %604 }
 0x16d   : > { %v620_v20 = vadd.f32 %v605_v39, %v588_v35 }
 0x16e   : > { %633 = vst.msk [vmem:[%s1015_s22 + $0x28] sm:$0xff] %vm530_vm0, %v625_v38 }
 0x16f   : > { %628 = vst.msk [vmem:[%s1015_s22] sm:$0xff] %vm530_vm0, %v620_v20  ;;  %v619_v42 = vpop.xlane.xlu1 %618 }
 0x170   : > { %v627_v43 = vadd.f32 %v619_v42, %v595_v40  ;;  %v609_v45 = vpop.xlane.xlu0 %608 }
 0x171   : > { %v622_v46 = vadd.f32 %v609_v45, %v590_v41 }
 0x172   : > { %635 = vst.msk [vmem:[%s1015_s22 + $0x38] sm:$0xff] %vm530_vm0, %v627_v43 }
 0x173   : > { %630 = vst.msk [vmem:[%s1015_s22 + $0x10] sm:$0xff] %vm530_vm0, %v622_v46 }
 0x174   : > { %v613_v47 = vpop.xlane.xlu0 %612 }
 0x175   : > { %v624_v50 = vadd.f32 %v613_v47, %v592_v33 }
 0x177   : > { %632 = vst.msk [vmem:[%s1015_s22 + $0x20] sm:$0xff] %vm530_vm0, %v624_v50 }
 0x178   : > { %v617_v51 = vpop.xlane.xlu0 %616 }
 0x179   : > { %v626_v52 = vadd.f32 %v617_v51, %v594_v44 }
 0x17b   : > { %634 = vst.msk [vmem:[%s1015_s22 + $0x30] sm:$0xff] %vm530_vm0, %v626_v52 }
 0x17c PF: > { %s15_s19 = sadd.s32 1, %s904_s19   ;;  %s1176_s15 = smov %s896_s17 }
 0x17d   : > { %p12_p7 = scmp.ge.s32.totalorder %s15_s19, 6   ;;  %s1177_s16 = smov %s900_s18 }
 0x17e   : > { %s1178_s17 = smov %s1181_s20  ;;  %s1179_s18 = smov %s1185_s21 }
 0x17f   :  { %14 = sbr.rel (!%p12_p7) target bundleno = 3 (0x3), region = 81 }

// kernel: encoder_2f_forward.8
= control target key start
LH: loop header
LB: loop body
LE: loop exit
PB: predicated region body
PF: predicated region fallthrough
CT: control target
= control target key end

     0   :  { %s1474_s21 = smov 0   ;;  %s1476_s22 = smov 0   ;;  %s1890_s0 = inlined_call_operand.vmem [shape: f32[2,3,256], index: 0, kind: input, shape index: {}]   ;;  %s1891_s1 = inlined_call_operand.vmem [shape: f32[2,64,3], index: 1, kind: input, shape index: {}]   ;;  %s1892_s2 = inlined_call_operand.vmem [shape: f32[64,1], index: 2, kind: input, shape index: {}]   ;;  %s1893_s3 = inlined_call_operand.vmem [shape: bf16[128,64], index: 3, kind: input, shape index: {}]   ;;  %s1894_s4 = inlined_call_operand.vmem [shape: f32[128,1], index: 4, kind: input, shape index: {}]   ;;  %s1895_s5 = inlined_call_operand.vmem [shape: f32[2,2,128,1], index: 5, kind: output, shape index: {0}]   ;;  %s1896_s6 = inlined_call_operand.vmem [shape: f32[2,2,128,1], index: 6, kind: output, shape index: {1}]  }
   0x1   :  { %s1478_s23 = smov 0   ;;  %s1480_s24 = smov 0  }
   0x2   :  { %s1482_s25 = smov 0  }
   0x3 LB: > { %s32_s26 = sadd.s32 1, %s1425_s23  ;;  %s36_s27 = sadd.s32 1, %s1429_s24  ;;  %s1433_s25 = sphi %s1482_s25, %s17_s25   ;;  %s1429_s24 = sphi %s1480_s24, %s1900_s24   ;;  %s1425_s23 = sphi %s1478_s23, %s1899_s23   ;;  %s1421_s22 = sphi %s1476_s22, %s1898_s22   ;;  %s1417_s21 = sphi %s1474_s21, %s1897_s21  }
   0x4   : > { %p34_p0 = scmp.ge.s32.totalorder %s32_s26, 2  ;;  %p1253_p1 = scmp.ge.s32.totalorder %s1433_s25, 1 }
   0x5   : > { %p257_p2 = scmp.lt.s32.totalorder %s1433_s25, 5 }
   0x6   : > { %s1902_s26 = smov (%p34_p0, %s32_s26), 0  ;;  %s1904_s27 = smov (!%p34_p0, %s36_s27), %s1429_s24 }
   0x7   : > { %p258_p3 = pnand %p1253_p1, %p257_p2  ;;  %p38_p4 = scmp.ge.s32.totalorder %s1904_s27, 2 }
   0x8   : > { %p310_p5 = scmp.lt.s32.totalorder (!%p258_p3), %s1421_s22, 1  ;;  %p312_p6 = scmp.lt.s32.totalorder (!%p258_p3), %s1417_s21, 1  ;;  %v1435_v0 = vmov (!%p258_p3), 2   ;;  %v1436_v1 = vmov (!%p258_p3), 1   ;;  %v1437_v7 = vmov (!%p258_p3), 0   ;;  %v352_v10 = vld [vmem:[%s1892_s2] sm:$0xff] (!%p258_p3)  ;;  %v400_v37 = vlaneseq (!%p258_p3) }
   0x9   : > { %s1906_s27 = smov (%p38_p4, %s1904_s27), 0  ;;  %261 = sbr.rel (%p258_p3) target bundleno = 667 (0x29b), region = 40 }
   0xa   : > { %1373 = vset.pattern.permute.xlu0 (!%p258_p3), %v1435_v0  ;;  %1372 = vset.pattern.permute.xlu1 (!%p258_p3), %v1436_v1  ;;  %v353_v11 = vld [vmem:[%s1892_s2 + $0x8] sm:$0xff] (!%p258_p3)  ;;  %v356_v13 = vld [vmem:[%s1892_s2 + $0x20] sm:$0xff] (!%p258_p3)  ;;  %v359_v14 = vld [vmem:[%s1892_s2 + $0x38] sm:$0xff] (!%p258_p3)  ;;  %vm728_vm0 = vcmask (!%p258_p3), 523264   ;;  %v401_v40 = vshrl.u32 (!%p258_p3), %v400_v37, 7  ;;  %vm879_vm1 = vcmask (!%p258_p3), 7168  }
   0xb   : > { %v593_v15 = vld [vmem:[%s1894_s4 + $0x8] sm:$0xff] (!%p258_p3)  ;;  %v595_v16 = vld [vmem:[%s1894_s4 + $0x18] sm:$0xff] (!%p258_p3)  ;;  %v354_v17 = vld [vmem:[%s1892_s2 + $0x10] sm:$0xff] (!%p258_p3) }
   0xc   : > { %v597_v18 = vld [vmem:[%s1894_s4 + $0x28] sm:$0xff] (!%p258_p3)  ;;  %v355_v19 = vld [vmem:[%s1892_s2 + $0x18] sm:$0xff] (!%p258_p3)  ;;  %v358_v26 = vld [vmem:[%s1892_s2 + $0x30] sm:$0xff] (!%p258_p3)  ;;  %v498_v41 = vsub.s32 (!%p258_p3), 2, %v401_v40  ;;  %v402_v52 = vsub.s32 (!%p258_p3), 0, %v401_v40  ;;  %v446_v53 = vsub.s32 (!%p258_p3), 1, %v401_v40 }
   0xd   : > { %v599_v20 = vld [vmem:[%s1894_s4 + $0x38] sm:$0xff] (!%p258_p3)  ;;  %v601_v21 = vld [vmem:[%s1894_s4 + $0x48] sm:$0xff] (!%p258_p3)  ;;  %v592_v27 = vld [vmem:[%s1894_s4] sm:$0xff] (!%p258_p3) }
   0xe   : > { %v603_v22 = vld [vmem:[%s1894_s4 + $0x58] sm:$0xff] (!%p258_p3)  ;;  %v605_v23 = vld [vmem:[%s1894_s4 + $0x68] sm:$0xff] (!%p258_p3)  ;;  %v594_v28 = vld [vmem:[%s1894_s4 + $0x10] sm:$0xff] (!%p258_p3) }
   0xf   : > { %v607_v24 = vld [vmem:[%s1894_s4 + $0x78] sm:$0xff] (!%p258_p3)  ;;  %v357_v25 = vld [vmem:[%s1892_s2 + $0x28] sm:$0xff] (!%p258_p3)  ;;  %v1387_v29 = vld [vmem:[%s1893_s3] sm:$0xff] (!%p258_p3)  }
  0x10   : > { %s1908_s22 = smov (!%p310_p5, %s1421_s22), 1  ;;  %v1388_v30 = vld [vmem:[%s1893_s3 + $0x20] sm:$0xff]   ;;  %1304 = vmatprep.mubr.msk.bf16.mxu0 %vm728_vm0, %v1387_v29  ;;  %v598_v32 = vld [vmem:[%s1894_s4 + $0x30] sm:$0xff] }
  0x11   : > { %s1512_s28 = scalar_select %p312_p6, %s1417_s21, 1  ;;  %v596_v31 = vld [vmem:[%s1894_s4 + $0x20] sm:$0xff]  ;;  %1312 = vmatprep.mubr.msk.bf16.mxu1 %vm728_vm0, %v1388_v30  ;;  %v602_v34 = vld [vmem:[%s1894_s4 + $0x50] sm:$0xff] }
  0x12   : > { %s1283_s29 = sshll.u32 %s1908_s22, 6  ;;  %s1259_s30 = sshll.u32 %s1908_s22, 5  ;;  %v600_v33 = vld [vmem:[%s1894_s4 + $0x40] sm:$0xff]  ;;  %v606_v36 = vld [vmem:[%s1894_s4 + $0x70] sm:$0xff] }
  0x13   : > { %s1519_s9 = scalar_lea.vmem %s1891_s1, %s1283_s29  ;;  %s1258_s10 = sshll.u32 %s1512_s28, 4  ;;  %v604_v35 = vld [vmem:[%s1894_s4 + $0x60] sm:$0xff] }
  0x14   : > { %s1522_s11 = sadd.s32 %s1259_s30, %s1258_s10  ;;  %v343_v2 = vld [vmem:[%s1519_s9] sm:$0xff]  ;;  %v345_v3 = vld [vmem:[%s1519_s9 + $0x10] sm:$0xff]  ;;  %v344_v4 = vld [vmem:[%s1519_s9 + $0x8] sm:$0xff]  ;;  %s1254_s19 = sshll.u32 %s1908_s22, 1 }
  0x15   : > { %465 = vperm.xlu0 %1373, %v343_v2   ;;  %413 = vperm.xlu1 %1372, %v343_v2   ;;  %v348_v5 = vld [vmem:[%s1519_s9 + $0x28] sm:$0xff]  ;;  %v347_v6 = vld [vmem:[%s1519_s9 + $0x20] sm:$0xff]  ;;  %v350_v8 = vld [vmem:[%s1519_s9 + $0x38] sm:$0xff]  ;;  %s315_s20 = sadd.s32 %s1254_s19, %s1512_s28  ;;  %s1280_s28 = sshll.u32 %s1417_s21, 7 }
  0x16   : > { %v346_v9 = vld [vmem:[%s1519_s9 + $0x18] sm:$0xff]  ;;  %v349_v12 = vld [vmem:[%s1519_s9 + $0x30] sm:$0xff]  ;;  %s1255_s29 = sshll.u32 %s315_s20, 2  ;;  %s1260_s20 = sshll.u32 %s1522_s11, 3 }
  0x17   : > { %s317_s8 = scalar_lea.vmem %s1890_s0, %s1255_s29  ;;  %s1690_s7 = scalar_lea.vmem %s1895_s5, %s1260_s20 }
  0x18   : > { %v351_v44 = vld [vmem:[%s317_s8] sm:$0x7]  ;;  %s1695_s11 = scalar_lea.vmem %s1896_s6, %s1260_s20 }
  0x19   : > { %473 = vperm.xlu0 %1373, %v345_v3   ;;  %417 = vperm.xlu1 %1372, %v344_v4   ;;  %v1626_v45 = vrot.slane %v351_v44, %v498_v41  ;;  %v1633_v55 = vrot.slane %v351_v44, %v402_v52  ;;  %v1635_v56 = vrot.slane %v351_v44, %v446_v53 }
  0x1d   : > { %485 = vperm.xlu0 %1373, %v348_v5   ;;  %1374 = vset.pattern.permute.xlu1 %v1435_v0 }
  0x1e   : > { %469 = vperm.xlu1 %1374, %v344_v4  }
  0x21   : > { %1381 = vset.pattern.permute.xlu0 %v1436_v1 }
  0x22   : > { %429 = vperm.xlu0 %1381, %v347_v6   ;;  %1375 = vset.pattern.permute.xlu1 %v1437_v7 }
  0x23   : > { %372 = vperm.xlu1 %1375, %v345_v3  }
  0x26   : > { %441 = vperm.xlu0 %1381, %v350_v8  }
  0x27   : > { %1376 = vset.pattern.permute.xlu1 %v1436_v1 }
  0x28   : > { %421 = vperm.xlu1 %1376, %v345_v3  }
  0x2a   : > { %1384 = vset.pattern.permute.xlu0 %v1437_v7 }
  0x2b   : > { %362 = vperm.xlu0 %1384, %v343_v2  }
  0x2c   : > { %425 = vperm.xlu1 %1376, %v346_v9  }
  0x2f   : > { %367 = vperm.xlu0 %1384, %v344_v4  }
  0x30   : > { %1377 = vset.pattern.permute.xlu1 %v1435_v0 }
  0x31   : > { %477 = vperm.xlu1 %1377, %v346_v9  }
  0x33   : > { %377 = vperm.xlu0 %1384, %v346_v9  }
  0x35   : > { %1378 = vset.pattern.permute.xlu1 %v1437_v7 }
  0x36   : > { %518 = vperm.xlu1 %1378, %v352_v10  }
  0x37   : > { %523 = vperm.xlu0 %1384, %v353_v11  }
  0x3a   : > { %382 = vperm.xlu1 %1378, %v347_v6  }
  0x3b   : > { %392 = vperm.xlu0 %1384, %v349_v12  }
  0x3e   : > { %387 = vperm.xlu1 %1378, %v348_v5  }
  0x3f   : > { %538 = vperm.xlu0 %1384, %v356_v13  }
  0x42   : > { %1379 = vset.pattern.permute.xlu1 %v1436_v1 }
  0x43   : > { %553 = vperm.xlu0 %1384, %v359_v14   ;;  %433 = vperm.xlu1 %1379, %v348_v5  }
  0x47   : > { %615 = vperm.xlu0 %1384, %v593_v15   ;;  %1380 = vset.pattern.permute.xlu1 %v1435_v0 }
  0x48   : > { %481 = vperm.xlu1 %1380, %v347_v6  }
  0x4b   : > { %625 = vperm.xlu0 %1384, %v595_v16  }
  0x4c   : > { %1382 = vset.pattern.permute.xlu1 %v1437_v7 }
  0x4d   : > { %528 = vperm.xlu1 %1382, %v354_v17  }
  0x4f   : > { %635 = vperm.xlu0 %1384, %v597_v18  }
  0x51   : > { %533 = vperm.xlu1 %1382, %v355_v19  }
  0x53   : > { %645 = vperm.xlu0 %1384, %v599_v20  }
  0x55   : > { %397 = vperm.xlu1 %1382, %v350_v8  }
  0x57   : > { %655 = vperm.xlu0 %1384, %v601_v21  }
  0x59   : > { %1383 = vset.pattern.permute.xlu1 %v1436_v1 }
  0x5a   : > { %437 = vperm.xlu1 %1383, %v349_v12  }
  0x5b   : > { %665 = vperm.xlu0 %1384, %v603_v22  }
  0x5e   : > { %1385 = vset.pattern.permute.xlu1 %v1435_v0 }
  0x5f   : > { %675 = vperm.xlu0 %1384, %v605_v23   ;;  %489 = vperm.xlu1 %1385, %v349_v12  }
  0x63   : > { %685 = vperm.xlu0 %1384, %v607_v24   ;;  %493 = vperm.xlu1 %1385, %v350_v8  }
  0x67   : > { %1386 = vset.pattern.permute.xlu1 %v1437_v7 }
  0x68   : > { %543 = vperm.xlu1 %1386, %v357_v25  }
  0x6c   : > { %548 = vperm.xlu1 %1386, %v358_v26  }
  0x70   : > { %610 = vperm.xlu1 %1386, %v592_v27  }
  0x74   : > { %620 = vperm.xlu1 %1386, %v594_v28  }
  0x78   : > { %630 = vperm.xlu1 %1386, %v596_v31  }
  0x7c   : > { %640 = vperm.xlu1 %1386, %v598_v32  }
  0x80   : > { %650 = vperm.xlu1 %1386, %v600_v33  }
  0x84   : > { %660 = vperm.xlu1 %1386, %v602_v34  }
  0x88   : > { %670 = vperm.xlu1 %1386, %v604_v35  }
  0x8c   : > { %680 = vperm.xlu1 %1386, %v606_v36  }
  0x94   : > { %v414_v38 = vpop.permute.xlu1 %413  ;;  %v466_v39 = vpop.permute.xlu0 %465 }
  0x95   : > { %v448_v60 = vmul.f32 %v1635_v56, %v414_v38  ;;  %v500_v0 = vmul.f32 %v1626_v45, %v466_v39 }
  0x98   : > { %v418_v42 = vpop.permute.xlu1 %417  ;;  %v474_v43 = vpop.permute.xlu0 %473 }
  0x99   : > { %v449_v62 = vmul.f32 %v1635_v56, %v418_v42  ;;  %v502_v26 = vmul.f32 %v1626_v45, %v474_v43 }
  0x9c   : > { %v486_v46 = vpop.permute.xlu0 %485 }
  0x9d   : > { %v470_v47 = vpop.permute.xlu1 %469  ;;  %v505_v48 = vmul.f32 %v1626_v45, %v486_v46 }
  0x9e   : > { %v501_v5 = vmul.f32 %v1626_v45, %v470_v47 }
  0xa1   : > { %v1629_v49 = vpop.permute.xlu0 %429 }
  0xa2   : > { %v373_v50 = vpop.permute.xlu1 %372  ;;  %v452_v43 = vmul.f32 %v1635_v56, %v1629_v49 }
  0xa3   : > { %v406_v22 = vmul.f32 %v1633_v55, %v373_v50 }
  0xa5   : > { %v1631_v51 = vpop.permute.xlu0 %441 }
  0xa6   : > { %v455_v53 = vmul.f32 %v1635_v56, %v1631_v51 }
  0xa7   : > { %v422_v54 = vpop.permute.xlu1 %421 }
  0xa8   : > { %v450_v20 = vmul.f32 %v1635_v56, %v422_v54 }
  0xaa   : > { %v363_v57 = vpop.permute.xlu0 %362  ;;  %v458_v27 = vadd.f32 %v450_v20, %v406_v22 }
  0xab   : > { %v426_v58 = vpop.permute.xlu1 %425  ;;  %v404_v59 = vmul.f32 %v1633_v55, %v363_v57 }
  0xac   : > { %v451_v28 = vmul.f32 %v1635_v56, %v426_v58  ;;  %v510_v32 = vadd.f32 %v502_v26, %v458_v27 }
  0xad   : > { %v456_v1 = vadd.f32 %v448_v60, %v404_v59 }
  0xae   : > { %v368_v61 = vpop.permute.xlu0 %367 }
  0xaf   : > { %v405_v63 = vmul.f32 %v1633_v55, %v368_v61  ;;  %v508_v6 = vadd.f32 %v500_v0, %v456_v1 }
  0xb0   : > { %v478_v2 = vpop.permute.xlu1 %477 }
  0xb1   : > { %v457_v3 = vadd.f32 %v449_v62, %v405_v63  ;;  %v503_v31 = vmul.f32 %v1626_v45, %v478_v2 }
  0xb2   : > { %v378_v4 = vpop.permute.xlu0 %377 }
  0xb3   : > { %v509_v8 = vadd.f32 %v501_v5, %v457_v3  ;;  %v407_v23 = vmul.f32 %v1633_v55, %v378_v4 }
  0xb5   : > { %v519_v7 = vpop.permute.xlu1 %518  ;;  %v459_v29 = vadd.f32 %v451_v28, %v407_v23  ;;  %v853_v28 = vand.u32 127, %v400_v37 }
  0xb6   : > { %v556_v9 = vadd.f32 %v519_v7, %v508_v6  ;;  %v524_v10 = vpop.permute.xlu0 %523 }
  0xb7   : > { %v557_v11 = vadd.f32 %v524_v10, %v509_v8  ;;  %v511_v34 = vadd.f32 %v503_v31, %v459_v29  ;;  %v854_v29 = vstv %s1280_s28 }
  0xb8   : > { %v564_v12 = vmax.f32 %v556_v9, 0.0 }
  0xb9   : > { %v565_v13 = vmax.f32 %v557_v11, 0.0  ;;  %v383_v14 = vpop.permute.xlu1 %382 }
  0xba   : > { %v408_v44 = vmul.f32 %v1633_v55, %v383_v14  ;;  %v393_v46 = vpop.permute.xlu0 %392  ;;  %v1392_v14 = vld [vmem:[%s1893_s3 + $0x30] sm:$0xff]  }
  0xbb   : > { %v588_v15 = vpack.c.bf16 %v565_v13, %v564_v12  ;;  %v410_v61 = vmul.f32 %v1633_v55, %v393_v46  ;;  %v1391_v13 = vld [vmem:[%s1893_s3 + $0x10] sm:$0xff]  }
  0xbc   : > { %v460_v50 = vadd.f32 %v452_v43, %v408_v44 }
  0xbd   : > { %v388_v16 = vpop.permute.xlu1 %387  ;;  %1296 = vmatprep.subr.bf16.mxu0 %v588_v15  ;;  %1320 = vmatprep.subr.bf16.mxu1 %v588_v15 }
  0xbe   : > { %1297 = vmatpush3.bf16.msra.mxu0 %v588_v15  ;;  %1324 = vmatpush3.bf16.msra.mxu1 %v588_v15  ;;  %v409_v18 = vmul.f32 %v1633_v55, %v388_v16  ;;  %v539_v58 = vpop.permute.xlu0 %538  ;;  %v1393_v15 = vld [vmem:[%s1893_s3 + $0x18] sm:$0xff]  }
  0xbf   : > { %v1394_v16 = vld [vmem:[%s1893_s3 + $0x38] sm:$0xff]  }
  0xc2   : > { %v434_v17 = vpop.permute.xlu1 %433  ;;  %v554_v4 = vpop.permute.xlu0 %553 }
  0xc3   : > { %v453_v19 = vmul.f32 %v1635_v56, %v434_v17  ;;  %v1438_v17 = vmov 0.0  }
  0xc4   : > { %882 = vst.msk [vmem:[%s1690_s7 + $0x10] sm:$0xff] %vm879_vm1, %v1438_v17  ;;  %880 = vst.msk [vmem:[%s1690_s7] sm:$0xff] %vm879_vm1, %v1438_v17 }
  0xc5   : > { %v461_v21 = vadd.f32 %v453_v19, %v409_v18  ;;  %881 = vst.msk [vmem:[%s1690_s7 + $0x8] sm:$0xff] %vm879_vm1, %v1438_v17  ;;  %883 = vst.msk [vmem:[%s1690_s7 + $0x18] sm:$0xff] %vm879_vm1, %v1438_v17 }
  0xc6   : > { %884 = vst.msk [vmem:[%s1690_s7 + $0x20] sm:$0xff] %vm879_vm1, %v1438_v17  ;;  %885 = vst.msk [vmem:[%s1690_s7 + $0x28] sm:$0xff] %vm879_vm1, %v1438_v17  ;;  %v616_v18 = vpop.permute.xlu0 %615 }
  0xc7   : > { %v482_v24 = vpop.permute.xlu1 %481  ;;  %v513_v25 = vadd.f32 %v505_v48, %v461_v21  ;;  %886 = vst.msk [vmem:[%s1690_s7 + $0x30] sm:$0xff] %vm879_vm1, %v1438_v17  ;;  %887 = vst.msk [vmem:[%s1690_s7 + $0x38] sm:$0xff] %vm879_vm1, %v1438_v17 }
  0xc8   : > { %v504_v47 = vmul.f32 %v1626_v45, %v482_v24  ;;  %888 = vst.msk [vmem:[%s1690_s7 + $0x40] sm:$0xff] %vm879_vm1, %v1438_v17  ;;  %889 = vst.msk [vmem:[%s1690_s7 + $0x48] sm:$0xff] %vm879_vm1, %v1438_v17 }
  0xc9   : > { %890 = vst.msk [vmem:[%s1690_s7 + $0x50] sm:$0xff] %vm879_vm1, %v1438_v17  ;;  %891 = vst.msk [vmem:[%s1690_s7 + $0x58] sm:$0xff] %vm879_vm1, %v1438_v17 }
  0xca   : > { %v512_v54 = vadd.f32 %v504_v47, %v460_v50  ;;  %892 = vst.msk [vmem:[%s1690_s7 + $0x60] sm:$0xff] %vm879_vm1, %v1438_v17  ;;  %893 = vst.msk [vmem:[%s1690_s7 + $0x68] sm:$0xff] %vm879_vm1, %v1438_v17  ;;  %v626_v20 = vpop.permute.xlu0 %625 }
  0xcb   : > { %894 = vst.msk [vmem:[%s1690_s7 + $0x70] sm:$0xff] %vm879_vm1, %v1438_v17  ;;  %895 = vst.msk [vmem:[%s1690_s7 + $0x78] sm:$0xff] %vm879_vm1, %v1438_v17 }
  0xcc   : > { %v529_v30 = vpop.permute.xlu1 %528  ;;  %v560_v62 = vadd.f32 %v539_v58, %v512_v54  ;;  %896 = vst.msk [vmem:[%s1695_s11] sm:$0xff] %vm879_vm1, %v1438_v17  ;;  %897 = vst.msk [vmem:[%s1695_s11 + $0x8] sm:$0xff] %vm879_vm1, %v1438_v17 }
  0xcd   : > { %v558_v33 = vadd.f32 %v529_v30, %v510_v32  ;;  %898 = vst.msk [vmem:[%s1695_s11 + $0x10] sm:$0xff] %vm879_vm1, %v1438_v17  ;;  %899 = vst.msk [vmem:[%s1695_s11 + $0x18] sm:$0xff] %vm879_vm1, %v1438_v17  ;;  %v855_v32 = vadd.s32 %v854_v29, %v853_v28 }
  0xce   : > { %v568_v51 = vmax.f32 %v560_v62, 0.0  ;;  %900 = vst.msk [vmem:[%s1695_s11 + $0x20] sm:$0xff] %vm879_vm1, %v1438_v17  ;;  %901 = vst.msk [vmem:[%s1695_s11 + $0x28] sm:$0xff] %vm879_vm1, %v1438_v17  ;;  %v636_v22 = vpop.permute.xlu0 %635 }
  0xcf   : > { %v566_v38 = vmax.f32 %v558_v33, 0.0  ;;  %902 = vst.msk [vmem:[%s1695_s11 + $0x30] sm:$0xff] %vm879_vm1, %v1438_v17  ;;  %903 = vst.msk [vmem:[%s1695_s11 + $0x38] sm:$0xff] %vm879_vm1, %v1438_v17  ;;  %vm856_vm2 = vcmp.lt.s32.totalorder %v855_v32, 16 }
  0xd0   : > { %v534_v35 = vpop.permute.xlu1 %533  ;;  %904 = vst.msk [vmem:[%s1695_s11 + $0x40] sm:$0xff] %vm879_vm1, %v1438_v17  ;;  %905 = vst.msk [vmem:[%s1695_s11 + $0x48] sm:$0xff] %vm879_vm1, %v1438_v17 }
  0xd1   : > { %v559_v36 = vadd.f32 %v534_v35, %v511_v34  ;;  %906 = vst.msk [vmem:[%s1695_s11 + $0x50] sm:$0xff] %vm879_vm1, %v1438_v17  ;;  %907 = vst.msk [vmem:[%s1695_s11 + $0x58] sm:$0xff] %vm879_vm1, %v1438_v17 }
  0xd2   : > { %908 = vst.msk [vmem:[%s1695_s11 + $0x60] sm:$0xff] %vm879_vm1, %v1438_v17  ;;  %909 = vst.msk [vmem:[%s1695_s11 + $0x68] sm:$0xff] %vm879_vm1, %v1438_v17  ;;  %v646_v24 = vpop.permute.xlu0 %645 }
  0xd3   : > { %v567_v39 = vmax.f32 %v559_v36, 0.0  ;;  %910 = vst.msk [vmem:[%s1695_s11 + $0x70] sm:$0xff] %vm879_vm1, %v1438_v17  ;;  %911 = vst.msk [vmem:[%s1695_s11 + $0x78] sm:$0xff] %vm879_vm1, %v1438_v17 }
  0xd4   : > { %v398_v40 = vpop.permute.xlu1 %397 }
  0xd5   : > { %v589_v41 = vpack.c.bf16 %v567_v39, %v566_v38  ;;  %v411_v52 = vmul.f32 %v1633_v55, %v398_v40 }
  0xd6   : > { %v656_v26 = vpop.permute.xlu0 %655 }
  0xd7   : > { %1298 = vmatprep.subr.bf16.mxu0 %v589_v41  ;;  %1321 = vmatprep.subr.bf16.mxu1 %v589_v41  ;;  %v463_v60 = vadd.f32 %v455_v53, %v411_v52 }
  0xd8   : > { %1299 = vmatpush3.bf16.msra.mxu0 %v589_v41  ;;  %1325 = vmatpush3.bf16.msra.mxu1 %v589_v41 }
  0xd9   : > { %v438_v42 = vpop.permute.xlu1 %437 }
  0xda   : > { %v454_v49 = vmul.f32 %v1635_v56, %v438_v42  ;;  %v1390_v56 = vld [vmem:[%s1893_s3 + $0x28] sm:$0xff]   ;;  %v666_v30 = vpop.permute.xlu0 %665 }
  0xdc   : > { %v462_v2 = vadd.f32 %v454_v49, %v410_v61 }
  0xde   : > { %v490_v48 = vpop.permute.xlu1 %489  ;;  %v676_v33 = vpop.permute.xlu0 %675 }
  0xdf   : > { %v506_v63 = vmul.f32 %v1626_v45, %v490_v48 }
  0xe1   : > { %v514_v7 = vadd.f32 %v506_v63, %v462_v2 }
  0xe2   : > { %v494_v57 = vpop.permute.xlu1 %493  ;;  %v686_v63 = vpop.permute.xlu0 %685 }
  0xe3   : > { %v507_v59 = vmul.f32 %v1626_v45, %v494_v57  ;;  %v1389_v45 = vld [vmem:[%s1893_s3 + $0x8] sm:$0xff]  }
  0xe5   : > { %v515_v0 = vadd.f32 %v507_v59, %v463_v60 }
  0xe7   : > { %v544_v1 = vpop.permute.xlu1 %543  ;;  %v563_v5 = vadd.f32 %v554_v4, %v515_v0 }
  0xe8   : > { %v561_v3 = vadd.f32 %v544_v1, %v513_v25 }
  0xe9   : > { %v571_v12 = vmax.f32 %v563_v5, 0.0 }
  0xea   : > { %v569_v6 = vmax.f32 %v561_v3, 0.0 }
  0xeb   : > { %v549_v8 = vpop.permute.xlu1 %548 }
  0xec   : > { %v590_v9 = vpack.c.bf16 %v569_v6, %v568_v51  ;;  %v562_v10 = vadd.f32 %v549_v8, %v514_v7 }
  0xee   : > { %v570_v11 = vmax.f32 %v562_v10, 0.0  ;;  %1300 = vmatprep.subr.bf16.mxu0 %v590_v9  ;;  %1322 = vmatprep.subr.bf16.mxu1 %v590_v9 }
  0xef   : > { %1301 = vmatpush3.bf16.msra.mxu0 %v590_v9  ;;  %1326 = vmatpush3.bf16.msra.mxu1 %v590_v9  ;;  %v611_v19 = vpop.permute.xlu1 %610 }
  0xf0   : > { %v591_v55 = vpack.c.bf16 %v571_v12, %v570_v11 }
  0xf2   : > { %1302 = vmatprep.subr.bf16.mxu0 %v591_v55  ;;  %1323 = vmatprep.subr.bf16.mxu1 %v591_v55 }
  0xf3   : > { %1303 = vmatpush3.bf16.msra.mxu0 %v591_v55  ;;  %1327 = vmatpush3.bf16.msra.mxu1 %v591_v55  ;;  %v621_v21 = vpop.permute.xlu1 %620 }
  0xf6   : > { %1305 = vmatmul.mubr.msk.bf16.vlgmr.msra.gmra.mrb[0].mxu0 %vm728_vm0, %v1389_v45  ;;  %1313 = vmatmul.mubr.msk.bf16.vlgmr.msra.gmra.mrb[0].mxu1 %vm728_vm0, %v1390_v56 }
  0xf7   : > { %1308 = vmatprep.mubr.msk.bf16.mxu0 %vm728_vm0, %v1391_v13  ;;  %1316 = vmatprep.mubr.msk.bf16.mxu1 %vm728_vm0, %v1392_v14  ;;  %v631_v23 = vpop.permute.xlu1 %630 }
  0xfb   : > { %v641_v25 = vpop.permute.xlu1 %640 }
  0xfe   : > { %1309 = vmatmul.mubr.msk.bf16.gmra.mrb[4].mxu0 %vm728_vm0, %v1393_v15  ;;  %1317 = vmatmul.mubr.msk.bf16.gmra.mrb[4].mxu1 %vm728_vm0, %v1394_v16 }
  0xff   : > { %v651_v27 = vpop.permute.xlu1 %650 }
 0x103   : > { %v661_v31 = vpop.permute.xlu1 %660 }
 0x107   : > { %v671_v34 = vpop.permute.xlu1 %670 }
 0x10b   : > { %v681_v0 = vpop.permute.xlu1 %680 }
 0x1c9   : > { %v1306_v35 = vpop.f32.mrb[0].mxu0  ;;  %v1314_v36 = vpop.f32.mrb[0].mxu1 }
 0x1ca   : > { %v796_v38 = vadd.f32 %v1306_v35, %v621_v21  ;;  %v828_v39 = vadd.f32 %v1314_v36, %v661_v31  ;;  %v787_v40 = vpop.f32.mrb[1].mxu0  ;;  %v819_v41 = vpop.f32.mrb[1].mxu1 }
 0x1cb   : > { %v788_v42 = vadd.f32 %v787_v40, %v611_v19  ;;  %v820_v43 = vadd.f32 %v819_v41, %v651_v27  ;;  %v1307_v44 = vpop.f32.mrb[2].mxu0  ;;  %v1315_v46 = vpop.f32.mrb[2].mxu1 }
 0x1cc   : > { %v799_v47 = vadd.f32 %v1307_v44, %v626_v20  ;;  %v831_v48 = vadd.f32 %v1315_v46, %v666_v30  ;;  %v790_v37 = vpop.f32.mrb[3].mxu0  ;;  %v822_v50 = vpop.f32.mrb[3].mxu1  ;;  %v861_v52 = vsel %vm856_vm2, %v796_v38, 0.0  ;;  %v869_v53 = vsel %vm856_vm2, %v828_v39, 0.0  ;;  %v914_v38 = vld [vmem:[%s1690_s7 + $0x10] sm:$0xff]  ;;  %v912_v39 = vld [vmem:[%s1690_s7] sm:$0xff] }
 0x1cd   : > { %v791_v54 = vadd.f32 %v790_v37, %v616_v18  ;;  %v823_v57 = vadd.f32 %v822_v50, %v656_v26  ;;  %932 = vadd.xlane.f32.xlu0 %v861_v52  ;;  %v859_v58 = vsel %vm856_vm2, %v788_v42, 0.0  ;;  %v867_v59 = vsel %vm856_vm2, %v820_v43, 0.0  ;;  %v922_v44 = vld [vmem:[%s1690_s7 + $0x50] sm:$0xff]  ;;  %v915_v46 = vld [vmem:[%s1690_s7 + $0x18] sm:$0xff] }
 0x1ce   : > { %928 = vadd.xlane.f32.xlu1 %v859_v58  ;;  %v862_v60 = vsel %vm856_vm2, %v799_v47, 0.0  ;;  %v870_v49 = vsel %vm856_vm2, %v831_v48, 0.0  ;;  %v1011_v19 = vmul.f32 %v861_v52, %v861_v52  ;;  %v1017_v27 = vmul.f32 %v867_v59, %v867_v59  ;;  %v920_v52 = vld [vmem:[%s1690_s7 + $0x40] sm:$0xff] }
 0x1cf   : > { %v868_v61 = vsel %vm856_vm2, %v823_v57, 0.0  ;;  %v860_v62 = vsel %vm856_vm2, %v791_v54, 0.0 }
 0x1d0   : > { %v1010_v26 = vmul.f32 %v860_v62, %v860_v62  ;;  %v1018_v28 = vmul.f32 %v868_v61, %v868_v61 }
 0x1d1   : > { %v1318_v1 = vpop.f32.mrb[4].mxu1  ;;  %948 = vadd.xlane.f32.xlu0 %v869_v53  ;;  %v1310_v2 = vpop.f32.mrb[4].mxu0 }
 0x1d2   : > { %v844_v3 = vadd.f32 %v1318_v1, %v681_v0  ;;  %v812_v4 = vadd.f32 %v1310_v2, %v641_v25  ;;  %v803_v5 = vpop.f32.mrb[5].mxu0  ;;  %v835_v51 = vpop.f32.mrb[5].mxu1  ;;  %934 = vadd.xlane.f32.xlu1 %v862_v60  ;;  %v1009_v25 = vmul.f32 %v859_v58, %v859_v58  ;;  %v1003_v1 = vld [vmem:[%s1695_s11 + $0x50] sm:$0xff]  ;;  %v996_v2 = vld [vmem:[%s1695_s11 + $0x18] sm:$0xff] }
 0x1d3   : > { %v804_v6 = vadd.f32 %v803_v5, %v631_v23  ;;  %v836_v7 = vadd.f32 %v835_v51, %v671_v34  ;;  %v1311_v8 = vpop.f32.mrb[6].mxu0  ;;  %v1319_v9 = vpop.f32.mrb[6].mxu1  ;;  %v1019_v23 = vmul.f32 %v869_v53, %v869_v53  ;;  %v923_v53 = vld [vmem:[%s1690_s7 + $0x58] sm:$0xff] }
 0x1d4   : > { %v815_v10 = vadd.f32 %v1311_v8, %v646_v24  ;;  %v847_v11 = vadd.f32 %v1319_v9, %v686_v63  ;;  %v806_v12 = vpop.f32.mrb[7].mxu0  ;;  %v838_v55 = vpop.f32.mrb[7].mxu1  ;;  %v865_v45 = vsel %vm856_vm2, %v812_v4, 0.0  ;;  %v873_v56 = vsel %vm856_vm2, %v844_v3, 0.0 }
 0x1d5   : > { %v807_v13 = vadd.f32 %v806_v12, %v636_v22  ;;  %v839_v14 = vadd.f32 %v838_v55, %v676_v33  ;;  %944 = vadd.xlane.f32.xlu0 %v867_v59  ;;  %v863_v15 = vsel %vm856_vm2, %v804_v6, 0.0  ;;  %v871_v16 = vsel %vm856_vm2, %v836_v7, 0.0  ;;  %v913_v6 = vld [vmem:[%s1690_s7 + $0x8] sm:$0xff]  ;;  %v1004_v7 = vld [vmem:[%s1695_s11 + $0x58] sm:$0xff]  ;;  %v993_v12 = vld [vmem:[%s1695_s11] sm:$0xff] }
 0x1d6   : > { %950 = vadd.xlane.f32.xlu1 %v870_v49  ;;  %v866_v17 = vsel %vm856_vm2, %v815_v10, 0.0  ;;  %v874_v18 = vsel %vm856_vm2, %v847_v11, 0.0  ;;  %v1012_v22 = vmul.f32 %v862_v60, %v862_v60  ;;  %v1020_v24 = vmul.f32 %v870_v49, %v870_v49  ;;  %v995_v60 = vld [vmem:[%s1695_s11 + $0x10] sm:$0xff]  ;;  %v921_v49 = vld [vmem:[%s1690_s7 + $0x48] sm:$0xff] }
 0x1d7   : > { %v864_v20 = vsel %vm856_vm2, %v807_v13, 0.0  ;;  %v872_v21 = vsel %vm856_vm2, %v839_v14, 0.0  ;;  %v1015_v29 = vmul.f32 %v865_v45, %v865_v45  ;;  %v1016_v30 = vmul.f32 %v866_v17, %v866_v17  ;;  %v994_v55 = vld [vmem:[%s1695_s11 + $0x8] sm:$0xff] }
 0x1d8   : > { %v1013_v31 = vmul.f32 %v863_v15, %v863_v15  ;;  %v1014_v32 = vmul.f32 %v864_v20, %v864_v20  ;;  %v1021_v33 = vmul.f32 %v871_v16, %v871_v16  ;;  %v1022_v34 = vmul.f32 %v872_v21, %v872_v21 }
 0x1d9   : > { %1029 = vadd.xlane.f32.xlu0 %v1011_v19  ;;  %v1023_v35 = vmul.f32 %v873_v56, %v873_v56  ;;  %v1024_v36 = vmul.f32 %v874_v18, %v874_v18 }
 0x1da   : > { %946 = vadd.xlane.f32.xlu1 %v868_v61 }
 0x1dd   : > { %1045 = vadd.xlane.f32.xlu0 %v1019_v23  ;;  %v919_v23 = vld [vmem:[%s1690_s7 + $0x38] sm:$0xff] }
 0x1de   : > { %1031 = vadd.xlane.f32.xlu1 %v1012_v22 }
 0x1e1   : > { %930 = vadd.xlane.f32.xlu0 %v860_v62 }
 0x1e2   : > { %1047 = vadd.xlane.f32.xlu1 %v1020_v24 }
 0x1e5   : > { %1025 = vadd.xlane.f32.xlu0 %v1009_v25 }
 0x1e6   : > { %1027 = vadd.xlane.f32.xlu1 %v1010_v26 }
 0x1e9   : > { %1041 = vadd.xlane.f32.xlu0 %v1017_v27  ;;  %v926_v27 = vld [vmem:[%s1690_s7 + $0x70] sm:$0xff] }
 0x1ea   : > { %1043 = vadd.xlane.f32.xlu1 %v1018_v28  ;;  %v927_v28 = vld [vmem:[%s1690_s7 + $0x78] sm:$0xff] }
 0x1ed   : > { %940 = vadd.xlane.f32.xlu0 %v865_v45 }
 0x1ee   : > { %942 = vadd.xlane.f32.xlu1 %v866_v17 }
 0x1f1   : > { %956 = vadd.xlane.f32.xlu0 %v873_v56 }
 0x1f2   : > { %958 = vadd.xlane.f32.xlu1 %v874_v18 }
 0x1f5   : > { %936 = vadd.xlane.f32.xlu0 %v863_v15  ;;  %v1001_v15 = vld [vmem:[%s1695_s11 + $0x40] sm:$0xff] }
 0x1f6   : > { %938 = vadd.xlane.f32.xlu1 %v864_v20 }
 0x1f9   : > { %952 = vadd.xlane.f32.xlu0 %v871_v16  ;;  %v1002_v16 = vld [vmem:[%s1695_s11 + $0x48] sm:$0xff] }
 0x1fa   : > { %954 = vadd.xlane.f32.xlu1 %v872_v21  ;;  %v918_v21 = vld [vmem:[%s1690_s7 + $0x30] sm:$0xff] }
 0x1fd   : > { %1037 = vadd.xlane.f32.xlu0 %v1015_v29 }
 0x1fe   : > { %1039 = vadd.xlane.f32.xlu1 %v1016_v30 }
 0x201   : > { %1033 = vadd.xlane.f32.xlu0 %v1013_v31 }
 0x202   : > { %1035 = vadd.xlane.f32.xlu1 %v1014_v32 }
 0x205   : > { %1049 = vadd.xlane.f32.xlu0 %v1021_v33  ;;  %v916_v33 = vld [vmem:[%s1690_s7 + $0x20] sm:$0xff] }
 0x206   : > { %1051 = vadd.xlane.f32.xlu1 %v1022_v34  ;;  %v917_v34 = vld [vmem:[%s1690_s7 + $0x28] sm:$0xff] }
 0x209   : > { %1053 = vadd.xlane.f32.xlu0 %v1023_v35 }
 0x20a   : > { %1055 = vadd.xlane.f32.xlu1 %v1024_v36 }
 0x25a   : > { %v933_v40 = vpop.xlane.xlu0 %932 }
 0x25b   : > { %v962_v41 = vadd.f32 %v933_v40, %v914_v38  ;;  %v929_v42 = vpop.xlane.xlu1 %928  ;;  %v924_v40 = vld [vmem:[%s1690_s7 + $0x60] sm:$0xff] }
 0x25c   : > { %v960_v43 = vadd.f32 %v929_v42, %v912_v39 }
 0x25d   : > { %979 = vst.msk [vmem:[%s1690_s7 + $0x10] sm:$0xff] %vm879_vm1, %v962_v41  ;;  %v925_v41 = vld [vmem:[%s1690_s7 + $0x68] sm:$0xff] }
 0x25e   : > { %977 = vst.msk [vmem:[%s1690_s7] sm:$0xff] %vm879_vm1, %v960_v43  ;;  %v949_v47 = vpop.xlane.xlu0 %948 }
 0x25f   : > { %v970_v48 = vadd.f32 %v949_v47, %v922_v44  ;;  %v935_v37 = vpop.xlane.xlu1 %934  ;;  %v999_v47 = vld [vmem:[%s1695_s11 + $0x30] sm:$0xff] }
 0x260   : > { %v963_v50 = vadd.f32 %v935_v37, %v915_v46 }
 0x261   : > { %987 = vst.msk [vmem:[%s1690_s7 + $0x50] sm:$0xff] %vm879_vm1, %v970_v48  ;;  %v1000_v48 = vld [vmem:[%s1695_s11 + $0x38] sm:$0xff] }
 0x262   : > { %980 = vst.msk [vmem:[%s1690_s7 + $0x18] sm:$0xff] %vm879_vm1, %v963_v50  ;;  %v945_v54 = vpop.xlane.xlu0 %944 }
 0x263   : > { %v968_v57 = vadd.f32 %v945_v54, %v920_v52  ;;  %v951_v58 = vpop.xlane.xlu1 %950  ;;  %v997_v54 = vld [vmem:[%s1695_s11 + $0x20] sm:$0xff] }
 0x264   : > { %v971_v59 = vadd.f32 %v951_v58, %v923_v53 }
 0x265   : > { %985 = vst.msk [vmem:[%s1690_s7 + $0x40] sm:$0xff] %vm879_vm1, %v968_v57  ;;  %v998_v57 = vld [vmem:[%s1695_s11 + $0x28] sm:$0xff] }
 0x266   : > { %988 = vst.msk [vmem:[%s1690_s7 + $0x58] sm:$0xff] %vm879_vm1, %v971_v59  ;;  %v1030_v61 = vpop.xlane.xlu0 %1029 }
 0x267   : > { %v1059_v62 = vadd.f32 %v1030_v61, %v995_v60  ;;  %v947_v63 = vpop.xlane.xlu1 %946  ;;  %v1005_v61 = vld [vmem:[%s1695_s11 + $0x60] sm:$0xff] }
 0x268   : > { %v969_v0 = vadd.f32 %v947_v63, %v921_v49 }
 0x269   : > { %1075 = vst.msk [vmem:[%s1695_s11 + $0x10] sm:$0xff] %vm879_vm1, %v1059_v62  ;;  %v1006_v62 = vld [vmem:[%s1695_s11 + $0x68] sm:$0xff] }
 0x26a   : > { %986 = vst.msk [vmem:[%s1690_s7 + $0x48] sm:$0xff] %vm879_vm1, %v969_v0  ;;  %v1046_v3 = vpop.xlane.xlu0 %1045 }
 0x26b   : > { %v1067_v4 = vadd.f32 %v1046_v3, %v1003_v1  ;;  %v1032_v5 = vpop.xlane.xlu1 %1031  ;;  %v1007_v3 = vld [vmem:[%s1695_s11 + $0x70] sm:$0xff] }
 0x26c   : > { %v1060_v51 = vadd.f32 %v1032_v5, %v996_v2 }
 0x26d   : > { %1083 = vst.msk [vmem:[%s1695_s11 + $0x50] sm:$0xff] %vm879_vm1, %v1067_v4  ;;  %v1008_v4 = vld [vmem:[%s1695_s11 + $0x78] sm:$0xff] }
 0x26e   : > { %1076 = vst.msk [vmem:[%s1695_s11 + $0x18] sm:$0xff] %vm879_vm1, %v1060_v51  ;;  %v931_v8 = vpop.xlane.xlu0 %930 }
 0x26f   : > { %v961_v9 = vadd.f32 %v931_v8, %v913_v6  ;;  %v1048_v10 = vpop.xlane.xlu1 %1047 }
 0x270   : > { %v1068_v11 = vadd.f32 %v1048_v10, %v1004_v7 }
 0x271   : > { %978 = vst.msk [vmem:[%s1690_s7 + $0x8] sm:$0xff] %vm879_vm1, %v961_v9 }
 0x272   : > { %1084 = vst.msk [vmem:[%s1695_s11 + $0x58] sm:$0xff] %vm879_vm1, %v1068_v11  ;;  %v1026_v45 = vpop.xlane.xlu0 %1025 }
 0x273   : > { %v1057_v56 = vadd.f32 %v1026_v45, %v993_v12  ;;  %v1028_v13 = vpop.xlane.xlu1 %1027 }
 0x274   : > { %v1058_v14 = vadd.f32 %v1028_v13, %v994_v55 }
 0x275   : > { %1073 = vst.msk [vmem:[%s1695_s11] sm:$0xff] %vm879_vm1, %v1057_v56 }
 0x276   : > { %1074 = vst.msk [vmem:[%s1695_s11 + $0x8] sm:$0xff] %vm879_vm1, %v1058_v14  ;;  %v1042_v17 = vpop.xlane.xlu0 %1041 }
 0x277   : > { %v1065_v18 = vadd.f32 %v1042_v17, %v1001_v15  ;;  %v1044_v19 = vpop.xlane.xlu1 %1043 }
 0x278   : > { %v1066_v20 = vadd.f32 %v1044_v19, %v1002_v16 }
 0x279   : > { %1081 = vst.msk [vmem:[%s1695_s11 + $0x40] sm:$0xff] %vm879_vm1, %v1065_v18 }
 0x27a   : > { %1082 = vst.msk [vmem:[%s1695_s11 + $0x48] sm:$0xff] %vm879_vm1, %v1066_v20  ;;  %v941_v22 = vpop.xlane.xlu0 %940 }
 0x27b   : > { %v966_v24 = vadd.f32 %v941_v22, %v918_v21  ;;  %v943_v25 = vpop.xlane.xlu1 %942 }
 0x27c   : > { %v967_v26 = vadd.f32 %v943_v25, %v919_v23 }
 0x27d   : > { %983 = vst.msk [vmem:[%s1690_s7 + $0x30] sm:$0xff] %vm879_vm1, %v966_v24 }
 0x27e   : > { %984 = vst.msk [vmem:[%s1690_s7 + $0x38] sm:$0xff] %vm879_vm1, %v967_v26  ;;  %v957_v29 = vpop.xlane.xlu0 %956 }
 0x27f   : > { %v974_v30 = vadd.f32 %v957_v29, %v926_v27  ;;  %v959_v31 = vpop.xlane.xlu1 %958 }
 0x280   : > { %v975_v32 = vadd.f32 %v959_v31, %v927_v28 }
 0x281   : > { %991 = vst.msk [vmem:[%s1690_s7 + $0x70] sm:$0xff] %vm879_vm1, %v974_v30 }
 0x282   : > { %992 = vst.msk [vmem:[%s1690_s7 + $0x78] sm:$0xff] %vm879_vm1, %v975_v32  ;;  %v937_v35 = vpop.xlane.xlu0 %936 }
 0x283   : > { %v964_v36 = vadd.f32 %v937_v35, %v916_v33  ;;  %v939_v38 = vpop.xlane.xlu1 %938 }
 0x284   : > { %v965_v39 = vadd.f32 %v939_v38, %v917_v34 }
 0x285   : > { %981 = vst.msk [vmem:[%s1690_s7 + $0x20] sm:$0xff] %vm879_vm1, %v964_v36 }
 0x286   : > { %982 = vst.msk [vmem:[%s1690_s7 + $0x28] sm:$0xff] %vm879_vm1, %v965_v39  ;;  %v953_v42 = vpop.xlane.xlu0 %952 }
 0x287   : > { %v972_v43 = vadd.f32 %v953_v42, %v924_v40  ;;  %v955_v44 = vpop.xlane.xlu1 %954 }
 0x288   : > { %v973_v46 = vadd.f32 %v955_v44, %v925_v41 }
 0x289   : > { %989 = vst.msk [vmem:[%s1690_s7 + $0x60] sm:$0xff] %vm879_vm1, %v972_v43 }
 0x28a   : > { %990 = vst.msk [vmem:[%s1690_s7 + $0x68] sm:$0xff] %vm879_vm1, %v973_v46  ;;  %v1038_v37 = vpop.xlane.xlu0 %1037 }
 0x28b   : > { %v1063_v50 = vadd.f32 %v1038_v37, %v999_v47  ;;  %v1040_v52 = vpop.xlane.xlu1 %1039 }
 0x28c   : > { %v1064_v53 = vadd.f32 %v1040_v52, %v1000_v48 }
 0x28d   : > { %1079 = vst.msk [vmem:[%s1695_s11 + $0x30] sm:$0xff] %vm879_vm1, %v1063_v50 }
 0x28e   : > { %1080 = vst.msk [vmem:[%s1695_s11 + $0x38] sm:$0xff] %vm879_vm1, %v1064_v53  ;;  %v1034_v58 = vpop.xlane.xlu0 %1033 }
 0x28f   : > { %v1061_v59 = vadd.f32 %v1034_v58, %v997_v54  ;;  %v1036_v60 = vpop.xlane.xlu1 %1035 }
 0x290   : > { %v1062_v49 = vadd.f32 %v1036_v60, %v998_v57 }
 0x291   : > { %1077 = vst.msk [vmem:[%s1695_s11 + $0x20] sm:$0xff] %vm879_vm1, %v1061_v59 }
 0x292   : > { %1078 = vst.msk [vmem:[%s1695_s11 + $0x28] sm:$0xff] %vm879_vm1, %v1062_v49  ;;  %v1050_v63 = vpop.xlane.xlu0 %1049 }
 0x293   : > { %v1069_v0 = vadd.f32 %v1050_v63, %v1005_v61  ;;  %v1052_v1 = vpop.xlane.xlu1 %1051 }
 0x294   : > { %v1070_v2 = vadd.f32 %v1052_v1, %v1006_v62 }
 0x295   : > { %1085 = vst.msk [vmem:[%s1695_s11 + $0x60] sm:$0xff] %vm879_vm1, %v1069_v0 }
 0x296   : > { %1086 = vst.msk [vmem:[%s1695_s11 + $0x68] sm:$0xff] %vm879_vm1, %v1070_v2  ;;  %v1054_v5 = vpop.xlane.xlu0 %1053 }
 0x297   : > { %v1071_v51 = vadd.f32 %v1054_v5, %v1007_v3  ;;  %v1056_v6 = vpop.xlane.xlu1 %1055 }
 0x298   : > { %v1072_v7 = vadd.f32 %v1056_v6, %v1008_v4 }
 0x299   : > { %1087 = vst.msk [vmem:[%s1695_s11 + $0x70] sm:$0xff] %vm879_vm1, %v1071_v51 }
 0x29a   : > { %1088 = vst.msk [vmem:[%s1695_s11 + $0x78] sm:$0xff] %vm879_vm1, %v1072_v7 }
 0x29b PF: > { %s17_s25 = sadd.s32 1, %s1433_s25   ;;  %s1897_s21 = smov %s1425_s23 }
 0x29c   : > { %p14_p7 = scmp.ge.s32.totalorder %s17_s25, 6   ;;  %s1898_s22 = smov %s1429_s24 }
 0x29d   : > { %s1899_s23 = smov %s1902_s26  ;;  %s1900_s24 = smov %s1906_s27 }
 0x29e   :  { %16 = sbr.rel (!%p14_p7) target bundleno = 3 (0x3), region = 89 }

// kernel: encoder_2f_forward.9
= control target key start
LH: loop header
LB: loop body
LE: loop exit
PB: predicated region body
PF: predicated region fallthrough
CT: control target
= control target key end

     0   :  { %s1700_s13 = smov 0   ;;  %s1702_s14 = smov 0   ;;  %s1974_s0 = inlined_call_operand.vmem [shape: f32[2,3,256], index: 0, kind: input, shape index: {}]   ;;  %s1975_s1 = inlined_call_operand.vmem [shape: f32[2,64,3], index: 1, kind: input, shape index: {}]   ;;  %s1976_s2 = inlined_call_operand.vmem [shape: f32[64,1], index: 2, kind: input, shape index: {}]   ;;  %s1977_s3 = inlined_call_operand.vmem [shape: bf16[128,64], index: 3, kind: input, shape index: {}]   ;;  %s1978_s4 = inlined_call_operand.vmem [shape: f32[128,1], index: 4, kind: input, shape index: {}]   ;;  %s1979_s5 = inlined_call_operand.vmem [shape: f32[5,128], index: 5, kind: input, shape index: {}]   ;;  %s1980_s6 = inlined_call_operand.vmem [shape: f32[5,1], index: 6, kind: input, shape index: {}]   ;;  %s1981_s7 = inlined_call_operand.vmem [shape: f32[2,2,5,1], index: 7, kind: output, shape index: {0}]   ;;  %s1982_s8 = inlined_call_operand.vmem [shape: f32[2,2,5,1], index: 8, kind: output, shape index: {1}]   ;;  %s1983_s9 = inlined_call_operand.vmem [shape: f32[2,2,5,1], index: 9, kind: output, shape index: {2}]   ;;  %s1984_s10 = inlined_call_operand.vmem [shape: f32[2,2,5,1], index: 10, kind: output, shape index: {3}]  }
   0x1   :  { %s1704_s15 = smov 0   ;;  %s1706_s16 = smov 0  }
   0x2   :  { %s1708_s17 = smov 0  }
   0x3 LB: > { %s36_s18 = sadd.s32 1, %s1627_s15  ;;  %s40_s19 = sadd.s32 1, %s1631_s16  ;;  %s1635_s17 = sphi %s1708_s17, %s21_s17   ;;  %s1631_s16 = sphi %s1706_s16, %s1988_s16   ;;  %s1627_s15 = sphi %s1704_s15, %s1987_s15   ;;  %s1623_s14 = sphi %s1702_s14, %s1986_s14   ;;  %s1619_s13 = sphi %s1700_s13, %s1985_s13  }
   0x4   : > { %p38_p0 = scmp.ge.s32.totalorder %s36_s18, 2  ;;  %p1381_p1 = scmp.ge.s32.totalorder %s1635_s17, 1 }
   0x5   : > { %p365_p2 = scmp.lt.s32.totalorder %s1635_s17, 5 }
   0x6   : > { %s1990_s18 = smov (%p38_p0, %s36_s18), 0  ;;  %s1992_s19 = smov (!%p38_p0, %s40_s19), %s1631_s16 }
   0x7   : > { %p366_p3 = pnand %p1381_p1, %p365_p2  ;;  %p42_p4 = scmp.ge.s32.totalorder %s1992_s19, 2 }
   0x8   : > { %p440_p5 = scmp.lt.s32.totalorder (!%p366_p3), %s1623_s14, 1  ;;  %v1637_v0 = vmov (!%p366_p3), 2   ;;  %v1638_v1 = vmov (!%p366_p3), 1   ;;  %v1639_v7 = vmov (!%p366_p3), 0   ;;  %v496_v10 = vld [vmem:[%s1976_s2] sm:$0xff] (!%p366_p3)  ;;  %v497_v11 = vld [vmem:[%s1976_s2 + $0x8] sm:$0xff] (!%p366_p3)  ;;  %v544_v43 = vlaneseq (!%p366_p3) }
   0x9   : > { %s1994_s19 = smov (%p42_p4, %s1992_s19), 0  ;;  %369 = sbr.rel (%p366_p3) target bundleno = 866 (0x362), region = 48 }
   0xa   : > { %1575 = vset.pattern.permute.xlu0 (!%p366_p3), %v1637_v0  ;;  %1574 = vset.pattern.permute.xlu1 (!%p366_p3), %v1638_v1  ;;  %v500_v13 = vld [vmem:[%s1976_s2 + $0x20] sm:$0xff] (!%p366_p3)  ;;  %v503_v14 = vld [vmem:[%s1976_s2 + $0x38] sm:$0xff] (!%p366_p3)  ;;  %v737_v15 = vld [vmem:[%s1978_s4 + $0x8] sm:$0xff] (!%p366_p3)  ;;  %vm872_vm0 = vcmask (!%p366_p3), 523264   ;;  %p442_p6 = scmp.lt.s32.totalorder (!%p366_p3), %s1619_s13, 1  ;;  %v545_v45 = vshrl.u32 (!%p366_p3), %v544_v43, 7 }
   0xb   : > { %v739_v16 = vld [vmem:[%s1978_s4 + $0x18] sm:$0xff] (!%p366_p3)  ;;  %v498_v17 = vld [vmem:[%s1976_s2 + $0x10] sm:$0xff] (!%p366_p3)  ;;  %v741_v18 = vld [vmem:[%s1978_s4 + $0x28] sm:$0xff] (!%p366_p3)  ;;  %vm1641_vm1 = vmmov (!%p366_p3), 0   ;;  %vm1103_vm2 = vcmask (!%p366_p3), 4096   ;;  %vm1109_vm4 = vcmask (!%p366_p3), 1044480  }
   0xc   : > { %v499_v19 = vld [vmem:[%s1976_s2 + $0x18] sm:$0xff] (!%p366_p3)  ;;  %v745_v21 = vld [vmem:[%s1978_s4 + $0x48] sm:$0xff] (!%p366_p3)  ;;  %v502_v26 = vld [vmem:[%s1976_s2 + $0x30] sm:$0xff] (!%p366_p3)  ;;  %v546_v48 = vsub.s32 (!%p366_p3), 0, %v545_v45  ;;  %v590_v49 = vsub.s32 (!%p366_p3), 1, %v545_v45  ;;  %v642_v52 = vsub.s32 (!%p366_p3), 2, %v545_v45 }
   0xd   : > { %v743_v20 = vld [vmem:[%s1978_s4 + $0x38] sm:$0xff] (!%p366_p3)  ;;  %v749_v23 = vld [vmem:[%s1978_s4 + $0x68] sm:$0xff] (!%p366_p3)  ;;  %v736_v27 = vld [vmem:[%s1978_s4] sm:$0xff] (!%p366_p3) }
   0xe   : > { %v747_v22 = vld [vmem:[%s1978_s4 + $0x58] sm:$0xff] (!%p366_p3)  ;;  %v501_v25 = vld [vmem:[%s1976_s2 + $0x28] sm:$0xff] (!%p366_p3)  ;;  %v738_v28 = vld [vmem:[%s1978_s4 + $0x10] sm:$0xff] (!%p366_p3) }
   0xf   : > { %v751_v24 = vld [vmem:[%s1978_s4 + $0x78] sm:$0xff] (!%p366_p3)  ;;  %v1589_v29 = vld [vmem:[%s1977_s3] sm:$0xff] (!%p366_p3)   ;;  %v742_v31 = vld [vmem:[%s1978_s4 + $0x30] sm:$0xff] (!%p366_p3) }
  0x10   : > { %s1996_s14 = smov (!%p440_p5, %s1623_s14), 1  ;;  %v740_v30 = vld [vmem:[%s1978_s4 + $0x20] sm:$0xff]  ;;  %1451 = vmatprep.mubr.msk.bf16.mxu0 %vm872_vm0, %v1589_v29  ;;  %v746_v33 = vld [vmem:[%s1978_s4 + $0x50] sm:$0xff] }
  0x11   : > { %s1413_s20 = sshll.u32 %s1996_s14, 6  ;;  %v744_v32 = vld [vmem:[%s1978_s4 + $0x40] sm:$0xff]  ;;  %v750_v35 = vld [vmem:[%s1978_s4 + $0x70] sm:$0xff]  ;;  %s1382_s25 = sshll.u32 %s1996_s14, 1 }
  0x12   : > { %s1740_s23 = scalar_lea.vmem %s1975_s1, %s1413_s20  ;;  %v748_v34 = vld [vmem:[%s1978_s4 + $0x60] sm:$0xff] }
  0x13   : > { %v487_v2 = vld [vmem:[%s1740_s23] sm:$0xff]  ;;  %v489_v3 = vld [vmem:[%s1740_s23 + $0x10] sm:$0xff]  ;;  %v488_v4 = vld [vmem:[%s1740_s23 + $0x8] sm:$0xff]  ;;  %s443_s24 = scalar_select %p442_p6, %s1619_s13, 1 }
  0x14   : > { %609 = vperm.xlu0 %1575, %v487_v2   ;;  %557 = vperm.xlu1 %1574, %v487_v2   ;;  %v492_v5 = vld [vmem:[%s1740_s23 + $0x28] sm:$0xff]  ;;  %v491_v6 = vld [vmem:[%s1740_s23 + $0x20] sm:$0xff]  ;;  %v494_v8 = vld [vmem:[%s1740_s23 + $0x38] sm:$0xff] }
  0x15   : > { %v490_v9 = vld [vmem:[%s1740_s23 + $0x18] sm:$0xff]  ;;  %v493_v12 = vld [vmem:[%s1740_s23 + $0x30] sm:$0xff]  ;;  %v1011_v36 = vld [vmem:[%s1980_s6] sm:$0x1f]  ;;  %s1842_s26 = sadd.s32 %s1382_s25, %s443_s24  ;;  %s1410_s24 = sshll.u32 %s1619_s13, 7 }
  0x16   : > { %s1383_s27 = sshll.u32 %s1842_s26, 2  ;;  %s1924_s20 = sshll.u32 %s1842_s26, 3 }
  0x17   : > { %s447_s30 = scalar_lea.vmem %s1974_s0, %s1383_s27  ;;  %s1930_s23 = scalar_lea.vmem %s1981_s7, %s1924_s20 }
  0x18   : > { %617 = vperm.xlu0 %1575, %v489_v3   ;;  %561 = vperm.xlu1 %1574, %v488_v4   ;;  %v495_v50 = vld [vmem:[%s447_s30] sm:$0x7]  ;;  %s469_s25 = scalar_lea.vmem %s1982_s8, %s1924_s20  ;;  %s477_s29 = scalar_lea.vmem %s1983_s9, %s1924_s20 }
  0x19   : > { %v1851_v53 = vrot.slane %v495_v50, %v546_v48  ;;  %v1853_v54 = vrot.slane %v495_v50, %v590_v49  ;;  %v1856_v58 = vrot.slane %v495_v50, %v642_v52  ;;  %s485_s11 = scalar_lea.vmem %s1984_s10, %s1924_s20 }
  0x1c   : > { %629 = vperm.xlu0 %1575, %v492_v5   ;;  %1576 = vset.pattern.permute.xlu1 %v1637_v0 }
  0x1d   : > { %613 = vperm.xlu1 %1576, %v488_v4  }
  0x20   : > { %1583 = vset.pattern.permute.xlu0 %v1638_v1 }
  0x21   : > { %573 = vperm.xlu0 %1583, %v491_v6   ;;  %1577 = vset.pattern.permute.xlu1 %v1639_v7 }
  0x22   : > { %516 = vperm.xlu1 %1577, %v489_v3  }
  0x25   : > { %585 = vperm.xlu0 %1583, %v494_v8  }
  0x26   : > { %1578 = vset.pattern.permute.xlu1 %v1638_v1 }
  0x27   : > { %565 = vperm.xlu1 %1578, %v489_v3  }
  0x29   : > { %1586 = vset.pattern.permute.xlu0 %v1639_v7 }
  0x2a   : > { %506 = vperm.xlu0 %1586, %v487_v2  }
  0x2b   : > { %569 = vperm.xlu1 %1578, %v490_v9  }
  0x2e   : > { %511 = vperm.xlu0 %1586, %v488_v4  }
  0x2f   : > { %1579 = vset.pattern.permute.xlu1 %v1637_v0 }
  0x30   : > { %621 = vperm.xlu1 %1579, %v490_v9  }
  0x32   : > { %521 = vperm.xlu0 %1586, %v490_v9  }
  0x34   : > { %1580 = vset.pattern.permute.xlu1 %v1639_v7 }
  0x35   : > { %662 = vperm.xlu1 %1580, %v496_v10  }
  0x36   : > { %667 = vperm.xlu0 %1586, %v497_v11  }
  0x39   : > { %526 = vperm.xlu1 %1580, %v491_v6  }
  0x3a   : > { %536 = vperm.xlu0 %1586, %v493_v12  }
  0x3d   : > { %531 = vperm.xlu1 %1580, %v492_v5  }
  0x3e   : > { %682 = vperm.xlu0 %1586, %v500_v13  }
  0x41   : > { %1581 = vset.pattern.permute.xlu1 %v1638_v1 }
  0x42   : > { %697 = vperm.xlu0 %1586, %v503_v14   ;;  %577 = vperm.xlu1 %1581, %v492_v5  }
  0x46   : > { %759 = vperm.xlu0 %1586, %v737_v15   ;;  %1582 = vset.pattern.permute.xlu1 %v1637_v0 }
  0x47   : > { %625 = vperm.xlu1 %1582, %v491_v6  }
  0x4a   : > { %769 = vperm.xlu0 %1586, %v739_v16  }
  0x4b   : > { %1584 = vset.pattern.permute.xlu1 %v1639_v7 }
  0x4c   : > { %672 = vperm.xlu1 %1584, %v498_v17  }
  0x4e   : > { %779 = vperm.xlu0 %1586, %v741_v18  }
  0x50   : > { %677 = vperm.xlu1 %1584, %v499_v19  }
  0x52   : > { %789 = vperm.xlu0 %1586, %v743_v20  }
  0x54   : > { %541 = vperm.xlu1 %1584, %v494_v8  }
  0x56   : > { %799 = vperm.xlu0 %1586, %v745_v21  }
  0x58   : > { %1585 = vset.pattern.permute.xlu1 %v1638_v1 }
  0x59   : > { %581 = vperm.xlu1 %1585, %v493_v12  }
  0x5a   : > { %809 = vperm.xlu0 %1586, %v747_v22  }
  0x5d   : > { %1587 = vset.pattern.permute.xlu1 %v1637_v0 }
  0x5e   : > { %819 = vperm.xlu0 %1586, %v749_v23   ;;  %633 = vperm.xlu1 %1587, %v493_v12  }
  0x62   : > { %829 = vperm.xlu0 %1586, %v751_v24   ;;  %637 = vperm.xlu1 %1587, %v494_v8  }
  0x66   : > { %1588 = vset.pattern.permute.xlu1 %v1639_v7 }
  0x67   : > { %687 = vperm.xlu1 %1588, %v501_v25  }
  0x6b   : > { %692 = vperm.xlu1 %1588, %v502_v26  }
  0x6f   : > { %754 = vperm.xlu1 %1588, %v736_v27  }
  0x73   : > { %764 = vperm.xlu1 %1588, %v738_v28  }
  0x77   : > { %774 = vperm.xlu1 %1588, %v740_v30  }
  0x7b   : > { %784 = vperm.xlu1 %1588, %v742_v31  }
  0x7f   : > { %794 = vperm.xlu1 %1588, %v744_v32  }
  0x83   : > { %804 = vperm.xlu1 %1588, %v746_v33  }
  0x87   : > { %814 = vperm.xlu1 %1588, %v748_v34  }
  0x8b   : > { %824 = vperm.xlu1 %1588, %v750_v35  }
  0x8f   : > { %1014 = vperm.xlu1 %1588, %v1011_v36  }
  0x93   : > { %v558_v37 = vpop.permute.xlu1 %557  ;;  %v610_v38 = vpop.permute.xlu0 %609 }
  0x94   : > { %v592_v59 = vmul.f32 %v1853_v54, %v558_v37  ;;  %v644_v63 = vmul.f32 %v1856_v58, %v610_v38 }
  0x97   : > { %v562_v39 = vpop.permute.xlu1 %561  ;;  %v618_v40 = vpop.permute.xlu0 %617 }
  0x98   : > { %v593_v61 = vmul.f32 %v1853_v54, %v562_v39  ;;  %v646_v21 = vmul.f32 %v1856_v58, %v618_v40 }
  0x9b   : > { %v1840_v41 = vpop.permute.xlu0 %629 }
  0x9c   : > { %v614_v42 = vpop.permute.xlu1 %613 }
  0x9d   : > { %v645_v4 = vmul.f32 %v1856_v58, %v614_v42 }
  0xa0   : > { %v574_v44 = vpop.permute.xlu0 %573 }
  0xa1   : > { %v517_v46 = vpop.permute.xlu1 %516  ;;  %v596_v37 = vmul.f32 %v1853_v54, %v574_v44 }
  0xa2   : > { %v550_v18 = vmul.f32 %v1851_v53, %v517_v46 }
  0xa4   : > { %v1849_v47 = vpop.permute.xlu0 %585 }
  0xa5   : > { %v599_v50 = vmul.f32 %v1853_v54, %v1849_v47 }
  0xa6   : > { %v566_v51 = vpop.permute.xlu1 %565 }
  0xa7   : > { %v594_v17 = vmul.f32 %v1853_v54, %v566_v51 }
  0xa9   : > { %v507_v55 = vpop.permute.xlu0 %506  ;;  %v602_v22 = vadd.f32 %v594_v17, %v550_v18  ;;  %v1596_v17 = vld [vmem:[%s1977_s3 + $0x38] sm:$0xff]   ;;  %v1640_v18 = vmov 0.0|0.0  }
  0xaa   : > { %v570_v56 = vpop.permute.xlu1 %569  ;;  %v548_v57 = vmul.f32 %v1851_v53, %v507_v55  ;;  %1502 = vmatprep.subr.bf16.mxu1 %v1640_v18 }
  0xab   : > { %v595_v23 = vmul.f32 %v1853_v54, %v570_v56  ;;  %v654_v27 = vadd.f32 %v646_v21, %v602_v22 }
  0xac   : > { %v600_v0 = vadd.f32 %v592_v59, %v548_v57  ;;  %v649_v57 = vmul.f32 %v1856_v58, %v1840_v41 }
  0xad   : > { %v512_v60 = vpop.permute.xlu0 %511 }
  0xae   : > { %v549_v62 = vmul.f32 %v1851_v53, %v512_v60  ;;  %v652_v5 = vadd.f32 %v644_v63, %v600_v0 }
  0xaf   : > { %v622_v1 = vpop.permute.xlu1 %621 }
  0xb0   : > { %v601_v2 = vadd.f32 %v593_v61, %v549_v62  ;;  %v647_v26 = vmul.f32 %v1856_v58, %v622_v1 }
  0xb1   : > { %v522_v3 = vpop.permute.xlu0 %521 }
  0xb2   : > { %v653_v7 = vadd.f32 %v645_v4, %v601_v2  ;;  %v551_v19 = vmul.f32 %v1851_v53, %v522_v3 }
  0xb4   : > { %v663_v6 = vpop.permute.xlu1 %662  ;;  %v603_v24 = vadd.f32 %v595_v23, %v551_v19  ;;  %v1642_v19 = vmov 0.0  }
  0xb5   : > { %v700_v8 = vadd.f32 %v663_v6, %v652_v5  ;;  %v668_v9 = vpop.permute.xlu0 %667  ;;  %1499 = vmatprep.mubr.msk.f32.mxu1 %vm1641_vm1, %v1642_v19  ;;  %1104 = vst.msk [vmem:[%s1930_s23] sm:$0x1f] %vm1103_vm2, %v1642_v19  ;;  %1105 = vst.msk [vmem:[%s469_s25] sm:$0x1f] %vm1103_vm2, %v1642_v19 }
  0xb6   : > { %v701_v10 = vadd.f32 %v668_v9, %v653_v7  ;;  %v655_v29 = vadd.f32 %v647_v26, %v603_v24 }
  0xb7   : > { %v708_v11 = vmax.f32 %v700_v8, 0.0 }
  0xb8   : > { %v709_v12 = vmax.f32 %v701_v10, 0.0  ;;  %v527_v13 = vpop.permute.xlu1 %526 }
  0xb9   : > { %v552_v38 = vmul.f32 %v1851_v53, %v527_v13  ;;  %v537_v39 = vpop.permute.xlu0 %536  ;;  %v1592_v13 = vld [vmem:[%s1977_s3 + $0x18] sm:$0xff]  }
  0xba   : > { %v732_v14 = vpack.c.bf16 %v709_v12, %v708_v11  ;;  %v554_v61 = vmul.f32 %v1851_v53, %v537_v39  ;;  %v1591_v12 = vld [vmem:[%s1977_s3 + $0x10] sm:$0xff]  }
  0xbb   : > { %v604_v46 = vadd.f32 %v596_v37, %v552_v38 }
  0xbc   : > { %v532_v15 = vpop.permute.xlu1 %531  ;;  %1443 = vmatprep.subr.bf16.mxu0 %v732_v14 }
  0xbd   : > { %1444 = vmatpush3.bf16.msra.mxu0 %v732_v14  ;;  %v553_v48 = vmul.f32 %v1851_v53, %v532_v15  ;;  %v683_v44 = vpop.permute.xlu0 %682  ;;  %v1593_v14 = vld [vmem:[%s1977_s3 + $0x20] sm:$0xff]   ;;  %v1594_v15 = vld [vmem:[%s1977_s3 + $0x28] sm:$0xff]  }
  0xc1   : > { %v578_v16 = vpop.permute.xlu1 %577  ;;  %v698_v4 = vpop.permute.xlu0 %697 }
  0xc2   : > { %v597_v40 = vmul.f32 %v1853_v54, %v578_v16  ;;  %v1595_v16 = vld [vmem:[%s1977_s3 + $0x30] sm:$0xff]  }
  0xc4   : > { %v605_v51 = vadd.f32 %v597_v40, %v553_v48 }
  0xc5   : > { %v760_v21 = vpop.permute.xlu0 %759 }
  0xc6   : > { %v626_v20 = vpop.permute.xlu1 %625  ;;  %v657_v1 = vadd.f32 %v649_v57, %v605_v51 }
  0xc7   : > { %v648_v42 = vmul.f32 %v1856_v58, %v626_v20 }
  0xc9   : > { %v656_v52 = vadd.f32 %v648_v42, %v604_v46  ;;  %v770_v23 = vpop.permute.xlu0 %769 }
  0xcb   : > { %v673_v25 = vpop.permute.xlu1 %672  ;;  %v704_v62 = vadd.f32 %v683_v44, %v656_v52 }
  0xcc   : > { %v702_v28 = vadd.f32 %v673_v25, %v654_v27 }
  0xcd   : > { %v712_v6 = vmax.f32 %v704_v62, 0.0  ;;  %v780_v25 = vpop.permute.xlu0 %779 }
  0xce   : > { %v710_v32 = vmax.f32 %v702_v28, 0.0 }
  0xcf   : > { %v678_v30 = vpop.permute.xlu1 %677 }
  0xd0   : > { %v703_v31 = vadd.f32 %v678_v30, %v655_v29 }
  0xd1   : > { %v790_v30 = vpop.permute.xlu0 %789 }
  0xd2   : > { %v711_v33 = vmax.f32 %v703_v31, 0.0 }
  0xd3   : > { %v542_v34 = vpop.permute.xlu1 %541 }
  0xd4   : > { %v733_v35 = vpack.c.bf16 %v711_v33, %v710_v32  ;;  %v555_v49 = vmul.f32 %v1851_v53, %v542_v34 }
  0xd6   : > { %1445 = vmatprep.subr.bf16.mxu0 %v733_v35  ;;  %v607_v59 = vadd.f32 %v599_v50, %v555_v49 }
  0xd7   : > { %1446 = vmatpush3.bf16.msra.mxu0 %v733_v35 }
  0xd8   : > { %v582_v36 = vpop.permute.xlu1 %581 }
  0xd9   : > { %v598_v60 = vmul.f32 %v1853_v54, %v582_v36 }
  0xdb   : > { %v606_v2 = vadd.f32 %v598_v60, %v554_v61 }
  0xdd   : > { %v634_v45 = vpop.permute.xlu1 %633 }
  0xde   : > { %v650_v63 = vmul.f32 %v1856_v58, %v634_v45  ;;  %v800_v45 = vpop.permute.xlu0 %799 }
  0xe0   : > { %v658_v8 = vadd.f32 %v650_v63, %v606_v2 }
  0xe1   : > { %v638_v55 = vpop.permute.xlu1 %637 }
  0xe2   : > { %v651_v56 = vmul.f32 %v1856_v58, %v638_v55  ;;  %v1590_v58 = vld [vmem:[%s1977_s3 + $0x8] sm:$0xff]   ;;  %v810_v61 = vpop.permute.xlu0 %809 }
  0xe4   : > { %v659_v0 = vadd.f32 %v651_v56, %v607_v59 }
  0xe6   : > { %v688_v47 = vpop.permute.xlu1 %687  ;;  %v707_v5 = vadd.f32 %v698_v4, %v659_v0 }
  0xe7   : > { %v705_v3 = vadd.f32 %v688_v47, %v657_v1 }
  0xe8   : > { %v715_v54 = vmax.f32 %v707_v5, 0.0 }
  0xe9   : > { %v713_v7 = vmax.f32 %v705_v3, 0.0 }
  0xea   : > { %v693_v9 = vpop.permute.xlu1 %692 }
  0xeb   : > { %v734_v41 = vpack.c.bf16 %v713_v7, %v712_v6  ;;  %v706_v10 = vadd.f32 %v693_v9, %v658_v8  ;;  %v820_v9 = vpop.permute.xlu0 %819 }
  0xed   : > { %v714_v11 = vmax.f32 %v706_v10, 0.0  ;;  %1447 = vmatprep.subr.bf16.mxu0 %v734_v41 }
  0xee   : > { %1448 = vmatpush3.bf16.msra.mxu0 %v734_v41  ;;  %v755_v20 = vpop.permute.xlu1 %754 }
  0xef   : > { %v735_v53 = vpack.c.bf16 %v715_v54, %v714_v11 }
  0xf1   : > { %1449 = vmatprep.subr.bf16.mxu0 %v735_v53 }
  0xf2   : > { %1450 = vmatpush3.bf16.msra.mxu0 %v735_v53  ;;  %v765_v22 = vpop.permute.xlu1 %764 }
  0xf5   : > { %1452 = vmatmul.mubr.msk.bf16.vlgmr.msra.gmra.mrb[0].mxu0 %vm872_vm0, %v1590_v58 }
  0xf6   : > { %1455 = vmatprep.mubr.msk.bf16.mxu0 %vm872_vm0, %v1591_v12  ;;  %v775_v24 = vpop.permute.xlu1 %774 }
  0xfa   : > { %v785_v26 = vpop.permute.xlu1 %784 }
  0xfd   : > { %1456 = vmatmul.mubr.msk.bf16.gmra.mrb[4].mxu0 %vm872_vm0, %v1592_v13 }
  0xfe   : > { %1459 = vmatprep.mubr.msk.bf16.mxu0 %vm872_vm0, %v1593_v14  ;;  %v795_v38 = vpop.permute.xlu1 %794 }
 0x102   : > { %v805_v56 = vpop.permute.xlu1 %804 }
 0x105   : > { %1460 = vmatmul.mubr.msk.bf16.gmra.mrb[8].mxu0 %vm872_vm0, %v1594_v15 }
 0x106   : > { %1463 = vmatprep.mubr.msk.bf16.mxu0 %vm872_vm0, %v1595_v16  ;;  %v815_v4 = vpop.permute.xlu1 %814 }
 0x10a   : > { %v825_v12 = vpop.permute.xlu1 %824 }
 0x10d   : > { %1464 = vmatmul.mubr.msk.bf16.gmra.mrb[12].mxu0 %vm872_vm0, %v1596_v17  ;;  %v830_v17 = vpop.permute.xlu0 %829 }
 0x1c8   : > { %v1453_v27 = vpop.f32.mrb[0].mxu0 }
 0x1c9   : > { %v940_v28 = vadd.f32 %v1453_v27, %v765_v22  ;;  %v931_v29 = vpop.f32.mrb[1].mxu0 }
 0x1ca   : > { %v932_v31 = vadd.f32 %v931_v29, %v755_v20  ;;  %v1454_v32 = vpop.f32.mrb[2].mxu0 }
 0x1cb   : > { %v943_v33 = vadd.f32 %v1454_v32, %v770_v23  ;;  %v934_v34 = vpop.f32.mrb[3].mxu0  ;;  %v996_v36 = vmax.f32 %v940_v28, 0.0  ;;  %v1091_v32 = vstv %s1410_s24 }
 0x1cc   : > { %v935_v35 = vadd.f32 %v934_v34, %v760_v21  ;;  %v994_v39 = vmax.f32 %v932_v31, 0.0  ;;  %v1010_v31 = vld [vmem:[%s1979_s5] sm:$0x1f]  ;;  %v1015_v34 = vpop.permute.xlu1 %1014 }
 0x1cd   : > { %v997_v37 = vmax.f32 %v943_v33, 0.0 }
 0x1ce   : > { %v995_v40 = vmax.f32 %v935_v35, 0.0 }
 0x1cf   : > { %v1506_v42 = vpack.c.bf16 %v997_v37, %v996_v36 }
 0x1d0   : > { %v1457_v46 = vpop.f32.mrb[4].mxu0  ;;  %v1503_v48 = vpack.c.bf16 %v995_v40, %v994_v39 }
 0x1d1   : > { %v956_v49 = vadd.f32 %v1457_v46, %v785_v26  ;;  %v947_v50 = vpop.f32.mrb[5].mxu0 }
 0x1d2   : > { %v948_v51 = vadd.f32 %v947_v50, %v775_v24  ;;  %v1458_v52 = vpop.f32.mrb[6].mxu0  ;;  %1504 = vmatpush3.bf16.msra.mxu1 %v1503_v48  ;;  %v1644_v50 = vmov inf  }
 0x1d3   : > { %v959_v55 = vadd.f32 %v1458_v52, %v790_v30  ;;  %v950_v44 = vpop.f32.mrb[7].mxu0  ;;  %1505 = vmatprep.subr.bf16.mxu1 %v1640_v18  ;;  %v1000_v59 = vmax.f32 %v956_v49, 0.0  ;;  %v1643_v49 = vmov -inf   ;;  %1107 = vst.msk [vmem:[%s485_s11] sm:$0x1f] %vm1103_vm2, %v1644_v50 }
 0x1d4   : > { %v951_v57 = vadd.f32 %v950_v44, %v780_v25  ;;  %v998_v62 = vmax.f32 %v948_v51, 0.0  ;;  %1106 = vst.msk [vmem:[%s477_s29] sm:$0x1f] %vm1103_vm2, %v1643_v49  ;;  %v1108_v51 = vld [vmem:[%s1930_s23] sm:$0x1f] }
 0x1d5   : > { %v1001_v60 = vmax.f32 %v959_v55, 0.0  ;;  %v1116_v55 = vld [vmem:[%s469_s25] sm:$0x1f] }
 0x1d6   : > { %v999_v63 = vmax.f32 %v951_v57, 0.0  ;;  %1507 = vmatpush3.bf16.msra.mxu1 %v1506_v42 }
 0x1d7   : > { %v1512_v0 = vpack.c.bf16 %v1001_v60, %v1000_v59  ;;  %1508 = vmatprep.subr.bf16.mxu1 %v1640_v18 }
 0x1d8   : > { %v1509_v1 = vpack.c.bf16 %v999_v63, %v998_v62  ;;  %v1461_v47 = vpop.f32.mrb[8].mxu0 }
 0x1d9   : > { %v972_v2 = vadd.f32 %v1461_v47, %v805_v56  ;;  %v963_v3 = vpop.f32.mrb[9].mxu0 }
 0x1da   : > { %v964_v5 = vadd.f32 %v963_v3, %v795_v38  ;;  %v1462_v6 = vpop.f32.mrb[10].mxu0  ;;  %1510 = vmatpush3.bf16.msra.mxu1 %v1509_v1 }
 0x1db   : > { %v975_v7 = vadd.f32 %v1462_v6, %v810_v61  ;;  %v966_v8 = vpop.f32.mrb[11].mxu0  ;;  %1511 = vmatprep.subr.bf16.mxu1 %v1640_v18  ;;  %v1004_v10 = vmax.f32 %v972_v2, 0.0  ;;  %v1123_v19 = vld [vmem:[%s477_s29] sm:$0x1f] }
 0x1dc   : > { %v967_v41 = vadd.f32 %v966_v8, %v800_v45  ;;  %v1002_v54 = vmax.f32 %v964_v5, 0.0  ;;  %v1129_v61 = vld [vmem:[%s485_s11] sm:$0x1f] }
 0x1dd   : > { %v1005_v11 = vmax.f32 %v975_v7, 0.0 }
 0x1de   : > { %v1003_v53 = vmax.f32 %v967_v41, 0.0  ;;  %1513 = vmatpush3.bf16.msra.mxu1 %v1512_v0 }
 0x1df   : > { %v1518_v58 = vpack.c.bf16 %v1005_v11, %v1004_v10  ;;  %1514 = vmatprep.subr.bf16.mxu1 %v1640_v18 }
 0x1e0   : > { %v1515_v13 = vpack.c.bf16 %v1003_v53, %v1002_v54  ;;  %v1465_v14 = vpop.f32.mrb[12].mxu0 }
 0x1e1   : > { %v988_v15 = vadd.f32 %v1465_v14, %v825_v12  ;;  %v979_v16 = vpop.f32.mrb[13].mxu0 }
 0x1e2   : > { %v980_v20 = vadd.f32 %v979_v16, %v815_v4  ;;  %v1466_v21 = vpop.f32.mrb[14].mxu0  ;;  %1516 = vmatpush3.bf16.msra.mxu1 %v1515_v13 }
 0x1e3   : > { %v991_v22 = vadd.f32 %v1466_v21, %v830_v17  ;;  %v982_v23 = vpop.f32.mrb[15].mxu0  ;;  %1517 = vmatprep.subr.bf16.mxu1 %v1640_v18  ;;  %v1008_v25 = vmax.f32 %v988_v15, 0.0 }
 0x1e4   : > { %v983_v24 = vadd.f32 %v982_v23, %v820_v9  ;;  %v1006_v27 = vmax.f32 %v980_v20, 0.0 }
 0x1e5   : > { %v1009_v26 = vmax.f32 %v991_v22, 0.0 }
 0x1e6   : > { %v1007_v28 = vmax.f32 %v983_v24, 0.0  ;;  %1519 = vmatpush3.bf16.msra.mxu1 %v1518_v58 }
 0x1e7   : > { %v1524_v29 = vpack.c.bf16 %v1009_v26, %v1008_v25  ;;  %1520 = vmatprep.subr.bf16.mxu1 %v1640_v18 }
 0x1e8   : > { %v1521_v30 = vpack.c.bf16 %v1007_v28, %v1006_v27 }
 0x1ea   : > { %1522 = vmatpush3.bf16.msra.mxu1 %v1521_v30 }
 0x1eb   : > { %1523 = vmatprep.subr.bf16.mxu1 %v1640_v18  ;;  %v1090_v18 = vand.u32 127, %v544_v43 }
 0x1ed   : > { %v1092_v33 = vadd.s32 %v1091_v32, %v1090_v18 }
 0x1ee   : > { %1525 = vmatpush3.bf16.msra.mxu1 %v1524_v29 }
 0x1ef   : > { %vm1093_vm3 = vcmp.lt.s32.totalorder %v1092_v33, 16 }
 0x1f1   : > { %1500 = vmatmul.mubr.f32.vlgmr.msra.gmra.mrb[0].mxu1 %v1010_v31 }
 0x2c4   : > { %v1083_v35 = vpop.f32.mrb[0].mxu1 }
 0x2c5   : > { %v1084_v36 = vadd.f32 %v1083_v35, %v1015_v34  ;;  %v1501_v37 = vpop.f32.mrb[1].mxu1 }
 0x2c7   : > { %v1096_v38 = vsel %vm1093_vm3, %v1084_v36, 0.0  ;;  %v1097_v42 = vsel %vm1093_vm3, %v1084_v36, -inf  ;;  %v1098_v46 = vsel %vm1093_vm3, %v1084_v36, inf }
 0x2c8   : > { %v1110_v39 = vsel %vm1109_vm4, %v1096_v38, 0.0  ;;  %v1117_v40 = vmul.f32 %v1096_v38, %v1096_v38  ;;  %v1124_v43 = vsel %vm1109_vm4, %v1097_v42, -inf  ;;  %v1130_v48 = vsel %vm1109_vm4, %v1098_v46, inf }
 0x2c9   : > { %1111 = vadd.xlane.f32.xlu0 %v1110_v39 }
 0x2ca   : > { %v1118_v45 = vsel %vm1109_vm4, %v1117_v40, 0.0 }
 0x2cb   : > { %1119 = vadd.xlane.f32.xlu1 %v1118_v45 }
 0x2cd   : > { %1125 = vmax.xlane.f32.xlu0 %v1124_v43 }
 0x2d1   : > { %1131 = vmin.xlane.f32.xlu0 %v1130_v48 }
 0x356   : > { %v1112_v52 = vpop.xlane.xlu0 %1111 }
 0x357   : > { %v1113_v44 = vadd.f32 %v1112_v52, %v1108_v51 }
 0x358   : > { %v1120_v56 = vpop.xlane.xlu1 %1119 }
 0x359   : > { %1115 = vst.msk [vmem:[%s1930_s23] sm:$0x1f] %vm1103_vm2, %v1113_v44  ;;  %v1121_v57 = vadd.f32 %v1120_v56, %v1116_v55 }
 0x35a   : > { %v1126_v59 = vpop.xlane.xlu0 %1125 }
 0x35b   : > { %1122 = vst.msk [vmem:[%s469_s25] sm:$0x1f] %vm1103_vm2, %v1121_v57  ;;  %v1127_v60 = vmax.f32 %v1123_v19, %v1126_v59 }
 0x35d   : > { %1128 = vst.msk [vmem:[%s477_s29] sm:$0x1f] %vm1103_vm2, %v1127_v60 }
 0x35e   : > { %v1132_v62 = vpop.xlane.xlu0 %1131 }
 0x35f   : > { %v1133_v63 = vmin.f32 %v1129_v61, %v1132_v62 }
 0x361   : > { %1134 = vst.msk [vmem:[%s485_s11] sm:$0x1f] %vm1103_vm2, %v1133_v63 }
 0x362 PF: > { %s21_s17 = sadd.s32 1, %s1635_s17   ;;  %s1985_s13 = smov %s1627_s15 }
 0x363   : > { %p18_p7 = scmp.ge.s32.totalorder %s21_s17, 6   ;;  %s1986_s14 = smov %s1631_s16 }
 0x364   : > { %s1987_s15 = smov %s1990_s18  ;;  %s1988_s16 = smov %s1994_s19 }
 0x365   :  { %20 = sbr.rel (!%p18_p7) target bundleno = 3 (0x3), region = 121 }

</bundles_post_ra>
